<compile_context>
chip_gen: v7x
topology: tpu7x:2x2x1
jax: 0.10.0
libtpu: 0.0.40
codegen_flags: <defaults>
</compile_context>

<pallas_src>
import jax
import jax.numpy as jnp
from jax.experimental import pallas as pl
from jax.experimental.pallas import tpu as pltpu

_LANE = 128
_VMEM_LIMIT = 48 * 1024 * 1024      # explicit override (v5e default scoped is 16 MiB)
_BLOCK_BYTES = 8 * 1024 * 1024      # byte target per input block
_BYPASS_BYTES = 4 * 1024 * 1024     # below this total size, let XLA fuse the add


def _sublane_align(dtype):
    """Sublane packing multiple: f32 -> 8, bf16 -> 16, int8/fp8 -> 32."""
    itemsize = jnp.dtype(dtype).itemsize
    return max(8, 8 * (4 // itemsize))


def _round_down(x, m):
    return (x // m) * m


def _blocks_2d(n, c, itemsize, sub):
    """Pick (n_blk, c_blk) so n_blk*c_blk*itemsize ~= _BLOCK_BYTES (never above)."""
    # Lane dim first, capped so at least `sub` sublanes still fit the budget.
    lane_cap = max(_LANE, _round_down(_BLOCK_BYTES // (sub * itemsize), _LANE))
    c_blk = c if c <= lane_cap else lane_cap
    rows = _BLOCK_BYTES // (c_blk * itemsize)          # >= sub by construction
    n_blk = n if n <= rows else max(sub, _round_down(rows, sub))
    return n_blk, c_blk


def _blocks_3d(n, c, hw, itemsize, sub):
    """Pick (n_blk, c_blk, hw_blk) hitting the byte target, batch folded in."""
    lane_cap = max(_LANE, _round_down(_BLOCK_BYTES // (sub * itemsize), _LANE))
    hw_blk = hw if hw <= lane_cap else lane_cap
    c_budget = _BLOCK_BYTES // (hw_blk * itemsize)     # >= sub by construction
    c_blk = c if c <= c_budget else max(sub, _round_down(c_budget, sub))
    n_budget = max(1, _BLOCK_BYTES // (c_blk * hw_blk * itemsize))
    n_blk = min(n, n_budget)
    return n_blk, c_blk, hw_blk


def _addbias_kernel(x_ref, b_ref, o_ref):
    # Pure VPU broadcast-add; bias broadcast happens in vregs, never in HBM.
    o_ref[...] = x_ref[...] + b_ref[...]


def _cost(x, b):
    # Memory-bound hint for XLA's scheduler: read x, write out, read bias once.
    return pl.CostEstimate(
        flops=int(x.size),
        transcendentals=0,
        bytes_accessed=2 * int(x.size) * x.dtype.itemsize
        + int(b.size) * b.dtype.itemsize,
    )


def _addbias_2d(x, b, n_blk, c_blk):
    """x: (N, C), b: (1, C). Lane-dense, byte-targeted tiles, pipelined DMA."""
    n, c = x.shape
    grid = (pl.cdiv(n, n_blk), pl.cdiv(c, c_blk))
    return pl.pallas_call(
        _addbias_kernel,
        out_shape=jax.ShapeDtypeStruct(x.shape, x.dtype),
        grid_spec=pltpu.PrefetchScalarGridSpec(
            num_scalar_prefetch=0,
            grid=grid,
            in_specs=[
                pl.BlockSpec((n_blk, c_blk), lambda i, j: (i, j)),
                # C-tile axis is innermost, so this tiny block is re-fetched
                # every step (<=~16 KiB per step: negligible vs the x tile).
                pl.BlockSpec((1, c_blk), lambda i, j: (0, j)),
            ],
            out_specs=pl.BlockSpec((n_blk, c_blk), lambda i, j: (i, j)),
        ),
        compiler_params=pltpu.CompilerParams(
            dimension_semantics=("parallel", "parallel"),
            vmem_limit_bytes=_VMEM_LIMIT,
        ),
        cost_estimate=_cost(x, b),
    )(x, b)


def _addbias_3d(x3, b3, n_blk, c_blk, hw_blk):
    """x3: (N, C, H*W), b3: (1, C, 1). Batch folded into the block."""
    n, c, hw = x3.shape
    grid = (pl.cdiv(n, n_blk), pl.cdiv(c, c_blk), pl.cdiv(hw, hw_blk))
    return pl.pallas_call(
        _addbias_kernel,
        out_shape=jax.ShapeDtypeStruct(x3.shape, x3.dtype),
        grid_spec=pltpu.PrefetchScalarGridSpec(
            num_scalar_prefetch=0,
            grid=grid,
            in_specs=[
                pl.BlockSpec((n_blk, c_blk, hw_blk),
                             lambda ni, ci, si: (ni, ci, si)),
                # Constant over the innermost H*W axis -> bias block only
                # re-fetched when the C-tile index changes.
                pl.BlockSpec((1, c_blk, 1), lambda ni, ci, si: (0, ci, 0)),
            ],
            out_specs=pl.BlockSpec((n_blk, c_blk, hw_blk),
                                   lambda ni, ci, si: (ni, ci, si)),
        ),
        compiler_params=pltpu.CompilerParams(
            dimension_semantics=("parallel", "parallel", "parallel"),
            vmem_limit_bytes=_VMEM_LIMIT,
        ),
        cost_estimate=_cost(x3, b3),
    )(x3, b3)


class AddBias:
    """JAX/Pallas port of the PyTorch AddBias module."""

    def __init__(self, bias):
        # Matches nn.Parameter(bias.unsqueeze(1)): shape (C, 1)
        self._bias = jnp.asarray(bias).reshape(-1, 1)

    def __call__(self, x):
        c = self._bias.shape[0]
        itemsize = jnp.dtype(x.dtype).itemsize
        total_bytes = int(x.size) * itemsize
        if x.ndim == 2:
            n, cc = x.shape
            assert cc == c, "channel mismatch"
            b = self._bias.T.reshape(1, c).astype(x.dtype)
            if c < _LANE or total_bytes < _BYPASS_BYTES:
                # Lane-sparse last dim or tiny input: masked partial stores /
                # launch overhead dominate; XLA fuses the broadcast-add anyway.
                return x + b
            n_blk, c_blk = _blocks_2d(n, c, itemsize, _sublane_align(x.dtype))
            return _addbias_2d(x, b, n_blk, c_blk)
        elif x.ndim == 4:
            n, cc, h, w = x.shape
            assert cc == c, "channel mismatch"
            hw = h * w
            if hw < _LANE or total_bytes < _BYPASS_BYTES:
                return x + self._bias.T.reshape(1, c, 1, 1).astype(x.dtype)
            # Flatten spatial dims -> lane-dense last axis (layout plumbing only).
            x3 = x.reshape(n, c, hw)
            b3 = self._bias.T.reshape(1, c, 1).astype(x.dtype)
            n_blk, c_blk, hw_blk = _blocks_3d(n, c, hw, itemsize,
                                              _sublane_align(x.dtype))
            y3 = _addbias_3d(x3, b3, n_blk, c_blk, hw_blk)
            return y3.reshape(n, c, h, w)
        else:
            raise ValueError("AddBias expects 2-D or 4-D input")


if __name__ == "__main__":
    key = jax.random.PRNGKey(0)
    ks = jax.random.split(key, 8)

    # --- Module-consistent tiny shapes (bypass path: XLA fused add) ---------
    C = 4
    bias = jax.random.normal(ks[0], (C,), dtype=jnp.float32)
    mod = AddBias(bias)

    x4 = jax.random.normal(ks[1], (2, C, 16, 16), dtype=jnp.float32)
    y4 = jax.block_until_ready(mod(x4))
    assert y4.shape == x4.shape and y4.dtype == x4.dtype
    assert jnp.allclose(y4, x4 + bias.reshape(1, C, 1, 1), atol=1e-6, rtol=1e-6)

    x2 = jax.random.normal(ks[2], (2, C), dtype=jnp.float32)
    y2 = jax.block_until_ready(mod(x2))
    assert y2.shape == x2.shape and y2.dtype == x2.dtype
    assert jnp.allclose(y2, x2 + bias.reshape(1, C), atol=1e-6, rtol=1e-6)

    # --- 4-D NCHW, large enough to take the Pallas path (batch folded) ------
    C4 = 64
    bias4 = jax.random.normal(ks[3], (C4,), dtype=jnp.float32)
    mod4 = AddBias(bias4)
    x4b = jax.random.normal(ks[4], (16, C4, 64, 64), dtype=jnp.float32)   # 16 MiB
    y4b = jax.block_until_ready(mod4(x4b))
    assert jnp.allclose(y4b, x4b + bias4.reshape(1, C4, 1, 1), atol=1e-6, rtol=1e-6)

    # --- 2-D Pallas path, f32 and bf16 (byte-targeted tiles adapt to dtype) -
    C2 = 512
    bias2 = jax.random.normal(ks[5], (C2,), dtype=jnp.float32)
    mod2 = AddBias(bias2)
    x2b = jax.random.normal(ks[6], (8192, C2), dtype=jnp.float32)         # 16 MiB
    y2b = jax.block_until_ready(mod2(x2b))
    assert jnp.allclose(y2b, x2b + bias2.reshape(1, C2), atol=1e-6, rtol=1e-6)

    x2c = jax.random.normal(ks[7], (8192, C2), dtype=jnp.bfloat16)        # 8 MiB
    y2c = jax.block_until_ready(mod2(x2c))
    ref2c = x2c + bias2.astype(jnp.bfloat16).reshape(1, C2)
    assert y2c.dtype == jnp.bfloat16
    assert jnp.allclose(y2c.astype(jnp.float32), ref2c.astype(jnp.float32),
                        atol=1e-2, rtol=1e-2)

    print("KERNEL_OK")
</pallas_src>

<mosaic_0001>
module attributes {stable_mosaic.version = 11 : i64} {
  func.func @_addbias_kernel(%arg0: i32, %arg1: i32, %arg2: i32, %arg3: memref<8x64x4096xf32, #tpu.memory_space<vmem>>, %arg4: memref<1x64x1xf32, #tpu.memory_space<vmem>>, %arg5: memref<8x64x4096xf32, #tpu.memory_space<vmem>>) attributes {dimension_semantics = [#tpu.dimension_semantics<parallel>, #tpu.dimension_semantics<parallel>, #tpu.dimension_semantics<parallel>], iteration_bounds = array<i64: 2, 1, 1>, scalar_prefetch = 0 : i64, scratch_operands = 0 : i64, tpu.core_type = #tpu.core_type<tc>, window_params = [{transform_indices = @transform_0, window_bounds = array<i64: 8, 64, 4096>}, {transform_indices = @transform_1, window_bounds = array<i64: 1, 64, 1>}, {transform_indices = @transform_2, window_bounds = array<i64: 8, 64, 4096>}]} {
    %c0 = arith.constant 0 : index
    %c0_0 = arith.constant 0 : index
    %c0_1 = arith.constant 0 : index
    %0 = vector.load %arg3[%c0, %c0_0, %c0_1] : memref<8x64x4096xf32, #tpu.memory_space<vmem>>, vector<8x64x4096xf32>
    %c0_2 = arith.constant 0 : index
    %c0_3 = arith.constant 0 : index
    %c0_4 = arith.constant 0 : index
    %1 = vector.load %arg4[%c0_2, %c0_3, %c0_4] : memref<1x64x1xf32, #tpu.memory_space<vmem>>, vector<1x64x1xf32>
    %2 = vector.broadcast %1 : vector<1x64x1xf32> to vector<8x64x4096xf32>
    %3 = arith.addf %0, %2 : vector<8x64x4096xf32>
    %c0_5 = arith.constant 0 : index
    %c0_6 = arith.constant 0 : index
    %c0_7 = arith.constant 0 : index
    %4 = vector.load %arg5[%c0_5, %c0_6, %c0_7] : memref<8x64x4096xf32, #tpu.memory_space<vmem>>, vector<8x64x4096xf32>
    tpu.vector_store %arg5[%c0_5, %c0_6, %c0_7], %3 {strides = array<i32>} : memref<8x64x4096xf32, #tpu.memory_space<vmem>>, vector<8x64x4096xf32>,
    return
  }
  func.func @transform_0(%arg0: i32, %arg1: i32, %arg2: i32) -> (i32, i32, i32) {
    %c0_i32 = arith.constant 0 : i32
    return %arg0, %arg1, %arg2 : i32, i32, i32
  }
  func.func @transform_1(%arg0: i32, %arg1: i32, %arg2: i32) -> (i32, i32, i32) {
    %c0_i32 = arith.constant 0 : i32
    %c0_i32_0 = arith.constant 0 : i32
    %c0_i32_1 = arith.constant 0 : i32
    return %c0_i32, %arg1, %c0_i32_0 : i32, i32, i32
  }
  func.func @transform_2(%arg0: i32, %arg1: i32, %arg2: i32) -> (i32, i32, i32) {
    %c0_i32 = arith.constant 0 : i32
    return %arg0, %arg1, %arg2 : i32, i32, i32
  }
}

</mosaic_0001>

<bundles_post_ra>
// kernel: tpu_custom_call.1
= control target key start
LH: loop header
LB: loop body
LE: loop exit
PB: predicated region body
PF: predicated region fallthrough
CT: control target
= control target key end

     0   :  { %7 = vsyncpa [#allocation3], 0  ;;  %s19083_s0 = inlined_call_operand.hbm [shape: f32[16,64,4096], index: 0, kind: input, shape index: {}]   ;;  %s19084_s1 = inlined_call_operand.vmem [shape: f32[1,64,1], index: 1, kind: input, shape index: {}]   ;;  %s19085_s2 = inlined_call_operand.hbm [shape: f32[16,64,4096], index: 2, kind: output, shape index: {}]  }
   0x1   :  { %9 = vsyncpa [#allocation3 + $0x1], 0 }
   0x2   :  { %10 = vsyncpa [#allocation4], 0 }
   0x3   :  { %12 = vsyncpa [#allocation4 + $0x1], 0  ;;  %s6771_s9 = smov 0   ;;  %s6773_s10 = smov 0  }
   0x4   :  { %s6775_s11 = smov 0   ;;  %s6777_s12 = smov 0  }
   0x5   :  { %s6779_s13 = smov 0   ;;  %s6781_s14 = smov 0  }
   0x6 LB: > { %s6544_s15 = sadd.s32 4294967295, %s6747_s14   ;;  %s6545_s16 = sadd.s32 4294967294, %s6747_s14   ;;  %s6747_s14 = sphi %s6781_s14, %s18_s14   ;;  %s6743_s13 = sphi %s6779_s13, %s19100_s13   ;;  %s6739_s12 = sphi %s6777_s12, %s19099_s12   ;;  %s6735_s11 = sphi %s6775_s11, %s19098_s11   ;;  %s6731_s10 = sphi %s6773_s10, %s19097_s10   ;;  %s6727_s9 = sphi %s6771_s9, %s19096_s9  }
   0x7   : > { %s37_s17 = sadd.s32 1, %s6743_s13  ;;  %s48_s18 = sadd.s32 1, %s6735_s11 }
   0x8   : > { %p39_p0 = scmp.ge.s32.totalorder %s37_s17, 2  ;;  %p55_p1 = scmp.ne.s32.totalorder %s6735_s11, %s6731_s10 }
   0x9   : > { %p56_p2 = scmp.eq.s32.totalorder %s6747_s14, 0  ;;  %p61_p3 = scmp.ne.s32.totalorder %s6731_s10, %s6727_s9 }
   0xa   : > { %s19102_s17 = smov (%p39_p0, %s37_s17), 0  ;;  %p62_p5 = scmp.eq.s32.totalorder %s6544_s15, 0 }
   0xb   : > { %p6812_p4 = por %p56_p2, %p55_p1  ;;  %s41_s20 = ssub.s32 %s6743_s13, %s19102_s17 }
   0xc   : > { %p115_p6 = scmp.eq.s32.totalorder %s6544_s15, 1  ;;  %p46_p7 = scmp.eq.s32.totalorder %s41_s20, 0 }
   0xd   : > { %p6818_p8 = por %p62_p5, %p61_p3  ;;  %p121_p10 = scmp.eq.s32.totalorder %s6545_s16, 1 }
   0xe   : > { %p6822_p9 = por %p115_p6, %p55_p1  ;;  %p6578_p13 = scmp.lt.s32.totalorder %s6747_s14, 2 }
   0xf   : > { %s6827_s23 = scalar_select %p46_p7, %s6735_s11, %s48_s18  }
  0x10   : > { %s19089_s22 = scalar_select %p6822_p9, 1, 0 }
  0x11   : > { %p6829_p11 = por %p121_p10, %p61_p3  ;;  %s150_s25 = sand.u32 1, %s6735_s11  }
  0x12   : > { %s6549_s26 = sshll.u32 %s150_s25, 14  ;;  %s6563_s27 = sshll.u32 %s6743_s13, 18 }
  0x13   : > { %s19090_s24 = scalar_select %p6829_p11, 1, 0 }
  0x14   : > { %s6840_s30 = scalar_lea.hbm %s19083_s0, %s6563_s27  ;;  %s154_s3 = scalar_lea.vmem [#allocation2], %s6549_s26 }
  0x15   : > { %s167_s4 = sshll.u32 %s154_s3, 4  ;;  %p6846_p0 = pnand %p6578_p13, %p6812_p4  ;;  %s6842_s4 = int_to_ptr.vmem [resolvable:$true] %s167_s4 }
  0x16   : > { %s6851_s6 = scalar_lea.sflag [#allocation3], %s150_s25  ;;  %s6635_s7 = scalar_lea.hbm %s6840_s30, 262144 }
  0x17   : > { %p6636_p2 = scmp.ne.s32.totalorder %s6840_s30, %s6635_s7  ;;  %p6637_p3 = pneg %p6846_p0 }
  0x18   : > { %s6640_s16 = scalar_lea.hbm %s19083_s0, 524288  ;;  %p6641_p4 = scmp.lt.u32.totalorder %s6840_s30, %s19083_s0 }
  0x19   : > { %p6638_p5 = pnand %p6637_p3, %p6636_p2  ;;  %p6642_p7 = scmp.lt.u32.totalorder %s6640_s16, %s6635_s7 }
  0x1a   : > { %p6644_p13 = scmp.lt.u32.totalorder %s6635_s7, %s6840_s30 }
  0x1b   : > { %p6639_p6 = pneg %p6638_p5  ;;  %p6643_p10 = por %p6642_p7, %p6641_p4 }
  0x1d   : > { %p6645_p12 = por %p6644_p13, %p6643_p10 }
  0x1f   : > { %p6646_p1 = pnand %p6645_p12, %p6639_p6 }
  0x21   : > { %6649 = shalt.err (!%p6646_p1)
}
  0x22   : > { %s6650_s20 = scalar_lea.vmem %s6842_s4, 262144  ;;  %s6749_s25 = smov [#allocation2]  }
  0x23   : > { %p6651_p2 = scmp.ne.s32.totalorder %s6842_s4, %s6650_s20  ;;  %s6655_s26 = sshll.u32 %s6749_s25, 4  ;;  %s6656_s26 = int_to_ptr.vmem [resolvable:$false] %s6655_s26 }
  0x24   : > { %s6657_s27 = scalar_lea.vmem %s6656_s26, 524288  ;;  %p6658_p9 = scmp.lt.s32.totalorder %s6842_s4, %s6656_s26 }
  0x25   : > { %p6653_p5 = pnand %p6651_p2, %p6637_p3  ;;  %p6659_p4 = scmp.lt.s32.totalorder %s6657_s27, %s6650_s20 }
  0x27   : > { %p6654_p11 = pneg %p6653_p5  ;;  %p6660_p7 = por %p6659_p4, %p6658_p9 }
  0x29   : > { %p6661_p10 = pnand %p6660_p7, %p6654_p11 }
  0x2b   : > { %6664 = shalt.err (!%p6661_p10)
}
  0x2c   : > { %s6750_s28 = smov 4096   ;;  %s6751_s29 = smov 256  }
  0x2d   : > { %6573 = dma.hbm_to_vmem [thread:$0]  (!%p6846_p0), %s6840_s30, 262144, %s6842_s4, %s6851_s6, %s6750_s28, %s6750_s28, %s6751_s29  }
  0x2e   : > { %p175_p12 = scmp.lt.s32.totalorder %s6747_s14, 3  ;;  %p19092_p1 = scmp.ge.s32.totalorder %s6747_s14, 1 }
  0x30   : > { %p176_p3 = pnand %p19092_p1, %p175_p12 }
  0x31   : > { %s6883_s3 = sand.u32 (!%p176_p3), 1, %s6731_s10  }
  0x32   : > { %179 = sbr.rel (%p176_p3) target bundleno = 1229 (0x4cd), region = 28  ;;  %s6554_s7 = sshll.u32 (!%p176_p3), %s6883_s3, 14 }
  0x33   : > { %s182_s8 = scalar_lea.sflag (!%p176_p3), [#allocation3], %s6883_s3  ;;  %s6889_s15 = scalar_lea.vmem (!%p176_p3), [#allocation2], %s6554_s7 }
  0x39   : > { %6718 = dma.done.wait (%p6818_p8), %s182_s8, 262144  }
  0x3a   : > { %6720 = vsyncadd (%p6818_p8), %s182_s8, 4294705152  ;;  %v6752_v0 = vmov 0   ;;  %v2273_v1 = vld [vmem:[%s19084_s1 + $0x10] sm:$0xff]  ;;  %v2271_v2 = vld [vmem:[%s19084_s1] sm:$0xff]  ;;  %s6975_s4 = scalar_lea.vmem [#allocation5], %s6554_s7  ;;  %s6565_s7 = sshll.u32 %s6739_s12, 18 }
  0x3b   : > { %6634 = vset.pattern.permute.xlu1 %v6752_v0  ;;  %6633 = vset.pattern.permute.xlu0 %v6752_v0  ;;  %v2274_v3 = vld [vmem:[%s19084_s1 + $0x18] sm:$0xff]  ;;  %v2272_v4 = vld [vmem:[%s19084_s1 + $0x8] sm:$0xff]  ;;  %v2275_v6 = vld [vmem:[%s19084_s1 + $0x20] sm:$0xff]  ;;  %s6435_s5 = sshll.u32 %s6975_s4, 4  ;;  %s19014_s16 = scalar_lea.hbm %s19085_s2, %s6565_s7  ;;  %s19018_s5 = int_to_ptr.vmem [resolvable:$true] %s6435_s5 }
  0x3c   : > { %2291 = vperm.xlu1 %6634, %v2273_v1   ;;  %2281 = vperm.xlu0 %6633, %v2271_v2   ;;  %v2276_v5 = vld [vmem:[%s19084_s1 + $0x28] sm:$0xff]  ;;  %v2278_v7 = vld [vmem:[%s19084_s1 + $0x38] sm:$0xff]  ;;  %v2277_v8 = vld [vmem:[%s19084_s1 + $0x30] sm:$0xff]  ;;  %s6416_s12 = scalar_lea.sflag [#allocation4], %s6883_s3  ;;  %s6665_s18 = scalar_lea.vmem %s19018_s5, 262144 }
  0x3d   : > { %v223_v9 = vld [vmem:[%s6889_s15] sm:$0xff]  ;;  %v224_v10 = vld [vmem:[%s6889_s15 + $0x8] sm:$0xff]  ;;  %v225_v11 = vld [vmem:[%s6889_s15 + $0x10] sm:$0xff]  ;;  %p6666_p8 = scmp.ne.s32.totalorder %s19018_s5, %s6665_s18  ;;  %p19093_p9 = scmp.ne.s32.totalorder %s19089_s22, 0 }
  0x3e   : > { %v226_v12 = vld [vmem:[%s6889_s15 + $0x18] sm:$0xff]  ;;  %v227_v13 = vld [vmem:[%s6889_s15 + $0x20] sm:$0xff]  ;;  %v228_v14 = vld [vmem:[%s6889_s15 + $0x28] sm:$0xff]  ;;  %s6753_s21 = smov [#allocation5]  }
  0x3f   : > { %v229_v15 = vld [vmem:[%s6889_s15 + $0x30] sm:$0xff]  ;;  %v230_v16 = vld [vmem:[%s6889_s15 + $0x38] sm:$0xff]  ;;  %v231_v18 = vld [vmem:[%s6889_s15 + $0x40] sm:$0xff]  ;;  %p6667_p11 = pnand %p6666_p8, %p19093_p9  ;;  %s6669_s19 = sshll.u32 %s6753_s21, 4  ;;  %s6670_s19 = int_to_ptr.vmem [resolvable:$false] %s6669_s19 }
  0x40   : > { %2296 = vperm.xlu1 %6634, %v2274_v3   ;;  %2286 = vperm.xlu0 %6633, %v2272_v4   ;;  %v232_v19 = vld [vmem:[%s6889_s15 + $0x48] sm:$0xff]  ;;  %v233_v20 = vld [vmem:[%s6889_s15 + $0x50] sm:$0xff]  ;;  %v234_v21 = vld [vmem:[%s6889_s15 + $0x58] sm:$0xff]  ;;  %s6671_s20 = scalar_lea.vmem %s6670_s19, 524288  ;;  %p6672_p6 = scmp.lt.s32.totalorder %s19018_s5, %s6670_s19 }
  0x41   : > { %v235_v22 = vld [vmem:[%s6889_s15 + $0x60] sm:$0xff]  ;;  %v236_v23 = vld [vmem:[%s6889_s15 + $0x68] sm:$0xff]  ;;  %v237_v24 = vld [vmem:[%s6889_s15 + $0x70] sm:$0xff]  ;;  %p6668_p0 = pneg %p6667_p11  ;;  %p6673_p13 = scmp.lt.s32.totalorder %s6671_s20, %s6665_s18 }
  0x42   : > { %v238_v25 = vld [vmem:[%s6889_s15 + $0x78] sm:$0xff]  ;;  %v239_v26 = vld [vmem:[%s6889_s15 + $0x80] sm:$0xff]  ;;  %v240_v27 = vld [vmem:[%s6889_s15 + $0x88] sm:$0xff] }
  0x43   : > { %v241_v28 = vld [vmem:[%s6889_s15 + $0x90] sm:$0xff]  ;;  %v242_v29 = vld [vmem:[%s6889_s15 + $0x98] sm:$0xff]  ;;  %v243_v30 = vld [vmem:[%s6889_s15 + $0xa0] sm:$0xff]  ;;  %p6674_p2 = por %p6673_p13, %p6672_p6 }
  0x44   : > { %2306 = vperm.xlu1 %6634, %v2276_v5   ;;  %2301 = vperm.xlu0 %6633, %v2275_v6   ;;  %v244_v31 = vld [vmem:[%s6889_s15 + $0xa8] sm:$0xff]  ;;  %v245_v32 = vld [vmem:[%s6889_s15 + $0xb0] sm:$0xff]  ;;  %v246_v33 = vld [vmem:[%s6889_s15 + $0xb8] sm:$0xff] }
  0x45   : > { %v247_v38 = vld [vmem:[%s6889_s15 + $0xc0] sm:$0xff]  ;;  %v248_v39 = vld [vmem:[%s6889_s15 + $0xc8] sm:$0xff]  ;;  %v249_v40 = vld [vmem:[%s6889_s15 + $0xd0] sm:$0xff]  ;;  %p6675_p5 = pnand %p6674_p2, %p6668_p0 }
  0x46   : > { %v250_v41 = vld [vmem:[%s6889_s15 + $0xd8] sm:$0xff]  ;;  %v6958_v46 = vld [vmem:[%s6889_s15 + $0xe0] sm:$0xff]  ;;  %v6961_v47 = vld [vmem:[%s6889_s15 + $0xe8] sm:$0xff] }
  0x47   : > { %v6964_v48 = vld [vmem:[%s6889_s15 + $0xf0] sm:$0xff]  ;;  %v6967_v49 = vld [vmem:[%s6889_s15 + $0xf8] sm:$0xff]  ;;  %v6982_v54 = vld [vmem:[%s6889_s15 + $0x100] sm:$0xff] }
  0x48   : > { %2316 = vperm.xlu1 %6634, %v2278_v7   ;;  %2311 = vperm.xlu0 %6633, %v2277_v8   ;;  %v6985_v55 = vld [vmem:[%s6889_s15 + $0x108] sm:$0xff]  ;;  %v6988_v56 = vld [vmem:[%s6889_s15 + $0x110] sm:$0xff]  ;;  %v6991_v57 = vld [vmem:[%s6889_s15 + $0x118] sm:$0xff] }
  0x49   : > { %v7002_v62 = vld [vmem:[%s6889_s15 + $0x120] sm:$0xff]  ;;  %v7005_v63 = vld [vmem:[%s6889_s15 + $0x128] sm:$0xff]  ;;  %v7008_v0 = vld [vmem:[%s6889_s15 + $0x130] sm:$0xff] }
  0x4a   : > { %v7011_v1 = vld [vmem:[%s6889_s15 + $0x138] sm:$0xff]  ;;  %v7024_v7 = vld [vmem:[%s6889_s15 + $0x140] sm:$0xff]  ;;  %v7027_v8 = vld [vmem:[%s6889_s15 + $0x148] sm:$0xff] }
  0xbb   : > { %v6927_v17 = vpop.permute.xlu0 %2281 }
  0xbc   : > { %v2319_v34 = vadd.f32 %v6927_v17, %v223_v9  ;;  %v2320_v35 = vadd.f32 %v6927_v17, %v224_v10  ;;  %v2321_v36 = vadd.f32 %v6927_v17, %v225_v11  ;;  %v2322_v37 = vadd.f32 %v6927_v17, %v226_v12  ;;  %v7030_v9 = vld [vmem:[%s6889_s15 + $0x150] sm:$0xff]  ;;  %v7033_v10 = vld [vmem:[%s6889_s15 + $0x158] sm:$0xff] }
  0xbd   : > { %v2323_v42 = vadd.f32 %v6927_v17, %v227_v13  ;;  %v2324_v43 = vadd.f32 %v6927_v17, %v228_v14  ;;  %v2325_v44 = vadd.f32 %v6927_v17, %v229_v15  ;;  %v2326_v45 = vadd.f32 %v6927_v17, %v230_v16  ;;  %v7044_v15 = vld [vmem:[%s6889_s15 + $0x160] sm:$0xff]  ;;  %v7047_v16 = vld [vmem:[%s6889_s15 + $0x168] sm:$0xff] }
  0xbe   : > { %v2327_v50 = vadd.f32 %v6927_v17, %v231_v18  ;;  %v2328_v51 = vadd.f32 %v6927_v17, %v232_v19  ;;  %v2329_v52 = vadd.f32 %v6927_v17, %v233_v20  ;;  %v2330_v53 = vadd.f32 %v6927_v17, %v234_v21  ;;  %4367 = vst [vmem:[%s6975_s4] sm:$0xff] %v2319_v34  ;;  %v7050_v18 = vld [vmem:[%s6889_s15 + $0x170] sm:$0xff]  ;;  %v7053_v19 = vld [vmem:[%s6889_s15 + $0x178] sm:$0xff] }
  0xbf   : > { %4368 = vst [vmem:[%s6975_s4 + $0x8] sm:$0xff] %v2320_v35  ;;  %4369 = vst [vmem:[%s6975_s4 + $0x10] sm:$0xff] %v2321_v36  ;;  %v2331_v58 = vadd.f32 %v6927_v17, %v235_v22  ;;  %v2332_v59 = vadd.f32 %v6927_v17, %v236_v23  ;;  %v2333_v60 = vadd.f32 %v6927_v17, %v237_v24  ;;  %v7021_v6 = vpop.permute.xlu0 %2286  ;;  %v7064_v24 = vld [vmem:[%s6889_s15 + $0x180] sm:$0xff]  ;;  %v7094_v34 = vld [vmem:[%s6889_s15 + $0x1b0] sm:$0xff] }
  0xc0   : > { %4370 = vst [vmem:[%s6975_s4 + $0x18] sm:$0xff] %v2322_v37  ;;  %v2334_v61 = vadd.f32 %v6927_v17, %v238_v25  ;;  %4371 = vst [vmem:[%s6975_s4 + $0x20] sm:$0xff] %v2323_v42  ;;  %v2335_v2 = vadd.f32 %v6927_v17, %v239_v26  ;;  %v2336_v3 = vadd.f32 %v6927_v17, %v240_v27  ;;  %v7067_v25 = vld [vmem:[%s6889_s15 + $0x188] sm:$0xff]  ;;  %v7070_v26 = vld [vmem:[%s6889_s15 + $0x190] sm:$0xff] }
  0xc1   : > { %4372 = vst [vmem:[%s6975_s4 + $0x28] sm:$0xff] %v2324_v43  ;;  %4373 = vst [vmem:[%s6975_s4 + $0x30] sm:$0xff] %v2325_v44  ;;  %v2337_v4 = vadd.f32 %v6927_v17, %v241_v28  ;;  %v2338_v5 = vadd.f32 %v6927_v17, %v242_v29  ;;  %v2339_v11 = vadd.f32 %v6927_v17, %v243_v30  ;;  %v7073_v27 = vld [vmem:[%s6889_s15 + $0x198] sm:$0xff]  ;;  %v7118_v42 = vld [vmem:[%s6889_s15 + $0x1d0] sm:$0xff] }
  0xc2   : > { %4374 = vst [vmem:[%s6975_s4 + $0x38] sm:$0xff] %v2326_v45  ;;  %4375 = vst [vmem:[%s6975_s4 + $0x40] sm:$0xff] %v2327_v50  ;;  %v2340_v12 = vadd.f32 %v6927_v17, %v244_v31  ;;  %v2341_v13 = vadd.f32 %v6927_v17, %v245_v32  ;;  %v2342_v14 = vadd.f32 %v6927_v17, %v246_v33  ;;  %v7088_v32 = vld [vmem:[%s6889_s15 + $0x1a0] sm:$0xff]  ;;  %v7091_v33 = vld [vmem:[%s6889_s15 + $0x1a8] sm:$0xff] }
  0xc3   : > { %4376 = vst [vmem:[%s6975_s4 + $0x48] sm:$0xff] %v2328_v51  ;;  %4377 = vst [vmem:[%s6975_s4 + $0x50] sm:$0xff] %v2329_v52  ;;  %v2343_v20 = vadd.f32 %v6927_v17, %v247_v38  ;;  %v2344_v21 = vadd.f32 %v6927_v17, %v248_v39  ;;  %v2345_v22 = vadd.f32 %v6927_v17, %v249_v40  ;;  %v7097_v35 = vld [vmem:[%s6889_s15 + $0x1b8] sm:$0xff]  ;;  %v7112_v40 = vld [vmem:[%s6889_s15 + $0x1c0] sm:$0xff] }
  0xc4   : > { %4378 = vst [vmem:[%s6975_s4 + $0x58] sm:$0xff] %v2330_v53  ;;  %4379 = vst [vmem:[%s6975_s4 + $0x60] sm:$0xff] %v2331_v58  ;;  %v2346_v23 = vadd.f32 %v6927_v17, %v250_v41  ;;  %v2347_v28 = vadd.f32 %v6927_v17, %v6958_v46  ;;  %v2348_v29 = vadd.f32 %v6927_v17, %v6961_v47  ;;  %v7115_v41 = vld [vmem:[%s6889_s15 + $0x1c8] sm:$0xff]  ;;  %v7121_v43 = vld [vmem:[%s6889_s15 + $0x1d8] sm:$0xff] }
  0xc5   : > { %4380 = vst [vmem:[%s6975_s4 + $0x68] sm:$0xff] %v2332_v59  ;;  %4381 = vst [vmem:[%s6975_s4 + $0x70] sm:$0xff] %v2333_v60  ;;  %v2349_v30 = vadd.f32 %v6927_v17, %v6964_v48  ;;  %v2350_v31 = vadd.f32 %v6927_v17, %v6967_v49  ;;  %v2351_v36 = vadd.f32 %v7021_v6, %v6982_v54  ;;  %v7136_v48 = vld [vmem:[%s6889_s15 + $0x1e0] sm:$0xff]  ;;  %v7139_v49 = vld [vmem:[%s6889_s15 + $0x1e8] sm:$0xff] }
  0xc6   : > { %4382 = vst [vmem:[%s6975_s4 + $0x78] sm:$0xff] %v2334_v61  ;;  %4383 = vst [vmem:[%s6975_s4 + $0x80] sm:$0xff] %v2335_v2  ;;  %v2352_v37 = vadd.f32 %v7021_v6, %v6985_v55  ;;  %v2353_v38 = vadd.f32 %v7021_v6, %v6988_v56  ;;  %v2354_v39 = vadd.f32 %v7021_v6, %v6991_v57  ;;  %v7142_v50 = vld [vmem:[%s6889_s15 + $0x1f0] sm:$0xff]  ;;  %v7145_v51 = vld [vmem:[%s6889_s15 + $0x1f8] sm:$0xff] }
  0xc7   : > { %4384 = vst [vmem:[%s6975_s4 + $0x88] sm:$0xff] %v2336_v3  ;;  %4385 = vst [vmem:[%s6975_s4 + $0x90] sm:$0xff] %v2337_v4  ;;  %v2355_v44 = vadd.f32 %v7021_v6, %v7002_v62  ;;  %v2356_v45 = vadd.f32 %v7021_v6, %v7005_v63  ;;  %v2357_v46 = vadd.f32 %v7021_v6, %v7008_v0  ;;  %v7160_v56 = vld [vmem:[%s6889_s15 + $0x200] sm:$0xff]  ;;  %v7163_v57 = vld [vmem:[%s6889_s15 + $0x208] sm:$0xff] }
  0xc8   : > { %4386 = vst [vmem:[%s6975_s4 + $0x98] sm:$0xff] %v2338_v5  ;;  %4387 = vst [vmem:[%s6975_s4 + $0xa0] sm:$0xff] %v2339_v11  ;;  %v2358_v47 = vadd.f32 %v7021_v6, %v7011_v1  ;;  %v2359_v52 = vadd.f32 %v7021_v6, %v7024_v7  ;;  %v2360_v53 = vadd.f32 %v7021_v6, %v7027_v8  ;;  %v7166_v58 = vld [vmem:[%s6889_s15 + $0x210] sm:$0xff]  ;;  %v7169_v59 = vld [vmem:[%s6889_s15 + $0x218] sm:$0xff] }
  0xc9   : > { %4388 = vst [vmem:[%s6975_s4 + $0xa8] sm:$0xff] %v2340_v12  ;;  %4389 = vst [vmem:[%s6975_s4 + $0xb0] sm:$0xff] %v2341_v13  ;;  %v2361_v54 = vadd.f32 %v7021_v6, %v7030_v9  ;;  %v2362_v55 = vadd.f32 %v7021_v6, %v7033_v10  ;;  %v2363_v60 = vadd.f32 %v7021_v6, %v7044_v15  ;;  %v7184_v0 = vld [vmem:[%s6889_s15 + $0x220] sm:$0xff]  ;;  %v7187_v1 = vld [vmem:[%s6889_s15 + $0x228] sm:$0xff]  ;;  %v7207_v9 = vpop.permute.xlu1 %2291 }
  0xca   : > { %4390 = vst [vmem:[%s6975_s4 + $0xb8] sm:$0xff] %v2342_v14  ;;  %4391 = vst [vmem:[%s6975_s4 + $0xc0] sm:$0xff] %v2343_v20  ;;  %v2364_v61 = vadd.f32 %v7021_v6, %v7047_v16  ;;  %v2365_v62 = vadd.f32 %v7021_v6, %v7050_v18  ;;  %v2366_v63 = vadd.f32 %v7021_v6, %v7053_v19  ;;  %v7190_v2 = vld [vmem:[%s6889_s15 + $0x230] sm:$0xff]  ;;  %v7193_v3 = vld [vmem:[%s6889_s15 + $0x238] sm:$0xff] }
  0xcb   : > { %4392 = vst [vmem:[%s6975_s4 + $0xc8] sm:$0xff] %v2344_v21  ;;  %4393 = vst [vmem:[%s6975_s4 + $0xd0] sm:$0xff] %v2345_v22  ;;  %v2367_v4 = vadd.f32 %v7021_v6, %v7064_v24  ;;  %v2368_v5 = vadd.f32 %v7021_v6, %v7067_v25  ;;  %v2369_v7 = vadd.f32 %v7021_v6, %v7070_v26  ;;  %v7210_v10 = vld [vmem:[%s6889_s15 + $0x240] sm:$0xff]  ;;  %v7213_v11 = vld [vmem:[%s6889_s15 + $0x248] sm:$0xff] }
  0xcc   : > { %4394 = vst [vmem:[%s6975_s4 + $0xd8] sm:$0xff] %v2346_v23  ;;  %4395 = vst [vmem:[%s6975_s4 + $0xe0] sm:$0xff] %v2347_v28  ;;  %v2370_v8 = vadd.f32 %v7021_v6, %v7073_v27  ;;  %v7216_v12 = vld [vmem:[%s6889_s15 + $0x250] sm:$0xff]  ;;  %v7219_v13 = vld [vmem:[%s6889_s15 + $0x258] sm:$0xff]  ;;  %v2371_v14 = vadd.f32 %v7021_v6, %v7088_v32  ;;  %v2372_v15 = vadd.f32 %v7021_v6, %v7091_v33 }
  0xcd   : > { %4396 = vst [vmem:[%s6975_s4 + $0xe8] sm:$0xff] %v2348_v29  ;;  %4397 = vst [vmem:[%s6975_s4 + $0xf0] sm:$0xff] %v2349_v30  ;;  %v2373_v16 = vadd.f32 %v7021_v6, %v7094_v34  ;;  %v2374_v18 = vadd.f32 %v7021_v6, %v7097_v35  ;;  %v7234_v19 = vld [vmem:[%s6889_s15 + $0x260] sm:$0xff]  ;;  %v7237_v20 = vld [vmem:[%s6889_s15 + $0x268] sm:$0xff]  ;;  %v2375_v23 = vadd.f32 %v7021_v6, %v7112_v40 }
  0xce   : > { %4398 = vst [vmem:[%s6975_s4 + $0xf8] sm:$0xff] %v2350_v31  ;;  %4399 = vst [vmem:[%s6975_s4 + $0x100] sm:$0xff] %v2351_v36  ;;  %v7240_v21 = vld [vmem:[%s6889_s15 + $0x270] sm:$0xff]  ;;  %v7243_v22 = vld [vmem:[%s6889_s15 + $0x278] sm:$0xff]  ;;  %v2376_v24 = vadd.f32 %v7021_v6, %v7115_v41  ;;  %v2377_v25 = vadd.f32 %v7021_v6, %v7118_v42  ;;  %v2378_v26 = vadd.f32 %v7021_v6, %v7121_v43 }
  0xcf   : > { %4400 = vst [vmem:[%s6975_s4 + $0x108] sm:$0xff] %v2352_v37  ;;  %4401 = vst [vmem:[%s6975_s4 + $0x110] sm:$0xff] %v2353_v38  ;;  %v7258_v27 = vld [vmem:[%s6889_s15 + $0x280] sm:$0xff]  ;;  %v7261_v28 = vld [vmem:[%s6889_s15 + $0x288] sm:$0xff]  ;;  %v2379_v31 = vadd.f32 %v7021_v6, %v7136_v48  ;;  %v2380_v32 = vadd.f32 %v7021_v6, %v7139_v49  ;;  %v2381_v33 = vadd.f32 %v7021_v6, %v7142_v50 }
  0xd0   : > { %4402 = vst [vmem:[%s6975_s4 + $0x118] sm:$0xff] %v2354_v39  ;;  %4403 = vst [vmem:[%s6975_s4 + $0x120] sm:$0xff] %v2355_v44  ;;  %v7264_v29 = vld [vmem:[%s6889_s15 + $0x290] sm:$0xff]  ;;  %v7267_v30 = vld [vmem:[%s6889_s15 + $0x298] sm:$0xff]  ;;  %v2382_v34 = vadd.f32 %v7021_v6, %v7145_v51  ;;  %v2383_v39 = vadd.f32 %v7207_v9, %v7160_v56  ;;  %v2384_v40 = vadd.f32 %v7207_v9, %v7163_v57 }
  0xd1   : > { %4404 = vst [vmem:[%s6975_s4 + $0x128] sm:$0xff] %v2356_v45  ;;  %4405 = vst [vmem:[%s6975_s4 + $0x130] sm:$0xff] %v2357_v46  ;;  %v7282_v35 = vld [vmem:[%s6889_s15 + $0x2a0] sm:$0xff]  ;;  %v7285_v36 = vld [vmem:[%s6889_s15 + $0x2a8] sm:$0xff]  ;;  %v2385_v41 = vadd.f32 %v7207_v9, %v7166_v58  ;;  %v2386_v42 = vadd.f32 %v7207_v9, %v7169_v59  ;;  %v2388_v48 = vadd.f32 %v7207_v9, %v7187_v1 }
  0xd2   : > { %4406 = vst [vmem:[%s6975_s4 + $0x138] sm:$0xff] %v2358_v47  ;;  %4407 = vst [vmem:[%s6975_s4 + $0x140] sm:$0xff] %v2359_v52  ;;  %v7288_v37 = vld [vmem:[%s6889_s15 + $0x2b0] sm:$0xff]  ;;  %v7291_v38 = vld [vmem:[%s6889_s15 + $0x2b8] sm:$0xff]  ;;  %v2387_v47 = vadd.f32 %v7207_v9, %v7184_v0  ;;  %v2389_v49 = vadd.f32 %v7207_v9, %v7190_v2  ;;  %v2390_v50 = vadd.f32 %v7207_v9, %v7193_v3 }
  0xd3   : > { %4408 = vst [vmem:[%s6975_s4 + $0x148] sm:$0xff] %v2360_v53  ;;  %4409 = vst [vmem:[%s6975_s4 + $0x150] sm:$0xff] %v2361_v54  ;;  %v7306_v43 = vld [vmem:[%s6889_s15 + $0x2c0] sm:$0xff]  ;;  %v7309_v44 = vld [vmem:[%s6889_s15 + $0x2c8] sm:$0xff]  ;;  %v2392_v56 = vadd.f32 %v7207_v9, %v7213_v11  ;;  %v2393_v57 = vadd.f32 %v7207_v9, %v7216_v12  ;;  %v2394_v58 = vadd.f32 %v7207_v9, %v7219_v13  ;;  %v7401_v13 = vpop.permute.xlu1 %2296 }
  0xd4   : > { %4410 = vst [vmem:[%s6975_s4 + $0x158] sm:$0xff] %v2362_v55  ;;  %4411 = vst [vmem:[%s6975_s4 + $0x160] sm:$0xff] %v2363_v60  ;;  %v7312_v45 = vld [vmem:[%s6889_s15 + $0x2d0] sm:$0xff]  ;;  %v7315_v46 = vld [vmem:[%s6889_s15 + $0x2d8] sm:$0xff]  ;;  %v2391_v55 = vadd.f32 %v7207_v9, %v7210_v10  ;;  %v2396_v0 = vadd.f32 %v7207_v9, %v7237_v20  ;;  %v2397_v1 = vadd.f32 %v7207_v9, %v7240_v21 }
  0xd5   : > { %4412 = vst [vmem:[%s6975_s4 + $0x168] sm:$0xff] %v2364_v61  ;;  %4413 = vst [vmem:[%s6975_s4 + $0x170] sm:$0xff] %v2365_v62  ;;  %v7330_v51 = vld [vmem:[%s6889_s15 + $0x2e0] sm:$0xff]  ;;  %v7333_v52 = vld [vmem:[%s6889_s15 + $0x2e8] sm:$0xff]  ;;  %v2398_v2 = vadd.f32 %v7207_v9, %v7243_v22  ;;  %v2400_v10 = vadd.f32 %v7207_v9, %v7261_v28  ;;  %v2401_v11 = vadd.f32 %v7207_v9, %v7264_v29 }
  0xd6   : > { %4414 = vst [vmem:[%s6975_s4 + $0x178] sm:$0xff] %v2366_v63  ;;  %4415 = vst [vmem:[%s6975_s4 + $0x180] sm:$0xff] %v2367_v4  ;;  %v7336_v53 = vld [vmem:[%s6889_s15 + $0x2f0] sm:$0xff]  ;;  %v7339_v54 = vld [vmem:[%s6889_s15 + $0x2f8] sm:$0xff]  ;;  %v2395_v63 = vadd.f32 %v7207_v9, %v7234_v19  ;;  %v2402_v12 = vadd.f32 %v7207_v9, %v7267_v30  ;;  %v2403_v19 = vadd.f32 %v7207_v9, %v7282_v35 }
  0xd7   : > { %4416 = vst [vmem:[%s6975_s4 + $0x188] sm:$0xff] %v2368_v5  ;;  %4417 = vst [vmem:[%s6975_s4 + $0x190] sm:$0xff] %v2369_v7  ;;  %v7354_v59 = vld [vmem:[%s6889_s15 + $0x300] sm:$0xff]  ;;  %v7357_v60 = vld [vmem:[%s6889_s15 + $0x308] sm:$0xff]  ;;  %v2404_v20 = vadd.f32 %v7207_v9, %v7285_v36  ;;  %v2405_v21 = vadd.f32 %v7207_v9, %v7288_v37  ;;  %v2406_v22 = vadd.f32 %v7207_v9, %v7291_v38 }
  0xd8   : > { %4418 = vst [vmem:[%s6975_s4 + $0x198] sm:$0xff] %v2370_v8  ;;  %4419 = vst [vmem:[%s6975_s4 + $0x1a0] sm:$0xff] %v2371_v14  ;;  %v7360_v61 = vld [vmem:[%s6889_s15 + $0x310] sm:$0xff]  ;;  %v7363_v62 = vld [vmem:[%s6889_s15 + $0x318] sm:$0xff]  ;;  %v2399_v8 = vadd.f32 %v7207_v9, %v7258_v27  ;;  %v2407_v27 = vadd.f32 %v7207_v9, %v7306_v43  ;;  %v2408_v28 = vadd.f32 %v7207_v9, %v7309_v44 }
  0xd9   : > { %4420 = vst [vmem:[%s6975_s4 + $0x1a8] sm:$0xff] %v2372_v15  ;;  %4421 = vst [vmem:[%s6975_s4 + $0x1b0] sm:$0xff] %v2373_v16  ;;  %v7378_v3 = vld [vmem:[%s6889_s15 + $0x320] sm:$0xff]  ;;  %v7381_v4 = vld [vmem:[%s6889_s15 + $0x328] sm:$0xff]  ;;  %v2409_v29 = vadd.f32 %v7207_v9, %v7312_v45  ;;  %v2410_v30 = vadd.f32 %v7207_v9, %v7315_v46  ;;  %v2411_v35 = vadd.f32 %v7207_v9, %v7330_v51 }
  0xda   : > { %4422 = vst [vmem:[%s6975_s4 + $0x1b8] sm:$0xff] %v2374_v18  ;;  %4423 = vst [vmem:[%s6975_s4 + $0x1c0] sm:$0xff] %v2375_v23  ;;  %v7384_v5 = vld [vmem:[%s6889_s15 + $0x330] sm:$0xff]  ;;  %v7387_v7 = vld [vmem:[%s6889_s15 + $0x338] sm:$0xff]  ;;  %v2412_v36 = vadd.f32 %v7207_v9, %v7333_v52  ;;  %v2413_v37 = vadd.f32 %v7207_v9, %v7336_v53  ;;  %v2414_v38 = vadd.f32 %v7207_v9, %v7339_v54 }
  0xdb   : > { %4424 = vst [vmem:[%s6975_s4 + $0x1c8] sm:$0xff] %v2376_v24  ;;  %4425 = vst [vmem:[%s6975_s4 + $0x1d0] sm:$0xff] %v2377_v25  ;;  %v7404_v14 = vld [vmem:[%s6889_s15 + $0x340] sm:$0xff]  ;;  %v7407_v15 = vld [vmem:[%s6889_s15 + $0x348] sm:$0xff]  ;;  %v2415_v43 = vadd.f32 %v7401_v13, %v7354_v59  ;;  %v2416_v44 = vadd.f32 %v7401_v13, %v7357_v60  ;;  %v2417_v45 = vadd.f32 %v7401_v13, %v7360_v61 }
  0xdc   : > { %4426 = vst [vmem:[%s6975_s4 + $0x1d8] sm:$0xff] %v2378_v26  ;;  %4427 = vst [vmem:[%s6975_s4 + $0x1e0] sm:$0xff] %v2379_v31  ;;  %v7410_v16 = vld [vmem:[%s6889_s15 + $0x350] sm:$0xff]  ;;  %v7413_v18 = vld [vmem:[%s6889_s15 + $0x358] sm:$0xff]  ;;  %v2418_v46 = vadd.f32 %v7401_v13, %v7363_v62  ;;  %v2419_v51 = vadd.f32 %v7401_v13, %v7378_v3  ;;  %v2420_v52 = vadd.f32 %v7401_v13, %v7381_v4 }
  0xdd   : > { %4428 = vst [vmem:[%s6975_s4 + $0x1e8] sm:$0xff] %v2380_v32  ;;  %4429 = vst [vmem:[%s6975_s4 + $0x1f0] sm:$0xff] %v2381_v33  ;;  %v7428_v23 = vld [vmem:[%s6889_s15 + $0x360] sm:$0xff]  ;;  %v7431_v24 = vld [vmem:[%s6889_s15 + $0x368] sm:$0xff]  ;;  %v2421_v53 = vadd.f32 %v7401_v13, %v7384_v5  ;;  %v2422_v54 = vadd.f32 %v7401_v13, %v7387_v7  ;;  %v2423_v59 = vadd.f32 %v7401_v13, %v7404_v14 }
  0xde   : > { %4430 = vst [vmem:[%s6975_s4 + $0x1f8] sm:$0xff] %v2382_v34  ;;  %4431 = vst [vmem:[%s6975_s4 + $0x200] sm:$0xff] %v2383_v39  ;;  %v7434_v25 = vld [vmem:[%s6889_s15 + $0x370] sm:$0xff]  ;;  %v7437_v26 = vld [vmem:[%s6889_s15 + $0x378] sm:$0xff]  ;;  %v2424_v60 = vadd.f32 %v7401_v13, %v7407_v15  ;;  %v2425_v61 = vadd.f32 %v7401_v13, %v7410_v16  ;;  %v2426_v62 = vadd.f32 %v7401_v13, %v7413_v18 }
  0xdf   : > { %4432 = vst [vmem:[%s6975_s4 + $0x208] sm:$0xff] %v2384_v40  ;;  %4433 = vst [vmem:[%s6975_s4 + $0x210] sm:$0xff] %v2385_v41  ;;  %v7452_v31 = vld [vmem:[%s6889_s15 + $0x380] sm:$0xff]  ;;  %v7455_v32 = vld [vmem:[%s6889_s15 + $0x388] sm:$0xff]  ;;  %v2427_v3 = vadd.f32 %v7401_v13, %v7428_v23  ;;  %v2428_v4 = vadd.f32 %v7401_v13, %v7431_v24  ;;  %v2429_v5 = vadd.f32 %v7401_v13, %v7434_v25 }
  0xe0   : > { %4434 = vst [vmem:[%s6975_s4 + $0x218] sm:$0xff] %v2386_v42  ;;  %4435 = vst [vmem:[%s6975_s4 + $0x220] sm:$0xff] %v2387_v47  ;;  %v7458_v33 = vld [vmem:[%s6889_s15 + $0x390] sm:$0xff]  ;;  %v7461_v34 = vld [vmem:[%s6889_s15 + $0x398] sm:$0xff]  ;;  %v2430_v7 = vadd.f32 %v7401_v13, %v7437_v26  ;;  %v2431_v14 = vadd.f32 %v7401_v13, %v7452_v31  ;;  %v2432_v15 = vadd.f32 %v7401_v13, %v7455_v32 }
  0xe1   : > { %4436 = vst [vmem:[%s6975_s4 + $0x228] sm:$0xff] %v2388_v48  ;;  %4437 = vst [vmem:[%s6975_s4 + $0x230] sm:$0xff] %v2389_v49  ;;  %v7476_v39 = vld [vmem:[%s6889_s15 + $0x3a0] sm:$0xff]  ;;  %v7479_v40 = vld [vmem:[%s6889_s15 + $0x3a8] sm:$0xff]  ;;  %v2433_v16 = vadd.f32 %v7401_v13, %v7458_v33  ;;  %v2434_v18 = vadd.f32 %v7401_v13, %v7461_v34 }
  0xe2   : > { %4438 = vst [vmem:[%s6975_s4 + $0x238] sm:$0xff] %v2390_v50  ;;  %4439 = vst [vmem:[%s6975_s4 + $0x240] sm:$0xff] %v2391_v55  ;;  %v7482_v41 = vld [vmem:[%s6889_s15 + $0x3b0] sm:$0xff]  ;;  %v7485_v42 = vld [vmem:[%s6889_s15 + $0x3b8] sm:$0xff]  ;;  %v2435_v24 = vadd.f32 %v7401_v13, %v7476_v39  ;;  %v2436_v25 = vadd.f32 %v7401_v13, %v7479_v40 }
  0xe3   : > { %4440 = vst [vmem:[%s6975_s4 + $0x248] sm:$0xff] %v2392_v56  ;;  %4441 = vst [vmem:[%s6975_s4 + $0x250] sm:$0xff] %v2393_v57  ;;  %v7500_v47 = vld [vmem:[%s6889_s15 + $0x3c0] sm:$0xff]  ;;  %v7503_v48 = vld [vmem:[%s6889_s15 + $0x3c8] sm:$0xff]  ;;  %v2437_v26 = vadd.f32 %v7401_v13, %v7482_v41 }
  0xe4   : > { %4442 = vst [vmem:[%s6975_s4 + $0x258] sm:$0xff] %v2394_v58  ;;  %4443 = vst [vmem:[%s6975_s4 + $0x260] sm:$0xff] %v2395_v63  ;;  %v7506_v49 = vld [vmem:[%s6889_s15 + $0x3d0] sm:$0xff]  ;;  %v7509_v50 = vld [vmem:[%s6889_s15 + $0x3d8] sm:$0xff]  ;;  %v2439_v32 = vadd.f32 %v7401_v13, %v7500_v47  ;;  %v2440_v33 = vadd.f32 %v7401_v13, %v7503_v48 }
  0xe5   : > { %4444 = vst [vmem:[%s6975_s4 + $0x268] sm:$0xff] %v2396_v0  ;;  %4445 = vst [vmem:[%s6975_s4 + $0x270] sm:$0xff] %v2397_v1  ;;  %v7524_v55 = vld [vmem:[%s6889_s15 + $0x3e0] sm:$0xff]  ;;  %v7527_v56 = vld [vmem:[%s6889_s15 + $0x3e8] sm:$0xff]  ;;  %v2441_v34 = vadd.f32 %v7401_v13, %v7506_v49 }
  0xe6   : > { %4446 = vst [vmem:[%s6975_s4 + $0x278] sm:$0xff] %v2398_v2  ;;  %4447 = vst [vmem:[%s6975_s4 + $0x280] sm:$0xff] %v2399_v8  ;;  %v7530_v57 = vld [vmem:[%s6889_s15 + $0x3f0] sm:$0xff]  ;;  %v7533_v58 = vld [vmem:[%s6889_s15 + $0x3f8] sm:$0xff]  ;;  %v2443_v40 = vadd.f32 %v7401_v13, %v7524_v55  ;;  %v2444_v41 = vadd.f32 %v7401_v13, %v7527_v56 }
  0xe7   : > { %4448 = vst [vmem:[%s6975_s4 + $0x288] sm:$0xff] %v2400_v10  ;;  %4449 = vst [vmem:[%s6975_s4 + $0x290] sm:$0xff] %v2401_v11  ;;  %v7548_v63 = vld [vmem:[%s6889_s15 + $0x400] sm:$0xff]  ;;  %v7551_v0 = vld [vmem:[%s6889_s15 + $0x408] sm:$0xff] }
  0xe8   : > { %4450 = vst [vmem:[%s6975_s4 + $0x298] sm:$0xff] %v2402_v12  ;;  %4451 = vst [vmem:[%s6975_s4 + $0x2a0] sm:$0xff] %v2403_v19  ;;  %v7554_v1 = vld [vmem:[%s6889_s15 + $0x410] sm:$0xff]  ;;  %v7557_v2 = vld [vmem:[%s6889_s15 + $0x418] sm:$0xff]  ;;  %v7595_v19 = vpop.permute.xlu0 %2301 }
  0xe9   : > { %4452 = vst [vmem:[%s6975_s4 + $0x2a8] sm:$0xff] %v2404_v20  ;;  %4453 = vst [vmem:[%s6975_s4 + $0x2b0] sm:$0xff] %v2405_v21  ;;  %v7572_v8 = vld [vmem:[%s6889_s15 + $0x420] sm:$0xff]  ;;  %v7575_v10 = vld [vmem:[%s6889_s15 + $0x428] sm:$0xff]  ;;  %v2447_v48 = vadd.f32 %v7595_v19, %v7548_v63  ;;  %v2448_v49 = vadd.f32 %v7595_v19, %v7551_v0 }
  0xea   : > { %4454 = vst [vmem:[%s6975_s4 + $0x2b8] sm:$0xff] %v2406_v22  ;;  %4455 = vst [vmem:[%s6975_s4 + $0x2c0] sm:$0xff] %v2407_v27  ;;  %v7578_v11 = vld [vmem:[%s6889_s15 + $0x430] sm:$0xff]  ;;  %v7581_v12 = vld [vmem:[%s6889_s15 + $0x438] sm:$0xff]  ;;  %v2438_v27 = vadd.f32 %v7401_v13, %v7485_v42  ;;  %v2445_v42 = vadd.f32 %v7401_v13, %v7530_v57  ;;  %v2451_v56 = vadd.f32 %v7595_v19, %v7572_v8 }
  0xeb   : > { %4456 = vst [vmem:[%s6975_s4 + $0x2c8] sm:$0xff] %v2408_v28  ;;  %4457 = vst [vmem:[%s6975_s4 + $0x2d0] sm:$0xff] %v2409_v29  ;;  %v7598_v20 = vld [vmem:[%s6889_s15 + $0x440] sm:$0xff]  ;;  %v7601_v21 = vld [vmem:[%s6889_s15 + $0x448] sm:$0xff]  ;;  %v2452_v57 = vadd.f32 %v7595_v19, %v7575_v10 }
  0xec   : > { %4458 = vst [vmem:[%s6975_s4 + $0x2d8] sm:$0xff] %v2410_v30  ;;  %4459 = vst [vmem:[%s6975_s4 + $0x2e0] sm:$0xff] %v2411_v35  ;;  %v7604_v22 = vld [vmem:[%s6889_s15 + $0x450] sm:$0xff]  ;;  %v7607_v23 = vld [vmem:[%s6889_s15 + $0x458] sm:$0xff]  ;;  %v2442_v35 = vadd.f32 %v7401_v13, %v7509_v50  ;;  %v2449_v50 = vadd.f32 %v7595_v19, %v7554_v1  ;;  %v2455_v0 = vadd.f32 %v7595_v19, %v7598_v20 }
  0xed   : > { %4460 = vst [vmem:[%s6975_s4 + $0x2e8] sm:$0xff] %v2412_v36  ;;  %4461 = vst [vmem:[%s6975_s4 + $0x2f0] sm:$0xff] %v2413_v37  ;;  %v7622_v28 = vld [vmem:[%s6889_s15 + $0x460] sm:$0xff]  ;;  %v7625_v29 = vld [vmem:[%s6889_s15 + $0x468] sm:$0xff]  ;;  %v2456_v1 = vadd.f32 %v7595_v19, %v7601_v21 }
  0xee   : > { %4462 = vst [vmem:[%s6975_s4 + $0x2f8] sm:$0xff] %v2414_v38  ;;  %4463 = vst [vmem:[%s6975_s4 + $0x300] sm:$0xff] %v2415_v43  ;;  %v7628_v30 = vld [vmem:[%s6889_s15 + $0x470] sm:$0xff]  ;;  %v7631_v31 = vld [vmem:[%s6889_s15 + $0x478] sm:$0xff]  ;;  %v2446_v43 = vadd.f32 %v7401_v13, %v7533_v58  ;;  %v2453_v58 = vadd.f32 %v7595_v19, %v7578_v11  ;;  %v2459_v10 = vadd.f32 %v7595_v19, %v7622_v28 }
  0xef   : > { %4464 = vst [vmem:[%s6975_s4 + $0x308] sm:$0xff] %v2416_v44  ;;  %4465 = vst [vmem:[%s6975_s4 + $0x310] sm:$0xff] %v2417_v45  ;;  %v7646_v36 = vld [vmem:[%s6889_s15 + $0x480] sm:$0xff]  ;;  %v7649_v37 = vld [vmem:[%s6889_s15 + $0x488] sm:$0xff]  ;;  %v2460_v11 = vadd.f32 %v7595_v19, %v7625_v29 }
  0xf0   : > { %4466 = vst [vmem:[%s6975_s4 + $0x318] sm:$0xff] %v2418_v46  ;;  %4467 = vst [vmem:[%s6975_s4 + $0x320] sm:$0xff] %v2419_v51  ;;  %v7652_v38 = vld [vmem:[%s6889_s15 + $0x490] sm:$0xff]  ;;  %v7655_v39 = vld [vmem:[%s6889_s15 + $0x498] sm:$0xff]  ;;  %v2450_v51 = vadd.f32 %v7595_v19, %v7557_v2  ;;  %v2457_v2 = vadd.f32 %v7595_v19, %v7604_v22  ;;  %v2463_v21 = vadd.f32 %v7595_v19, %v7646_v36 }
  0xf1   : > { %4468 = vst [vmem:[%s6975_s4 + $0x328] sm:$0xff] %v2420_v52  ;;  %4469 = vst [vmem:[%s6975_s4 + $0x330] sm:$0xff] %v2421_v53  ;;  %v7670_v44 = vld [vmem:[%s6889_s15 + $0x4a0] sm:$0xff]  ;;  %v7673_v45 = vld [vmem:[%s6889_s15 + $0x4a8] sm:$0xff]  ;;  %v2464_v22 = vadd.f32 %v7595_v19, %v7649_v37 }
  0xf2   : > { %4470 = vst [vmem:[%s6975_s4 + $0x338] sm:$0xff] %v2422_v54  ;;  %4471 = vst [vmem:[%s6975_s4 + $0x340] sm:$0xff] %v2423_v59  ;;  %v7676_v46 = vld [vmem:[%s6889_s15 + $0x4b0] sm:$0xff]  ;;  %v7679_v47 = vld [vmem:[%s6889_s15 + $0x4b8] sm:$0xff]  ;;  %v2454_v59 = vadd.f32 %v7595_v19, %v7581_v12  ;;  %v2461_v12 = vadd.f32 %v7595_v19, %v7628_v30  ;;  %v2467_v30 = vadd.f32 %v7595_v19, %v7670_v44 }
  0xf3   : > { %4472 = vst [vmem:[%s6975_s4 + $0x348] sm:$0xff] %v2424_v60  ;;  %4473 = vst [vmem:[%s6975_s4 + $0x350] sm:$0xff] %v2425_v61  ;;  %v7694_v52 = vld [vmem:[%s6889_s15 + $0x4c0] sm:$0xff]  ;;  %v7697_v53 = vld [vmem:[%s6889_s15 + $0x4c8] sm:$0xff] }
  0xf4   : > { %4474 = vst [vmem:[%s6975_s4 + $0x358] sm:$0xff] %v2426_v62  ;;  %4475 = vst [vmem:[%s6975_s4 + $0x360] sm:$0xff] %v2427_v3  ;;  %v7700_v54 = vld [vmem:[%s6889_s15 + $0x4d0] sm:$0xff]  ;;  %v7703_v55 = vld [vmem:[%s6889_s15 + $0x4d8] sm:$0xff]  ;;  %v2458_v3 = vadd.f32 %v7595_v19, %v7607_v23  ;;  %v2465_v23 = vadd.f32 %v7595_v19, %v7652_v38  ;;  %v2471_v38 = vadd.f32 %v7595_v19, %v7694_v52 }
  0xf5   : > { %4476 = vst [vmem:[%s6975_s4 + $0x368] sm:$0xff] %v2428_v4  ;;  %4477 = vst [vmem:[%s6975_s4 + $0x370] sm:$0xff] %v2429_v5  ;;  %v7718_v60 = vld [vmem:[%s6889_s15 + $0x4e0] sm:$0xff]  ;;  %v7721_v61 = vld [vmem:[%s6889_s15 + $0x4e8] sm:$0xff] }
  0xf6   : > { %4478 = vst [vmem:[%s6975_s4 + $0x378] sm:$0xff] %v2430_v7  ;;  %4479 = vst [vmem:[%s6975_s4 + $0x380] sm:$0xff] %v2431_v14  ;;  %v7724_v62 = vld [vmem:[%s6889_s15 + $0x4f0] sm:$0xff]  ;;  %v7727_v63 = vld [vmem:[%s6889_s15 + $0x4f8] sm:$0xff]  ;;  %v2462_v14 = vadd.f32 %v7595_v19, %v7631_v31  ;;  %v2468_v31 = vadd.f32 %v7595_v19, %v7673_v45 }
  0xf7   : > { %4480 = vst [vmem:[%s6975_s4 + $0x388] sm:$0xff] %v2432_v15  ;;  %4481 = vst [vmem:[%s6975_s4 + $0x390] sm:$0xff] %v2433_v16  ;;  %v7742_v4 = vld [vmem:[%s6889_s15 + $0x500] sm:$0xff]  ;;  %v7745_v5 = vld [vmem:[%s6889_s15 + $0x508] sm:$0xff] }
  0xf8   : > { %4482 = vst [vmem:[%s6975_s4 + $0x398] sm:$0xff] %v2434_v18  ;;  %4483 = vst [vmem:[%s6975_s4 + $0x3a0] sm:$0xff] %v2435_v24  ;;  %v7748_v7 = vld [vmem:[%s6889_s15 + $0x510] sm:$0xff]  ;;  %v7751_v8 = vld [vmem:[%s6889_s15 + $0x518] sm:$0xff]  ;;  %v2466_v24 = vadd.f32 %v7595_v19, %v7655_v39  ;;  %v2472_v39 = vadd.f32 %v7595_v19, %v7697_v53 }
  0xf9   : > { %4484 = vst [vmem:[%s6975_s4 + $0x3a8] sm:$0xff] %v2436_v25  ;;  %4485 = vst [vmem:[%s6975_s4 + $0x3b0] sm:$0xff] %v2437_v26  ;;  %v7766_v15 = vld [vmem:[%s6889_s15 + $0x520] sm:$0xff]  ;;  %v7769_v16 = vld [vmem:[%s6889_s15 + $0x528] sm:$0xff]  ;;  %v7789_v25 = vpop.permute.xlu1 %2306 }
  0xfa   : > { %4486 = vst [vmem:[%s6975_s4 + $0x3b8] sm:$0xff] %v2438_v27  ;;  %4487 = vst [vmem:[%s6975_s4 + $0x3c0] sm:$0xff] %v2439_v32  ;;  %v7772_v18 = vld [vmem:[%s6889_s15 + $0x530] sm:$0xff]  ;;  %v7775_v20 = vld [vmem:[%s6889_s15 + $0x538] sm:$0xff]  ;;  %v2469_v32 = vadd.f32 %v7595_v19, %v7676_v46  ;;  %v2475_v46 = vadd.f32 %v7595_v19, %v7718_v60 }
  0xfb   : > { %4488 = vst [vmem:[%s6975_s4 + $0x3c8] sm:$0xff] %v2440_v33  ;;  %4489 = vst [vmem:[%s6975_s4 + $0x3d0] sm:$0xff] %v2441_v34  ;;  %v7792_v26 = vld [vmem:[%s6889_s15 + $0x540] sm:$0xff]  ;;  %v7795_v27 = vld [vmem:[%s6889_s15 + $0x548] sm:$0xff]  ;;  %v2470_v33 = vadd.f32 %v7595_v19, %v7679_v47  ;;  %v2476_v47 = vadd.f32 %v7595_v19, %v7721_v61 }
  0xfc   : > { %4490 = vst [vmem:[%s6975_s4 + $0x3d8] sm:$0xff] %v2442_v35  ;;  %4491 = vst [vmem:[%s6975_s4 + $0x3e0] sm:$0xff] %v2443_v40  ;;  %v7798_v28 = vld [vmem:[%s6889_s15 + $0x550] sm:$0xff]  ;;  %v7801_v29 = vld [vmem:[%s6889_s15 + $0x558] sm:$0xff]  ;;  %v2473_v40 = vadd.f32 %v7595_v19, %v7700_v54  ;;  %v2479_v54 = vadd.f32 %v7789_v25, %v7742_v4 }
  0xfd   : > { %4492 = vst [vmem:[%s6975_s4 + $0x3e8] sm:$0xff] %v2444_v41  ;;  %4493 = vst [vmem:[%s6975_s4 + $0x3f0] sm:$0xff] %v2445_v42  ;;  %v7816_v34 = vld [vmem:[%s6889_s15 + $0x560] sm:$0xff]  ;;  %v7819_v35 = vld [vmem:[%s6889_s15 + $0x568] sm:$0xff]  ;;  %v2474_v41 = vadd.f32 %v7595_v19, %v7703_v55  ;;  %v2480_v55 = vadd.f32 %v7789_v25, %v7745_v5 }
  0xfe   : > { %4494 = vst [vmem:[%s6975_s4 + $0x3f8] sm:$0xff] %v2446_v43  ;;  %4495 = vst [vmem:[%s6975_s4 + $0x400] sm:$0xff] %v2447_v48  ;;  %v7822_v36 = vld [vmem:[%s6889_s15 + $0x570] sm:$0xff]  ;;  %v7825_v37 = vld [vmem:[%s6889_s15 + $0x578] sm:$0xff]  ;;  %v2477_v48 = vadd.f32 %v7595_v19, %v7724_v62  ;;  %v2483_v62 = vadd.f32 %v7789_v25, %v7766_v15 }
  0xff   : > { %4496 = vst [vmem:[%s6975_s4 + $0x408] sm:$0xff] %v2448_v49  ;;  %4497 = vst [vmem:[%s6975_s4 + $0x410] sm:$0xff] %v2449_v50  ;;  %v7840_v42 = vld [vmem:[%s6889_s15 + $0x580] sm:$0xff]  ;;  %v7843_v43 = vld [vmem:[%s6889_s15 + $0x588] sm:$0xff]  ;;  %v2478_v49 = vadd.f32 %v7595_v19, %v7727_v63  ;;  %v2484_v63 = vadd.f32 %v7789_v25, %v7769_v16 }
 0x100   : > { %4498 = vst [vmem:[%s6975_s4 + $0x418] sm:$0xff] %v2450_v51  ;;  %4499 = vst [vmem:[%s6975_s4 + $0x420] sm:$0xff] %v2451_v56  ;;  %v7846_v44 = vld [vmem:[%s6889_s15 + $0x590] sm:$0xff]  ;;  %v7849_v45 = vld [vmem:[%s6889_s15 + $0x598] sm:$0xff]  ;;  %v2481_v56 = vadd.f32 %v7789_v25, %v7748_v7  ;;  %v2487_v7 = vadd.f32 %v7789_v25, %v7792_v26 }
 0x101   : > { %4500 = vst [vmem:[%s6975_s4 + $0x428] sm:$0xff] %v2452_v57  ;;  %4501 = vst [vmem:[%s6975_s4 + $0x430] sm:$0xff] %v2453_v58  ;;  %v7864_v50 = vld [vmem:[%s6889_s15 + $0x5a0] sm:$0xff]  ;;  %v7867_v51 = vld [vmem:[%s6889_s15 + $0x5a8] sm:$0xff]  ;;  %v2482_v57 = vadd.f32 %v7789_v25, %v7751_v8  ;;  %v2488_v8 = vadd.f32 %v7789_v25, %v7795_v27 }
 0x102   : > { %4502 = vst [vmem:[%s6975_s4 + $0x438] sm:$0xff] %v2454_v59  ;;  %4503 = vst [vmem:[%s6975_s4 + $0x440] sm:$0xff] %v2455_v0  ;;  %v7870_v52 = vld [vmem:[%s6889_s15 + $0x5b0] sm:$0xff]  ;;  %v7873_v53 = vld [vmem:[%s6889_s15 + $0x5b8] sm:$0xff]  ;;  %v2485_v0 = vadd.f32 %v7789_v25, %v7772_v18  ;;  %v2491_v18 = vadd.f32 %v7789_v25, %v7816_v34 }
 0x103   : > { %4504 = vst [vmem:[%s6975_s4 + $0x448] sm:$0xff] %v2456_v1  ;;  %4505 = vst [vmem:[%s6975_s4 + $0x450] sm:$0xff] %v2457_v2  ;;  %v7888_v58 = vld [vmem:[%s6889_s15 + $0x5c0] sm:$0xff]  ;;  %v7891_v59 = vld [vmem:[%s6889_s15 + $0x5c8] sm:$0xff]  ;;  %v2486_v1 = vadd.f32 %v7789_v25, %v7775_v20  ;;  %v2492_v20 = vadd.f32 %v7789_v25, %v7819_v35 }
 0x104   : > { %4506 = vst [vmem:[%s6975_s4 + $0x458] sm:$0xff] %v2458_v3  ;;  %4507 = vst [vmem:[%s6975_s4 + $0x460] sm:$0xff] %v2459_v10  ;;  %v7894_v60 = vld [vmem:[%s6889_s15 + $0x5d0] sm:$0xff]  ;;  %v7897_v61 = vld [vmem:[%s6889_s15 + $0x5d8] sm:$0xff]  ;;  %v2489_v10 = vadd.f32 %v7789_v25, %v7798_v28  ;;  %v2495_v28 = vadd.f32 %v7789_v25, %v7840_v42 }
 0x105   : > { %4508 = vst [vmem:[%s6975_s4 + $0x468] sm:$0xff] %v2460_v11  ;;  %4509 = vst [vmem:[%s6975_s4 + $0x470] sm:$0xff] %v2461_v12  ;;  %v7912_v2 = vld [vmem:[%s6889_s15 + $0x5e0] sm:$0xff]  ;;  %v7915_v3 = vld [vmem:[%s6889_s15 + $0x5e8] sm:$0xff]  ;;  %v2490_v11 = vadd.f32 %v7789_v25, %v7801_v29  ;;  %v2496_v29 = vadd.f32 %v7789_v25, %v7843_v43 }
 0x106   : > { %4510 = vst [vmem:[%s6975_s4 + $0x478] sm:$0xff] %v2462_v14  ;;  %4511 = vst [vmem:[%s6975_s4 + $0x480] sm:$0xff] %v2463_v21  ;;  %v7918_v4 = vld [vmem:[%s6889_s15 + $0x5f0] sm:$0xff]  ;;  %v7921_v5 = vld [vmem:[%s6889_s15 + $0x5f8] sm:$0xff]  ;;  %v2493_v21 = vadd.f32 %v7789_v25, %v7822_v36 }
 0x107   : > { %4512 = vst [vmem:[%s6975_s4 + $0x488] sm:$0xff] %v2464_v22  ;;  %4513 = vst [vmem:[%s6975_s4 + $0x490] sm:$0xff] %v2465_v23  ;;  %v7936_v12 = vld [vmem:[%s6889_s15 + $0x600] sm:$0xff]  ;;  %v7939_v14 = vld [vmem:[%s6889_s15 + $0x608] sm:$0xff]  ;;  %v2494_v22 = vadd.f32 %v7789_v25, %v7825_v37  ;;  %v2499_v37 = vadd.f32 %v7789_v25, %v7864_v50 }
 0x108   : > { %4514 = vst [vmem:[%s6975_s4 + $0x498] sm:$0xff] %v2466_v24  ;;  %4515 = vst [vmem:[%s6975_s4 + $0x4a0] sm:$0xff] %v2467_v30  ;;  %v7942_v15 = vld [vmem:[%s6889_s15 + $0x610] sm:$0xff]  ;;  %v7945_v16 = vld [vmem:[%s6889_s15 + $0x618] sm:$0xff]  ;;  %v2497_v30 = vadd.f32 %v7789_v25, %v7846_v44 }
 0x109   : > { %4516 = vst [vmem:[%s6975_s4 + $0x4a8] sm:$0xff] %v2468_v31  ;;  %4517 = vst [vmem:[%s6975_s4 + $0x4b0] sm:$0xff] %v2469_v32  ;;  %v7960_v23 = vld [vmem:[%s6889_s15 + $0x620] sm:$0xff]  ;;  %v7963_v24 = vld [vmem:[%s6889_s15 + $0x628] sm:$0xff]  ;;  %v2498_v31 = vadd.f32 %v7789_v25, %v7849_v45  ;;  %v7983_v32 = vpop.permute.xlu0 %2311  ;;  %v2503_v45 = vadd.f32 %v7789_v25, %v7888_v58 }
 0x10a   : > { %4518 = vst [vmem:[%s6975_s4 + $0x4b8] sm:$0xff] %v2470_v33  ;;  %4519 = vst [vmem:[%s6975_s4 + $0x4c0] sm:$0xff] %v2471_v38  ;;  %v7966_v26 = vld [vmem:[%s6889_s15 + $0x630] sm:$0xff]  ;;  %v7969_v27 = vld [vmem:[%s6889_s15 + $0x638] sm:$0xff]  ;;  %v2500_v38 = vadd.f32 %v7789_v25, %v7867_v51 }
 0x10b   : > { %4520 = vst [vmem:[%s6975_s4 + $0x4c8] sm:$0xff] %v2472_v39  ;;  %4521 = vst [vmem:[%s6975_s4 + $0x4d0] sm:$0xff] %v2473_v40  ;;  %v7986_v33 = vld [vmem:[%s6889_s15 + $0x640] sm:$0xff]  ;;  %v7989_v34 = vld [vmem:[%s6889_s15 + $0x648] sm:$0xff]  ;;  %v2501_v39 = vadd.f32 %v7789_v25, %v7870_v52  ;;  %v2502_v40 = vadd.f32 %v7789_v25, %v7873_v53  ;;  %v2507_v53 = vadd.f32 %v7789_v25, %v7912_v2 }
 0x10c   : > { %4522 = vst [vmem:[%s6975_s4 + $0x4d8] sm:$0xff] %v2474_v41  ;;  %4523 = vst [vmem:[%s6975_s4 + $0x4e0] sm:$0xff] %v2475_v46  ;;  %v7992_v35 = vld [vmem:[%s6889_s15 + $0x650] sm:$0xff]  ;;  %v7995_v36 = vld [vmem:[%s6889_s15 + $0x658] sm:$0xff]  ;;  %v2504_v46 = vadd.f32 %v7789_v25, %v7891_v59 }
 0x10d   : > { %4524 = vst [vmem:[%s6975_s4 + $0x4e8] sm:$0xff] %v2476_v47  ;;  %4525 = vst [vmem:[%s6975_s4 + $0x4f0] sm:$0xff] %v2477_v48  ;;  %v8010_v41 = vld [vmem:[%s6889_s15 + $0x660] sm:$0xff]  ;;  %v8013_v42 = vld [vmem:[%s6889_s15 + $0x668] sm:$0xff]  ;;  %v2505_v47 = vadd.f32 %v7789_v25, %v7894_v60  ;;  %v2506_v48 = vadd.f32 %v7789_v25, %v7897_v61  ;;  %v2511_v61 = vadd.f32 %v7983_v32, %v7936_v12 }
 0x10e   : > { %4526 = vst [vmem:[%s6975_s4 + $0x4f8] sm:$0xff] %v2478_v49  ;;  %4527 = vst [vmem:[%s6975_s4 + $0x500] sm:$0xff] %v2479_v54  ;;  %v8016_v43 = vld [vmem:[%s6889_s15 + $0x670] sm:$0xff]  ;;  %v8019_v44 = vld [vmem:[%s6889_s15 + $0x678] sm:$0xff]  ;;  %v2508_v54 = vadd.f32 %v7789_v25, %v7915_v3 }
 0x10f   : > { %4528 = vst [vmem:[%s6975_s4 + $0x508] sm:$0xff] %v2480_v55  ;;  %4529 = vst [vmem:[%s6975_s4 + $0x510] sm:$0xff] %v2481_v56  ;;  %v8034_v49 = vld [vmem:[%s6889_s15 + $0x680] sm:$0xff]  ;;  %v8037_v50 = vld [vmem:[%s6889_s15 + $0x688] sm:$0xff]  ;;  %v2509_v55 = vadd.f32 %v7789_v25, %v7918_v4  ;;  %v2510_v56 = vadd.f32 %v7789_v25, %v7921_v5  ;;  %v2515_v5 = vadd.f32 %v7983_v32, %v7960_v23 }
 0x110   : > { %4530 = vst [vmem:[%s6975_s4 + $0x518] sm:$0xff] %v2482_v57  ;;  %4531 = vst [vmem:[%s6975_s4 + $0x520] sm:$0xff] %v2483_v62  ;;  %v8040_v51 = vld [vmem:[%s6889_s15 + $0x690] sm:$0xff]  ;;  %v8043_v52 = vld [vmem:[%s6889_s15 + $0x698] sm:$0xff]  ;;  %v2512_v62 = vadd.f32 %v7983_v32, %v7939_v14 }
 0x111   : > { %4532 = vst [vmem:[%s6975_s4 + $0x528] sm:$0xff] %v2484_v63  ;;  %4533 = vst [vmem:[%s6975_s4 + $0x530] sm:$0xff] %v2485_v0  ;;  %v8058_v57 = vld [vmem:[%s6889_s15 + $0x6a0] sm:$0xff]  ;;  %v8061_v58 = vld [vmem:[%s6889_s15 + $0x6a8] sm:$0xff]  ;;  %v2513_v63 = vadd.f32 %v7983_v32, %v7942_v15  ;;  %v2514_v0 = vadd.f32 %v7983_v32, %v7945_v16  ;;  %v2519_v16 = vadd.f32 %v7983_v32, %v7986_v33 }
 0x112   : > { %4534 = vst [vmem:[%s6975_s4 + $0x538] sm:$0xff] %v2486_v1  ;;  %4535 = vst [vmem:[%s6975_s4 + $0x540] sm:$0xff] %v2487_v7  ;;  %v8064_v59 = vld [vmem:[%s6889_s15 + $0x6b0] sm:$0xff]  ;;  %v8067_v60 = vld [vmem:[%s6889_s15 + $0x6b8] sm:$0xff]  ;;  %v2516_v7 = vadd.f32 %v7983_v32, %v7963_v24 }
 0x113   : > { %4536 = vst [vmem:[%s6975_s4 + $0x548] sm:$0xff] %v2488_v8  ;;  %4537 = vst [vmem:[%s6975_s4 + $0x550] sm:$0xff] %v2489_v10  ;;  %v8082_v1 = vld [vmem:[%s6889_s15 + $0x6c0] sm:$0xff]  ;;  %v8085_v2 = vld [vmem:[%s6889_s15 + $0x6c8] sm:$0xff]  ;;  %v2517_v8 = vadd.f32 %v7983_v32, %v7966_v26  ;;  %v2518_v10 = vadd.f32 %v7983_v32, %v7969_v27  ;;  %v2523_v27 = vadd.f32 %v7983_v32, %v8010_v41 }
 0x114   : > { %4538 = vst [vmem:[%s6975_s4 + $0x558] sm:$0xff] %v2490_v11  ;;  %4539 = vst [vmem:[%s6975_s4 + $0x560] sm:$0xff] %v2491_v18  ;;  %v8088_v3 = vld [vmem:[%s6889_s15 + $0x6d0] sm:$0xff]  ;;  %v8091_v4 = vld [vmem:[%s6889_s15 + $0x6d8] sm:$0xff]  ;;  %v2520_v18 = vadd.f32 %v7983_v32, %v7989_v34 }
 0x115   : > { %4540 = vst [vmem:[%s6975_s4 + $0x568] sm:$0xff] %v2492_v20  ;;  %4541 = vst [vmem:[%s6975_s4 + $0x570] sm:$0xff] %v2493_v21  ;;  %v8106_v11 = vld [vmem:[%s6889_s15 + $0x6e0] sm:$0xff]  ;;  %v8109_v12 = vld [vmem:[%s6889_s15 + $0x6e8] sm:$0xff]  ;;  %v2521_v20 = vadd.f32 %v7983_v32, %v7992_v35  ;;  %v2522_v21 = vadd.f32 %v7983_v32, %v7995_v36  ;;  %v2527_v36 = vadd.f32 %v7983_v32, %v8034_v49 }
 0x116   : > { %4542 = vst [vmem:[%s6975_s4 + $0x578] sm:$0xff] %v2494_v22  ;;  %4543 = vst [vmem:[%s6975_s4 + $0x580] sm:$0xff] %v2495_v28  ;;  %v8112_v14 = vld [vmem:[%s6889_s15 + $0x6f0] sm:$0xff]  ;;  %v8115_v15 = vld [vmem:[%s6889_s15 + $0x6f8] sm:$0xff]  ;;  %v2524_v28 = vadd.f32 %v7983_v32, %v8013_v42 }
 0x117   : > { %4544 = vst [vmem:[%s6975_s4 + $0x588] sm:$0xff] %v2496_v29  ;;  %4545 = vst [vmem:[%s6975_s4 + $0x590] sm:$0xff] %v2497_v30  ;;  %v8130_v22 = vld [vmem:[%s6889_s15 + $0x700] sm:$0xff]  ;;  %v8133_v23 = vld [vmem:[%s6889_s15 + $0x708] sm:$0xff]  ;;  %v2525_v29 = vadd.f32 %v7983_v32, %v8016_v43  ;;  %v2526_v30 = vadd.f32 %v7983_v32, %v8019_v44 }
 0x118   : > { %4546 = vst [vmem:[%s6975_s4 + $0x598] sm:$0xff] %v2498_v31  ;;  %4547 = vst [vmem:[%s6975_s4 + $0x5a0] sm:$0xff] %v2499_v37  ;;  %v8136_v24 = vld [vmem:[%s6889_s15 + $0x710] sm:$0xff]  ;;  %v8139_v26 = vld [vmem:[%s6889_s15 + $0x718] sm:$0xff]  ;;  %v2528_v37 = vadd.f32 %v7983_v32, %v8037_v50 }
 0x119   : > { %4548 = vst [vmem:[%s6975_s4 + $0x5a8] sm:$0xff] %v2500_v38  ;;  %4549 = vst [vmem:[%s6975_s4 + $0x5b0] sm:$0xff] %v2501_v39  ;;  %v8154_v31 = vld [vmem:[%s6889_s15 + $0x720] sm:$0xff]  ;;  %v8157_v33 = vld [vmem:[%s6889_s15 + $0x728] sm:$0xff]  ;;  %v2529_v38 = vadd.f32 %v7983_v32, %v8040_v51  ;;  %v2530_v39 = vadd.f32 %v7983_v32, %v8043_v52 }
 0x11a   : > { %4550 = vst [vmem:[%s6975_s4 + $0x5b8] sm:$0xff] %v2502_v40  ;;  %4551 = vst [vmem:[%s6975_s4 + $0x5c0] sm:$0xff] %v2503_v45  ;;  %v8160_v34 = vld [vmem:[%s6889_s15 + $0x730] sm:$0xff]  ;;  %v8163_v35 = vld [vmem:[%s6889_s15 + $0x738] sm:$0xff]  ;;  %v8177_v40 = vpop.permute.xlu1 %2316  ;;  %v2531_v45 = vadd.f32 %v7983_v32, %v8058_v57 }
 0x11b   : > { %4552 = vst [vmem:[%s6975_s4 + $0x5c8] sm:$0xff] %v2504_v46  ;;  %4553 = vst [vmem:[%s6975_s4 + $0x5d0] sm:$0xff] %v2505_v47  ;;  %v8180_v41 = vld [vmem:[%s6889_s15 + $0x740] sm:$0xff]  ;;  %v8183_v42 = vld [vmem:[%s6889_s15 + $0x748] sm:$0xff]  ;;  %v2532_v46 = vadd.f32 %v7983_v32, %v8061_v58  ;;  %v2533_v47 = vadd.f32 %v7983_v32, %v8064_v59 }
 0x11c   : > { %4554 = vst [vmem:[%s6975_s4 + $0x5d8] sm:$0xff] %v2506_v48  ;;  %4555 = vst [vmem:[%s6975_s4 + $0x5e0] sm:$0xff] %v2507_v53  ;;  %v8186_v43 = vld [vmem:[%s6889_s15 + $0x750] sm:$0xff]  ;;  %v8189_v44 = vld [vmem:[%s6889_s15 + $0x758] sm:$0xff]  ;;  %v2534_v48 = vadd.f32 %v7983_v32, %v8067_v60  ;;  %v2535_v53 = vadd.f32 %v7983_v32, %v8082_v1 }
 0x11d   : > { %4556 = vst [vmem:[%s6975_s4 + $0x5e8] sm:$0xff] %v2508_v54  ;;  %4557 = vst [vmem:[%s6975_s4 + $0x5f0] sm:$0xff] %v2509_v55  ;;  %v8204_v49 = vld [vmem:[%s6889_s15 + $0x760] sm:$0xff]  ;;  %v8207_v50 = vld [vmem:[%s6889_s15 + $0x768] sm:$0xff]  ;;  %v2536_v54 = vadd.f32 %v7983_v32, %v8085_v2  ;;  %v2537_v55 = vadd.f32 %v7983_v32, %v8088_v3 }
 0x11e   : > { %4558 = vst [vmem:[%s6975_s4 + $0x5f8] sm:$0xff] %v2510_v56  ;;  %4559 = vst [vmem:[%s6975_s4 + $0x600] sm:$0xff] %v2511_v61  ;;  %v8210_v51 = vld [vmem:[%s6889_s15 + $0x770] sm:$0xff]  ;;  %v8213_v52 = vld [vmem:[%s6889_s15 + $0x778] sm:$0xff]  ;;  %v2538_v56 = vadd.f32 %v7983_v32, %v8091_v4  ;;  %v2539_v61 = vadd.f32 %v7983_v32, %v8106_v11 }
 0x11f   : > { %4560 = vst [vmem:[%s6975_s4 + $0x608] sm:$0xff] %v2512_v62  ;;  %4561 = vst [vmem:[%s6975_s4 + $0x610] sm:$0xff] %v2513_v63  ;;  %v8228_v57 = vld [vmem:[%s6889_s15 + $0x780] sm:$0xff]  ;;  %v8231_v58 = vld [vmem:[%s6889_s15 + $0x788] sm:$0xff]  ;;  %v2540_v62 = vadd.f32 %v7983_v32, %v8109_v12  ;;  %v2541_v63 = vadd.f32 %v7983_v32, %v8112_v14 }
 0x120   : > { %4562 = vst [vmem:[%s6975_s4 + $0x618] sm:$0xff] %v2514_v0  ;;  %4563 = vst [vmem:[%s6975_s4 + $0x620] sm:$0xff] %v2515_v5  ;;  %v8234_v59 = vld [vmem:[%s6889_s15 + $0x790] sm:$0xff]  ;;  %v8237_v60 = vld [vmem:[%s6889_s15 + $0x798] sm:$0xff]  ;;  %v2542_v0 = vadd.f32 %v7983_v32, %v8115_v15  ;;  %v2543_v5 = vadd.f32 %v8177_v40, %v8130_v22 }
 0x121   : > { %4564 = vst [vmem:[%s6975_s4 + $0x628] sm:$0xff] %v2516_v7  ;;  %4565 = vst [vmem:[%s6975_s4 + $0x630] sm:$0xff] %v2517_v8  ;;  %v8252_v1 = vld [vmem:[%s6889_s15 + $0x7a0] sm:$0xff]  ;;  %v8255_v2 = vld [vmem:[%s6889_s15 + $0x7a8] sm:$0xff]  ;;  %v2544_v7 = vadd.f32 %v8177_v40, %v8133_v23  ;;  %v2545_v8 = vadd.f32 %v8177_v40, %v8136_v24 }
 0x122   : > { %4566 = vst [vmem:[%s6975_s4 + $0x638] sm:$0xff] %v2518_v10  ;;  %4567 = vst [vmem:[%s6975_s4 + $0x640] sm:$0xff] %v2519_v16  ;;  %v8258_v3 = vld [vmem:[%s6889_s15 + $0x7b0] sm:$0xff]  ;;  %v8261_v4 = vld [vmem:[%s6889_s15 + $0x7b8] sm:$0xff]  ;;  %v2546_v10 = vadd.f32 %v8177_v40, %v8139_v26  ;;  %v2547_v16 = vadd.f32 %v8177_v40, %v8154_v31 }
 0x123   : > { %4568 = vst [vmem:[%s6975_s4 + $0x648] sm:$0xff] %v2520_v18  ;;  %4569 = vst [vmem:[%s6975_s4 + $0x650] sm:$0xff] %v2521_v20  ;;  %v8276_v11 = vld [vmem:[%s6889_s15 + $0x7c0] sm:$0xff]  ;;  %v8279_v12 = vld [vmem:[%s6889_s15 + $0x7c8] sm:$0xff]  ;;  %v2548_v18 = vadd.f32 %v8177_v40, %v8157_v33  ;;  %v2549_v20 = vadd.f32 %v8177_v40, %v8160_v34 }
 0x124   : > { %4570 = vst [vmem:[%s6975_s4 + $0x658] sm:$0xff] %v2522_v21  ;;  %4571 = vst [vmem:[%s6975_s4 + $0x660] sm:$0xff] %v2523_v27  ;;  %v8282_v14 = vld [vmem:[%s6889_s15 + $0x7d0] sm:$0xff]  ;;  %v8285_v15 = vld [vmem:[%s6889_s15 + $0x7d8] sm:$0xff]  ;;  %v2550_v21 = vadd.f32 %v8177_v40, %v8163_v35  ;;  %v2551_v27 = vadd.f32 %v8177_v40, %v8180_v41 }
 0x125   : > { %4572 = vst [vmem:[%s6975_s4 + $0x668] sm:$0xff] %v2524_v28  ;;  %4573 = vst [vmem:[%s6975_s4 + $0x670] sm:$0xff] %v2525_v29  ;;  %v8300_v22 = vld [vmem:[%s6889_s15 + $0x7e0] sm:$0xff]  ;;  %v8303_v23 = vld [vmem:[%s6889_s15 + $0x7e8] sm:$0xff]  ;;  %v2552_v28 = vadd.f32 %v8177_v40, %v8183_v42  ;;  %v2553_v29 = vadd.f32 %v8177_v40, %v8186_v43 }
 0x126   : > { %4574 = vst [vmem:[%s6975_s4 + $0x678] sm:$0xff] %v2526_v30  ;;  %4575 = vst [vmem:[%s6975_s4 + $0x680] sm:$0xff] %v2527_v36  ;;  %v8306_v24 = vld [vmem:[%s6889_s15 + $0x7f0] sm:$0xff]  ;;  %v8309_v26 = vld [vmem:[%s6889_s15 + $0x7f8] sm:$0xff]  ;;  %v2554_v30 = vadd.f32 %v8177_v40, %v8189_v44  ;;  %v2555_v36 = vadd.f32 %v8177_v40, %v8204_v49 }
 0x127   : > { %4576 = vst [vmem:[%s6975_s4 + $0x688] sm:$0xff] %v2528_v37  ;;  %4577 = vst [vmem:[%s6975_s4 + $0x690] sm:$0xff] %v2529_v38  ;;  %v8324_v31 = vld [vmem:[%s6889_s15 + $0x800] sm:$0xff]  ;;  %v8327_v33 = vld [vmem:[%s6889_s15 + $0x808] sm:$0xff]  ;;  %v2556_v37 = vadd.f32 %v8177_v40, %v8207_v50  ;;  %v2557_v38 = vadd.f32 %v8177_v40, %v8210_v51 }
 0x128   : > { %4578 = vst [vmem:[%s6975_s4 + $0x698] sm:$0xff] %v2530_v39  ;;  %4579 = vst [vmem:[%s6975_s4 + $0x6a0] sm:$0xff] %v2531_v45  ;;  %v8330_v34 = vld [vmem:[%s6889_s15 + $0x810] sm:$0xff]  ;;  %v8333_v35 = vld [vmem:[%s6889_s15 + $0x818] sm:$0xff]  ;;  %v2558_v39 = vadd.f32 %v8177_v40, %v8213_v52  ;;  %v2559_v45 = vadd.f32 %v8177_v40, %v8228_v57 }
 0x129   : > { %4580 = vst [vmem:[%s6975_s4 + $0x6a8] sm:$0xff] %v2532_v46  ;;  %4581 = vst [vmem:[%s6975_s4 + $0x6b0] sm:$0xff] %v2533_v47  ;;  %v8348_v41 = vld [vmem:[%s6889_s15 + $0x820] sm:$0xff]  ;;  %v8351_v42 = vld [vmem:[%s6889_s15 + $0x828] sm:$0xff]  ;;  %v2560_v46 = vadd.f32 %v8177_v40, %v8231_v58  ;;  %v2561_v47 = vadd.f32 %v8177_v40, %v8234_v59 }
 0x12a   : > { %4582 = vst [vmem:[%s6975_s4 + $0x6b8] sm:$0xff] %v2534_v48  ;;  %4583 = vst [vmem:[%s6975_s4 + $0x6c0] sm:$0xff] %v2535_v53  ;;  %v8354_v43 = vld [vmem:[%s6889_s15 + $0x830] sm:$0xff]  ;;  %v8357_v44 = vld [vmem:[%s6889_s15 + $0x838] sm:$0xff]  ;;  %v2562_v48 = vadd.f32 %v8177_v40, %v8237_v60  ;;  %v2563_v53 = vadd.f32 %v8177_v40, %v8252_v1 }
 0x12b   : > { %4584 = vst [vmem:[%s6975_s4 + $0x6c8] sm:$0xff] %v2536_v54  ;;  %4585 = vst [vmem:[%s6975_s4 + $0x6d0] sm:$0xff] %v2537_v55  ;;  %v8372_v49 = vld [vmem:[%s6889_s15 + $0x840] sm:$0xff]  ;;  %v8375_v50 = vld [vmem:[%s6889_s15 + $0x848] sm:$0xff]  ;;  %v2564_v54 = vadd.f32 %v8177_v40, %v8255_v2  ;;  %v2565_v55 = vadd.f32 %v8177_v40, %v8258_v3 }
 0x12c   : > { %4586 = vst [vmem:[%s6975_s4 + $0x6d8] sm:$0xff] %v2538_v56  ;;  %4587 = vst [vmem:[%s6975_s4 + $0x6e0] sm:$0xff] %v2539_v61  ;;  %v8378_v51 = vld [vmem:[%s6889_s15 + $0x850] sm:$0xff]  ;;  %v8381_v52 = vld [vmem:[%s6889_s15 + $0x858] sm:$0xff]  ;;  %v2566_v56 = vadd.f32 %v8177_v40, %v8261_v4  ;;  %v2567_v61 = vadd.f32 %v8177_v40, %v8276_v11 }
 0x12d   : > { %4588 = vst [vmem:[%s6975_s4 + $0x6e8] sm:$0xff] %v2540_v62  ;;  %4589 = vst [vmem:[%s6975_s4 + $0x6f0] sm:$0xff] %v2541_v63  ;;  %v8396_v57 = vld [vmem:[%s6889_s15 + $0x860] sm:$0xff]  ;;  %v8399_v58 = vld [vmem:[%s6889_s15 + $0x868] sm:$0xff]  ;;  %v2568_v62 = vadd.f32 %v8177_v40, %v8279_v12  ;;  %v2569_v63 = vadd.f32 %v8177_v40, %v8282_v14 }
 0x12e   : > { %4590 = vst [vmem:[%s6975_s4 + $0x6f8] sm:$0xff] %v2542_v0  ;;  %4591 = vst [vmem:[%s6975_s4 + $0x700] sm:$0xff] %v2543_v5  ;;  %v8402_v59 = vld [vmem:[%s6889_s15 + $0x870] sm:$0xff]  ;;  %v8405_v60 = vld [vmem:[%s6889_s15 + $0x878] sm:$0xff]  ;;  %v2570_v0 = vadd.f32 %v8177_v40, %v8285_v15  ;;  %v2571_v5 = vadd.f32 %v8177_v40, %v8300_v22 }
 0x12f   : > { %4592 = vst [vmem:[%s6975_s4 + $0x708] sm:$0xff] %v2544_v7  ;;  %4593 = vst [vmem:[%s6975_s4 + $0x710] sm:$0xff] %v2545_v8  ;;  %v8420_v1 = vld [vmem:[%s6889_s15 + $0x880] sm:$0xff]  ;;  %v8423_v2 = vld [vmem:[%s6889_s15 + $0x888] sm:$0xff]  ;;  %v2572_v7 = vadd.f32 %v8177_v40, %v8303_v23  ;;  %v2573_v8 = vadd.f32 %v8177_v40, %v8306_v24 }
 0x130   : > { %4594 = vst [vmem:[%s6975_s4 + $0x718] sm:$0xff] %v2546_v10  ;;  %4595 = vst [vmem:[%s6975_s4 + $0x720] sm:$0xff] %v2547_v16  ;;  %v8426_v3 = vld [vmem:[%s6889_s15 + $0x890] sm:$0xff]  ;;  %v8429_v4 = vld [vmem:[%s6889_s15 + $0x898] sm:$0xff]  ;;  %v2574_v10 = vadd.f32 %v8177_v40, %v8309_v26  ;;  %v2575_v16 = vadd.f32 %v6927_v17, %v8324_v31 }
 0x131   : > { %4596 = vst [vmem:[%s6975_s4 + $0x728] sm:$0xff] %v2548_v18  ;;  %4597 = vst [vmem:[%s6975_s4 + $0x730] sm:$0xff] %v2549_v20  ;;  %v8444_v11 = vld [vmem:[%s6889_s15 + $0x8a0] sm:$0xff]  ;;  %v8447_v12 = vld [vmem:[%s6889_s15 + $0x8a8] sm:$0xff]  ;;  %v2576_v18 = vadd.f32 %v6927_v17, %v8327_v33  ;;  %v2577_v20 = vadd.f32 %v6927_v17, %v8330_v34 }
 0x132   : > { %4598 = vst [vmem:[%s6975_s4 + $0x738] sm:$0xff] %v2550_v21  ;;  %4599 = vst [vmem:[%s6975_s4 + $0x740] sm:$0xff] %v2551_v27  ;;  %v8450_v14 = vld [vmem:[%s6889_s15 + $0x8b0] sm:$0xff]  ;;  %v8453_v15 = vld [vmem:[%s6889_s15 + $0x8b8] sm:$0xff]  ;;  %v2578_v21 = vadd.f32 %v6927_v17, %v8333_v35  ;;  %v2579_v27 = vadd.f32 %v6927_v17, %v8348_v41 }
 0x133   : > { %4600 = vst [vmem:[%s6975_s4 + $0x748] sm:$0xff] %v2552_v28  ;;  %4601 = vst [vmem:[%s6975_s4 + $0x750] sm:$0xff] %v2553_v29  ;;  %v8468_v22 = vld [vmem:[%s6889_s15 + $0x8c0] sm:$0xff]  ;;  %v8471_v23 = vld [vmem:[%s6889_s15 + $0x8c8] sm:$0xff]  ;;  %v2580_v28 = vadd.f32 %v6927_v17, %v8351_v42  ;;  %v2581_v29 = vadd.f32 %v6927_v17, %v8354_v43 }
 0x134   : > { %4602 = vst [vmem:[%s6975_s4 + $0x758] sm:$0xff] %v2554_v30  ;;  %4603 = vst [vmem:[%s6975_s4 + $0x760] sm:$0xff] %v2555_v36  ;;  %v8474_v24 = vld [vmem:[%s6889_s15 + $0x8d0] sm:$0xff]  ;;  %v8477_v26 = vld [vmem:[%s6889_s15 + $0x8d8] sm:$0xff]  ;;  %v2582_v30 = vadd.f32 %v6927_v17, %v8357_v44  ;;  %v2583_v36 = vadd.f32 %v6927_v17, %v8372_v49 }
 0x135   : > { %4604 = vst [vmem:[%s6975_s4 + $0x768] sm:$0xff] %v2556_v37  ;;  %4605 = vst [vmem:[%s6975_s4 + $0x770] sm:$0xff] %v2557_v38  ;;  %v8492_v31 = vld [vmem:[%s6889_s15 + $0x8e0] sm:$0xff]  ;;  %v8495_v33 = vld [vmem:[%s6889_s15 + $0x8e8] sm:$0xff]  ;;  %v2584_v37 = vadd.f32 %v6927_v17, %v8375_v50  ;;  %v2585_v38 = vadd.f32 %v6927_v17, %v8378_v51 }
 0x136   : > { %4606 = vst [vmem:[%s6975_s4 + $0x778] sm:$0xff] %v2558_v39  ;;  %4607 = vst [vmem:[%s6975_s4 + $0x780] sm:$0xff] %v2559_v45  ;;  %v8498_v34 = vld [vmem:[%s6889_s15 + $0x8f0] sm:$0xff]  ;;  %v8501_v35 = vld [vmem:[%s6889_s15 + $0x8f8] sm:$0xff]  ;;  %v2586_v39 = vadd.f32 %v6927_v17, %v8381_v52  ;;  %v2587_v45 = vadd.f32 %v6927_v17, %v8396_v57 }
 0x137   : > { %4608 = vst [vmem:[%s6975_s4 + $0x788] sm:$0xff] %v2560_v46  ;;  %4609 = vst [vmem:[%s6975_s4 + $0x790] sm:$0xff] %v2561_v47  ;;  %v8516_v41 = vld [vmem:[%s6889_s15 + $0x900] sm:$0xff]  ;;  %v8519_v42 = vld [vmem:[%s6889_s15 + $0x908] sm:$0xff]  ;;  %v2588_v46 = vadd.f32 %v6927_v17, %v8399_v58  ;;  %v2589_v47 = vadd.f32 %v6927_v17, %v8402_v59 }
 0x138   : > { %4610 = vst [vmem:[%s6975_s4 + $0x798] sm:$0xff] %v2562_v48  ;;  %4611 = vst [vmem:[%s6975_s4 + $0x7a0] sm:$0xff] %v2563_v53  ;;  %v8522_v43 = vld [vmem:[%s6889_s15 + $0x910] sm:$0xff]  ;;  %v8525_v44 = vld [vmem:[%s6889_s15 + $0x918] sm:$0xff]  ;;  %v2590_v48 = vadd.f32 %v6927_v17, %v8405_v60  ;;  %v2591_v53 = vadd.f32 %v6927_v17, %v8420_v1 }
 0x139   : > { %4612 = vst [vmem:[%s6975_s4 + $0x7a8] sm:$0xff] %v2564_v54  ;;  %4613 = vst [vmem:[%s6975_s4 + $0x7b0] sm:$0xff] %v2565_v55  ;;  %v8540_v49 = vld [vmem:[%s6889_s15 + $0x920] sm:$0xff]  ;;  %v8543_v50 = vld [vmem:[%s6889_s15 + $0x928] sm:$0xff]  ;;  %v2592_v54 = vadd.f32 %v6927_v17, %v8423_v2  ;;  %v2593_v55 = vadd.f32 %v6927_v17, %v8426_v3 }
 0x13a   : > { %4614 = vst [vmem:[%s6975_s4 + $0x7b8] sm:$0xff] %v2566_v56  ;;  %4615 = vst [vmem:[%s6975_s4 + $0x7c0] sm:$0xff] %v2567_v61  ;;  %v8546_v51 = vld [vmem:[%s6889_s15 + $0x930] sm:$0xff]  ;;  %v8549_v52 = vld [vmem:[%s6889_s15 + $0x938] sm:$0xff]  ;;  %v2594_v56 = vadd.f32 %v6927_v17, %v8429_v4  ;;  %v2595_v61 = vadd.f32 %v6927_v17, %v8444_v11 }
 0x13b   : > { %4616 = vst [vmem:[%s6975_s4 + $0x7c8] sm:$0xff] %v2568_v62  ;;  %4617 = vst [vmem:[%s6975_s4 + $0x7d0] sm:$0xff] %v2569_v63  ;;  %v8564_v57 = vld [vmem:[%s6889_s15 + $0x940] sm:$0xff]  ;;  %v8567_v58 = vld [vmem:[%s6889_s15 + $0x948] sm:$0xff]  ;;  %v2596_v62 = vadd.f32 %v6927_v17, %v8447_v12  ;;  %v2597_v63 = vadd.f32 %v6927_v17, %v8450_v14 }
 0x13c   : > { %4618 = vst [vmem:[%s6975_s4 + $0x7d8] sm:$0xff] %v2570_v0  ;;  %4619 = vst [vmem:[%s6975_s4 + $0x7e0] sm:$0xff] %v2571_v5  ;;  %v8570_v59 = vld [vmem:[%s6889_s15 + $0x950] sm:$0xff]  ;;  %v8573_v60 = vld [vmem:[%s6889_s15 + $0x958] sm:$0xff]  ;;  %v2598_v0 = vadd.f32 %v6927_v17, %v8453_v15  ;;  %v2599_v5 = vadd.f32 %v6927_v17, %v8468_v22 }
 0x13d   : > { %4620 = vst [vmem:[%s6975_s4 + $0x7e8] sm:$0xff] %v2572_v7  ;;  %4621 = vst [vmem:[%s6975_s4 + $0x7f0] sm:$0xff] %v2573_v8  ;;  %v8588_v1 = vld [vmem:[%s6889_s15 + $0x960] sm:$0xff]  ;;  %v8591_v2 = vld [vmem:[%s6889_s15 + $0x968] sm:$0xff]  ;;  %v2600_v7 = vadd.f32 %v6927_v17, %v8471_v23  ;;  %v2601_v8 = vadd.f32 %v6927_v17, %v8474_v24 }
 0x13e   : > { %4622 = vst [vmem:[%s6975_s4 + $0x7f8] sm:$0xff] %v2574_v10  ;;  %4623 = vst [vmem:[%s6975_s4 + $0x800] sm:$0xff] %v2575_v16  ;;  %v8594_v3 = vld [vmem:[%s6889_s15 + $0x970] sm:$0xff]  ;;  %v8597_v4 = vld [vmem:[%s6889_s15 + $0x978] sm:$0xff]  ;;  %v2602_v10 = vadd.f32 %v6927_v17, %v8477_v26  ;;  %v2603_v16 = vadd.f32 %v6927_v17, %v8492_v31 }
 0x13f   : > { %4624 = vst [vmem:[%s6975_s4 + $0x808] sm:$0xff] %v2576_v18  ;;  %4625 = vst [vmem:[%s6975_s4 + $0x810] sm:$0xff] %v2577_v20  ;;  %v8612_v11 = vld [vmem:[%s6889_s15 + $0x980] sm:$0xff]  ;;  %v8615_v12 = vld [vmem:[%s6889_s15 + $0x988] sm:$0xff]  ;;  %v2604_v18 = vadd.f32 %v6927_v17, %v8495_v33  ;;  %v2605_v20 = vadd.f32 %v6927_v17, %v8498_v34 }
 0x140   : > { %4626 = vst [vmem:[%s6975_s4 + $0x818] sm:$0xff] %v2578_v21  ;;  %4627 = vst [vmem:[%s6975_s4 + $0x820] sm:$0xff] %v2579_v27  ;;  %v8618_v14 = vld [vmem:[%s6889_s15 + $0x990] sm:$0xff]  ;;  %v8621_v15 = vld [vmem:[%s6889_s15 + $0x998] sm:$0xff]  ;;  %v2606_v21 = vadd.f32 %v6927_v17, %v8501_v35  ;;  %v2607_v27 = vadd.f32 %v7021_v6, %v8516_v41 }
 0x141   : > { %4628 = vst [vmem:[%s6975_s4 + $0x828] sm:$0xff] %v2580_v28  ;;  %4629 = vst [vmem:[%s6975_s4 + $0x830] sm:$0xff] %v2581_v29  ;;  %v8636_v22 = vld [vmem:[%s6889_s15 + $0x9a0] sm:$0xff]  ;;  %v8639_v23 = vld [vmem:[%s6889_s15 + $0x9a8] sm:$0xff]  ;;  %v2608_v28 = vadd.f32 %v7021_v6, %v8519_v42  ;;  %v2609_v29 = vadd.f32 %v7021_v6, %v8522_v43 }
 0x142   : > { %4630 = vst [vmem:[%s6975_s4 + $0x838] sm:$0xff] %v2582_v30  ;;  %4631 = vst [vmem:[%s6975_s4 + $0x840] sm:$0xff] %v2583_v36  ;;  %v8642_v24 = vld [vmem:[%s6889_s15 + $0x9b0] sm:$0xff]  ;;  %v8645_v26 = vld [vmem:[%s6889_s15 + $0x9b8] sm:$0xff]  ;;  %v2610_v30 = vadd.f32 %v7021_v6, %v8525_v44  ;;  %v2611_v36 = vadd.f32 %v7021_v6, %v8540_v49 }
 0x143   : > { %4632 = vst [vmem:[%s6975_s4 + $0x848] sm:$0xff] %v2584_v37  ;;  %4633 = vst [vmem:[%s6975_s4 + $0x850] sm:$0xff] %v2585_v38  ;;  %v8660_v31 = vld [vmem:[%s6889_s15 + $0x9c0] sm:$0xff]  ;;  %v8663_v33 = vld [vmem:[%s6889_s15 + $0x9c8] sm:$0xff]  ;;  %v2612_v37 = vadd.f32 %v7021_v6, %v8543_v50  ;;  %v2613_v38 = vadd.f32 %v7021_v6, %v8546_v51 }
 0x144   : > { %4634 = vst [vmem:[%s6975_s4 + $0x858] sm:$0xff] %v2586_v39  ;;  %4635 = vst [vmem:[%s6975_s4 + $0x860] sm:$0xff] %v2587_v45  ;;  %v8666_v34 = vld [vmem:[%s6889_s15 + $0x9d0] sm:$0xff]  ;;  %v8669_v35 = vld [vmem:[%s6889_s15 + $0x9d8] sm:$0xff]  ;;  %v2614_v39 = vadd.f32 %v7021_v6, %v8549_v52  ;;  %v2615_v45 = vadd.f32 %v7021_v6, %v8564_v57 }
 0x145   : > { %4636 = vst [vmem:[%s6975_s4 + $0x868] sm:$0xff] %v2588_v46  ;;  %4637 = vst [vmem:[%s6975_s4 + $0x870] sm:$0xff] %v2589_v47  ;;  %v8684_v41 = vld [vmem:[%s6889_s15 + $0x9e0] sm:$0xff]  ;;  %v8687_v42 = vld [vmem:[%s6889_s15 + $0x9e8] sm:$0xff]  ;;  %v2616_v46 = vadd.f32 %v7021_v6, %v8567_v58  ;;  %v2617_v47 = vadd.f32 %v7021_v6, %v8570_v59 }
 0x146   : > { %4638 = vst [vmem:[%s6975_s4 + $0x878] sm:$0xff] %v2590_v48  ;;  %4639 = vst [vmem:[%s6975_s4 + $0x880] sm:$0xff] %v2591_v53  ;;  %v8690_v43 = vld [vmem:[%s6889_s15 + $0x9f0] sm:$0xff]  ;;  %v8693_v44 = vld [vmem:[%s6889_s15 + $0x9f8] sm:$0xff]  ;;  %v2618_v48 = vadd.f32 %v7021_v6, %v8573_v60  ;;  %v2619_v53 = vadd.f32 %v7021_v6, %v8588_v1 }
 0x147   : > { %4640 = vst [vmem:[%s6975_s4 + $0x888] sm:$0xff] %v2592_v54  ;;  %4641 = vst [vmem:[%s6975_s4 + $0x890] sm:$0xff] %v2593_v55  ;;  %v8708_v49 = vld [vmem:[%s6889_s15 + $0xa00] sm:$0xff]  ;;  %v8711_v50 = vld [vmem:[%s6889_s15 + $0xa08] sm:$0xff]  ;;  %v2620_v54 = vadd.f32 %v7021_v6, %v8591_v2  ;;  %v2621_v55 = vadd.f32 %v7021_v6, %v8594_v3 }
 0x148   : > { %4642 = vst [vmem:[%s6975_s4 + $0x898] sm:$0xff] %v2594_v56  ;;  %4643 = vst [vmem:[%s6975_s4 + $0x8a0] sm:$0xff] %v2595_v61  ;;  %v8714_v51 = vld [vmem:[%s6889_s15 + $0xa10] sm:$0xff]  ;;  %v8717_v52 = vld [vmem:[%s6889_s15 + $0xa18] sm:$0xff]  ;;  %v2622_v56 = vadd.f32 %v7021_v6, %v8597_v4  ;;  %v2623_v61 = vadd.f32 %v7021_v6, %v8612_v11 }
 0x149   : > { %4644 = vst [vmem:[%s6975_s4 + $0x8a8] sm:$0xff] %v2596_v62  ;;  %4645 = vst [vmem:[%s6975_s4 + $0x8b0] sm:$0xff] %v2597_v63  ;;  %v8732_v57 = vld [vmem:[%s6889_s15 + $0xa20] sm:$0xff]  ;;  %v8735_v58 = vld [vmem:[%s6889_s15 + $0xa28] sm:$0xff]  ;;  %v2624_v62 = vadd.f32 %v7021_v6, %v8615_v12  ;;  %v2625_v63 = vadd.f32 %v7021_v6, %v8618_v14 }
 0x14a   : > { %4646 = vst [vmem:[%s6975_s4 + $0x8b8] sm:$0xff] %v2598_v0  ;;  %4647 = vst [vmem:[%s6975_s4 + $0x8c0] sm:$0xff] %v2599_v5  ;;  %v8738_v59 = vld [vmem:[%s6889_s15 + $0xa30] sm:$0xff]  ;;  %v8741_v60 = vld [vmem:[%s6889_s15 + $0xa38] sm:$0xff]  ;;  %v2626_v0 = vadd.f32 %v7021_v6, %v8621_v15  ;;  %v2627_v5 = vadd.f32 %v7021_v6, %v8636_v22 }
 0x14b   : > { %4648 = vst [vmem:[%s6975_s4 + $0x8c8] sm:$0xff] %v2600_v7  ;;  %4649 = vst [vmem:[%s6975_s4 + $0x8d0] sm:$0xff] %v2601_v8  ;;  %v8756_v1 = vld [vmem:[%s6889_s15 + $0xa40] sm:$0xff]  ;;  %v8759_v2 = vld [vmem:[%s6889_s15 + $0xa48] sm:$0xff]  ;;  %v2628_v7 = vadd.f32 %v7021_v6, %v8639_v23  ;;  %v2629_v8 = vadd.f32 %v7021_v6, %v8642_v24 }
 0x14c   : > { %4650 = vst [vmem:[%s6975_s4 + $0x8d8] sm:$0xff] %v2602_v10  ;;  %4651 = vst [vmem:[%s6975_s4 + $0x8e0] sm:$0xff] %v2603_v16  ;;  %v8762_v3 = vld [vmem:[%s6889_s15 + $0xa50] sm:$0xff]  ;;  %v8765_v4 = vld [vmem:[%s6889_s15 + $0xa58] sm:$0xff]  ;;  %v2630_v10 = vadd.f32 %v7021_v6, %v8645_v26  ;;  %v2631_v16 = vadd.f32 %v7021_v6, %v8660_v31 }
 0x14d   : > { %4652 = vst [vmem:[%s6975_s4 + $0x8e8] sm:$0xff] %v2604_v18  ;;  %4653 = vst [vmem:[%s6975_s4 + $0x8f0] sm:$0xff] %v2605_v20  ;;  %v8780_v11 = vld [vmem:[%s6889_s15 + $0xa60] sm:$0xff]  ;;  %v8783_v12 = vld [vmem:[%s6889_s15 + $0xa68] sm:$0xff]  ;;  %v2632_v18 = vadd.f32 %v7021_v6, %v8663_v33  ;;  %v2633_v20 = vadd.f32 %v7021_v6, %v8666_v34 }
 0x14e   : > { %4654 = vst [vmem:[%s6975_s4 + $0x8f8] sm:$0xff] %v2606_v21  ;;  %4655 = vst [vmem:[%s6975_s4 + $0x900] sm:$0xff] %v2607_v27  ;;  %v8786_v14 = vld [vmem:[%s6889_s15 + $0xa70] sm:$0xff]  ;;  %v8789_v15 = vld [vmem:[%s6889_s15 + $0xa78] sm:$0xff]  ;;  %v2634_v21 = vadd.f32 %v7021_v6, %v8669_v35  ;;  %v2635_v27 = vadd.f32 %v7021_v6, %v8684_v41 }
 0x14f   : > { %4656 = vst [vmem:[%s6975_s4 + $0x908] sm:$0xff] %v2608_v28  ;;  %4657 = vst [vmem:[%s6975_s4 + $0x910] sm:$0xff] %v2609_v29  ;;  %v8804_v22 = vld [vmem:[%s6889_s15 + $0xa80] sm:$0xff]  ;;  %v8807_v23 = vld [vmem:[%s6889_s15 + $0xa88] sm:$0xff]  ;;  %v2636_v28 = vadd.f32 %v7021_v6, %v8687_v42  ;;  %v2637_v29 = vadd.f32 %v7021_v6, %v8690_v43 }
 0x150   : > { %4658 = vst [vmem:[%s6975_s4 + $0x918] sm:$0xff] %v2610_v30  ;;  %4659 = vst [vmem:[%s6975_s4 + $0x920] sm:$0xff] %v2611_v36  ;;  %v8810_v24 = vld [vmem:[%s6889_s15 + $0xa90] sm:$0xff]  ;;  %v8813_v26 = vld [vmem:[%s6889_s15 + $0xa98] sm:$0xff]  ;;  %v2638_v30 = vadd.f32 %v7021_v6, %v8693_v44  ;;  %v2639_v36 = vadd.f32 %v7207_v9, %v8708_v49 }
 0x151   : > { %4660 = vst [vmem:[%s6975_s4 + $0x928] sm:$0xff] %v2612_v37  ;;  %4661 = vst [vmem:[%s6975_s4 + $0x930] sm:$0xff] %v2613_v38  ;;  %v8828_v31 = vld [vmem:[%s6889_s15 + $0xaa0] sm:$0xff]  ;;  %v8831_v33 = vld [vmem:[%s6889_s15 + $0xaa8] sm:$0xff]  ;;  %v2640_v37 = vadd.f32 %v7207_v9, %v8711_v50  ;;  %v2641_v38 = vadd.f32 %v7207_v9, %v8714_v51 }
 0x152   : > { %4662 = vst [vmem:[%s6975_s4 + $0x938] sm:$0xff] %v2614_v39  ;;  %4663 = vst [vmem:[%s6975_s4 + $0x940] sm:$0xff] %v2615_v45  ;;  %v8834_v34 = vld [vmem:[%s6889_s15 + $0xab0] sm:$0xff]  ;;  %v8837_v35 = vld [vmem:[%s6889_s15 + $0xab8] sm:$0xff]  ;;  %v2642_v39 = vadd.f32 %v7207_v9, %v8717_v52  ;;  %v2643_v45 = vadd.f32 %v7207_v9, %v8732_v57 }
 0x153   : > { %4664 = vst [vmem:[%s6975_s4 + $0x948] sm:$0xff] %v2616_v46  ;;  %4665 = vst [vmem:[%s6975_s4 + $0x950] sm:$0xff] %v2617_v47  ;;  %v8852_v41 = vld [vmem:[%s6889_s15 + $0xac0] sm:$0xff]  ;;  %v8855_v42 = vld [vmem:[%s6889_s15 + $0xac8] sm:$0xff]  ;;  %v2644_v46 = vadd.f32 %v7207_v9, %v8735_v58  ;;  %v2645_v47 = vadd.f32 %v7207_v9, %v8738_v59 }
 0x154   : > { %4666 = vst [vmem:[%s6975_s4 + $0x958] sm:$0xff] %v2618_v48  ;;  %4667 = vst [vmem:[%s6975_s4 + $0x960] sm:$0xff] %v2619_v53  ;;  %v8858_v43 = vld [vmem:[%s6889_s15 + $0xad0] sm:$0xff]  ;;  %v8861_v44 = vld [vmem:[%s6889_s15 + $0xad8] sm:$0xff]  ;;  %v2646_v48 = vadd.f32 %v7207_v9, %v8741_v60  ;;  %v2647_v53 = vadd.f32 %v7207_v9, %v8756_v1 }
 0x155   : > { %4668 = vst [vmem:[%s6975_s4 + $0x968] sm:$0xff] %v2620_v54  ;;  %4669 = vst [vmem:[%s6975_s4 + $0x970] sm:$0xff] %v2621_v55  ;;  %v8876_v49 = vld [vmem:[%s6889_s15 + $0xae0] sm:$0xff]  ;;  %v8879_v50 = vld [vmem:[%s6889_s15 + $0xae8] sm:$0xff]  ;;  %v2648_v54 = vadd.f32 %v7207_v9, %v8759_v2  ;;  %v2649_v55 = vadd.f32 %v7207_v9, %v8762_v3 }
 0x156   : > { %4670 = vst [vmem:[%s6975_s4 + $0x978] sm:$0xff] %v2622_v56  ;;  %4671 = vst [vmem:[%s6975_s4 + $0x980] sm:$0xff] %v2623_v61  ;;  %v8882_v51 = vld [vmem:[%s6889_s15 + $0xaf0] sm:$0xff]  ;;  %v8885_v52 = vld [vmem:[%s6889_s15 + $0xaf8] sm:$0xff]  ;;  %v2650_v56 = vadd.f32 %v7207_v9, %v8765_v4  ;;  %v2651_v61 = vadd.f32 %v7207_v9, %v8780_v11 }
 0x157   : > { %4672 = vst [vmem:[%s6975_s4 + $0x988] sm:$0xff] %v2624_v62  ;;  %4673 = vst [vmem:[%s6975_s4 + $0x990] sm:$0xff] %v2625_v63  ;;  %v8900_v57 = vld [vmem:[%s6889_s15 + $0xb00] sm:$0xff]  ;;  %v8903_v58 = vld [vmem:[%s6889_s15 + $0xb08] sm:$0xff]  ;;  %v2652_v62 = vadd.f32 %v7207_v9, %v8783_v12  ;;  %v2653_v63 = vadd.f32 %v7207_v9, %v8786_v14 }
 0x158   : > { %4674 = vst [vmem:[%s6975_s4 + $0x998] sm:$0xff] %v2626_v0  ;;  %4675 = vst [vmem:[%s6975_s4 + $0x9a0] sm:$0xff] %v2627_v5  ;;  %v8906_v59 = vld [vmem:[%s6889_s15 + $0xb10] sm:$0xff]  ;;  %v8909_v60 = vld [vmem:[%s6889_s15 + $0xb18] sm:$0xff]  ;;  %v2654_v0 = vadd.f32 %v7207_v9, %v8789_v15  ;;  %v2655_v5 = vadd.f32 %v7207_v9, %v8804_v22 }
 0x159   : > { %4676 = vst [vmem:[%s6975_s4 + $0x9a8] sm:$0xff] %v2628_v7  ;;  %4677 = vst [vmem:[%s6975_s4 + $0x9b0] sm:$0xff] %v2629_v8  ;;  %v8924_v1 = vld [vmem:[%s6889_s15 + $0xb20] sm:$0xff]  ;;  %v8927_v2 = vld [vmem:[%s6889_s15 + $0xb28] sm:$0xff]  ;;  %v2656_v7 = vadd.f32 %v7207_v9, %v8807_v23  ;;  %v2657_v8 = vadd.f32 %v7207_v9, %v8810_v24 }
 0x15a   : > { %4678 = vst [vmem:[%s6975_s4 + $0x9b8] sm:$0xff] %v2630_v10  ;;  %4679 = vst [vmem:[%s6975_s4 + $0x9c0] sm:$0xff] %v2631_v16  ;;  %v8930_v3 = vld [vmem:[%s6889_s15 + $0xb30] sm:$0xff]  ;;  %v8933_v4 = vld [vmem:[%s6889_s15 + $0xb38] sm:$0xff]  ;;  %v2658_v10 = vadd.f32 %v7207_v9, %v8813_v26  ;;  %v2659_v16 = vadd.f32 %v7207_v9, %v8828_v31 }
 0x15b   : > { %4680 = vst [vmem:[%s6975_s4 + $0x9c8] sm:$0xff] %v2632_v18  ;;  %4681 = vst [vmem:[%s6975_s4 + $0x9d0] sm:$0xff] %v2633_v20  ;;  %v8948_v11 = vld [vmem:[%s6889_s15 + $0xb40] sm:$0xff]  ;;  %v8951_v12 = vld [vmem:[%s6889_s15 + $0xb48] sm:$0xff]  ;;  %v2660_v18 = vadd.f32 %v7207_v9, %v8831_v33  ;;  %v2661_v20 = vadd.f32 %v7207_v9, %v8834_v34 }
 0x15c   : > { %4682 = vst [vmem:[%s6975_s4 + $0x9d8] sm:$0xff] %v2634_v21  ;;  %4683 = vst [vmem:[%s6975_s4 + $0x9e0] sm:$0xff] %v2635_v27  ;;  %v8954_v14 = vld [vmem:[%s6889_s15 + $0xb50] sm:$0xff]  ;;  %v8957_v15 = vld [vmem:[%s6889_s15 + $0xb58] sm:$0xff]  ;;  %v2662_v21 = vadd.f32 %v7207_v9, %v8837_v35  ;;  %v2663_v27 = vadd.f32 %v7207_v9, %v8852_v41 }
 0x15d   : > { %4684 = vst [vmem:[%s6975_s4 + $0x9e8] sm:$0xff] %v2636_v28  ;;  %4685 = vst [vmem:[%s6975_s4 + $0x9f0] sm:$0xff] %v2637_v29  ;;  %v8972_v22 = vld [vmem:[%s6889_s15 + $0xb60] sm:$0xff]  ;;  %v8975_v23 = vld [vmem:[%s6889_s15 + $0xb68] sm:$0xff]  ;;  %v2664_v28 = vadd.f32 %v7207_v9, %v8855_v42  ;;  %v2665_v29 = vadd.f32 %v7207_v9, %v8858_v43 }
 0x15e   : > { %4686 = vst [vmem:[%s6975_s4 + $0x9f8] sm:$0xff] %v2638_v30  ;;  %4687 = vst [vmem:[%s6975_s4 + $0xa00] sm:$0xff] %v2639_v36  ;;  %v8978_v24 = vld [vmem:[%s6889_s15 + $0xb70] sm:$0xff]  ;;  %v8981_v26 = vld [vmem:[%s6889_s15 + $0xb78] sm:$0xff]  ;;  %v2666_v30 = vadd.f32 %v7207_v9, %v8861_v44  ;;  %v2667_v36 = vadd.f32 %v7207_v9, %v8876_v49 }
 0x15f   : > { %4688 = vst [vmem:[%s6975_s4 + $0xa08] sm:$0xff] %v2640_v37  ;;  %4689 = vst [vmem:[%s6975_s4 + $0xa10] sm:$0xff] %v2641_v38  ;;  %v8996_v31 = vld [vmem:[%s6889_s15 + $0xb80] sm:$0xff]  ;;  %v8999_v33 = vld [vmem:[%s6889_s15 + $0xb88] sm:$0xff]  ;;  %v2668_v37 = vadd.f32 %v7207_v9, %v8879_v50  ;;  %v2669_v38 = vadd.f32 %v7207_v9, %v8882_v51 }
 0x160   : > { %4690 = vst [vmem:[%s6975_s4 + $0xa18] sm:$0xff] %v2642_v39  ;;  %4691 = vst [vmem:[%s6975_s4 + $0xa20] sm:$0xff] %v2643_v45  ;;  %v9002_v34 = vld [vmem:[%s6889_s15 + $0xb90] sm:$0xff]  ;;  %v9005_v35 = vld [vmem:[%s6889_s15 + $0xb98] sm:$0xff]  ;;  %v2670_v39 = vadd.f32 %v7207_v9, %v8885_v52  ;;  %v2671_v45 = vadd.f32 %v7401_v13, %v8900_v57 }
 0x161   : > { %4692 = vst [vmem:[%s6975_s4 + $0xa28] sm:$0xff] %v2644_v46  ;;  %4693 = vst [vmem:[%s6975_s4 + $0xa30] sm:$0xff] %v2645_v47  ;;  %v9020_v41 = vld [vmem:[%s6889_s15 + $0xba0] sm:$0xff]  ;;  %v9023_v42 = vld [vmem:[%s6889_s15 + $0xba8] sm:$0xff]  ;;  %v2672_v46 = vadd.f32 %v7401_v13, %v8903_v58  ;;  %v2673_v47 = vadd.f32 %v7401_v13, %v8906_v59 }
 0x162   : > { %4694 = vst [vmem:[%s6975_s4 + $0xa38] sm:$0xff] %v2646_v48  ;;  %4695 = vst [vmem:[%s6975_s4 + $0xa40] sm:$0xff] %v2647_v53  ;;  %v9026_v43 = vld [vmem:[%s6889_s15 + $0xbb0] sm:$0xff]  ;;  %v9029_v44 = vld [vmem:[%s6889_s15 + $0xbb8] sm:$0xff]  ;;  %v2674_v48 = vadd.f32 %v7401_v13, %v8909_v60  ;;  %v2675_v53 = vadd.f32 %v7401_v13, %v8924_v1 }
 0x163   : > { %4696 = vst [vmem:[%s6975_s4 + $0xa48] sm:$0xff] %v2648_v54  ;;  %4697 = vst [vmem:[%s6975_s4 + $0xa50] sm:$0xff] %v2649_v55  ;;  %v9044_v49 = vld [vmem:[%s6889_s15 + $0xbc0] sm:$0xff]  ;;  %v9047_v50 = vld [vmem:[%s6889_s15 + $0xbc8] sm:$0xff]  ;;  %v2676_v54 = vadd.f32 %v7401_v13, %v8927_v2  ;;  %v2677_v55 = vadd.f32 %v7401_v13, %v8930_v3 }
 0x164   : > { %4698 = vst [vmem:[%s6975_s4 + $0xa58] sm:$0xff] %v2650_v56  ;;  %4699 = vst [vmem:[%s6975_s4 + $0xa60] sm:$0xff] %v2651_v61  ;;  %v9050_v51 = vld [vmem:[%s6889_s15 + $0xbd0] sm:$0xff]  ;;  %v9053_v52 = vld [vmem:[%s6889_s15 + $0xbd8] sm:$0xff]  ;;  %v2678_v56 = vadd.f32 %v7401_v13, %v8933_v4  ;;  %v2679_v61 = vadd.f32 %v7401_v13, %v8948_v11 }
 0x165   : > { %4700 = vst [vmem:[%s6975_s4 + $0xa68] sm:$0xff] %v2652_v62  ;;  %4701 = vst [vmem:[%s6975_s4 + $0xa70] sm:$0xff] %v2653_v63  ;;  %v9068_v57 = vld [vmem:[%s6889_s15 + $0xbe0] sm:$0xff]  ;;  %v9071_v58 = vld [vmem:[%s6889_s15 + $0xbe8] sm:$0xff]  ;;  %v2680_v62 = vadd.f32 %v7401_v13, %v8951_v12  ;;  %v2681_v63 = vadd.f32 %v7401_v13, %v8954_v14 }
 0x166   : > { %4702 = vst [vmem:[%s6975_s4 + $0xa78] sm:$0xff] %v2654_v0  ;;  %4703 = vst [vmem:[%s6975_s4 + $0xa80] sm:$0xff] %v2655_v5  ;;  %v9074_v59 = vld [vmem:[%s6889_s15 + $0xbf0] sm:$0xff]  ;;  %v9077_v60 = vld [vmem:[%s6889_s15 + $0xbf8] sm:$0xff]  ;;  %v2682_v0 = vadd.f32 %v7401_v13, %v8957_v15  ;;  %v2683_v5 = vadd.f32 %v7401_v13, %v8972_v22 }
 0x167   : > { %4704 = vst [vmem:[%s6975_s4 + $0xa88] sm:$0xff] %v2656_v7  ;;  %4705 = vst [vmem:[%s6975_s4 + $0xa90] sm:$0xff] %v2657_v8  ;;  %v9092_v1 = vld [vmem:[%s6889_s15 + $0xc00] sm:$0xff]  ;;  %v9095_v2 = vld [vmem:[%s6889_s15 + $0xc08] sm:$0xff]  ;;  %v2684_v7 = vadd.f32 %v7401_v13, %v8975_v23  ;;  %v2685_v8 = vadd.f32 %v7401_v13, %v8978_v24 }
 0x168   : > { %4706 = vst [vmem:[%s6975_s4 + $0xa98] sm:$0xff] %v2658_v10  ;;  %4707 = vst [vmem:[%s6975_s4 + $0xaa0] sm:$0xff] %v2659_v16  ;;  %v9098_v3 = vld [vmem:[%s6889_s15 + $0xc10] sm:$0xff]  ;;  %v9101_v4 = vld [vmem:[%s6889_s15 + $0xc18] sm:$0xff]  ;;  %v2686_v10 = vadd.f32 %v7401_v13, %v8981_v26  ;;  %v2687_v16 = vadd.f32 %v7401_v13, %v8996_v31 }
 0x169   : > { %4708 = vst [vmem:[%s6975_s4 + $0xaa8] sm:$0xff] %v2660_v18  ;;  %4709 = vst [vmem:[%s6975_s4 + $0xab0] sm:$0xff] %v2661_v20  ;;  %v9116_v11 = vld [vmem:[%s6889_s15 + $0xc20] sm:$0xff]  ;;  %v9119_v12 = vld [vmem:[%s6889_s15 + $0xc28] sm:$0xff]  ;;  %v2688_v18 = vadd.f32 %v7401_v13, %v8999_v33  ;;  %v2689_v20 = vadd.f32 %v7401_v13, %v9002_v34 }
 0x16a   : > { %4710 = vst [vmem:[%s6975_s4 + $0xab8] sm:$0xff] %v2662_v21  ;;  %4711 = vst [vmem:[%s6975_s4 + $0xac0] sm:$0xff] %v2663_v27  ;;  %v9122_v14 = vld [vmem:[%s6889_s15 + $0xc30] sm:$0xff]  ;;  %v9125_v15 = vld [vmem:[%s6889_s15 + $0xc38] sm:$0xff]  ;;  %v2690_v21 = vadd.f32 %v7401_v13, %v9005_v35  ;;  %v2691_v27 = vadd.f32 %v7401_v13, %v9020_v41 }
 0x16b   : > { %4712 = vst [vmem:[%s6975_s4 + $0xac8] sm:$0xff] %v2664_v28  ;;  %4713 = vst [vmem:[%s6975_s4 + $0xad0] sm:$0xff] %v2665_v29  ;;  %v9140_v22 = vld [vmem:[%s6889_s15 + $0xc40] sm:$0xff]  ;;  %v9143_v23 = vld [vmem:[%s6889_s15 + $0xc48] sm:$0xff]  ;;  %v2692_v28 = vadd.f32 %v7401_v13, %v9023_v42  ;;  %v2693_v29 = vadd.f32 %v7401_v13, %v9026_v43 }
 0x16c   : > { %4714 = vst [vmem:[%s6975_s4 + $0xad8] sm:$0xff] %v2666_v30  ;;  %4715 = vst [vmem:[%s6975_s4 + $0xae0] sm:$0xff] %v2667_v36  ;;  %v9146_v24 = vld [vmem:[%s6889_s15 + $0xc50] sm:$0xff]  ;;  %v9149_v26 = vld [vmem:[%s6889_s15 + $0xc58] sm:$0xff]  ;;  %v2694_v30 = vadd.f32 %v7401_v13, %v9029_v44  ;;  %v2695_v36 = vadd.f32 %v7401_v13, %v9044_v49 }
 0x16d   : > { %4716 = vst [vmem:[%s6975_s4 + $0xae8] sm:$0xff] %v2668_v37  ;;  %4717 = vst [vmem:[%s6975_s4 + $0xaf0] sm:$0xff] %v2669_v38  ;;  %v9164_v31 = vld [vmem:[%s6889_s15 + $0xc60] sm:$0xff]  ;;  %v9167_v33 = vld [vmem:[%s6889_s15 + $0xc68] sm:$0xff]  ;;  %v2696_v37 = vadd.f32 %v7401_v13, %v9047_v50  ;;  %v2697_v38 = vadd.f32 %v7401_v13, %v9050_v51 }
 0x16e   : > { %4718 = vst [vmem:[%s6975_s4 + $0xaf8] sm:$0xff] %v2670_v39  ;;  %4719 = vst [vmem:[%s6975_s4 + $0xb00] sm:$0xff] %v2671_v45  ;;  %v9170_v34 = vld [vmem:[%s6889_s15 + $0xc70] sm:$0xff]  ;;  %v9173_v35 = vld [vmem:[%s6889_s15 + $0xc78] sm:$0xff]  ;;  %v2698_v39 = vadd.f32 %v7401_v13, %v9053_v52  ;;  %v2699_v45 = vadd.f32 %v7401_v13, %v9068_v57 }
 0x16f   : > { %4720 = vst [vmem:[%s6975_s4 + $0xb08] sm:$0xff] %v2672_v46  ;;  %4721 = vst [vmem:[%s6975_s4 + $0xb10] sm:$0xff] %v2673_v47  ;;  %v9188_v41 = vld [vmem:[%s6889_s15 + $0xc80] sm:$0xff]  ;;  %v9191_v42 = vld [vmem:[%s6889_s15 + $0xc88] sm:$0xff]  ;;  %v2700_v46 = vadd.f32 %v7401_v13, %v9071_v58  ;;  %v2701_v47 = vadd.f32 %v7401_v13, %v9074_v59 }
 0x170   : > { %4722 = vst [vmem:[%s6975_s4 + $0xb18] sm:$0xff] %v2674_v48  ;;  %4723 = vst [vmem:[%s6975_s4 + $0xb20] sm:$0xff] %v2675_v53  ;;  %v9194_v43 = vld [vmem:[%s6889_s15 + $0xc90] sm:$0xff]  ;;  %v9197_v44 = vld [vmem:[%s6889_s15 + $0xc98] sm:$0xff]  ;;  %v2702_v48 = vadd.f32 %v7401_v13, %v9077_v60  ;;  %v2703_v53 = vadd.f32 %v7595_v19, %v9092_v1 }
 0x171   : > { %4724 = vst [vmem:[%s6975_s4 + $0xb28] sm:$0xff] %v2676_v54  ;;  %4725 = vst [vmem:[%s6975_s4 + $0xb30] sm:$0xff] %v2677_v55  ;;  %v9212_v49 = vld [vmem:[%s6889_s15 + $0xca0] sm:$0xff]  ;;  %v9215_v50 = vld [vmem:[%s6889_s15 + $0xca8] sm:$0xff]  ;;  %v2704_v54 = vadd.f32 %v7595_v19, %v9095_v2  ;;  %v2705_v55 = vadd.f32 %v7595_v19, %v9098_v3 }
 0x172   : > { %4726 = vst [vmem:[%s6975_s4 + $0xb38] sm:$0xff] %v2678_v56  ;;  %4727 = vst [vmem:[%s6975_s4 + $0xb40] sm:$0xff] %v2679_v61  ;;  %v9218_v51 = vld [vmem:[%s6889_s15 + $0xcb0] sm:$0xff]  ;;  %v9221_v52 = vld [vmem:[%s6889_s15 + $0xcb8] sm:$0xff]  ;;  %v2706_v56 = vadd.f32 %v7595_v19, %v9101_v4  ;;  %v2707_v61 = vadd.f32 %v7595_v19, %v9116_v11 }
 0x173   : > { %4728 = vst [vmem:[%s6975_s4 + $0xb48] sm:$0xff] %v2680_v62  ;;  %4729 = vst [vmem:[%s6975_s4 + $0xb50] sm:$0xff] %v2681_v63  ;;  %v9236_v57 = vld [vmem:[%s6889_s15 + $0xcc0] sm:$0xff]  ;;  %v9239_v58 = vld [vmem:[%s6889_s15 + $0xcc8] sm:$0xff]  ;;  %v2708_v62 = vadd.f32 %v7595_v19, %v9119_v12  ;;  %v2709_v63 = vadd.f32 %v7595_v19, %v9122_v14 }
 0x174   : > { %4730 = vst [vmem:[%s6975_s4 + $0xb58] sm:$0xff] %v2682_v0  ;;  %4731 = vst [vmem:[%s6975_s4 + $0xb60] sm:$0xff] %v2683_v5  ;;  %v9242_v59 = vld [vmem:[%s6889_s15 + $0xcd0] sm:$0xff]  ;;  %v9245_v60 = vld [vmem:[%s6889_s15 + $0xcd8] sm:$0xff]  ;;  %v2710_v0 = vadd.f32 %v7595_v19, %v9125_v15  ;;  %v2711_v5 = vadd.f32 %v7595_v19, %v9140_v22 }
 0x175   : > { %4732 = vst [vmem:[%s6975_s4 + $0xb68] sm:$0xff] %v2684_v7  ;;  %4733 = vst [vmem:[%s6975_s4 + $0xb70] sm:$0xff] %v2685_v8  ;;  %v9260_v1 = vld [vmem:[%s6889_s15 + $0xce0] sm:$0xff]  ;;  %v9263_v2 = vld [vmem:[%s6889_s15 + $0xce8] sm:$0xff]  ;;  %v2712_v7 = vadd.f32 %v7595_v19, %v9143_v23  ;;  %v2713_v8 = vadd.f32 %v7595_v19, %v9146_v24 }
 0x176   : > { %4734 = vst [vmem:[%s6975_s4 + $0xb78] sm:$0xff] %v2686_v10  ;;  %4735 = vst [vmem:[%s6975_s4 + $0xb80] sm:$0xff] %v2687_v16  ;;  %v9266_v3 = vld [vmem:[%s6889_s15 + $0xcf0] sm:$0xff]  ;;  %v9269_v4 = vld [vmem:[%s6889_s15 + $0xcf8] sm:$0xff]  ;;  %v2714_v10 = vadd.f32 %v7595_v19, %v9149_v26  ;;  %v2715_v16 = vadd.f32 %v7595_v19, %v9164_v31 }
 0x177   : > { %4736 = vst [vmem:[%s6975_s4 + $0xb88] sm:$0xff] %v2688_v18  ;;  %4737 = vst [vmem:[%s6975_s4 + $0xb90] sm:$0xff] %v2689_v20  ;;  %v9284_v11 = vld [vmem:[%s6889_s15 + $0xd00] sm:$0xff]  ;;  %v9287_v12 = vld [vmem:[%s6889_s15 + $0xd08] sm:$0xff]  ;;  %v2716_v18 = vadd.f32 %v7595_v19, %v9167_v33  ;;  %v2717_v20 = vadd.f32 %v7595_v19, %v9170_v34 }
 0x178   : > { %4738 = vst [vmem:[%s6975_s4 + $0xb98] sm:$0xff] %v2690_v21  ;;  %4739 = vst [vmem:[%s6975_s4 + $0xba0] sm:$0xff] %v2691_v27  ;;  %v9290_v14 = vld [vmem:[%s6889_s15 + $0xd10] sm:$0xff]  ;;  %v9293_v15 = vld [vmem:[%s6889_s15 + $0xd18] sm:$0xff]  ;;  %v2718_v21 = vadd.f32 %v7595_v19, %v9173_v35  ;;  %v2719_v27 = vadd.f32 %v7595_v19, %v9188_v41 }
 0x179   : > { %4740 = vst [vmem:[%s6975_s4 + $0xba8] sm:$0xff] %v2692_v28  ;;  %4741 = vst [vmem:[%s6975_s4 + $0xbb0] sm:$0xff] %v2693_v29  ;;  %v9308_v22 = vld [vmem:[%s6889_s15 + $0xd20] sm:$0xff]  ;;  %v9311_v23 = vld [vmem:[%s6889_s15 + $0xd28] sm:$0xff]  ;;  %v2720_v28 = vadd.f32 %v7595_v19, %v9191_v42  ;;  %v2721_v29 = vadd.f32 %v7595_v19, %v9194_v43 }
 0x17a   : > { %4742 = vst [vmem:[%s6975_s4 + $0xbb8] sm:$0xff] %v2694_v30  ;;  %4743 = vst [vmem:[%s6975_s4 + $0xbc0] sm:$0xff] %v2695_v36  ;;  %v9314_v24 = vld [vmem:[%s6889_s15 + $0xd30] sm:$0xff]  ;;  %v9317_v26 = vld [vmem:[%s6889_s15 + $0xd38] sm:$0xff]  ;;  %v2722_v30 = vadd.f32 %v7595_v19, %v9197_v44  ;;  %v2723_v36 = vadd.f32 %v7595_v19, %v9212_v49 }
 0x17b   : > { %4744 = vst [vmem:[%s6975_s4 + $0xbc8] sm:$0xff] %v2696_v37  ;;  %4745 = vst [vmem:[%s6975_s4 + $0xbd0] sm:$0xff] %v2697_v38  ;;  %v9332_v31 = vld [vmem:[%s6889_s15 + $0xd40] sm:$0xff]  ;;  %v9335_v33 = vld [vmem:[%s6889_s15 + $0xd48] sm:$0xff]  ;;  %v2724_v37 = vadd.f32 %v7595_v19, %v9215_v50  ;;  %v2725_v38 = vadd.f32 %v7595_v19, %v9218_v51 }
 0x17c   : > { %4746 = vst [vmem:[%s6975_s4 + $0xbd8] sm:$0xff] %v2698_v39  ;;  %4747 = vst [vmem:[%s6975_s4 + $0xbe0] sm:$0xff] %v2699_v45  ;;  %v9338_v34 = vld [vmem:[%s6889_s15 + $0xd50] sm:$0xff]  ;;  %v9341_v35 = vld [vmem:[%s6889_s15 + $0xd58] sm:$0xff]  ;;  %v2726_v39 = vadd.f32 %v7595_v19, %v9221_v52  ;;  %v2727_v45 = vadd.f32 %v7595_v19, %v9236_v57 }
 0x17d   : > { %4748 = vst [vmem:[%s6975_s4 + $0xbe8] sm:$0xff] %v2700_v46  ;;  %4749 = vst [vmem:[%s6975_s4 + $0xbf0] sm:$0xff] %v2701_v47  ;;  %v9356_v41 = vld [vmem:[%s6889_s15 + $0xd60] sm:$0xff]  ;;  %v9359_v42 = vld [vmem:[%s6889_s15 + $0xd68] sm:$0xff]  ;;  %v2728_v46 = vadd.f32 %v7595_v19, %v9239_v58  ;;  %v2729_v47 = vadd.f32 %v7595_v19, %v9242_v59 }
 0x17e   : > { %4750 = vst [vmem:[%s6975_s4 + $0xbf8] sm:$0xff] %v2702_v48  ;;  %4751 = vst [vmem:[%s6975_s4 + $0xc00] sm:$0xff] %v2703_v53  ;;  %v9362_v43 = vld [vmem:[%s6889_s15 + $0xd70] sm:$0xff]  ;;  %v9365_v44 = vld [vmem:[%s6889_s15 + $0xd78] sm:$0xff]  ;;  %v2730_v48 = vadd.f32 %v7595_v19, %v9245_v60  ;;  %v2731_v53 = vadd.f32 %v7595_v19, %v9260_v1 }
 0x17f   : > { %4752 = vst [vmem:[%s6975_s4 + $0xc08] sm:$0xff] %v2704_v54  ;;  %4753 = vst [vmem:[%s6975_s4 + $0xc10] sm:$0xff] %v2705_v55  ;;  %v9380_v49 = vld [vmem:[%s6889_s15 + $0xd80] sm:$0xff]  ;;  %v9383_v50 = vld [vmem:[%s6889_s15 + $0xd88] sm:$0xff]  ;;  %v2732_v54 = vadd.f32 %v7595_v19, %v9263_v2  ;;  %v2733_v55 = vadd.f32 %v7595_v19, %v9266_v3 }
 0x180   : > { %4754 = vst [vmem:[%s6975_s4 + $0xc18] sm:$0xff] %v2706_v56  ;;  %4755 = vst [vmem:[%s6975_s4 + $0xc20] sm:$0xff] %v2707_v61  ;;  %v9386_v51 = vld [vmem:[%s6889_s15 + $0xd90] sm:$0xff]  ;;  %v9389_v52 = vld [vmem:[%s6889_s15 + $0xd98] sm:$0xff]  ;;  %v2734_v56 = vadd.f32 %v7595_v19, %v9269_v4  ;;  %v2735_v61 = vadd.f32 %v7789_v25, %v9284_v11 }
 0x181   : > { %4756 = vst [vmem:[%s6975_s4 + $0xc28] sm:$0xff] %v2708_v62  ;;  %4757 = vst [vmem:[%s6975_s4 + $0xc30] sm:$0xff] %v2709_v63  ;;  %v9404_v57 = vld [vmem:[%s6889_s15 + $0xda0] sm:$0xff]  ;;  %v9407_v58 = vld [vmem:[%s6889_s15 + $0xda8] sm:$0xff]  ;;  %v2736_v62 = vadd.f32 %v7789_v25, %v9287_v12  ;;  %v2737_v63 = vadd.f32 %v7789_v25, %v9290_v14 }
 0x182   : > { %4758 = vst [vmem:[%s6975_s4 + $0xc38] sm:$0xff] %v2710_v0  ;;  %4759 = vst [vmem:[%s6975_s4 + $0xc40] sm:$0xff] %v2711_v5  ;;  %v9410_v59 = vld [vmem:[%s6889_s15 + $0xdb0] sm:$0xff]  ;;  %v9413_v60 = vld [vmem:[%s6889_s15 + $0xdb8] sm:$0xff]  ;;  %v2738_v0 = vadd.f32 %v7789_v25, %v9293_v15  ;;  %v2739_v5 = vadd.f32 %v7789_v25, %v9308_v22 }
 0x183   : > { %4760 = vst [vmem:[%s6975_s4 + $0xc48] sm:$0xff] %v2712_v7  ;;  %4761 = vst [vmem:[%s6975_s4 + $0xc50] sm:$0xff] %v2713_v8  ;;  %v9428_v1 = vld [vmem:[%s6889_s15 + $0xdc0] sm:$0xff]  ;;  %v9431_v2 = vld [vmem:[%s6889_s15 + $0xdc8] sm:$0xff]  ;;  %v2740_v7 = vadd.f32 %v7789_v25, %v9311_v23  ;;  %v2741_v8 = vadd.f32 %v7789_v25, %v9314_v24 }
 0x184   : > { %4762 = vst [vmem:[%s6975_s4 + $0xc58] sm:$0xff] %v2714_v10  ;;  %4763 = vst [vmem:[%s6975_s4 + $0xc60] sm:$0xff] %v2715_v16  ;;  %v9434_v3 = vld [vmem:[%s6889_s15 + $0xdd0] sm:$0xff]  ;;  %v9437_v4 = vld [vmem:[%s6889_s15 + $0xdd8] sm:$0xff]  ;;  %v2742_v10 = vadd.f32 %v7789_v25, %v9317_v26  ;;  %v2743_v16 = vadd.f32 %v7789_v25, %v9332_v31 }
 0x185   : > { %4764 = vst [vmem:[%s6975_s4 + $0xc68] sm:$0xff] %v2716_v18  ;;  %4765 = vst [vmem:[%s6975_s4 + $0xc70] sm:$0xff] %v2717_v20  ;;  %v9452_v11 = vld [vmem:[%s6889_s15 + $0xde0] sm:$0xff]  ;;  %v9455_v12 = vld [vmem:[%s6889_s15 + $0xde8] sm:$0xff]  ;;  %v2744_v18 = vadd.f32 %v7789_v25, %v9335_v33  ;;  %v2745_v20 = vadd.f32 %v7789_v25, %v9338_v34 }
 0x186   : > { %4766 = vst [vmem:[%s6975_s4 + $0xc78] sm:$0xff] %v2718_v21  ;;  %4767 = vst [vmem:[%s6975_s4 + $0xc80] sm:$0xff] %v2719_v27  ;;  %v9458_v14 = vld [vmem:[%s6889_s15 + $0xdf0] sm:$0xff]  ;;  %v9461_v15 = vld [vmem:[%s6889_s15 + $0xdf8] sm:$0xff]  ;;  %v2746_v21 = vadd.f32 %v7789_v25, %v9341_v35  ;;  %v2747_v27 = vadd.f32 %v7789_v25, %v9356_v41 }
 0x187   : > { %4768 = vst [vmem:[%s6975_s4 + $0xc88] sm:$0xff] %v2720_v28  ;;  %4769 = vst [vmem:[%s6975_s4 + $0xc90] sm:$0xff] %v2721_v29  ;;  %v9476_v22 = vld [vmem:[%s6889_s15 + $0xe00] sm:$0xff]  ;;  %v9479_v23 = vld [vmem:[%s6889_s15 + $0xe08] sm:$0xff]  ;;  %v2748_v28 = vadd.f32 %v7789_v25, %v9359_v42  ;;  %v2749_v29 = vadd.f32 %v7789_v25, %v9362_v43 }
 0x188   : > { %4770 = vst [vmem:[%s6975_s4 + $0xc98] sm:$0xff] %v2722_v30  ;;  %4771 = vst [vmem:[%s6975_s4 + $0xca0] sm:$0xff] %v2723_v36  ;;  %v9482_v24 = vld [vmem:[%s6889_s15 + $0xe10] sm:$0xff]  ;;  %v9485_v26 = vld [vmem:[%s6889_s15 + $0xe18] sm:$0xff]  ;;  %v2750_v30 = vadd.f32 %v7789_v25, %v9365_v44  ;;  %v2751_v36 = vadd.f32 %v7789_v25, %v9380_v49 }
 0x189   : > { %4772 = vst [vmem:[%s6975_s4 + $0xca8] sm:$0xff] %v2724_v37  ;;  %4773 = vst [vmem:[%s6975_s4 + $0xcb0] sm:$0xff] %v2725_v38  ;;  %v9500_v31 = vld [vmem:[%s6889_s15 + $0xe20] sm:$0xff]  ;;  %v9503_v33 = vld [vmem:[%s6889_s15 + $0xe28] sm:$0xff]  ;;  %v2752_v37 = vadd.f32 %v7789_v25, %v9383_v50  ;;  %v2753_v38 = vadd.f32 %v7789_v25, %v9386_v51 }
 0x18a   : > { %4774 = vst [vmem:[%s6975_s4 + $0xcb8] sm:$0xff] %v2726_v39  ;;  %4775 = vst [vmem:[%s6975_s4 + $0xcc0] sm:$0xff] %v2727_v45  ;;  %v9506_v34 = vld [vmem:[%s6889_s15 + $0xe30] sm:$0xff]  ;;  %v9509_v35 = vld [vmem:[%s6889_s15 + $0xe38] sm:$0xff]  ;;  %v2754_v39 = vadd.f32 %v7789_v25, %v9389_v52  ;;  %v2755_v45 = vadd.f32 %v7789_v25, %v9404_v57 }
 0x18b   : > { %4776 = vst [vmem:[%s6975_s4 + $0xcc8] sm:$0xff] %v2728_v46  ;;  %4777 = vst [vmem:[%s6975_s4 + $0xcd0] sm:$0xff] %v2729_v47  ;;  %v9524_v41 = vld [vmem:[%s6889_s15 + $0xe40] sm:$0xff]  ;;  %v9527_v42 = vld [vmem:[%s6889_s15 + $0xe48] sm:$0xff]  ;;  %v2756_v46 = vadd.f32 %v7789_v25, %v9407_v58  ;;  %v2757_v47 = vadd.f32 %v7789_v25, %v9410_v59 }
 0x18c   : > { %4778 = vst [vmem:[%s6975_s4 + $0xcd8] sm:$0xff] %v2730_v48  ;;  %4779 = vst [vmem:[%s6975_s4 + $0xce0] sm:$0xff] %v2731_v53  ;;  %v9530_v43 = vld [vmem:[%s6889_s15 + $0xe50] sm:$0xff]  ;;  %v9533_v44 = vld [vmem:[%s6889_s15 + $0xe58] sm:$0xff]  ;;  %v2758_v48 = vadd.f32 %v7789_v25, %v9413_v60  ;;  %v2759_v53 = vadd.f32 %v7789_v25, %v9428_v1 }
 0x18d   : > { %4780 = vst [vmem:[%s6975_s4 + $0xce8] sm:$0xff] %v2732_v54  ;;  %4781 = vst [vmem:[%s6975_s4 + $0xcf0] sm:$0xff] %v2733_v55  ;;  %v9548_v49 = vld [vmem:[%s6889_s15 + $0xe60] sm:$0xff]  ;;  %v9551_v50 = vld [vmem:[%s6889_s15 + $0xe68] sm:$0xff]  ;;  %v2760_v54 = vadd.f32 %v7789_v25, %v9431_v2  ;;  %v2761_v55 = vadd.f32 %v7789_v25, %v9434_v3 }
 0x18e   : > { %4782 = vst [vmem:[%s6975_s4 + $0xcf8] sm:$0xff] %v2734_v56  ;;  %4783 = vst [vmem:[%s6975_s4 + $0xd00] sm:$0xff] %v2735_v61  ;;  %v9554_v51 = vld [vmem:[%s6889_s15 + $0xe70] sm:$0xff]  ;;  %v9557_v52 = vld [vmem:[%s6889_s15 + $0xe78] sm:$0xff]  ;;  %v2762_v56 = vadd.f32 %v7789_v25, %v9437_v4  ;;  %v2763_v61 = vadd.f32 %v7789_v25, %v9452_v11 }
 0x18f   : > { %4784 = vst [vmem:[%s6975_s4 + $0xd08] sm:$0xff] %v2736_v62  ;;  %4785 = vst [vmem:[%s6975_s4 + $0xd10] sm:$0xff] %v2737_v63  ;;  %v9572_v57 = vld [vmem:[%s6889_s15 + $0xe80] sm:$0xff]  ;;  %v9575_v58 = vld [vmem:[%s6889_s15 + $0xe88] sm:$0xff]  ;;  %v2764_v62 = vadd.f32 %v7789_v25, %v9455_v12  ;;  %v2765_v63 = vadd.f32 %v7789_v25, %v9458_v14 }
 0x190   : > { %4786 = vst [vmem:[%s6975_s4 + $0xd18] sm:$0xff] %v2738_v0  ;;  %4787 = vst [vmem:[%s6975_s4 + $0xd20] sm:$0xff] %v2739_v5  ;;  %v9578_v59 = vld [vmem:[%s6889_s15 + $0xe90] sm:$0xff]  ;;  %v9581_v60 = vld [vmem:[%s6889_s15 + $0xe98] sm:$0xff]  ;;  %v2766_v0 = vadd.f32 %v7789_v25, %v9461_v15  ;;  %v2767_v5 = vadd.f32 %v7983_v32, %v9476_v22 }
 0x191   : > { %4788 = vst [vmem:[%s6975_s4 + $0xd28] sm:$0xff] %v2740_v7  ;;  %4789 = vst [vmem:[%s6975_s4 + $0xd30] sm:$0xff] %v2741_v8  ;;  %v9596_v1 = vld [vmem:[%s6889_s15 + $0xea0] sm:$0xff]  ;;  %v9599_v2 = vld [vmem:[%s6889_s15 + $0xea8] sm:$0xff]  ;;  %v2768_v7 = vadd.f32 %v7983_v32, %v9479_v23  ;;  %v2769_v8 = vadd.f32 %v7983_v32, %v9482_v24 }
 0x192   : > { %4790 = vst [vmem:[%s6975_s4 + $0xd38] sm:$0xff] %v2742_v10  ;;  %4791 = vst [vmem:[%s6975_s4 + $0xd40] sm:$0xff] %v2743_v16  ;;  %v9602_v3 = vld [vmem:[%s6889_s15 + $0xeb0] sm:$0xff]  ;;  %v9605_v4 = vld [vmem:[%s6889_s15 + $0xeb8] sm:$0xff]  ;;  %v2770_v10 = vadd.f32 %v7983_v32, %v9485_v26  ;;  %v2771_v16 = vadd.f32 %v7983_v32, %v9500_v31 }
 0x193   : > { %4792 = vst [vmem:[%s6975_s4 + $0xd48] sm:$0xff] %v2744_v18  ;;  %4793 = vst [vmem:[%s6975_s4 + $0xd50] sm:$0xff] %v2745_v20  ;;  %v9620_v11 = vld [vmem:[%s6889_s15 + $0xec0] sm:$0xff]  ;;  %v9623_v12 = vld [vmem:[%s6889_s15 + $0xec8] sm:$0xff]  ;;  %v2772_v18 = vadd.f32 %v7983_v32, %v9503_v33  ;;  %v2773_v20 = vadd.f32 %v7983_v32, %v9506_v34 }
 0x194   : > { %4794 = vst [vmem:[%s6975_s4 + $0xd58] sm:$0xff] %v2746_v21  ;;  %4795 = vst [vmem:[%s6975_s4 + $0xd60] sm:$0xff] %v2747_v27  ;;  %v9626_v14 = vld [vmem:[%s6889_s15 + $0xed0] sm:$0xff]  ;;  %v9629_v15 = vld [vmem:[%s6889_s15 + $0xed8] sm:$0xff]  ;;  %v2774_v21 = vadd.f32 %v7983_v32, %v9509_v35  ;;  %v2775_v27 = vadd.f32 %v7983_v32, %v9524_v41 }
 0x195   : > { %4796 = vst [vmem:[%s6975_s4 + $0xd68] sm:$0xff] %v2748_v28  ;;  %4797 = vst [vmem:[%s6975_s4 + $0xd70] sm:$0xff] %v2749_v29  ;;  %v9644_v22 = vld [vmem:[%s6889_s15 + $0xee0] sm:$0xff]  ;;  %v9647_v23 = vld [vmem:[%s6889_s15 + $0xee8] sm:$0xff]  ;;  %v2776_v28 = vadd.f32 %v7983_v32, %v9527_v42  ;;  %v2777_v29 = vadd.f32 %v7983_v32, %v9530_v43 }
 0x196   : > { %4798 = vst [vmem:[%s6975_s4 + $0xd78] sm:$0xff] %v2750_v30  ;;  %4799 = vst [vmem:[%s6975_s4 + $0xd80] sm:$0xff] %v2751_v36  ;;  %v9650_v24 = vld [vmem:[%s6889_s15 + $0xef0] sm:$0xff]  ;;  %v9653_v26 = vld [vmem:[%s6889_s15 + $0xef8] sm:$0xff]  ;;  %v2778_v30 = vadd.f32 %v7983_v32, %v9533_v44  ;;  %v2779_v36 = vadd.f32 %v7983_v32, %v9548_v49 }
 0x197   : > { %4800 = vst [vmem:[%s6975_s4 + $0xd88] sm:$0xff] %v2752_v37  ;;  %4801 = vst [vmem:[%s6975_s4 + $0xd90] sm:$0xff] %v2753_v38  ;;  %v9668_v31 = vld [vmem:[%s6889_s15 + $0xf00] sm:$0xff]  ;;  %v9671_v33 = vld [vmem:[%s6889_s15 + $0xf08] sm:$0xff]  ;;  %v2780_v37 = vadd.f32 %v7983_v32, %v9551_v50  ;;  %v2781_v38 = vadd.f32 %v7983_v32, %v9554_v51 }
 0x198   : > { %4802 = vst [vmem:[%s6975_s4 + $0xd98] sm:$0xff] %v2754_v39  ;;  %4803 = vst [vmem:[%s6975_s4 + $0xda0] sm:$0xff] %v2755_v45  ;;  %v9674_v34 = vld [vmem:[%s6889_s15 + $0xf10] sm:$0xff]  ;;  %v9677_v35 = vld [vmem:[%s6889_s15 + $0xf18] sm:$0xff]  ;;  %v2782_v39 = vadd.f32 %v7983_v32, %v9557_v52  ;;  %v2783_v45 = vadd.f32 %v7983_v32, %v9572_v57 }
 0x199   : > { %4804 = vst [vmem:[%s6975_s4 + $0xda8] sm:$0xff] %v2756_v46  ;;  %4805 = vst [vmem:[%s6975_s4 + $0xdb0] sm:$0xff] %v2757_v47  ;;  %v9692_v41 = vld [vmem:[%s6889_s15 + $0xf20] sm:$0xff]  ;;  %v9695_v42 = vld [vmem:[%s6889_s15 + $0xf28] sm:$0xff]  ;;  %v2784_v46 = vadd.f32 %v7983_v32, %v9575_v58  ;;  %v2785_v47 = vadd.f32 %v7983_v32, %v9578_v59 }
 0x19a   : > { %4806 = vst [vmem:[%s6975_s4 + $0xdb8] sm:$0xff] %v2758_v48  ;;  %4807 = vst [vmem:[%s6975_s4 + $0xdc0] sm:$0xff] %v2759_v53  ;;  %v9698_v43 = vld [vmem:[%s6889_s15 + $0xf30] sm:$0xff]  ;;  %v9701_v44 = vld [vmem:[%s6889_s15 + $0xf38] sm:$0xff]  ;;  %v2786_v48 = vadd.f32 %v7983_v32, %v9581_v60  ;;  %v2787_v53 = vadd.f32 %v7983_v32, %v9596_v1 }
 0x19b   : > { %4808 = vst [vmem:[%s6975_s4 + $0xdc8] sm:$0xff] %v2760_v54  ;;  %4809 = vst [vmem:[%s6975_s4 + $0xdd0] sm:$0xff] %v2761_v55  ;;  %v9716_v49 = vld [vmem:[%s6889_s15 + $0xf40] sm:$0xff]  ;;  %v9719_v50 = vld [vmem:[%s6889_s15 + $0xf48] sm:$0xff]  ;;  %v2788_v54 = vadd.f32 %v7983_v32, %v9599_v2  ;;  %v2789_v55 = vadd.f32 %v7983_v32, %v9602_v3 }
 0x19c   : > { %4810 = vst [vmem:[%s6975_s4 + $0xdd8] sm:$0xff] %v2762_v56  ;;  %4811 = vst [vmem:[%s6975_s4 + $0xde0] sm:$0xff] %v2763_v61  ;;  %v9722_v51 = vld [vmem:[%s6889_s15 + $0xf50] sm:$0xff]  ;;  %v9725_v52 = vld [vmem:[%s6889_s15 + $0xf58] sm:$0xff]  ;;  %v2790_v56 = vadd.f32 %v7983_v32, %v9605_v4  ;;  %v2791_v61 = vadd.f32 %v7983_v32, %v9620_v11 }
 0x19d   : > { %4812 = vst [vmem:[%s6975_s4 + $0xde8] sm:$0xff] %v2764_v62  ;;  %4813 = vst [vmem:[%s6975_s4 + $0xdf0] sm:$0xff] %v2765_v63  ;;  %v9740_v57 = vld [vmem:[%s6889_s15 + $0xf60] sm:$0xff]  ;;  %v9743_v58 = vld [vmem:[%s6889_s15 + $0xf68] sm:$0xff]  ;;  %v2792_v62 = vadd.f32 %v7983_v32, %v9623_v12  ;;  %v2793_v63 = vadd.f32 %v7983_v32, %v9626_v14 }
 0x19e   : > { %4814 = vst [vmem:[%s6975_s4 + $0xdf8] sm:$0xff] %v2766_v0  ;;  %4815 = vst [vmem:[%s6975_s4 + $0xe00] sm:$0xff] %v2767_v5  ;;  %v9746_v59 = vld [vmem:[%s6889_s15 + $0xf70] sm:$0xff]  ;;  %v9749_v60 = vld [vmem:[%s6889_s15 + $0xf78] sm:$0xff]  ;;  %v2794_v0 = vadd.f32 %v7983_v32, %v9629_v15  ;;  %v2795_v5 = vadd.f32 %v7983_v32, %v9644_v22 }
 0x19f   : > { %4816 = vst [vmem:[%s6975_s4 + $0xe08] sm:$0xff] %v2768_v7  ;;  %4817 = vst [vmem:[%s6975_s4 + $0xe10] sm:$0xff] %v2769_v8  ;;  %v9764_v1 = vld [vmem:[%s6889_s15 + $0xf80] sm:$0xff]  ;;  %v9767_v2 = vld [vmem:[%s6889_s15 + $0xf88] sm:$0xff]  ;;  %v2796_v7 = vadd.f32 %v7983_v32, %v9647_v23  ;;  %v2797_v8 = vadd.f32 %v7983_v32, %v9650_v24 }
 0x1a0   : > { %4818 = vst [vmem:[%s6975_s4 + $0xe18] sm:$0xff] %v2770_v10  ;;  %4819 = vst [vmem:[%s6975_s4 + $0xe20] sm:$0xff] %v2771_v16  ;;  %v9770_v3 = vld [vmem:[%s6889_s15 + $0xf90] sm:$0xff]  ;;  %v9773_v4 = vld [vmem:[%s6889_s15 + $0xf98] sm:$0xff]  ;;  %v2798_v10 = vadd.f32 %v7983_v32, %v9653_v26  ;;  %v2799_v16 = vadd.f32 %v8177_v40, %v9668_v31 }
 0x1a1   : > { %4820 = vst [vmem:[%s6975_s4 + $0xe28] sm:$0xff] %v2772_v18  ;;  %4821 = vst [vmem:[%s6975_s4 + $0xe30] sm:$0xff] %v2773_v20  ;;  %v9788_v11 = vld [vmem:[%s6889_s15 + $0xfa0] sm:$0xff]  ;;  %v9791_v12 = vld [vmem:[%s6889_s15 + $0xfa8] sm:$0xff]  ;;  %v2800_v18 = vadd.f32 %v8177_v40, %v9671_v33  ;;  %v2801_v20 = vadd.f32 %v8177_v40, %v9674_v34 }
 0x1a2   : > { %4822 = vst [vmem:[%s6975_s4 + $0xe38] sm:$0xff] %v2774_v21  ;;  %4823 = vst [vmem:[%s6975_s4 + $0xe40] sm:$0xff] %v2775_v27  ;;  %v9794_v14 = vld [vmem:[%s6889_s15 + $0xfb0] sm:$0xff]  ;;  %v9797_v15 = vld [vmem:[%s6889_s15 + $0xfb8] sm:$0xff]  ;;  %v2802_v21 = vadd.f32 %v8177_v40, %v9677_v35  ;;  %v2803_v27 = vadd.f32 %v8177_v40, %v9692_v41 }
 0x1a3   : > { %4824 = vst [vmem:[%s6975_s4 + $0xe48] sm:$0xff] %v2776_v28  ;;  %4825 = vst [vmem:[%s6975_s4 + $0xe50] sm:$0xff] %v2777_v29  ;;  %v9812_v22 = vld [vmem:[%s6889_s15 + $0xfc0] sm:$0xff]  ;;  %v9815_v23 = vld [vmem:[%s6889_s15 + $0xfc8] sm:$0xff]  ;;  %v2804_v28 = vadd.f32 %v8177_v40, %v9695_v42  ;;  %v2805_v29 = vadd.f32 %v8177_v40, %v9698_v43 }
 0x1a4   : > { %4826 = vst [vmem:[%s6975_s4 + $0xe58] sm:$0xff] %v2778_v30  ;;  %4827 = vst [vmem:[%s6975_s4 + $0xe60] sm:$0xff] %v2779_v36  ;;  %v9818_v24 = vld [vmem:[%s6889_s15 + $0xfd0] sm:$0xff]  ;;  %v9821_v26 = vld [vmem:[%s6889_s15 + $0xfd8] sm:$0xff]  ;;  %v2806_v30 = vadd.f32 %v8177_v40, %v9701_v44  ;;  %v2807_v36 = vadd.f32 %v8177_v40, %v9716_v49 }
 0x1a5   : > { %4828 = vst [vmem:[%s6975_s4 + $0xe68] sm:$0xff] %v2780_v37  ;;  %4829 = vst [vmem:[%s6975_s4 + $0xe70] sm:$0xff] %v2781_v38  ;;  %v9836_v31 = vld [vmem:[%s6889_s15 + $0xfe0] sm:$0xff]  ;;  %v9839_v33 = vld [vmem:[%s6889_s15 + $0xfe8] sm:$0xff]  ;;  %v2808_v37 = vadd.f32 %v8177_v40, %v9719_v50  ;;  %v2809_v38 = vadd.f32 %v8177_v40, %v9722_v51 }
 0x1a6   : > { %4830 = vst [vmem:[%s6975_s4 + $0xe78] sm:$0xff] %v2782_v39  ;;  %4831 = vst [vmem:[%s6975_s4 + $0xe80] sm:$0xff] %v2783_v45  ;;  %v9842_v34 = vld [vmem:[%s6889_s15 + $0xff0] sm:$0xff]  ;;  %v9845_v35 = vld [vmem:[%s6889_s15 + $0xff8] sm:$0xff]  ;;  %v2810_v39 = vadd.f32 %v8177_v40, %v9725_v52  ;;  %v2811_v45 = vadd.f32 %v8177_v40, %v9740_v57 }
 0x1a7   : > { %4832 = vst [vmem:[%s6975_s4 + $0xe88] sm:$0xff] %v2784_v46  ;;  %4833 = vst [vmem:[%s6975_s4 + $0xe90] sm:$0xff] %v2785_v47  ;;  %v9860_v41 = vld [vmem:[%s6889_s15 + $0x1000] sm:$0xff]  ;;  %v9863_v42 = vld [vmem:[%s6889_s15 + $0x1008] sm:$0xff]  ;;  %v2812_v46 = vadd.f32 %v8177_v40, %v9743_v58  ;;  %v2813_v47 = vadd.f32 %v8177_v40, %v9746_v59 }
 0x1a8   : > { %4834 = vst [vmem:[%s6975_s4 + $0xe98] sm:$0xff] %v2786_v48  ;;  %4835 = vst [vmem:[%s6975_s4 + $0xea0] sm:$0xff] %v2787_v53  ;;  %v9866_v43 = vld [vmem:[%s6889_s15 + $0x1010] sm:$0xff]  ;;  %v9869_v44 = vld [vmem:[%s6889_s15 + $0x1018] sm:$0xff]  ;;  %v2814_v48 = vadd.f32 %v8177_v40, %v9749_v60  ;;  %v2815_v53 = vadd.f32 %v8177_v40, %v9764_v1 }
 0x1a9   : > { %4836 = vst [vmem:[%s6975_s4 + $0xea8] sm:$0xff] %v2788_v54  ;;  %4837 = vst [vmem:[%s6975_s4 + $0xeb0] sm:$0xff] %v2789_v55  ;;  %v9884_v49 = vld [vmem:[%s6889_s15 + $0x1020] sm:$0xff]  ;;  %v9887_v50 = vld [vmem:[%s6889_s15 + $0x1028] sm:$0xff]  ;;  %v2816_v54 = vadd.f32 %v8177_v40, %v9767_v2  ;;  %v2817_v55 = vadd.f32 %v8177_v40, %v9770_v3 }
 0x1aa   : > { %4838 = vst [vmem:[%s6975_s4 + $0xeb8] sm:$0xff] %v2790_v56  ;;  %4839 = vst [vmem:[%s6975_s4 + $0xec0] sm:$0xff] %v2791_v61  ;;  %v9890_v51 = vld [vmem:[%s6889_s15 + $0x1030] sm:$0xff]  ;;  %v9893_v52 = vld [vmem:[%s6889_s15 + $0x1038] sm:$0xff]  ;;  %v2818_v56 = vadd.f32 %v8177_v40, %v9773_v4  ;;  %v2819_v61 = vadd.f32 %v8177_v40, %v9788_v11 }
 0x1ab   : > { %4840 = vst [vmem:[%s6975_s4 + $0xec8] sm:$0xff] %v2792_v62  ;;  %4841 = vst [vmem:[%s6975_s4 + $0xed0] sm:$0xff] %v2793_v63  ;;  %v9908_v57 = vld [vmem:[%s6889_s15 + $0x1040] sm:$0xff]  ;;  %v9911_v58 = vld [vmem:[%s6889_s15 + $0x1048] sm:$0xff]  ;;  %v2820_v62 = vadd.f32 %v8177_v40, %v9791_v12  ;;  %v2821_v63 = vadd.f32 %v8177_v40, %v9794_v14 }
 0x1ac   : > { %4842 = vst [vmem:[%s6975_s4 + $0xed8] sm:$0xff] %v2794_v0  ;;  %4843 = vst [vmem:[%s6975_s4 + $0xee0] sm:$0xff] %v2795_v5  ;;  %v9914_v59 = vld [vmem:[%s6889_s15 + $0x1050] sm:$0xff]  ;;  %v9917_v60 = vld [vmem:[%s6889_s15 + $0x1058] sm:$0xff]  ;;  %v2822_v0 = vadd.f32 %v8177_v40, %v9797_v15  ;;  %v2823_v5 = vadd.f32 %v8177_v40, %v9812_v22 }
 0x1ad   : > { %4844 = vst [vmem:[%s6975_s4 + $0xee8] sm:$0xff] %v2796_v7  ;;  %4845 = vst [vmem:[%s6975_s4 + $0xef0] sm:$0xff] %v2797_v8  ;;  %v9932_v1 = vld [vmem:[%s6889_s15 + $0x1060] sm:$0xff]  ;;  %v9935_v2 = vld [vmem:[%s6889_s15 + $0x1068] sm:$0xff]  ;;  %v2824_v7 = vadd.f32 %v8177_v40, %v9815_v23  ;;  %v2825_v8 = vadd.f32 %v8177_v40, %v9818_v24 }
 0x1ae   : > { %4846 = vst [vmem:[%s6975_s4 + $0xef8] sm:$0xff] %v2798_v10  ;;  %4847 = vst [vmem:[%s6975_s4 + $0xf00] sm:$0xff] %v2799_v16  ;;  %v9938_v3 = vld [vmem:[%s6889_s15 + $0x1070] sm:$0xff]  ;;  %v9941_v4 = vld [vmem:[%s6889_s15 + $0x1078] sm:$0xff]  ;;  %v2826_v10 = vadd.f32 %v8177_v40, %v9821_v26  ;;  %v2827_v16 = vadd.f32 %v8177_v40, %v9836_v31 }
 0x1af   : > { %4848 = vst [vmem:[%s6975_s4 + $0xf08] sm:$0xff] %v2800_v18  ;;  %4849 = vst [vmem:[%s6975_s4 + $0xf10] sm:$0xff] %v2801_v20  ;;  %v9956_v11 = vld [vmem:[%s6889_s15 + $0x1080] sm:$0xff]  ;;  %v9959_v12 = vld [vmem:[%s6889_s15 + $0x1088] sm:$0xff]  ;;  %v2828_v18 = vadd.f32 %v8177_v40, %v9839_v33  ;;  %v2829_v20 = vadd.f32 %v8177_v40, %v9842_v34 }
 0x1b0   : > { %4850 = vst [vmem:[%s6975_s4 + $0xf18] sm:$0xff] %v2802_v21  ;;  %4851 = vst [vmem:[%s6975_s4 + $0xf20] sm:$0xff] %v2803_v27  ;;  %v9962_v14 = vld [vmem:[%s6889_s15 + $0x1090] sm:$0xff]  ;;  %v9965_v15 = vld [vmem:[%s6889_s15 + $0x1098] sm:$0xff]  ;;  %v2830_v21 = vadd.f32 %v8177_v40, %v9845_v35  ;;  %v2831_v27 = vadd.f32 %v6927_v17, %v9860_v41 }
 0x1b1   : > { %4852 = vst [vmem:[%s6975_s4 + $0xf28] sm:$0xff] %v2804_v28  ;;  %4853 = vst [vmem:[%s6975_s4 + $0xf30] sm:$0xff] %v2805_v29  ;;  %v9980_v22 = vld [vmem:[%s6889_s15 + $0x10a0] sm:$0xff]  ;;  %v9983_v23 = vld [vmem:[%s6889_s15 + $0x10a8] sm:$0xff]  ;;  %v2832_v28 = vadd.f32 %v6927_v17, %v9863_v42  ;;  %v2833_v29 = vadd.f32 %v6927_v17, %v9866_v43 }
 0x1b2   : > { %4854 = vst [vmem:[%s6975_s4 + $0xf38] sm:$0xff] %v2806_v30  ;;  %4855 = vst [vmem:[%s6975_s4 + $0xf40] sm:$0xff] %v2807_v36  ;;  %v9986_v24 = vld [vmem:[%s6889_s15 + $0x10b0] sm:$0xff]  ;;  %v9989_v26 = vld [vmem:[%s6889_s15 + $0x10b8] sm:$0xff]  ;;  %v2834_v30 = vadd.f32 %v6927_v17, %v9869_v44  ;;  %v2835_v36 = vadd.f32 %v6927_v17, %v9884_v49 }
 0x1b3   : > { %4856 = vst [vmem:[%s6975_s4 + $0xf48] sm:$0xff] %v2808_v37  ;;  %4857 = vst [vmem:[%s6975_s4 + $0xf50] sm:$0xff] %v2809_v38  ;;  %v10004_v31 = vld [vmem:[%s6889_s15 + $0x10c0] sm:$0xff]  ;;  %v10007_v33 = vld [vmem:[%s6889_s15 + $0x10c8] sm:$0xff]  ;;  %v2836_v37 = vadd.f32 %v6927_v17, %v9887_v50  ;;  %v2837_v38 = vadd.f32 %v6927_v17, %v9890_v51 }
 0x1b4   : > { %4858 = vst [vmem:[%s6975_s4 + $0xf58] sm:$0xff] %v2810_v39  ;;  %4859 = vst [vmem:[%s6975_s4 + $0xf60] sm:$0xff] %v2811_v45  ;;  %v10010_v34 = vld [vmem:[%s6889_s15 + $0x10d0] sm:$0xff]  ;;  %v10013_v35 = vld [vmem:[%s6889_s15 + $0x10d8] sm:$0xff]  ;;  %v2838_v39 = vadd.f32 %v6927_v17, %v9893_v52  ;;  %v2839_v45 = vadd.f32 %v6927_v17, %v9908_v57 }
 0x1b5   : > { %4860 = vst [vmem:[%s6975_s4 + $0xf68] sm:$0xff] %v2812_v46  ;;  %4861 = vst [vmem:[%s6975_s4 + $0xf70] sm:$0xff] %v2813_v47  ;;  %v10028_v41 = vld [vmem:[%s6889_s15 + $0x10e0] sm:$0xff]  ;;  %v10031_v42 = vld [vmem:[%s6889_s15 + $0x10e8] sm:$0xff]  ;;  %v2840_v46 = vadd.f32 %v6927_v17, %v9911_v58  ;;  %v2841_v47 = vadd.f32 %v6927_v17, %v9914_v59 }
 0x1b6   : > { %4862 = vst [vmem:[%s6975_s4 + $0xf78] sm:$0xff] %v2814_v48  ;;  %4863 = vst [vmem:[%s6975_s4 + $0xf80] sm:$0xff] %v2815_v53  ;;  %v10034_v43 = vld [vmem:[%s6889_s15 + $0x10f0] sm:$0xff]  ;;  %v10037_v44 = vld [vmem:[%s6889_s15 + $0x10f8] sm:$0xff]  ;;  %v2842_v48 = vadd.f32 %v6927_v17, %v9917_v60  ;;  %v2843_v53 = vadd.f32 %v6927_v17, %v9932_v1 }
 0x1b7   : > { %4864 = vst [vmem:[%s6975_s4 + $0xf88] sm:$0xff] %v2816_v54  ;;  %4865 = vst [vmem:[%s6975_s4 + $0xf90] sm:$0xff] %v2817_v55  ;;  %v10052_v49 = vld [vmem:[%s6889_s15 + $0x1100] sm:$0xff]  ;;  %v10055_v50 = vld [vmem:[%s6889_s15 + $0x1108] sm:$0xff]  ;;  %v2844_v54 = vadd.f32 %v6927_v17, %v9935_v2  ;;  %v2845_v55 = vadd.f32 %v6927_v17, %v9938_v3 }
 0x1b8   : > { %4866 = vst [vmem:[%s6975_s4 + $0xf98] sm:$0xff] %v2818_v56  ;;  %4867 = vst [vmem:[%s6975_s4 + $0xfa0] sm:$0xff] %v2819_v61  ;;  %v10058_v51 = vld [vmem:[%s6889_s15 + $0x1110] sm:$0xff]  ;;  %v10061_v52 = vld [vmem:[%s6889_s15 + $0x1118] sm:$0xff]  ;;  %v2846_v56 = vadd.f32 %v6927_v17, %v9941_v4  ;;  %v2847_v61 = vadd.f32 %v6927_v17, %v9956_v11 }
 0x1b9   : > { %4868 = vst [vmem:[%s6975_s4 + $0xfa8] sm:$0xff] %v2820_v62  ;;  %4869 = vst [vmem:[%s6975_s4 + $0xfb0] sm:$0xff] %v2821_v63  ;;  %v10076_v57 = vld [vmem:[%s6889_s15 + $0x1120] sm:$0xff]  ;;  %v10079_v58 = vld [vmem:[%s6889_s15 + $0x1128] sm:$0xff]  ;;  %v2848_v62 = vadd.f32 %v6927_v17, %v9959_v12  ;;  %v2849_v63 = vadd.f32 %v6927_v17, %v9962_v14 }
 0x1ba   : > { %4870 = vst [vmem:[%s6975_s4 + $0xfb8] sm:$0xff] %v2822_v0  ;;  %4871 = vst [vmem:[%s6975_s4 + $0xfc0] sm:$0xff] %v2823_v5  ;;  %v10082_v59 = vld [vmem:[%s6889_s15 + $0x1130] sm:$0xff]  ;;  %v10085_v60 = vld [vmem:[%s6889_s15 + $0x1138] sm:$0xff]  ;;  %v2850_v0 = vadd.f32 %v6927_v17, %v9965_v15  ;;  %v2851_v5 = vadd.f32 %v6927_v17, %v9980_v22 }
 0x1bb   : > { %4872 = vst [vmem:[%s6975_s4 + $0xfc8] sm:$0xff] %v2824_v7  ;;  %4873 = vst [vmem:[%s6975_s4 + $0xfd0] sm:$0xff] %v2825_v8  ;;  %v10100_v1 = vld [vmem:[%s6889_s15 + $0x1140] sm:$0xff]  ;;  %v10103_v2 = vld [vmem:[%s6889_s15 + $0x1148] sm:$0xff]  ;;  %v2852_v7 = vadd.f32 %v6927_v17, %v9983_v23  ;;  %v2853_v8 = vadd.f32 %v6927_v17, %v9986_v24 }
 0x1bc   : > { %4874 = vst [vmem:[%s6975_s4 + $0xfd8] sm:$0xff] %v2826_v10  ;;  %4875 = vst [vmem:[%s6975_s4 + $0xfe0] sm:$0xff] %v2827_v16  ;;  %v10106_v3 = vld [vmem:[%s6889_s15 + $0x1150] sm:$0xff]  ;;  %v10109_v4 = vld [vmem:[%s6889_s15 + $0x1158] sm:$0xff]  ;;  %v2854_v10 = vadd.f32 %v6927_v17, %v9989_v26  ;;  %v2855_v16 = vadd.f32 %v6927_v17, %v10004_v31 }
 0x1bd   : > { %4876 = vst [vmem:[%s6975_s4 + $0xfe8] sm:$0xff] %v2828_v18  ;;  %4877 = vst [vmem:[%s6975_s4 + $0xff0] sm:$0xff] %v2829_v20  ;;  %v10124_v11 = vld [vmem:[%s6889_s15 + $0x1160] sm:$0xff]  ;;  %v10127_v12 = vld [vmem:[%s6889_s15 + $0x1168] sm:$0xff]  ;;  %v2856_v18 = vadd.f32 %v6927_v17, %v10007_v33  ;;  %v2857_v20 = vadd.f32 %v6927_v17, %v10010_v34 }
 0x1be   : > { %4878 = vst [vmem:[%s6975_s4 + $0xff8] sm:$0xff] %v2830_v21  ;;  %4879 = vst [vmem:[%s6975_s4 + $0x1000] sm:$0xff] %v2831_v27  ;;  %v10130_v14 = vld [vmem:[%s6889_s15 + $0x1170] sm:$0xff]  ;;  %v10133_v15 = vld [vmem:[%s6889_s15 + $0x1178] sm:$0xff]  ;;  %v2858_v21 = vadd.f32 %v6927_v17, %v10013_v35  ;;  %v2859_v27 = vadd.f32 %v6927_v17, %v10028_v41 }
 0x1bf   : > { %4880 = vst [vmem:[%s6975_s4 + $0x1008] sm:$0xff] %v2832_v28  ;;  %4881 = vst [vmem:[%s6975_s4 + $0x1010] sm:$0xff] %v2833_v29  ;;  %v10148_v22 = vld [vmem:[%s6889_s15 + $0x1180] sm:$0xff]  ;;  %v10151_v23 = vld [vmem:[%s6889_s15 + $0x1188] sm:$0xff]  ;;  %v2860_v28 = vadd.f32 %v6927_v17, %v10031_v42  ;;  %v2861_v29 = vadd.f32 %v6927_v17, %v10034_v43 }
 0x1c0   : > { %4882 = vst [vmem:[%s6975_s4 + $0x1018] sm:$0xff] %v2834_v30  ;;  %4883 = vst [vmem:[%s6975_s4 + $0x1020] sm:$0xff] %v2835_v36  ;;  %v10154_v24 = vld [vmem:[%s6889_s15 + $0x1190] sm:$0xff]  ;;  %v10157_v26 = vld [vmem:[%s6889_s15 + $0x1198] sm:$0xff]  ;;  %v2862_v30 = vadd.f32 %v6927_v17, %v10037_v44  ;;  %v2863_v36 = vadd.f32 %v7021_v6, %v10052_v49 }
 0x1c1   : > { %4884 = vst [vmem:[%s6975_s4 + $0x1028] sm:$0xff] %v2836_v37  ;;  %4885 = vst [vmem:[%s6975_s4 + $0x1030] sm:$0xff] %v2837_v38  ;;  %v10172_v31 = vld [vmem:[%s6889_s15 + $0x11a0] sm:$0xff]  ;;  %v10175_v33 = vld [vmem:[%s6889_s15 + $0x11a8] sm:$0xff]  ;;  %v2864_v37 = vadd.f32 %v7021_v6, %v10055_v50  ;;  %v2865_v38 = vadd.f32 %v7021_v6, %v10058_v51 }
 0x1c2   : > { %4886 = vst [vmem:[%s6975_s4 + $0x1038] sm:$0xff] %v2838_v39  ;;  %4887 = vst [vmem:[%s6975_s4 + $0x1040] sm:$0xff] %v2839_v45  ;;  %v10178_v34 = vld [vmem:[%s6889_s15 + $0x11b0] sm:$0xff]  ;;  %v10181_v35 = vld [vmem:[%s6889_s15 + $0x11b8] sm:$0xff]  ;;  %v2866_v39 = vadd.f32 %v7021_v6, %v10061_v52  ;;  %v2867_v45 = vadd.f32 %v7021_v6, %v10076_v57 }
 0x1c3   : > { %4888 = vst [vmem:[%s6975_s4 + $0x1048] sm:$0xff] %v2840_v46  ;;  %4889 = vst [vmem:[%s6975_s4 + $0x1050] sm:$0xff] %v2841_v47  ;;  %v10196_v41 = vld [vmem:[%s6889_s15 + $0x11c0] sm:$0xff]  ;;  %v10199_v42 = vld [vmem:[%s6889_s15 + $0x11c8] sm:$0xff]  ;;  %v2868_v46 = vadd.f32 %v7021_v6, %v10079_v58  ;;  %v2869_v47 = vadd.f32 %v7021_v6, %v10082_v59 }
 0x1c4   : > { %4890 = vst [vmem:[%s6975_s4 + $0x1058] sm:$0xff] %v2842_v48  ;;  %4891 = vst [vmem:[%s6975_s4 + $0x1060] sm:$0xff] %v2843_v53  ;;  %v10202_v43 = vld [vmem:[%s6889_s15 + $0x11d0] sm:$0xff]  ;;  %v10205_v44 = vld [vmem:[%s6889_s15 + $0x11d8] sm:$0xff]  ;;  %v2870_v48 = vadd.f32 %v7021_v6, %v10085_v60  ;;  %v2871_v53 = vadd.f32 %v7021_v6, %v10100_v1 }
 0x1c5   : > { %4892 = vst [vmem:[%s6975_s4 + $0x1068] sm:$0xff] %v2844_v54  ;;  %4893 = vst [vmem:[%s6975_s4 + $0x1070] sm:$0xff] %v2845_v55  ;;  %v10220_v49 = vld [vmem:[%s6889_s15 + $0x11e0] sm:$0xff]  ;;  %v10223_v50 = vld [vmem:[%s6889_s15 + $0x11e8] sm:$0xff]  ;;  %v2872_v54 = vadd.f32 %v7021_v6, %v10103_v2  ;;  %v2873_v55 = vadd.f32 %v7021_v6, %v10106_v3 }
 0x1c6   : > { %4894 = vst [vmem:[%s6975_s4 + $0x1078] sm:$0xff] %v2846_v56  ;;  %4895 = vst [vmem:[%s6975_s4 + $0x1080] sm:$0xff] %v2847_v61  ;;  %v10226_v51 = vld [vmem:[%s6889_s15 + $0x11f0] sm:$0xff]  ;;  %v10229_v52 = vld [vmem:[%s6889_s15 + $0x11f8] sm:$0xff]  ;;  %v2874_v56 = vadd.f32 %v7021_v6, %v10109_v4  ;;  %v2875_v61 = vadd.f32 %v7021_v6, %v10124_v11 }
 0x1c7   : > { %4896 = vst [vmem:[%s6975_s4 + $0x1088] sm:$0xff] %v2848_v62  ;;  %4897 = vst [vmem:[%s6975_s4 + $0x1090] sm:$0xff] %v2849_v63  ;;  %v10244_v57 = vld [vmem:[%s6889_s15 + $0x1200] sm:$0xff]  ;;  %v10247_v58 = vld [vmem:[%s6889_s15 + $0x1208] sm:$0xff]  ;;  %v2876_v62 = vadd.f32 %v7021_v6, %v10127_v12  ;;  %v2877_v63 = vadd.f32 %v7021_v6, %v10130_v14 }
 0x1c8   : > { %4898 = vst [vmem:[%s6975_s4 + $0x1098] sm:$0xff] %v2850_v0  ;;  %4899 = vst [vmem:[%s6975_s4 + $0x10a0] sm:$0xff] %v2851_v5  ;;  %v10250_v59 = vld [vmem:[%s6889_s15 + $0x1210] sm:$0xff]  ;;  %v10253_v60 = vld [vmem:[%s6889_s15 + $0x1218] sm:$0xff]  ;;  %v2878_v0 = vadd.f32 %v7021_v6, %v10133_v15  ;;  %v2879_v5 = vadd.f32 %v7021_v6, %v10148_v22 }
 0x1c9   : > { %4900 = vst [vmem:[%s6975_s4 + $0x10a8] sm:$0xff] %v2852_v7  ;;  %4901 = vst [vmem:[%s6975_s4 + $0x10b0] sm:$0xff] %v2853_v8  ;;  %v10268_v1 = vld [vmem:[%s6889_s15 + $0x1220] sm:$0xff]  ;;  %v10271_v2 = vld [vmem:[%s6889_s15 + $0x1228] sm:$0xff]  ;;  %v2880_v7 = vadd.f32 %v7021_v6, %v10151_v23  ;;  %v2881_v8 = vadd.f32 %v7021_v6, %v10154_v24 }
 0x1ca   : > { %4902 = vst [vmem:[%s6975_s4 + $0x10b8] sm:$0xff] %v2854_v10  ;;  %4903 = vst [vmem:[%s6975_s4 + $0x10c0] sm:$0xff] %v2855_v16  ;;  %v10274_v3 = vld [vmem:[%s6889_s15 + $0x1230] sm:$0xff]  ;;  %v10277_v4 = vld [vmem:[%s6889_s15 + $0x1238] sm:$0xff]  ;;  %v2882_v10 = vadd.f32 %v7021_v6, %v10157_v26  ;;  %v2883_v16 = vadd.f32 %v7021_v6, %v10172_v31 }
 0x1cb   : > { %4904 = vst [vmem:[%s6975_s4 + $0x10c8] sm:$0xff] %v2856_v18  ;;  %4905 = vst [vmem:[%s6975_s4 + $0x10d0] sm:$0xff] %v2857_v20  ;;  %v10292_v11 = vld [vmem:[%s6889_s15 + $0x1240] sm:$0xff]  ;;  %v10295_v12 = vld [vmem:[%s6889_s15 + $0x1248] sm:$0xff]  ;;  %v2884_v18 = vadd.f32 %v7021_v6, %v10175_v33  ;;  %v2885_v20 = vadd.f32 %v7021_v6, %v10178_v34 }
 0x1cc   : > { %4906 = vst [vmem:[%s6975_s4 + $0x10d8] sm:$0xff] %v2858_v21  ;;  %4907 = vst [vmem:[%s6975_s4 + $0x10e0] sm:$0xff] %v2859_v27  ;;  %v10298_v14 = vld [vmem:[%s6889_s15 + $0x1250] sm:$0xff]  ;;  %v10301_v15 = vld [vmem:[%s6889_s15 + $0x1258] sm:$0xff]  ;;  %v2886_v21 = vadd.f32 %v7021_v6, %v10181_v35  ;;  %v2887_v27 = vadd.f32 %v7021_v6, %v10196_v41 }
 0x1cd   : > { %4908 = vst [vmem:[%s6975_s4 + $0x10e8] sm:$0xff] %v2860_v28  ;;  %4909 = vst [vmem:[%s6975_s4 + $0x10f0] sm:$0xff] %v2861_v29  ;;  %v10316_v22 = vld [vmem:[%s6889_s15 + $0x1260] sm:$0xff]  ;;  %v10319_v23 = vld [vmem:[%s6889_s15 + $0x1268] sm:$0xff]  ;;  %v2888_v28 = vadd.f32 %v7021_v6, %v10199_v42  ;;  %v2889_v29 = vadd.f32 %v7021_v6, %v10202_v43 }
 0x1ce   : > { %4910 = vst [vmem:[%s6975_s4 + $0x10f8] sm:$0xff] %v2862_v30  ;;  %4911 = vst [vmem:[%s6975_s4 + $0x1100] sm:$0xff] %v2863_v36  ;;  %v10322_v24 = vld [vmem:[%s6889_s15 + $0x1270] sm:$0xff]  ;;  %v10325_v26 = vld [vmem:[%s6889_s15 + $0x1278] sm:$0xff]  ;;  %v2890_v30 = vadd.f32 %v7021_v6, %v10205_v44  ;;  %v2891_v36 = vadd.f32 %v7021_v6, %v10220_v49 }
 0x1cf   : > { %4912 = vst [vmem:[%s6975_s4 + $0x1108] sm:$0xff] %v2864_v37  ;;  %4913 = vst [vmem:[%s6975_s4 + $0x1110] sm:$0xff] %v2865_v38  ;;  %v10340_v31 = vld [vmem:[%s6889_s15 + $0x1280] sm:$0xff]  ;;  %v10343_v33 = vld [vmem:[%s6889_s15 + $0x1288] sm:$0xff]  ;;  %v2892_v37 = vadd.f32 %v7021_v6, %v10223_v50  ;;  %v2893_v38 = vadd.f32 %v7021_v6, %v10226_v51 }
 0x1d0   : > { %4914 = vst [vmem:[%s6975_s4 + $0x1118] sm:$0xff] %v2866_v39  ;;  %4915 = vst [vmem:[%s6975_s4 + $0x1120] sm:$0xff] %v2867_v45  ;;  %v10346_v34 = vld [vmem:[%s6889_s15 + $0x1290] sm:$0xff]  ;;  %v10349_v35 = vld [vmem:[%s6889_s15 + $0x1298] sm:$0xff]  ;;  %v2894_v39 = vadd.f32 %v7021_v6, %v10229_v52  ;;  %v2895_v45 = vadd.f32 %v7207_v9, %v10244_v57 }
 0x1d1   : > { %4916 = vst [vmem:[%s6975_s4 + $0x1128] sm:$0xff] %v2868_v46  ;;  %4917 = vst [vmem:[%s6975_s4 + $0x1130] sm:$0xff] %v2869_v47  ;;  %v10364_v41 = vld [vmem:[%s6889_s15 + $0x12a0] sm:$0xff]  ;;  %v10367_v42 = vld [vmem:[%s6889_s15 + $0x12a8] sm:$0xff]  ;;  %v2896_v46 = vadd.f32 %v7207_v9, %v10247_v58  ;;  %v2897_v47 = vadd.f32 %v7207_v9, %v10250_v59 }
 0x1d2   : > { %4918 = vst [vmem:[%s6975_s4 + $0x1138] sm:$0xff] %v2870_v48  ;;  %4919 = vst [vmem:[%s6975_s4 + $0x1140] sm:$0xff] %v2871_v53  ;;  %v10370_v43 = vld [vmem:[%s6889_s15 + $0x12b0] sm:$0xff]  ;;  %v10373_v44 = vld [vmem:[%s6889_s15 + $0x12b8] sm:$0xff]  ;;  %v2898_v48 = vadd.f32 %v7207_v9, %v10253_v60  ;;  %v2899_v53 = vadd.f32 %v7207_v9, %v10268_v1 }
 0x1d3   : > { %4920 = vst [vmem:[%s6975_s4 + $0x1148] sm:$0xff] %v2872_v54  ;;  %4921 = vst [vmem:[%s6975_s4 + $0x1150] sm:$0xff] %v2873_v55  ;;  %v10388_v49 = vld [vmem:[%s6889_s15 + $0x12c0] sm:$0xff]  ;;  %v10391_v50 = vld [vmem:[%s6889_s15 + $0x12c8] sm:$0xff]  ;;  %v2900_v54 = vadd.f32 %v7207_v9, %v10271_v2  ;;  %v2901_v55 = vadd.f32 %v7207_v9, %v10274_v3 }
 0x1d4   : > { %4922 = vst [vmem:[%s6975_s4 + $0x1158] sm:$0xff] %v2874_v56  ;;  %4923 = vst [vmem:[%s6975_s4 + $0x1160] sm:$0xff] %v2875_v61  ;;  %v10394_v51 = vld [vmem:[%s6889_s15 + $0x12d0] sm:$0xff]  ;;  %v10397_v52 = vld [vmem:[%s6889_s15 + $0x12d8] sm:$0xff]  ;;  %v2902_v56 = vadd.f32 %v7207_v9, %v10277_v4  ;;  %v2903_v61 = vadd.f32 %v7207_v9, %v10292_v11 }
 0x1d5   : > { %4924 = vst [vmem:[%s6975_s4 + $0x1168] sm:$0xff] %v2876_v62  ;;  %4925 = vst [vmem:[%s6975_s4 + $0x1170] sm:$0xff] %v2877_v63  ;;  %v10412_v57 = vld [vmem:[%s6889_s15 + $0x12e0] sm:$0xff]  ;;  %v10415_v58 = vld [vmem:[%s6889_s15 + $0x12e8] sm:$0xff]  ;;  %v2904_v62 = vadd.f32 %v7207_v9, %v10295_v12  ;;  %v2905_v63 = vadd.f32 %v7207_v9, %v10298_v14 }
 0x1d6   : > { %4926 = vst [vmem:[%s6975_s4 + $0x1178] sm:$0xff] %v2878_v0  ;;  %4927 = vst [vmem:[%s6975_s4 + $0x1180] sm:$0xff] %v2879_v5  ;;  %v10418_v59 = vld [vmem:[%s6889_s15 + $0x12f0] sm:$0xff]  ;;  %v10421_v60 = vld [vmem:[%s6889_s15 + $0x12f8] sm:$0xff]  ;;  %v2906_v0 = vadd.f32 %v7207_v9, %v10301_v15  ;;  %v2907_v5 = vadd.f32 %v7207_v9, %v10316_v22 }
 0x1d7   : > { %4928 = vst [vmem:[%s6975_s4 + $0x1188] sm:$0xff] %v2880_v7  ;;  %4929 = vst [vmem:[%s6975_s4 + $0x1190] sm:$0xff] %v2881_v8  ;;  %v10436_v1 = vld [vmem:[%s6889_s15 + $0x1300] sm:$0xff]  ;;  %v10439_v2 = vld [vmem:[%s6889_s15 + $0x1308] sm:$0xff]  ;;  %v2908_v7 = vadd.f32 %v7207_v9, %v10319_v23  ;;  %v2909_v8 = vadd.f32 %v7207_v9, %v10322_v24 }
 0x1d8   : > { %4930 = vst [vmem:[%s6975_s4 + $0x1198] sm:$0xff] %v2882_v10  ;;  %4931 = vst [vmem:[%s6975_s4 + $0x11a0] sm:$0xff] %v2883_v16  ;;  %v10442_v3 = vld [vmem:[%s6889_s15 + $0x1310] sm:$0xff]  ;;  %v10445_v4 = vld [vmem:[%s6889_s15 + $0x1318] sm:$0xff]  ;;  %v2910_v10 = vadd.f32 %v7207_v9, %v10325_v26  ;;  %v2911_v16 = vadd.f32 %v7207_v9, %v10340_v31 }
 0x1d9   : > { %4932 = vst [vmem:[%s6975_s4 + $0x11a8] sm:$0xff] %v2884_v18  ;;  %4933 = vst [vmem:[%s6975_s4 + $0x11b0] sm:$0xff] %v2885_v20  ;;  %v10460_v11 = vld [vmem:[%s6889_s15 + $0x1320] sm:$0xff]  ;;  %v10463_v12 = vld [vmem:[%s6889_s15 + $0x1328] sm:$0xff]  ;;  %v2912_v18 = vadd.f32 %v7207_v9, %v10343_v33  ;;  %v2913_v20 = vadd.f32 %v7207_v9, %v10346_v34 }
 0x1da   : > { %4934 = vst [vmem:[%s6975_s4 + $0x11b8] sm:$0xff] %v2886_v21  ;;  %4935 = vst [vmem:[%s6975_s4 + $0x11c0] sm:$0xff] %v2887_v27  ;;  %v10466_v14 = vld [vmem:[%s6889_s15 + $0x1330] sm:$0xff]  ;;  %v10469_v15 = vld [vmem:[%s6889_s15 + $0x1338] sm:$0xff]  ;;  %v2914_v21 = vadd.f32 %v7207_v9, %v10349_v35  ;;  %v2915_v27 = vadd.f32 %v7207_v9, %v10364_v41 }
 0x1db   : > { %4936 = vst [vmem:[%s6975_s4 + $0x11c8] sm:$0xff] %v2888_v28  ;;  %4937 = vst [vmem:[%s6975_s4 + $0x11d0] sm:$0xff] %v2889_v29  ;;  %v10484_v22 = vld [vmem:[%s6889_s15 + $0x1340] sm:$0xff]  ;;  %v10487_v23 = vld [vmem:[%s6889_s15 + $0x1348] sm:$0xff]  ;;  %v2916_v28 = vadd.f32 %v7207_v9, %v10367_v42  ;;  %v2917_v29 = vadd.f32 %v7207_v9, %v10370_v43 }
 0x1dc   : > { %4938 = vst [vmem:[%s6975_s4 + $0x11d8] sm:$0xff] %v2890_v30  ;;  %4939 = vst [vmem:[%s6975_s4 + $0x11e0] sm:$0xff] %v2891_v36  ;;  %v10490_v24 = vld [vmem:[%s6889_s15 + $0x1350] sm:$0xff]  ;;  %v10493_v26 = vld [vmem:[%s6889_s15 + $0x1358] sm:$0xff]  ;;  %v2918_v30 = vadd.f32 %v7207_v9, %v10373_v44  ;;  %v2919_v36 = vadd.f32 %v7207_v9, %v10388_v49 }
 0x1dd   : > { %4940 = vst [vmem:[%s6975_s4 + $0x11e8] sm:$0xff] %v2892_v37  ;;  %4941 = vst [vmem:[%s6975_s4 + $0x11f0] sm:$0xff] %v2893_v38  ;;  %v10508_v31 = vld [vmem:[%s6889_s15 + $0x1360] sm:$0xff]  ;;  %v10511_v33 = vld [vmem:[%s6889_s15 + $0x1368] sm:$0xff]  ;;  %v2920_v37 = vadd.f32 %v7207_v9, %v10391_v50  ;;  %v2921_v38 = vadd.f32 %v7207_v9, %v10394_v51 }
 0x1de   : > { %4942 = vst [vmem:[%s6975_s4 + $0x11f8] sm:$0xff] %v2894_v39  ;;  %4943 = vst [vmem:[%s6975_s4 + $0x1200] sm:$0xff] %v2895_v45  ;;  %v10514_v34 = vld [vmem:[%s6889_s15 + $0x1370] sm:$0xff]  ;;  %v10517_v35 = vld [vmem:[%s6889_s15 + $0x1378] sm:$0xff]  ;;  %v2922_v39 = vadd.f32 %v7207_v9, %v10397_v52  ;;  %v2923_v45 = vadd.f32 %v7207_v9, %v10412_v57 }
 0x1df   : > { %4944 = vst [vmem:[%s6975_s4 + $0x1208] sm:$0xff] %v2896_v46  ;;  %4945 = vst [vmem:[%s6975_s4 + $0x1210] sm:$0xff] %v2897_v47  ;;  %v10532_v41 = vld [vmem:[%s6889_s15 + $0x1380] sm:$0xff]  ;;  %v10535_v42 = vld [vmem:[%s6889_s15 + $0x1388] sm:$0xff]  ;;  %v2924_v46 = vadd.f32 %v7207_v9, %v10415_v58  ;;  %v2925_v47 = vadd.f32 %v7207_v9, %v10418_v59 }
 0x1e0   : > { %4946 = vst [vmem:[%s6975_s4 + $0x1218] sm:$0xff] %v2898_v48  ;;  %4947 = vst [vmem:[%s6975_s4 + $0x1220] sm:$0xff] %v2899_v53  ;;  %v10538_v43 = vld [vmem:[%s6889_s15 + $0x1390] sm:$0xff]  ;;  %v10541_v44 = vld [vmem:[%s6889_s15 + $0x1398] sm:$0xff]  ;;  %v2926_v48 = vadd.f32 %v7207_v9, %v10421_v60  ;;  %v2927_v53 = vadd.f32 %v7401_v13, %v10436_v1 }
 0x1e1   : > { %4948 = vst [vmem:[%s6975_s4 + $0x1228] sm:$0xff] %v2900_v54  ;;  %4949 = vst [vmem:[%s6975_s4 + $0x1230] sm:$0xff] %v2901_v55  ;;  %v10556_v49 = vld [vmem:[%s6889_s15 + $0x13a0] sm:$0xff]  ;;  %v10559_v50 = vld [vmem:[%s6889_s15 + $0x13a8] sm:$0xff]  ;;  %v2928_v54 = vadd.f32 %v7401_v13, %v10439_v2  ;;  %v2929_v55 = vadd.f32 %v7401_v13, %v10442_v3 }
 0x1e2   : > { %4950 = vst [vmem:[%s6975_s4 + $0x1238] sm:$0xff] %v2902_v56  ;;  %4951 = vst [vmem:[%s6975_s4 + $0x1240] sm:$0xff] %v2903_v61  ;;  %v10562_v51 = vld [vmem:[%s6889_s15 + $0x13b0] sm:$0xff]  ;;  %v10565_v52 = vld [vmem:[%s6889_s15 + $0x13b8] sm:$0xff]  ;;  %v2930_v56 = vadd.f32 %v7401_v13, %v10445_v4  ;;  %v2931_v61 = vadd.f32 %v7401_v13, %v10460_v11 }
 0x1e3   : > { %4952 = vst [vmem:[%s6975_s4 + $0x1248] sm:$0xff] %v2904_v62  ;;  %4953 = vst [vmem:[%s6975_s4 + $0x1250] sm:$0xff] %v2905_v63  ;;  %v10580_v57 = vld [vmem:[%s6889_s15 + $0x13c0] sm:$0xff]  ;;  %v10583_v58 = vld [vmem:[%s6889_s15 + $0x13c8] sm:$0xff]  ;;  %v2932_v62 = vadd.f32 %v7401_v13, %v10463_v12  ;;  %v2933_v63 = vadd.f32 %v7401_v13, %v10466_v14 }
 0x1e4   : > { %4954 = vst [vmem:[%s6975_s4 + $0x1258] sm:$0xff] %v2906_v0  ;;  %4955 = vst [vmem:[%s6975_s4 + $0x1260] sm:$0xff] %v2907_v5  ;;  %v10586_v59 = vld [vmem:[%s6889_s15 + $0x13d0] sm:$0xff]  ;;  %v10589_v60 = vld [vmem:[%s6889_s15 + $0x13d8] sm:$0xff]  ;;  %v2934_v0 = vadd.f32 %v7401_v13, %v10469_v15  ;;  %v2935_v5 = vadd.f32 %v7401_v13, %v10484_v22 }
 0x1e5   : > { %4956 = vst [vmem:[%s6975_s4 + $0x1268] sm:$0xff] %v2908_v7  ;;  %4957 = vst [vmem:[%s6975_s4 + $0x1270] sm:$0xff] %v2909_v8  ;;  %v10604_v1 = vld [vmem:[%s6889_s15 + $0x13e0] sm:$0xff]  ;;  %v10607_v2 = vld [vmem:[%s6889_s15 + $0x13e8] sm:$0xff]  ;;  %v2936_v7 = vadd.f32 %v7401_v13, %v10487_v23  ;;  %v2937_v8 = vadd.f32 %v7401_v13, %v10490_v24 }
 0x1e6   : > { %4958 = vst [vmem:[%s6975_s4 + $0x1278] sm:$0xff] %v2910_v10  ;;  %4959 = vst [vmem:[%s6975_s4 + $0x1280] sm:$0xff] %v2911_v16  ;;  %v10610_v3 = vld [vmem:[%s6889_s15 + $0x13f0] sm:$0xff]  ;;  %v10613_v4 = vld [vmem:[%s6889_s15 + $0x13f8] sm:$0xff]  ;;  %v2938_v10 = vadd.f32 %v7401_v13, %v10493_v26  ;;  %v2939_v16 = vadd.f32 %v7401_v13, %v10508_v31 }
 0x1e7   : > { %4960 = vst [vmem:[%s6975_s4 + $0x1288] sm:$0xff] %v2912_v18  ;;  %4961 = vst [vmem:[%s6975_s4 + $0x1290] sm:$0xff] %v2913_v20  ;;  %v10628_v11 = vld [vmem:[%s6889_s15 + $0x1400] sm:$0xff]  ;;  %v10631_v12 = vld [vmem:[%s6889_s15 + $0x1408] sm:$0xff]  ;;  %v2940_v18 = vadd.f32 %v7401_v13, %v10511_v33  ;;  %v2941_v20 = vadd.f32 %v7401_v13, %v10514_v34 }
 0x1e8   : > { %4962 = vst [vmem:[%s6975_s4 + $0x1298] sm:$0xff] %v2914_v21  ;;  %4963 = vst [vmem:[%s6975_s4 + $0x12a0] sm:$0xff] %v2915_v27  ;;  %v10634_v14 = vld [vmem:[%s6889_s15 + $0x1410] sm:$0xff]  ;;  %v10637_v15 = vld [vmem:[%s6889_s15 + $0x1418] sm:$0xff]  ;;  %v2942_v21 = vadd.f32 %v7401_v13, %v10517_v35  ;;  %v2943_v27 = vadd.f32 %v7401_v13, %v10532_v41 }
 0x1e9   : > { %4964 = vst [vmem:[%s6975_s4 + $0x12a8] sm:$0xff] %v2916_v28  ;;  %4965 = vst [vmem:[%s6975_s4 + $0x12b0] sm:$0xff] %v2917_v29  ;;  %v10652_v22 = vld [vmem:[%s6889_s15 + $0x1420] sm:$0xff]  ;;  %v10655_v23 = vld [vmem:[%s6889_s15 + $0x1428] sm:$0xff]  ;;  %v2944_v28 = vadd.f32 %v7401_v13, %v10535_v42  ;;  %v2945_v29 = vadd.f32 %v7401_v13, %v10538_v43 }
 0x1ea   : > { %4966 = vst [vmem:[%s6975_s4 + $0x12b8] sm:$0xff] %v2918_v30  ;;  %4967 = vst [vmem:[%s6975_s4 + $0x12c0] sm:$0xff] %v2919_v36  ;;  %v10658_v24 = vld [vmem:[%s6889_s15 + $0x1430] sm:$0xff]  ;;  %v10661_v26 = vld [vmem:[%s6889_s15 + $0x1438] sm:$0xff]  ;;  %v2946_v30 = vadd.f32 %v7401_v13, %v10541_v44  ;;  %v2947_v36 = vadd.f32 %v7401_v13, %v10556_v49 }
 0x1eb   : > { %4968 = vst [vmem:[%s6975_s4 + $0x12c8] sm:$0xff] %v2920_v37  ;;  %4969 = vst [vmem:[%s6975_s4 + $0x12d0] sm:$0xff] %v2921_v38  ;;  %v10676_v31 = vld [vmem:[%s6889_s15 + $0x1440] sm:$0xff]  ;;  %v10679_v33 = vld [vmem:[%s6889_s15 + $0x1448] sm:$0xff]  ;;  %v2948_v37 = vadd.f32 %v7401_v13, %v10559_v50  ;;  %v2949_v38 = vadd.f32 %v7401_v13, %v10562_v51 }
 0x1ec   : > { %4970 = vst [vmem:[%s6975_s4 + $0x12d8] sm:$0xff] %v2922_v39  ;;  %4971 = vst [vmem:[%s6975_s4 + $0x12e0] sm:$0xff] %v2923_v45  ;;  %v10682_v34 = vld [vmem:[%s6889_s15 + $0x1450] sm:$0xff]  ;;  %v10685_v35 = vld [vmem:[%s6889_s15 + $0x1458] sm:$0xff]  ;;  %v2950_v39 = vadd.f32 %v7401_v13, %v10565_v52  ;;  %v2951_v45 = vadd.f32 %v7401_v13, %v10580_v57 }
 0x1ed   : > { %4972 = vst [vmem:[%s6975_s4 + $0x12e8] sm:$0xff] %v2924_v46  ;;  %4973 = vst [vmem:[%s6975_s4 + $0x12f0] sm:$0xff] %v2925_v47  ;;  %v10700_v41 = vld [vmem:[%s6889_s15 + $0x1460] sm:$0xff]  ;;  %v10703_v42 = vld [vmem:[%s6889_s15 + $0x1468] sm:$0xff]  ;;  %v2952_v46 = vadd.f32 %v7401_v13, %v10583_v58  ;;  %v2953_v47 = vadd.f32 %v7401_v13, %v10586_v59 }
 0x1ee   : > { %4974 = vst [vmem:[%s6975_s4 + $0x12f8] sm:$0xff] %v2926_v48  ;;  %4975 = vst [vmem:[%s6975_s4 + $0x1300] sm:$0xff] %v2927_v53  ;;  %v10706_v43 = vld [vmem:[%s6889_s15 + $0x1470] sm:$0xff]  ;;  %v10709_v44 = vld [vmem:[%s6889_s15 + $0x1478] sm:$0xff]  ;;  %v2954_v48 = vadd.f32 %v7401_v13, %v10589_v60  ;;  %v2955_v53 = vadd.f32 %v7401_v13, %v10604_v1 }
 0x1ef   : > { %4976 = vst [vmem:[%s6975_s4 + $0x1308] sm:$0xff] %v2928_v54  ;;  %4977 = vst [vmem:[%s6975_s4 + $0x1310] sm:$0xff] %v2929_v55  ;;  %v10724_v49 = vld [vmem:[%s6889_s15 + $0x1480] sm:$0xff]  ;;  %v10727_v50 = vld [vmem:[%s6889_s15 + $0x1488] sm:$0xff]  ;;  %v2956_v54 = vadd.f32 %v7401_v13, %v10607_v2  ;;  %v2957_v55 = vadd.f32 %v7401_v13, %v10610_v3 }
 0x1f0   : > { %4978 = vst [vmem:[%s6975_s4 + $0x1318] sm:$0xff] %v2930_v56  ;;  %4979 = vst [vmem:[%s6975_s4 + $0x1320] sm:$0xff] %v2931_v61  ;;  %v10730_v51 = vld [vmem:[%s6889_s15 + $0x1490] sm:$0xff]  ;;  %v10733_v52 = vld [vmem:[%s6889_s15 + $0x1498] sm:$0xff]  ;;  %v2958_v56 = vadd.f32 %v7401_v13, %v10613_v4  ;;  %v2959_v61 = vadd.f32 %v7595_v19, %v10628_v11 }
 0x1f1   : > { %4980 = vst [vmem:[%s6975_s4 + $0x1328] sm:$0xff] %v2932_v62  ;;  %4981 = vst [vmem:[%s6975_s4 + $0x1330] sm:$0xff] %v2933_v63  ;;  %v10748_v57 = vld [vmem:[%s6889_s15 + $0x14a0] sm:$0xff]  ;;  %v10751_v58 = vld [vmem:[%s6889_s15 + $0x14a8] sm:$0xff]  ;;  %v2960_v62 = vadd.f32 %v7595_v19, %v10631_v12  ;;  %v2961_v63 = vadd.f32 %v7595_v19, %v10634_v14 }
 0x1f2   : > { %4982 = vst [vmem:[%s6975_s4 + $0x1338] sm:$0xff] %v2934_v0  ;;  %4983 = vst [vmem:[%s6975_s4 + $0x1340] sm:$0xff] %v2935_v5  ;;  %v10754_v59 = vld [vmem:[%s6889_s15 + $0x14b0] sm:$0xff]  ;;  %v10757_v60 = vld [vmem:[%s6889_s15 + $0x14b8] sm:$0xff]  ;;  %v2962_v0 = vadd.f32 %v7595_v19, %v10637_v15  ;;  %v2963_v5 = vadd.f32 %v7595_v19, %v10652_v22 }
 0x1f3   : > { %4984 = vst [vmem:[%s6975_s4 + $0x1348] sm:$0xff] %v2936_v7  ;;  %4985 = vst [vmem:[%s6975_s4 + $0x1350] sm:$0xff] %v2937_v8  ;;  %v10772_v1 = vld [vmem:[%s6889_s15 + $0x14c0] sm:$0xff]  ;;  %v10775_v2 = vld [vmem:[%s6889_s15 + $0x14c8] sm:$0xff]  ;;  %v2964_v7 = vadd.f32 %v7595_v19, %v10655_v23  ;;  %v2965_v8 = vadd.f32 %v7595_v19, %v10658_v24 }
 0x1f4   : > { %4986 = vst [vmem:[%s6975_s4 + $0x1358] sm:$0xff] %v2938_v10  ;;  %4987 = vst [vmem:[%s6975_s4 + $0x1360] sm:$0xff] %v2939_v16  ;;  %v10778_v3 = vld [vmem:[%s6889_s15 + $0x14d0] sm:$0xff]  ;;  %v10781_v4 = vld [vmem:[%s6889_s15 + $0x14d8] sm:$0xff]  ;;  %v2966_v10 = vadd.f32 %v7595_v19, %v10661_v26  ;;  %v2967_v16 = vadd.f32 %v7595_v19, %v10676_v31 }
 0x1f5   : > { %4988 = vst [vmem:[%s6975_s4 + $0x1368] sm:$0xff] %v2940_v18  ;;  %4989 = vst [vmem:[%s6975_s4 + $0x1370] sm:$0xff] %v2941_v20  ;;  %v10796_v11 = vld [vmem:[%s6889_s15 + $0x14e0] sm:$0xff]  ;;  %v10799_v12 = vld [vmem:[%s6889_s15 + $0x14e8] sm:$0xff]  ;;  %v2968_v18 = vadd.f32 %v7595_v19, %v10679_v33  ;;  %v2969_v20 = vadd.f32 %v7595_v19, %v10682_v34 }
 0x1f6   : > { %4990 = vst [vmem:[%s6975_s4 + $0x1378] sm:$0xff] %v2942_v21  ;;  %4991 = vst [vmem:[%s6975_s4 + $0x1380] sm:$0xff] %v2943_v27  ;;  %v10802_v14 = vld [vmem:[%s6889_s15 + $0x14f0] sm:$0xff]  ;;  %v10805_v15 = vld [vmem:[%s6889_s15 + $0x14f8] sm:$0xff]  ;;  %v2970_v21 = vadd.f32 %v7595_v19, %v10685_v35  ;;  %v2971_v27 = vadd.f32 %v7595_v19, %v10700_v41 }
 0x1f7   : > { %4992 = vst [vmem:[%s6975_s4 + $0x1388] sm:$0xff] %v2944_v28  ;;  %4993 = vst [vmem:[%s6975_s4 + $0x1390] sm:$0xff] %v2945_v29  ;;  %v10820_v22 = vld [vmem:[%s6889_s15 + $0x1500] sm:$0xff]  ;;  %v10823_v23 = vld [vmem:[%s6889_s15 + $0x1508] sm:$0xff]  ;;  %v2972_v28 = vadd.f32 %v7595_v19, %v10703_v42  ;;  %v2973_v29 = vadd.f32 %v7595_v19, %v10706_v43 }
 0x1f8   : > { %4994 = vst [vmem:[%s6975_s4 + $0x1398] sm:$0xff] %v2946_v30  ;;  %4995 = vst [vmem:[%s6975_s4 + $0x13a0] sm:$0xff] %v2947_v36  ;;  %v10826_v24 = vld [vmem:[%s6889_s15 + $0x1510] sm:$0xff]  ;;  %v10829_v26 = vld [vmem:[%s6889_s15 + $0x1518] sm:$0xff]  ;;  %v2974_v30 = vadd.f32 %v7595_v19, %v10709_v44  ;;  %v2975_v36 = vadd.f32 %v7595_v19, %v10724_v49 }
 0x1f9   : > { %4996 = vst [vmem:[%s6975_s4 + $0x13a8] sm:$0xff] %v2948_v37  ;;  %4997 = vst [vmem:[%s6975_s4 + $0x13b0] sm:$0xff] %v2949_v38  ;;  %v10844_v31 = vld [vmem:[%s6889_s15 + $0x1520] sm:$0xff]  ;;  %v10847_v33 = vld [vmem:[%s6889_s15 + $0x1528] sm:$0xff]  ;;  %v2976_v37 = vadd.f32 %v7595_v19, %v10727_v50  ;;  %v2977_v38 = vadd.f32 %v7595_v19, %v10730_v51 }
 0x1fa   : > { %4998 = vst [vmem:[%s6975_s4 + $0x13b8] sm:$0xff] %v2950_v39  ;;  %4999 = vst [vmem:[%s6975_s4 + $0x13c0] sm:$0xff] %v2951_v45  ;;  %v10850_v34 = vld [vmem:[%s6889_s15 + $0x1530] sm:$0xff]  ;;  %v10853_v35 = vld [vmem:[%s6889_s15 + $0x1538] sm:$0xff]  ;;  %v2978_v39 = vadd.f32 %v7595_v19, %v10733_v52  ;;  %v2979_v45 = vadd.f32 %v7595_v19, %v10748_v57 }
 0x1fb   : > { %5000 = vst [vmem:[%s6975_s4 + $0x13c8] sm:$0xff] %v2952_v46  ;;  %5001 = vst [vmem:[%s6975_s4 + $0x13d0] sm:$0xff] %v2953_v47  ;;  %v10868_v41 = vld [vmem:[%s6889_s15 + $0x1540] sm:$0xff]  ;;  %v10871_v42 = vld [vmem:[%s6889_s15 + $0x1548] sm:$0xff]  ;;  %v2980_v46 = vadd.f32 %v7595_v19, %v10751_v58  ;;  %v2981_v47 = vadd.f32 %v7595_v19, %v10754_v59 }
 0x1fc   : > { %5002 = vst [vmem:[%s6975_s4 + $0x13d8] sm:$0xff] %v2954_v48  ;;  %5003 = vst [vmem:[%s6975_s4 + $0x13e0] sm:$0xff] %v2955_v53  ;;  %v10874_v43 = vld [vmem:[%s6889_s15 + $0x1550] sm:$0xff]  ;;  %v10877_v44 = vld [vmem:[%s6889_s15 + $0x1558] sm:$0xff]  ;;  %v2982_v48 = vadd.f32 %v7595_v19, %v10757_v60  ;;  %v2983_v53 = vadd.f32 %v7595_v19, %v10772_v1 }
 0x1fd   : > { %5004 = vst [vmem:[%s6975_s4 + $0x13e8] sm:$0xff] %v2956_v54  ;;  %5005 = vst [vmem:[%s6975_s4 + $0x13f0] sm:$0xff] %v2957_v55  ;;  %v10892_v49 = vld [vmem:[%s6889_s15 + $0x1560] sm:$0xff]  ;;  %v10895_v50 = vld [vmem:[%s6889_s15 + $0x1568] sm:$0xff]  ;;  %v2984_v54 = vadd.f32 %v7595_v19, %v10775_v2  ;;  %v2985_v55 = vadd.f32 %v7595_v19, %v10778_v3 }
 0x1fe   : > { %5006 = vst [vmem:[%s6975_s4 + $0x13f8] sm:$0xff] %v2958_v56  ;;  %5007 = vst [vmem:[%s6975_s4 + $0x1400] sm:$0xff] %v2959_v61  ;;  %v10898_v51 = vld [vmem:[%s6889_s15 + $0x1570] sm:$0xff]  ;;  %v10901_v52 = vld [vmem:[%s6889_s15 + $0x1578] sm:$0xff]  ;;  %v2986_v56 = vadd.f32 %v7595_v19, %v10781_v4  ;;  %v2987_v61 = vadd.f32 %v7595_v19, %v10796_v11 }
 0x1ff   : > { %5008 = vst [vmem:[%s6975_s4 + $0x1408] sm:$0xff] %v2960_v62  ;;  %5009 = vst [vmem:[%s6975_s4 + $0x1410] sm:$0xff] %v2961_v63  ;;  %v10916_v57 = vld [vmem:[%s6889_s15 + $0x1580] sm:$0xff]  ;;  %v10919_v58 = vld [vmem:[%s6889_s15 + $0x1588] sm:$0xff]  ;;  %v2988_v62 = vadd.f32 %v7595_v19, %v10799_v12  ;;  %v2989_v63 = vadd.f32 %v7595_v19, %v10802_v14 }
 0x200   : > { %5010 = vst [vmem:[%s6975_s4 + $0x1418] sm:$0xff] %v2962_v0  ;;  %5011 = vst [vmem:[%s6975_s4 + $0x1420] sm:$0xff] %v2963_v5  ;;  %v10922_v59 = vld [vmem:[%s6889_s15 + $0x1590] sm:$0xff]  ;;  %v10925_v60 = vld [vmem:[%s6889_s15 + $0x1598] sm:$0xff]  ;;  %v2990_v0 = vadd.f32 %v7595_v19, %v10805_v15  ;;  %v2991_v5 = vadd.f32 %v7789_v25, %v10820_v22 }
 0x201   : > { %5012 = vst [vmem:[%s6975_s4 + $0x1428] sm:$0xff] %v2964_v7  ;;  %5013 = vst [vmem:[%s6975_s4 + $0x1430] sm:$0xff] %v2965_v8  ;;  %v10940_v1 = vld [vmem:[%s6889_s15 + $0x15a0] sm:$0xff]  ;;  %v10943_v2 = vld [vmem:[%s6889_s15 + $0x15a8] sm:$0xff]  ;;  %v2992_v7 = vadd.f32 %v7789_v25, %v10823_v23  ;;  %v2993_v8 = vadd.f32 %v7789_v25, %v10826_v24 }
 0x202   : > { %5014 = vst [vmem:[%s6975_s4 + $0x1438] sm:$0xff] %v2966_v10  ;;  %5015 = vst [vmem:[%s6975_s4 + $0x1440] sm:$0xff] %v2967_v16  ;;  %v10946_v3 = vld [vmem:[%s6889_s15 + $0x15b0] sm:$0xff]  ;;  %v10949_v4 = vld [vmem:[%s6889_s15 + $0x15b8] sm:$0xff]  ;;  %v2994_v10 = vadd.f32 %v7789_v25, %v10829_v26  ;;  %v2995_v16 = vadd.f32 %v7789_v25, %v10844_v31 }
 0x203   : > { %5016 = vst [vmem:[%s6975_s4 + $0x1448] sm:$0xff] %v2968_v18  ;;  %5017 = vst [vmem:[%s6975_s4 + $0x1450] sm:$0xff] %v2969_v20  ;;  %v10964_v11 = vld [vmem:[%s6889_s15 + $0x15c0] sm:$0xff]  ;;  %v10967_v12 = vld [vmem:[%s6889_s15 + $0x15c8] sm:$0xff]  ;;  %v2996_v18 = vadd.f32 %v7789_v25, %v10847_v33  ;;  %v2997_v20 = vadd.f32 %v7789_v25, %v10850_v34 }
 0x204   : > { %5018 = vst [vmem:[%s6975_s4 + $0x1458] sm:$0xff] %v2970_v21  ;;  %5019 = vst [vmem:[%s6975_s4 + $0x1460] sm:$0xff] %v2971_v27  ;;  %v10970_v14 = vld [vmem:[%s6889_s15 + $0x15d0] sm:$0xff]  ;;  %v10973_v15 = vld [vmem:[%s6889_s15 + $0x15d8] sm:$0xff]  ;;  %v2998_v21 = vadd.f32 %v7789_v25, %v10853_v35  ;;  %v2999_v27 = vadd.f32 %v7789_v25, %v10868_v41 }
 0x205   : > { %5020 = vst [vmem:[%s6975_s4 + $0x1468] sm:$0xff] %v2972_v28  ;;  %5021 = vst [vmem:[%s6975_s4 + $0x1470] sm:$0xff] %v2973_v29  ;;  %v10988_v22 = vld [vmem:[%s6889_s15 + $0x15e0] sm:$0xff]  ;;  %v10991_v23 = vld [vmem:[%s6889_s15 + $0x15e8] sm:$0xff]  ;;  %v3000_v28 = vadd.f32 %v7789_v25, %v10871_v42  ;;  %v3001_v29 = vadd.f32 %v7789_v25, %v10874_v43 }
 0x206   : > { %5022 = vst [vmem:[%s6975_s4 + $0x1478] sm:$0xff] %v2974_v30  ;;  %5023 = vst [vmem:[%s6975_s4 + $0x1480] sm:$0xff] %v2975_v36  ;;  %v10994_v24 = vld [vmem:[%s6889_s15 + $0x15f0] sm:$0xff]  ;;  %v10997_v26 = vld [vmem:[%s6889_s15 + $0x15f8] sm:$0xff]  ;;  %v3002_v30 = vadd.f32 %v7789_v25, %v10877_v44  ;;  %v3003_v36 = vadd.f32 %v7789_v25, %v10892_v49 }
 0x207   : > { %5024 = vst [vmem:[%s6975_s4 + $0x1488] sm:$0xff] %v2976_v37  ;;  %5025 = vst [vmem:[%s6975_s4 + $0x1490] sm:$0xff] %v2977_v38  ;;  %v11012_v31 = vld [vmem:[%s6889_s15 + $0x1600] sm:$0xff]  ;;  %v11015_v33 = vld [vmem:[%s6889_s15 + $0x1608] sm:$0xff]  ;;  %v3004_v37 = vadd.f32 %v7789_v25, %v10895_v50  ;;  %v3005_v38 = vadd.f32 %v7789_v25, %v10898_v51 }
 0x208   : > { %5026 = vst [vmem:[%s6975_s4 + $0x1498] sm:$0xff] %v2978_v39  ;;  %5027 = vst [vmem:[%s6975_s4 + $0x14a0] sm:$0xff] %v2979_v45  ;;  %v11018_v34 = vld [vmem:[%s6889_s15 + $0x1610] sm:$0xff]  ;;  %v11021_v35 = vld [vmem:[%s6889_s15 + $0x1618] sm:$0xff]  ;;  %v3006_v39 = vadd.f32 %v7789_v25, %v10901_v52  ;;  %v3007_v45 = vadd.f32 %v7789_v25, %v10916_v57 }
 0x209   : > { %5028 = vst [vmem:[%s6975_s4 + $0x14a8] sm:$0xff] %v2980_v46  ;;  %5029 = vst [vmem:[%s6975_s4 + $0x14b0] sm:$0xff] %v2981_v47  ;;  %v11036_v41 = vld [vmem:[%s6889_s15 + $0x1620] sm:$0xff]  ;;  %v11039_v42 = vld [vmem:[%s6889_s15 + $0x1628] sm:$0xff]  ;;  %v3008_v46 = vadd.f32 %v7789_v25, %v10919_v58  ;;  %v3009_v47 = vadd.f32 %v7789_v25, %v10922_v59 }
 0x20a   : > { %5030 = vst [vmem:[%s6975_s4 + $0x14b8] sm:$0xff] %v2982_v48  ;;  %5031 = vst [vmem:[%s6975_s4 + $0x14c0] sm:$0xff] %v2983_v53  ;;  %v11042_v43 = vld [vmem:[%s6889_s15 + $0x1630] sm:$0xff]  ;;  %v11045_v44 = vld [vmem:[%s6889_s15 + $0x1638] sm:$0xff]  ;;  %v3010_v48 = vadd.f32 %v7789_v25, %v10925_v60  ;;  %v3011_v53 = vadd.f32 %v7789_v25, %v10940_v1 }
 0x20b   : > { %5032 = vst [vmem:[%s6975_s4 + $0x14c8] sm:$0xff] %v2984_v54  ;;  %5033 = vst [vmem:[%s6975_s4 + $0x14d0] sm:$0xff] %v2985_v55  ;;  %v11060_v49 = vld [vmem:[%s6889_s15 + $0x1640] sm:$0xff]  ;;  %v11063_v50 = vld [vmem:[%s6889_s15 + $0x1648] sm:$0xff]  ;;  %v3012_v54 = vadd.f32 %v7789_v25, %v10943_v2  ;;  %v3013_v55 = vadd.f32 %v7789_v25, %v10946_v3 }
 0x20c   : > { %5034 = vst [vmem:[%s6975_s4 + $0x14d8] sm:$0xff] %v2986_v56  ;;  %5035 = vst [vmem:[%s6975_s4 + $0x14e0] sm:$0xff] %v2987_v61  ;;  %v11066_v51 = vld [vmem:[%s6889_s15 + $0x1650] sm:$0xff]  ;;  %v11069_v52 = vld [vmem:[%s6889_s15 + $0x1658] sm:$0xff]  ;;  %v3014_v56 = vadd.f32 %v7789_v25, %v10949_v4  ;;  %v3015_v61 = vadd.f32 %v7789_v25, %v10964_v11 }
 0x20d   : > { %5036 = vst [vmem:[%s6975_s4 + $0x14e8] sm:$0xff] %v2988_v62  ;;  %5037 = vst [vmem:[%s6975_s4 + $0x14f0] sm:$0xff] %v2989_v63  ;;  %v11084_v57 = vld [vmem:[%s6889_s15 + $0x1660] sm:$0xff]  ;;  %v11087_v58 = vld [vmem:[%s6889_s15 + $0x1668] sm:$0xff]  ;;  %v3016_v62 = vadd.f32 %v7789_v25, %v10967_v12  ;;  %v3017_v63 = vadd.f32 %v7789_v25, %v10970_v14 }
 0x20e   : > { %5038 = vst [vmem:[%s6975_s4 + $0x14f8] sm:$0xff] %v2990_v0  ;;  %5039 = vst [vmem:[%s6975_s4 + $0x1500] sm:$0xff] %v2991_v5  ;;  %v11090_v59 = vld [vmem:[%s6889_s15 + $0x1670] sm:$0xff]  ;;  %v11093_v60 = vld [vmem:[%s6889_s15 + $0x1678] sm:$0xff]  ;;  %v3018_v0 = vadd.f32 %v7789_v25, %v10973_v15  ;;  %v3019_v5 = vadd.f32 %v7789_v25, %v10988_v22 }
 0x20f   : > { %5040 = vst [vmem:[%s6975_s4 + $0x1508] sm:$0xff] %v2992_v7  ;;  %5041 = vst [vmem:[%s6975_s4 + $0x1510] sm:$0xff] %v2993_v8  ;;  %v11108_v1 = vld [vmem:[%s6889_s15 + $0x1680] sm:$0xff]  ;;  %v11111_v2 = vld [vmem:[%s6889_s15 + $0x1688] sm:$0xff]  ;;  %v3020_v7 = vadd.f32 %v7789_v25, %v10991_v23  ;;  %v3021_v8 = vadd.f32 %v7789_v25, %v10994_v24 }
 0x210   : > { %5042 = vst [vmem:[%s6975_s4 + $0x1518] sm:$0xff] %v2994_v10  ;;  %5043 = vst [vmem:[%s6975_s4 + $0x1520] sm:$0xff] %v2995_v16  ;;  %v11114_v3 = vld [vmem:[%s6889_s15 + $0x1690] sm:$0xff]  ;;  %v11117_v4 = vld [vmem:[%s6889_s15 + $0x1698] sm:$0xff]  ;;  %v3022_v10 = vadd.f32 %v7789_v25, %v10997_v26  ;;  %v3023_v16 = vadd.f32 %v7983_v32, %v11012_v31 }
 0x211   : > { %5044 = vst [vmem:[%s6975_s4 + $0x1528] sm:$0xff] %v2996_v18  ;;  %5045 = vst [vmem:[%s6975_s4 + $0x1530] sm:$0xff] %v2997_v20  ;;  %v11132_v11 = vld [vmem:[%s6889_s15 + $0x16a0] sm:$0xff]  ;;  %v11135_v12 = vld [vmem:[%s6889_s15 + $0x16a8] sm:$0xff]  ;;  %v3024_v18 = vadd.f32 %v7983_v32, %v11015_v33  ;;  %v3025_v20 = vadd.f32 %v7983_v32, %v11018_v34 }
 0x212   : > { %5046 = vst [vmem:[%s6975_s4 + $0x1538] sm:$0xff] %v2998_v21  ;;  %5047 = vst [vmem:[%s6975_s4 + $0x1540] sm:$0xff] %v2999_v27  ;;  %v11138_v14 = vld [vmem:[%s6889_s15 + $0x16b0] sm:$0xff]  ;;  %v11141_v15 = vld [vmem:[%s6889_s15 + $0x16b8] sm:$0xff]  ;;  %v3026_v21 = vadd.f32 %v7983_v32, %v11021_v35  ;;  %v3027_v27 = vadd.f32 %v7983_v32, %v11036_v41 }
 0x213   : > { %5048 = vst [vmem:[%s6975_s4 + $0x1548] sm:$0xff] %v3000_v28  ;;  %5049 = vst [vmem:[%s6975_s4 + $0x1550] sm:$0xff] %v3001_v29  ;;  %v11156_v22 = vld [vmem:[%s6889_s15 + $0x16c0] sm:$0xff]  ;;  %v11159_v23 = vld [vmem:[%s6889_s15 + $0x16c8] sm:$0xff]  ;;  %v3028_v28 = vadd.f32 %v7983_v32, %v11039_v42  ;;  %v3029_v29 = vadd.f32 %v7983_v32, %v11042_v43 }
 0x214   : > { %5050 = vst [vmem:[%s6975_s4 + $0x1558] sm:$0xff] %v3002_v30  ;;  %5051 = vst [vmem:[%s6975_s4 + $0x1560] sm:$0xff] %v3003_v36  ;;  %v11162_v24 = vld [vmem:[%s6889_s15 + $0x16d0] sm:$0xff]  ;;  %v11165_v26 = vld [vmem:[%s6889_s15 + $0x16d8] sm:$0xff]  ;;  %v3030_v30 = vadd.f32 %v7983_v32, %v11045_v44  ;;  %v3031_v36 = vadd.f32 %v7983_v32, %v11060_v49 }
 0x215   : > { %5052 = vst [vmem:[%s6975_s4 + $0x1568] sm:$0xff] %v3004_v37  ;;  %5053 = vst [vmem:[%s6975_s4 + $0x1570] sm:$0xff] %v3005_v38  ;;  %v11180_v31 = vld [vmem:[%s6889_s15 + $0x16e0] sm:$0xff]  ;;  %v11183_v33 = vld [vmem:[%s6889_s15 + $0x16e8] sm:$0xff]  ;;  %v3032_v37 = vadd.f32 %v7983_v32, %v11063_v50  ;;  %v3033_v38 = vadd.f32 %v7983_v32, %v11066_v51 }
 0x216   : > { %5054 = vst [vmem:[%s6975_s4 + $0x1578] sm:$0xff] %v3006_v39  ;;  %5055 = vst [vmem:[%s6975_s4 + $0x1580] sm:$0xff] %v3007_v45  ;;  %v11186_v34 = vld [vmem:[%s6889_s15 + $0x16f0] sm:$0xff]  ;;  %v11189_v35 = vld [vmem:[%s6889_s15 + $0x16f8] sm:$0xff]  ;;  %v3034_v39 = vadd.f32 %v7983_v32, %v11069_v52  ;;  %v3035_v45 = vadd.f32 %v7983_v32, %v11084_v57 }
 0x217   : > { %5056 = vst [vmem:[%s6975_s4 + $0x1588] sm:$0xff] %v3008_v46  ;;  %5057 = vst [vmem:[%s6975_s4 + $0x1590] sm:$0xff] %v3009_v47  ;;  %v11204_v41 = vld [vmem:[%s6889_s15 + $0x1700] sm:$0xff]  ;;  %v11207_v42 = vld [vmem:[%s6889_s15 + $0x1708] sm:$0xff]  ;;  %v3036_v46 = vadd.f32 %v7983_v32, %v11087_v58  ;;  %v3037_v47 = vadd.f32 %v7983_v32, %v11090_v59 }
 0x218   : > { %5058 = vst [vmem:[%s6975_s4 + $0x1598] sm:$0xff] %v3010_v48  ;;  %5059 = vst [vmem:[%s6975_s4 + $0x15a0] sm:$0xff] %v3011_v53  ;;  %v11210_v43 = vld [vmem:[%s6889_s15 + $0x1710] sm:$0xff]  ;;  %v11213_v44 = vld [vmem:[%s6889_s15 + $0x1718] sm:$0xff]  ;;  %v3038_v48 = vadd.f32 %v7983_v32, %v11093_v60  ;;  %v3039_v53 = vadd.f32 %v7983_v32, %v11108_v1 }
 0x219   : > { %5060 = vst [vmem:[%s6975_s4 + $0x15a8] sm:$0xff] %v3012_v54  ;;  %5061 = vst [vmem:[%s6975_s4 + $0x15b0] sm:$0xff] %v3013_v55  ;;  %v11228_v49 = vld [vmem:[%s6889_s15 + $0x1720] sm:$0xff]  ;;  %v11231_v50 = vld [vmem:[%s6889_s15 + $0x1728] sm:$0xff]  ;;  %v3040_v54 = vadd.f32 %v7983_v32, %v11111_v2  ;;  %v3041_v55 = vadd.f32 %v7983_v32, %v11114_v3 }
 0x21a   : > { %5062 = vst [vmem:[%s6975_s4 + $0x15b8] sm:$0xff] %v3014_v56  ;;  %5063 = vst [vmem:[%s6975_s4 + $0x15c0] sm:$0xff] %v3015_v61  ;;  %v11234_v51 = vld [vmem:[%s6889_s15 + $0x1730] sm:$0xff]  ;;  %v11237_v52 = vld [vmem:[%s6889_s15 + $0x1738] sm:$0xff]  ;;  %v3042_v56 = vadd.f32 %v7983_v32, %v11117_v4  ;;  %v3043_v61 = vadd.f32 %v7983_v32, %v11132_v11 }
 0x21b   : > { %5064 = vst [vmem:[%s6975_s4 + $0x15c8] sm:$0xff] %v3016_v62  ;;  %5065 = vst [vmem:[%s6975_s4 + $0x15d0] sm:$0xff] %v3017_v63  ;;  %v11252_v57 = vld [vmem:[%s6889_s15 + $0x1740] sm:$0xff]  ;;  %v11255_v58 = vld [vmem:[%s6889_s15 + $0x1748] sm:$0xff]  ;;  %v3044_v62 = vadd.f32 %v7983_v32, %v11135_v12  ;;  %v3045_v63 = vadd.f32 %v7983_v32, %v11138_v14 }
 0x21c   : > { %5066 = vst [vmem:[%s6975_s4 + $0x15d8] sm:$0xff] %v3018_v0  ;;  %5067 = vst [vmem:[%s6975_s4 + $0x15e0] sm:$0xff] %v3019_v5  ;;  %v11258_v59 = vld [vmem:[%s6889_s15 + $0x1750] sm:$0xff]  ;;  %v11261_v60 = vld [vmem:[%s6889_s15 + $0x1758] sm:$0xff]  ;;  %v3046_v0 = vadd.f32 %v7983_v32, %v11141_v15  ;;  %v3047_v5 = vadd.f32 %v7983_v32, %v11156_v22 }
 0x21d   : > { %5068 = vst [vmem:[%s6975_s4 + $0x15e8] sm:$0xff] %v3020_v7  ;;  %5069 = vst [vmem:[%s6975_s4 + $0x15f0] sm:$0xff] %v3021_v8  ;;  %v11276_v1 = vld [vmem:[%s6889_s15 + $0x1760] sm:$0xff]  ;;  %v11279_v2 = vld [vmem:[%s6889_s15 + $0x1768] sm:$0xff]  ;;  %v3048_v7 = vadd.f32 %v7983_v32, %v11159_v23  ;;  %v3049_v8 = vadd.f32 %v7983_v32, %v11162_v24 }
 0x21e   : > { %5070 = vst [vmem:[%s6975_s4 + $0x15f8] sm:$0xff] %v3022_v10  ;;  %5071 = vst [vmem:[%s6975_s4 + $0x1600] sm:$0xff] %v3023_v16  ;;  %v11282_v3 = vld [vmem:[%s6889_s15 + $0x1770] sm:$0xff]  ;;  %v11285_v4 = vld [vmem:[%s6889_s15 + $0x1778] sm:$0xff]  ;;  %v3050_v10 = vadd.f32 %v7983_v32, %v11165_v26  ;;  %v3051_v16 = vadd.f32 %v7983_v32, %v11180_v31 }
 0x21f   : > { %5072 = vst [vmem:[%s6975_s4 + $0x1608] sm:$0xff] %v3024_v18  ;;  %5073 = vst [vmem:[%s6975_s4 + $0x1610] sm:$0xff] %v3025_v20  ;;  %v11300_v11 = vld [vmem:[%s6889_s15 + $0x1780] sm:$0xff]  ;;  %v11303_v12 = vld [vmem:[%s6889_s15 + $0x1788] sm:$0xff]  ;;  %v3052_v18 = vadd.f32 %v7983_v32, %v11183_v33  ;;  %v3053_v20 = vadd.f32 %v7983_v32, %v11186_v34 }
 0x220   : > { %5074 = vst [vmem:[%s6975_s4 + $0x1618] sm:$0xff] %v3026_v21  ;;  %5075 = vst [vmem:[%s6975_s4 + $0x1620] sm:$0xff] %v3027_v27  ;;  %v11306_v14 = vld [vmem:[%s6889_s15 + $0x1790] sm:$0xff]  ;;  %v11309_v15 = vld [vmem:[%s6889_s15 + $0x1798] sm:$0xff]  ;;  %v3054_v21 = vadd.f32 %v7983_v32, %v11189_v35  ;;  %v3055_v27 = vadd.f32 %v8177_v40, %v11204_v41 }
 0x221   : > { %5076 = vst [vmem:[%s6975_s4 + $0x1628] sm:$0xff] %v3028_v28  ;;  %5077 = vst [vmem:[%s6975_s4 + $0x1630] sm:$0xff] %v3029_v29  ;;  %v11324_v22 = vld [vmem:[%s6889_s15 + $0x17a0] sm:$0xff]  ;;  %v11327_v23 = vld [vmem:[%s6889_s15 + $0x17a8] sm:$0xff]  ;;  %v3056_v28 = vadd.f32 %v8177_v40, %v11207_v42  ;;  %v3057_v29 = vadd.f32 %v8177_v40, %v11210_v43 }
 0x222   : > { %5078 = vst [vmem:[%s6975_s4 + $0x1638] sm:$0xff] %v3030_v30  ;;  %5079 = vst [vmem:[%s6975_s4 + $0x1640] sm:$0xff] %v3031_v36  ;;  %v11330_v24 = vld [vmem:[%s6889_s15 + $0x17b0] sm:$0xff]  ;;  %v11333_v26 = vld [vmem:[%s6889_s15 + $0x17b8] sm:$0xff]  ;;  %v3058_v30 = vadd.f32 %v8177_v40, %v11213_v44  ;;  %v3059_v36 = vadd.f32 %v8177_v40, %v11228_v49 }
 0x223   : > { %5080 = vst [vmem:[%s6975_s4 + $0x1648] sm:$0xff] %v3032_v37  ;;  %5081 = vst [vmem:[%s6975_s4 + $0x1650] sm:$0xff] %v3033_v38  ;;  %v11348_v31 = vld [vmem:[%s6889_s15 + $0x17c0] sm:$0xff]  ;;  %v11351_v33 = vld [vmem:[%s6889_s15 + $0x17c8] sm:$0xff]  ;;  %v3060_v37 = vadd.f32 %v8177_v40, %v11231_v50  ;;  %v3061_v38 = vadd.f32 %v8177_v40, %v11234_v51 }
 0x224   : > { %5082 = vst [vmem:[%s6975_s4 + $0x1658] sm:$0xff] %v3034_v39  ;;  %5083 = vst [vmem:[%s6975_s4 + $0x1660] sm:$0xff] %v3035_v45  ;;  %v11354_v34 = vld [vmem:[%s6889_s15 + $0x17d0] sm:$0xff]  ;;  %v11357_v35 = vld [vmem:[%s6889_s15 + $0x17d8] sm:$0xff]  ;;  %v3062_v39 = vadd.f32 %v8177_v40, %v11237_v52  ;;  %v3063_v45 = vadd.f32 %v8177_v40, %v11252_v57 }
 0x225   : > { %5084 = vst [vmem:[%s6975_s4 + $0x1668] sm:$0xff] %v3036_v46  ;;  %5085 = vst [vmem:[%s6975_s4 + $0x1670] sm:$0xff] %v3037_v47  ;;  %v11372_v41 = vld [vmem:[%s6889_s15 + $0x17e0] sm:$0xff]  ;;  %v11375_v42 = vld [vmem:[%s6889_s15 + $0x17e8] sm:$0xff]  ;;  %v3064_v46 = vadd.f32 %v8177_v40, %v11255_v58  ;;  %v3065_v47 = vadd.f32 %v8177_v40, %v11258_v59 }
 0x226   : > { %5086 = vst [vmem:[%s6975_s4 + $0x1678] sm:$0xff] %v3038_v48  ;;  %5087 = vst [vmem:[%s6975_s4 + $0x1680] sm:$0xff] %v3039_v53  ;;  %v11378_v43 = vld [vmem:[%s6889_s15 + $0x17f0] sm:$0xff]  ;;  %v11381_v44 = vld [vmem:[%s6889_s15 + $0x17f8] sm:$0xff]  ;;  %v3066_v48 = vadd.f32 %v8177_v40, %v11261_v60  ;;  %v3067_v53 = vadd.f32 %v8177_v40, %v11276_v1 }
 0x227   : > { %5088 = vst [vmem:[%s6975_s4 + $0x1688] sm:$0xff] %v3040_v54  ;;  %5089 = vst [vmem:[%s6975_s4 + $0x1690] sm:$0xff] %v3041_v55  ;;  %v11396_v49 = vld [vmem:[%s6889_s15 + $0x1800] sm:$0xff]  ;;  %v11399_v50 = vld [vmem:[%s6889_s15 + $0x1808] sm:$0xff]  ;;  %v3068_v54 = vadd.f32 %v8177_v40, %v11279_v2  ;;  %v3069_v55 = vadd.f32 %v8177_v40, %v11282_v3 }
 0x228   : > { %5090 = vst [vmem:[%s6975_s4 + $0x1698] sm:$0xff] %v3042_v56  ;;  %5091 = vst [vmem:[%s6975_s4 + $0x16a0] sm:$0xff] %v3043_v61  ;;  %v11402_v51 = vld [vmem:[%s6889_s15 + $0x1810] sm:$0xff]  ;;  %v11405_v52 = vld [vmem:[%s6889_s15 + $0x1818] sm:$0xff]  ;;  %v3070_v56 = vadd.f32 %v8177_v40, %v11285_v4  ;;  %v3071_v61 = vadd.f32 %v8177_v40, %v11300_v11 }
 0x229   : > { %5092 = vst [vmem:[%s6975_s4 + $0x16a8] sm:$0xff] %v3044_v62  ;;  %5093 = vst [vmem:[%s6975_s4 + $0x16b0] sm:$0xff] %v3045_v63  ;;  %v11420_v57 = vld [vmem:[%s6889_s15 + $0x1820] sm:$0xff]  ;;  %v11423_v58 = vld [vmem:[%s6889_s15 + $0x1828] sm:$0xff]  ;;  %v3072_v62 = vadd.f32 %v8177_v40, %v11303_v12  ;;  %v3073_v63 = vadd.f32 %v8177_v40, %v11306_v14 }
 0x22a   : > { %5094 = vst [vmem:[%s6975_s4 + $0x16b8] sm:$0xff] %v3046_v0  ;;  %5095 = vst [vmem:[%s6975_s4 + $0x16c0] sm:$0xff] %v3047_v5  ;;  %v11426_v59 = vld [vmem:[%s6889_s15 + $0x1830] sm:$0xff]  ;;  %v11429_v60 = vld [vmem:[%s6889_s15 + $0x1838] sm:$0xff]  ;;  %v3074_v0 = vadd.f32 %v8177_v40, %v11309_v15  ;;  %v3075_v5 = vadd.f32 %v8177_v40, %v11324_v22 }
 0x22b   : > { %5096 = vst [vmem:[%s6975_s4 + $0x16c8] sm:$0xff] %v3048_v7  ;;  %5097 = vst [vmem:[%s6975_s4 + $0x16d0] sm:$0xff] %v3049_v8  ;;  %v11444_v1 = vld [vmem:[%s6889_s15 + $0x1840] sm:$0xff]  ;;  %v11447_v2 = vld [vmem:[%s6889_s15 + $0x1848] sm:$0xff]  ;;  %v3076_v7 = vadd.f32 %v8177_v40, %v11327_v23  ;;  %v3077_v8 = vadd.f32 %v8177_v40, %v11330_v24 }
 0x22c   : > { %5098 = vst [vmem:[%s6975_s4 + $0x16d8] sm:$0xff] %v3050_v10  ;;  %5099 = vst [vmem:[%s6975_s4 + $0x16e0] sm:$0xff] %v3051_v16  ;;  %v11450_v3 = vld [vmem:[%s6889_s15 + $0x1850] sm:$0xff]  ;;  %v11453_v4 = vld [vmem:[%s6889_s15 + $0x1858] sm:$0xff]  ;;  %v3078_v10 = vadd.f32 %v8177_v40, %v11333_v26  ;;  %v3079_v16 = vadd.f32 %v8177_v40, %v11348_v31 }
 0x22d   : > { %5100 = vst [vmem:[%s6975_s4 + $0x16e8] sm:$0xff] %v3052_v18  ;;  %5101 = vst [vmem:[%s6975_s4 + $0x16f0] sm:$0xff] %v3053_v20  ;;  %v11468_v11 = vld [vmem:[%s6889_s15 + $0x1860] sm:$0xff]  ;;  %v11471_v12 = vld [vmem:[%s6889_s15 + $0x1868] sm:$0xff]  ;;  %v3080_v18 = vadd.f32 %v8177_v40, %v11351_v33  ;;  %v3081_v20 = vadd.f32 %v8177_v40, %v11354_v34 }
 0x22e   : > { %5102 = vst [vmem:[%s6975_s4 + $0x16f8] sm:$0xff] %v3054_v21  ;;  %5103 = vst [vmem:[%s6975_s4 + $0x1700] sm:$0xff] %v3055_v27  ;;  %v11474_v14 = vld [vmem:[%s6889_s15 + $0x1870] sm:$0xff]  ;;  %v11477_v15 = vld [vmem:[%s6889_s15 + $0x1878] sm:$0xff]  ;;  %v3082_v21 = vadd.f32 %v8177_v40, %v11357_v35  ;;  %v3083_v27 = vadd.f32 %v8177_v40, %v11372_v41 }
 0x22f   : > { %5104 = vst [vmem:[%s6975_s4 + $0x1708] sm:$0xff] %v3056_v28  ;;  %5105 = vst [vmem:[%s6975_s4 + $0x1710] sm:$0xff] %v3057_v29  ;;  %v11492_v22 = vld [vmem:[%s6889_s15 + $0x1880] sm:$0xff]  ;;  %v11495_v23 = vld [vmem:[%s6889_s15 + $0x1888] sm:$0xff]  ;;  %v3084_v28 = vadd.f32 %v8177_v40, %v11375_v42  ;;  %v3085_v29 = vadd.f32 %v8177_v40, %v11378_v43 }
 0x230   : > { %5106 = vst [vmem:[%s6975_s4 + $0x1718] sm:$0xff] %v3058_v30  ;;  %5107 = vst [vmem:[%s6975_s4 + $0x1720] sm:$0xff] %v3059_v36  ;;  %v11498_v24 = vld [vmem:[%s6889_s15 + $0x1890] sm:$0xff]  ;;  %v11501_v26 = vld [vmem:[%s6889_s15 + $0x1898] sm:$0xff]  ;;  %v3086_v30 = vadd.f32 %v8177_v40, %v11381_v44  ;;  %v3087_v36 = vadd.f32 %v6927_v17, %v11396_v49 }
 0x231   : > { %5108 = vst [vmem:[%s6975_s4 + $0x1728] sm:$0xff] %v3060_v37  ;;  %5109 = vst [vmem:[%s6975_s4 + $0x1730] sm:$0xff] %v3061_v38  ;;  %v11516_v31 = vld [vmem:[%s6889_s15 + $0x18a0] sm:$0xff]  ;;  %v11519_v33 = vld [vmem:[%s6889_s15 + $0x18a8] sm:$0xff]  ;;  %v3088_v37 = vadd.f32 %v6927_v17, %v11399_v50  ;;  %v3089_v38 = vadd.f32 %v6927_v17, %v11402_v51 }
 0x232   : > { %5110 = vst [vmem:[%s6975_s4 + $0x1738] sm:$0xff] %v3062_v39  ;;  %5111 = vst [vmem:[%s6975_s4 + $0x1740] sm:$0xff] %v3063_v45  ;;  %v11522_v34 = vld [vmem:[%s6889_s15 + $0x18b0] sm:$0xff]  ;;  %v11525_v35 = vld [vmem:[%s6889_s15 + $0x18b8] sm:$0xff]  ;;  %v3090_v39 = vadd.f32 %v6927_v17, %v11405_v52  ;;  %v3091_v45 = vadd.f32 %v6927_v17, %v11420_v57 }
 0x233   : > { %5112 = vst [vmem:[%s6975_s4 + $0x1748] sm:$0xff] %v3064_v46  ;;  %5113 = vst [vmem:[%s6975_s4 + $0x1750] sm:$0xff] %v3065_v47  ;;  %v11540_v41 = vld [vmem:[%s6889_s15 + $0x18c0] sm:$0xff]  ;;  %v11543_v42 = vld [vmem:[%s6889_s15 + $0x18c8] sm:$0xff]  ;;  %v3092_v46 = vadd.f32 %v6927_v17, %v11423_v58  ;;  %v3093_v47 = vadd.f32 %v6927_v17, %v11426_v59 }
 0x234   : > { %5114 = vst [vmem:[%s6975_s4 + $0x1758] sm:$0xff] %v3066_v48  ;;  %5115 = vst [vmem:[%s6975_s4 + $0x1760] sm:$0xff] %v3067_v53  ;;  %v11546_v43 = vld [vmem:[%s6889_s15 + $0x18d0] sm:$0xff]  ;;  %v11549_v44 = vld [vmem:[%s6889_s15 + $0x18d8] sm:$0xff]  ;;  %v3094_v48 = vadd.f32 %v6927_v17, %v11429_v60  ;;  %v3095_v53 = vadd.f32 %v6927_v17, %v11444_v1 }
 0x235   : > { %5116 = vst [vmem:[%s6975_s4 + $0x1768] sm:$0xff] %v3068_v54  ;;  %5117 = vst [vmem:[%s6975_s4 + $0x1770] sm:$0xff] %v3069_v55  ;;  %v11564_v49 = vld [vmem:[%s6889_s15 + $0x18e0] sm:$0xff]  ;;  %v11567_v50 = vld [vmem:[%s6889_s15 + $0x18e8] sm:$0xff]  ;;  %v3096_v54 = vadd.f32 %v6927_v17, %v11447_v2  ;;  %v3097_v55 = vadd.f32 %v6927_v17, %v11450_v3 }
 0x236   : > { %5118 = vst [vmem:[%s6975_s4 + $0x1778] sm:$0xff] %v3070_v56  ;;  %5119 = vst [vmem:[%s6975_s4 + $0x1780] sm:$0xff] %v3071_v61  ;;  %v11570_v51 = vld [vmem:[%s6889_s15 + $0x18f0] sm:$0xff]  ;;  %v11573_v52 = vld [vmem:[%s6889_s15 + $0x18f8] sm:$0xff]  ;;  %v3098_v56 = vadd.f32 %v6927_v17, %v11453_v4  ;;  %v3099_v61 = vadd.f32 %v6927_v17, %v11468_v11 }
 0x237   : > { %5120 = vst [vmem:[%s6975_s4 + $0x1788] sm:$0xff] %v3072_v62  ;;  %5121 = vst [vmem:[%s6975_s4 + $0x1790] sm:$0xff] %v3073_v63  ;;  %v11588_v57 = vld [vmem:[%s6889_s15 + $0x1900] sm:$0xff]  ;;  %v11591_v58 = vld [vmem:[%s6889_s15 + $0x1908] sm:$0xff]  ;;  %v3100_v62 = vadd.f32 %v6927_v17, %v11471_v12  ;;  %v3101_v63 = vadd.f32 %v6927_v17, %v11474_v14 }
 0x238   : > { %5122 = vst [vmem:[%s6975_s4 + $0x1798] sm:$0xff] %v3074_v0  ;;  %5123 = vst [vmem:[%s6975_s4 + $0x17a0] sm:$0xff] %v3075_v5  ;;  %v11594_v59 = vld [vmem:[%s6889_s15 + $0x1910] sm:$0xff]  ;;  %v11597_v60 = vld [vmem:[%s6889_s15 + $0x1918] sm:$0xff]  ;;  %v3102_v0 = vadd.f32 %v6927_v17, %v11477_v15  ;;  %v3103_v5 = vadd.f32 %v6927_v17, %v11492_v22 }
 0x239   : > { %5124 = vst [vmem:[%s6975_s4 + $0x17a8] sm:$0xff] %v3076_v7  ;;  %5125 = vst [vmem:[%s6975_s4 + $0x17b0] sm:$0xff] %v3077_v8  ;;  %v11612_v1 = vld [vmem:[%s6889_s15 + $0x1920] sm:$0xff]  ;;  %v11615_v2 = vld [vmem:[%s6889_s15 + $0x1928] sm:$0xff]  ;;  %v3104_v7 = vadd.f32 %v6927_v17, %v11495_v23  ;;  %v3105_v8 = vadd.f32 %v6927_v17, %v11498_v24 }
 0x23a   : > { %5126 = vst [vmem:[%s6975_s4 + $0x17b8] sm:$0xff] %v3078_v10  ;;  %5127 = vst [vmem:[%s6975_s4 + $0x17c0] sm:$0xff] %v3079_v16  ;;  %v11618_v3 = vld [vmem:[%s6889_s15 + $0x1930] sm:$0xff]  ;;  %v11621_v4 = vld [vmem:[%s6889_s15 + $0x1938] sm:$0xff]  ;;  %v3106_v10 = vadd.f32 %v6927_v17, %v11501_v26  ;;  %v3107_v16 = vadd.f32 %v6927_v17, %v11516_v31 }
 0x23b   : > { %5128 = vst [vmem:[%s6975_s4 + $0x17c8] sm:$0xff] %v3080_v18  ;;  %5129 = vst [vmem:[%s6975_s4 + $0x17d0] sm:$0xff] %v3081_v20  ;;  %v11636_v11 = vld [vmem:[%s6889_s15 + $0x1940] sm:$0xff]  ;;  %v11639_v12 = vld [vmem:[%s6889_s15 + $0x1948] sm:$0xff]  ;;  %v3108_v18 = vadd.f32 %v6927_v17, %v11519_v33  ;;  %v3109_v20 = vadd.f32 %v6927_v17, %v11522_v34 }
 0x23c   : > { %5130 = vst [vmem:[%s6975_s4 + $0x17d8] sm:$0xff] %v3082_v21  ;;  %5131 = vst [vmem:[%s6975_s4 + $0x17e0] sm:$0xff] %v3083_v27  ;;  %v11642_v14 = vld [vmem:[%s6889_s15 + $0x1950] sm:$0xff]  ;;  %v11645_v15 = vld [vmem:[%s6889_s15 + $0x1958] sm:$0xff]  ;;  %v3110_v21 = vadd.f32 %v6927_v17, %v11525_v35  ;;  %v3111_v27 = vadd.f32 %v6927_v17, %v11540_v41 }
 0x23d   : > { %5132 = vst [vmem:[%s6975_s4 + $0x17e8] sm:$0xff] %v3084_v28  ;;  %5133 = vst [vmem:[%s6975_s4 + $0x17f0] sm:$0xff] %v3085_v29  ;;  %v11660_v22 = vld [vmem:[%s6889_s15 + $0x1960] sm:$0xff]  ;;  %v11663_v23 = vld [vmem:[%s6889_s15 + $0x1968] sm:$0xff]  ;;  %v3112_v28 = vadd.f32 %v6927_v17, %v11543_v42  ;;  %v3113_v29 = vadd.f32 %v6927_v17, %v11546_v43 }
 0x23e   : > { %5134 = vst [vmem:[%s6975_s4 + $0x17f8] sm:$0xff] %v3086_v30  ;;  %5135 = vst [vmem:[%s6975_s4 + $0x1800] sm:$0xff] %v3087_v36  ;;  %v11666_v24 = vld [vmem:[%s6889_s15 + $0x1970] sm:$0xff]  ;;  %v11669_v26 = vld [vmem:[%s6889_s15 + $0x1978] sm:$0xff]  ;;  %v3114_v30 = vadd.f32 %v6927_v17, %v11549_v44  ;;  %v3115_v36 = vadd.f32 %v6927_v17, %v11564_v49 }
 0x23f   : > { %5136 = vst [vmem:[%s6975_s4 + $0x1808] sm:$0xff] %v3088_v37  ;;  %5137 = vst [vmem:[%s6975_s4 + $0x1810] sm:$0xff] %v3089_v38  ;;  %v11684_v31 = vld [vmem:[%s6889_s15 + $0x1980] sm:$0xff]  ;;  %v11687_v33 = vld [vmem:[%s6889_s15 + $0x1988] sm:$0xff]  ;;  %v3116_v37 = vadd.f32 %v6927_v17, %v11567_v50  ;;  %v3117_v38 = vadd.f32 %v6927_v17, %v11570_v51 }
 0x240   : > { %5138 = vst [vmem:[%s6975_s4 + $0x1818] sm:$0xff] %v3090_v39  ;;  %5139 = vst [vmem:[%s6975_s4 + $0x1820] sm:$0xff] %v3091_v45  ;;  %v11690_v34 = vld [vmem:[%s6889_s15 + $0x1990] sm:$0xff]  ;;  %v11693_v35 = vld [vmem:[%s6889_s15 + $0x1998] sm:$0xff]  ;;  %v3118_v39 = vadd.f32 %v6927_v17, %v11573_v52  ;;  %v3119_v45 = vadd.f32 %v7021_v6, %v11588_v57 }
 0x241   : > { %5140 = vst [vmem:[%s6975_s4 + $0x1828] sm:$0xff] %v3092_v46  ;;  %5141 = vst [vmem:[%s6975_s4 + $0x1830] sm:$0xff] %v3093_v47  ;;  %v11708_v41 = vld [vmem:[%s6889_s15 + $0x19a0] sm:$0xff]  ;;  %v11711_v42 = vld [vmem:[%s6889_s15 + $0x19a8] sm:$0xff]  ;;  %v3120_v46 = vadd.f32 %v7021_v6, %v11591_v58  ;;  %v3121_v47 = vadd.f32 %v7021_v6, %v11594_v59 }
 0x242   : > { %5142 = vst [vmem:[%s6975_s4 + $0x1838] sm:$0xff] %v3094_v48  ;;  %5143 = vst [vmem:[%s6975_s4 + $0x1840] sm:$0xff] %v3095_v53  ;;  %v11714_v43 = vld [vmem:[%s6889_s15 + $0x19b0] sm:$0xff]  ;;  %v11717_v44 = vld [vmem:[%s6889_s15 + $0x19b8] sm:$0xff]  ;;  %v3122_v48 = vadd.f32 %v7021_v6, %v11597_v60  ;;  %v3123_v53 = vadd.f32 %v7021_v6, %v11612_v1 }
 0x243   : > { %5144 = vst [vmem:[%s6975_s4 + $0x1848] sm:$0xff] %v3096_v54  ;;  %5145 = vst [vmem:[%s6975_s4 + $0x1850] sm:$0xff] %v3097_v55  ;;  %v11732_v49 = vld [vmem:[%s6889_s15 + $0x19c0] sm:$0xff]  ;;  %v11735_v50 = vld [vmem:[%s6889_s15 + $0x19c8] sm:$0xff]  ;;  %v3124_v54 = vadd.f32 %v7021_v6, %v11615_v2  ;;  %v3125_v55 = vadd.f32 %v7021_v6, %v11618_v3 }
 0x244   : > { %5146 = vst [vmem:[%s6975_s4 + $0x1858] sm:$0xff] %v3098_v56  ;;  %5147 = vst [vmem:[%s6975_s4 + $0x1860] sm:$0xff] %v3099_v61  ;;  %v11738_v51 = vld [vmem:[%s6889_s15 + $0x19d0] sm:$0xff]  ;;  %v11741_v52 = vld [vmem:[%s6889_s15 + $0x19d8] sm:$0xff]  ;;  %v3126_v56 = vadd.f32 %v7021_v6, %v11621_v4  ;;  %v3127_v61 = vadd.f32 %v7021_v6, %v11636_v11 }
 0x245   : > { %5148 = vst [vmem:[%s6975_s4 + $0x1868] sm:$0xff] %v3100_v62  ;;  %5149 = vst [vmem:[%s6975_s4 + $0x1870] sm:$0xff] %v3101_v63  ;;  %v11756_v57 = vld [vmem:[%s6889_s15 + $0x19e0] sm:$0xff]  ;;  %v11759_v58 = vld [vmem:[%s6889_s15 + $0x19e8] sm:$0xff]  ;;  %v3128_v62 = vadd.f32 %v7021_v6, %v11639_v12  ;;  %v3129_v63 = vadd.f32 %v7021_v6, %v11642_v14 }
 0x246   : > { %5150 = vst [vmem:[%s6975_s4 + $0x1878] sm:$0xff] %v3102_v0  ;;  %5151 = vst [vmem:[%s6975_s4 + $0x1880] sm:$0xff] %v3103_v5  ;;  %v11762_v59 = vld [vmem:[%s6889_s15 + $0x19f0] sm:$0xff]  ;;  %v11765_v60 = vld [vmem:[%s6889_s15 + $0x19f8] sm:$0xff]  ;;  %v3130_v0 = vadd.f32 %v7021_v6, %v11645_v15  ;;  %v3131_v5 = vadd.f32 %v7021_v6, %v11660_v22 }
 0x247   : > { %5152 = vst [vmem:[%s6975_s4 + $0x1888] sm:$0xff] %v3104_v7  ;;  %5153 = vst [vmem:[%s6975_s4 + $0x1890] sm:$0xff] %v3105_v8  ;;  %v11780_v1 = vld [vmem:[%s6889_s15 + $0x1a00] sm:$0xff]  ;;  %v11783_v2 = vld [vmem:[%s6889_s15 + $0x1a08] sm:$0xff]  ;;  %v3132_v7 = vadd.f32 %v7021_v6, %v11663_v23  ;;  %v3133_v8 = vadd.f32 %v7021_v6, %v11666_v24 }
 0x248   : > { %5154 = vst [vmem:[%s6975_s4 + $0x1898] sm:$0xff] %v3106_v10  ;;  %5155 = vst [vmem:[%s6975_s4 + $0x18a0] sm:$0xff] %v3107_v16  ;;  %v11786_v3 = vld [vmem:[%s6889_s15 + $0x1a10] sm:$0xff]  ;;  %v11789_v4 = vld [vmem:[%s6889_s15 + $0x1a18] sm:$0xff]  ;;  %v3134_v10 = vadd.f32 %v7021_v6, %v11669_v26  ;;  %v3135_v16 = vadd.f32 %v7021_v6, %v11684_v31 }
 0x249   : > { %5156 = vst [vmem:[%s6975_s4 + $0x18a8] sm:$0xff] %v3108_v18  ;;  %5157 = vst [vmem:[%s6975_s4 + $0x18b0] sm:$0xff] %v3109_v20  ;;  %v11804_v11 = vld [vmem:[%s6889_s15 + $0x1a20] sm:$0xff]  ;;  %v11807_v12 = vld [vmem:[%s6889_s15 + $0x1a28] sm:$0xff]  ;;  %v3136_v18 = vadd.f32 %v7021_v6, %v11687_v33  ;;  %v3137_v20 = vadd.f32 %v7021_v6, %v11690_v34 }
 0x24a   : > { %5158 = vst [vmem:[%s6975_s4 + $0x18b8] sm:$0xff] %v3110_v21  ;;  %5159 = vst [vmem:[%s6975_s4 + $0x18c0] sm:$0xff] %v3111_v27  ;;  %v11810_v14 = vld [vmem:[%s6889_s15 + $0x1a30] sm:$0xff]  ;;  %v11813_v15 = vld [vmem:[%s6889_s15 + $0x1a38] sm:$0xff]  ;;  %v3138_v21 = vadd.f32 %v7021_v6, %v11693_v35  ;;  %v3139_v27 = vadd.f32 %v7021_v6, %v11708_v41 }
 0x24b   : > { %5160 = vst [vmem:[%s6975_s4 + $0x18c8] sm:$0xff] %v3112_v28  ;;  %5161 = vst [vmem:[%s6975_s4 + $0x18d0] sm:$0xff] %v3113_v29  ;;  %v11828_v22 = vld [vmem:[%s6889_s15 + $0x1a40] sm:$0xff]  ;;  %v11831_v23 = vld [vmem:[%s6889_s15 + $0x1a48] sm:$0xff]  ;;  %v3140_v28 = vadd.f32 %v7021_v6, %v11711_v42  ;;  %v3141_v29 = vadd.f32 %v7021_v6, %v11714_v43 }
 0x24c   : > { %5162 = vst [vmem:[%s6975_s4 + $0x18d8] sm:$0xff] %v3114_v30  ;;  %5163 = vst [vmem:[%s6975_s4 + $0x18e0] sm:$0xff] %v3115_v36  ;;  %v11834_v24 = vld [vmem:[%s6889_s15 + $0x1a50] sm:$0xff]  ;;  %v11837_v26 = vld [vmem:[%s6889_s15 + $0x1a58] sm:$0xff]  ;;  %v3142_v30 = vadd.f32 %v7021_v6, %v11717_v44  ;;  %v3143_v36 = vadd.f32 %v7021_v6, %v11732_v49 }
 0x24d   : > { %5164 = vst [vmem:[%s6975_s4 + $0x18e8] sm:$0xff] %v3116_v37  ;;  %5165 = vst [vmem:[%s6975_s4 + $0x18f0] sm:$0xff] %v3117_v38  ;;  %v11852_v31 = vld [vmem:[%s6889_s15 + $0x1a60] sm:$0xff]  ;;  %v11855_v33 = vld [vmem:[%s6889_s15 + $0x1a68] sm:$0xff]  ;;  %v3144_v37 = vadd.f32 %v7021_v6, %v11735_v50  ;;  %v3145_v38 = vadd.f32 %v7021_v6, %v11738_v51 }
 0x24e   : > { %5166 = vst [vmem:[%s6975_s4 + $0x18f8] sm:$0xff] %v3118_v39  ;;  %5167 = vst [vmem:[%s6975_s4 + $0x1900] sm:$0xff] %v3119_v45  ;;  %v11858_v34 = vld [vmem:[%s6889_s15 + $0x1a70] sm:$0xff]  ;;  %v11861_v35 = vld [vmem:[%s6889_s15 + $0x1a78] sm:$0xff]  ;;  %v3146_v39 = vadd.f32 %v7021_v6, %v11741_v52  ;;  %v3147_v45 = vadd.f32 %v7021_v6, %v11756_v57 }
 0x24f   : > { %5168 = vst [vmem:[%s6975_s4 + $0x1908] sm:$0xff] %v3120_v46  ;;  %5169 = vst [vmem:[%s6975_s4 + $0x1910] sm:$0xff] %v3121_v47  ;;  %v11876_v41 = vld [vmem:[%s6889_s15 + $0x1a80] sm:$0xff]  ;;  %v11879_v42 = vld [vmem:[%s6889_s15 + $0x1a88] sm:$0xff]  ;;  %v3148_v46 = vadd.f32 %v7021_v6, %v11759_v58  ;;  %v3149_v47 = vadd.f32 %v7021_v6, %v11762_v59 }
 0x250   : > { %5170 = vst [vmem:[%s6975_s4 + $0x1918] sm:$0xff] %v3122_v48  ;;  %5171 = vst [vmem:[%s6975_s4 + $0x1920] sm:$0xff] %v3123_v53  ;;  %v11882_v43 = vld [vmem:[%s6889_s15 + $0x1a90] sm:$0xff]  ;;  %v11885_v44 = vld [vmem:[%s6889_s15 + $0x1a98] sm:$0xff]  ;;  %v3150_v48 = vadd.f32 %v7021_v6, %v11765_v60  ;;  %v3151_v53 = vadd.f32 %v7207_v9, %v11780_v1 }
 0x251   : > { %5172 = vst [vmem:[%s6975_s4 + $0x1928] sm:$0xff] %v3124_v54  ;;  %5173 = vst [vmem:[%s6975_s4 + $0x1930] sm:$0xff] %v3125_v55  ;;  %v11900_v49 = vld [vmem:[%s6889_s15 + $0x1aa0] sm:$0xff]  ;;  %v11903_v50 = vld [vmem:[%s6889_s15 + $0x1aa8] sm:$0xff]  ;;  %v3152_v54 = vadd.f32 %v7207_v9, %v11783_v2  ;;  %v3153_v55 = vadd.f32 %v7207_v9, %v11786_v3 }
 0x252   : > { %5174 = vst [vmem:[%s6975_s4 + $0x1938] sm:$0xff] %v3126_v56  ;;  %5175 = vst [vmem:[%s6975_s4 + $0x1940] sm:$0xff] %v3127_v61  ;;  %v11906_v51 = vld [vmem:[%s6889_s15 + $0x1ab0] sm:$0xff]  ;;  %v11909_v52 = vld [vmem:[%s6889_s15 + $0x1ab8] sm:$0xff]  ;;  %v3154_v56 = vadd.f32 %v7207_v9, %v11789_v4  ;;  %v3155_v61 = vadd.f32 %v7207_v9, %v11804_v11 }
 0x253   : > { %5176 = vst [vmem:[%s6975_s4 + $0x1948] sm:$0xff] %v3128_v62  ;;  %5177 = vst [vmem:[%s6975_s4 + $0x1950] sm:$0xff] %v3129_v63  ;;  %v11924_v57 = vld [vmem:[%s6889_s15 + $0x1ac0] sm:$0xff]  ;;  %v11927_v58 = vld [vmem:[%s6889_s15 + $0x1ac8] sm:$0xff]  ;;  %v3156_v62 = vadd.f32 %v7207_v9, %v11807_v12  ;;  %v3157_v63 = vadd.f32 %v7207_v9, %v11810_v14 }
 0x254   : > { %5178 = vst [vmem:[%s6975_s4 + $0x1958] sm:$0xff] %v3130_v0  ;;  %5179 = vst [vmem:[%s6975_s4 + $0x1960] sm:$0xff] %v3131_v5  ;;  %v11930_v59 = vld [vmem:[%s6889_s15 + $0x1ad0] sm:$0xff]  ;;  %v11933_v60 = vld [vmem:[%s6889_s15 + $0x1ad8] sm:$0xff]  ;;  %v3158_v0 = vadd.f32 %v7207_v9, %v11813_v15  ;;  %v3159_v5 = vadd.f32 %v7207_v9, %v11828_v22 }
 0x255   : > { %5180 = vst [vmem:[%s6975_s4 + $0x1968] sm:$0xff] %v3132_v7  ;;  %5181 = vst [vmem:[%s6975_s4 + $0x1970] sm:$0xff] %v3133_v8  ;;  %v11948_v1 = vld [vmem:[%s6889_s15 + $0x1ae0] sm:$0xff]  ;;  %v11951_v2 = vld [vmem:[%s6889_s15 + $0x1ae8] sm:$0xff]  ;;  %v3160_v7 = vadd.f32 %v7207_v9, %v11831_v23  ;;  %v3161_v8 = vadd.f32 %v7207_v9, %v11834_v24 }
 0x256   : > { %5182 = vst [vmem:[%s6975_s4 + $0x1978] sm:$0xff] %v3134_v10  ;;  %5183 = vst [vmem:[%s6975_s4 + $0x1980] sm:$0xff] %v3135_v16  ;;  %v11954_v3 = vld [vmem:[%s6889_s15 + $0x1af0] sm:$0xff]  ;;  %v11957_v4 = vld [vmem:[%s6889_s15 + $0x1af8] sm:$0xff]  ;;  %v3162_v10 = vadd.f32 %v7207_v9, %v11837_v26  ;;  %v3163_v16 = vadd.f32 %v7207_v9, %v11852_v31 }
 0x257   : > { %5184 = vst [vmem:[%s6975_s4 + $0x1988] sm:$0xff] %v3136_v18  ;;  %5185 = vst [vmem:[%s6975_s4 + $0x1990] sm:$0xff] %v3137_v20  ;;  %v11972_v11 = vld [vmem:[%s6889_s15 + $0x1b00] sm:$0xff]  ;;  %v11975_v12 = vld [vmem:[%s6889_s15 + $0x1b08] sm:$0xff]  ;;  %v3164_v18 = vadd.f32 %v7207_v9, %v11855_v33  ;;  %v3165_v20 = vadd.f32 %v7207_v9, %v11858_v34 }
 0x258   : > { %5186 = vst [vmem:[%s6975_s4 + $0x1998] sm:$0xff] %v3138_v21  ;;  %5187 = vst [vmem:[%s6975_s4 + $0x19a0] sm:$0xff] %v3139_v27  ;;  %v11978_v14 = vld [vmem:[%s6889_s15 + $0x1b10] sm:$0xff]  ;;  %v11981_v15 = vld [vmem:[%s6889_s15 + $0x1b18] sm:$0xff]  ;;  %v3166_v21 = vadd.f32 %v7207_v9, %v11861_v35  ;;  %v3167_v27 = vadd.f32 %v7207_v9, %v11876_v41 }
 0x259   : > { %5188 = vst [vmem:[%s6975_s4 + $0x19a8] sm:$0xff] %v3140_v28  ;;  %5189 = vst [vmem:[%s6975_s4 + $0x19b0] sm:$0xff] %v3141_v29  ;;  %v11996_v22 = vld [vmem:[%s6889_s15 + $0x1b20] sm:$0xff]  ;;  %v11999_v23 = vld [vmem:[%s6889_s15 + $0x1b28] sm:$0xff]  ;;  %v3168_v28 = vadd.f32 %v7207_v9, %v11879_v42  ;;  %v3169_v29 = vadd.f32 %v7207_v9, %v11882_v43 }
 0x25a   : > { %5190 = vst [vmem:[%s6975_s4 + $0x19b8] sm:$0xff] %v3142_v30  ;;  %5191 = vst [vmem:[%s6975_s4 + $0x19c0] sm:$0xff] %v3143_v36  ;;  %v12002_v24 = vld [vmem:[%s6889_s15 + $0x1b30] sm:$0xff]  ;;  %v12005_v26 = vld [vmem:[%s6889_s15 + $0x1b38] sm:$0xff]  ;;  %v3170_v30 = vadd.f32 %v7207_v9, %v11885_v44  ;;  %v3171_v36 = vadd.f32 %v7207_v9, %v11900_v49 }
 0x25b   : > { %5192 = vst [vmem:[%s6975_s4 + $0x19c8] sm:$0xff] %v3144_v37  ;;  %5193 = vst [vmem:[%s6975_s4 + $0x19d0] sm:$0xff] %v3145_v38  ;;  %v12020_v31 = vld [vmem:[%s6889_s15 + $0x1b40] sm:$0xff]  ;;  %v12023_v33 = vld [vmem:[%s6889_s15 + $0x1b48] sm:$0xff]  ;;  %v3172_v37 = vadd.f32 %v7207_v9, %v11903_v50  ;;  %v3173_v38 = vadd.f32 %v7207_v9, %v11906_v51 }
 0x25c   : > { %5194 = vst [vmem:[%s6975_s4 + $0x19d8] sm:$0xff] %v3146_v39  ;;  %5195 = vst [vmem:[%s6975_s4 + $0x19e0] sm:$0xff] %v3147_v45  ;;  %v12026_v34 = vld [vmem:[%s6889_s15 + $0x1b50] sm:$0xff]  ;;  %v12029_v35 = vld [vmem:[%s6889_s15 + $0x1b58] sm:$0xff]  ;;  %v3174_v39 = vadd.f32 %v7207_v9, %v11909_v52  ;;  %v3175_v45 = vadd.f32 %v7207_v9, %v11924_v57 }
 0x25d   : > { %5196 = vst [vmem:[%s6975_s4 + $0x19e8] sm:$0xff] %v3148_v46  ;;  %5197 = vst [vmem:[%s6975_s4 + $0x19f0] sm:$0xff] %v3149_v47  ;;  %v12044_v41 = vld [vmem:[%s6889_s15 + $0x1b60] sm:$0xff]  ;;  %v12047_v42 = vld [vmem:[%s6889_s15 + $0x1b68] sm:$0xff]  ;;  %v3176_v46 = vadd.f32 %v7207_v9, %v11927_v58  ;;  %v3177_v47 = vadd.f32 %v7207_v9, %v11930_v59 }
 0x25e   : > { %5198 = vst [vmem:[%s6975_s4 + $0x19f8] sm:$0xff] %v3150_v48  ;;  %5199 = vst [vmem:[%s6975_s4 + $0x1a00] sm:$0xff] %v3151_v53  ;;  %v12050_v43 = vld [vmem:[%s6889_s15 + $0x1b70] sm:$0xff]  ;;  %v12053_v44 = vld [vmem:[%s6889_s15 + $0x1b78] sm:$0xff]  ;;  %v3178_v48 = vadd.f32 %v7207_v9, %v11933_v60  ;;  %v3179_v53 = vadd.f32 %v7207_v9, %v11948_v1 }
 0x25f   : > { %5200 = vst [vmem:[%s6975_s4 + $0x1a08] sm:$0xff] %v3152_v54  ;;  %5201 = vst [vmem:[%s6975_s4 + $0x1a10] sm:$0xff] %v3153_v55  ;;  %v12068_v49 = vld [vmem:[%s6889_s15 + $0x1b80] sm:$0xff]  ;;  %v12071_v50 = vld [vmem:[%s6889_s15 + $0x1b88] sm:$0xff]  ;;  %v3180_v54 = vadd.f32 %v7207_v9, %v11951_v2  ;;  %v3181_v55 = vadd.f32 %v7207_v9, %v11954_v3 }
 0x260   : > { %5202 = vst [vmem:[%s6975_s4 + $0x1a18] sm:$0xff] %v3154_v56  ;;  %5203 = vst [vmem:[%s6975_s4 + $0x1a20] sm:$0xff] %v3155_v61  ;;  %v12074_v51 = vld [vmem:[%s6889_s15 + $0x1b90] sm:$0xff]  ;;  %v12077_v52 = vld [vmem:[%s6889_s15 + $0x1b98] sm:$0xff]  ;;  %v3182_v56 = vadd.f32 %v7207_v9, %v11957_v4  ;;  %v3183_v61 = vadd.f32 %v7401_v13, %v11972_v11 }
 0x261   : > { %5204 = vst [vmem:[%s6975_s4 + $0x1a28] sm:$0xff] %v3156_v62  ;;  %5205 = vst [vmem:[%s6975_s4 + $0x1a30] sm:$0xff] %v3157_v63  ;;  %v12092_v57 = vld [vmem:[%s6889_s15 + $0x1ba0] sm:$0xff]  ;;  %v12095_v58 = vld [vmem:[%s6889_s15 + $0x1ba8] sm:$0xff]  ;;  %v3184_v62 = vadd.f32 %v7401_v13, %v11975_v12  ;;  %v3185_v63 = vadd.f32 %v7401_v13, %v11978_v14 }
 0x262   : > { %5206 = vst [vmem:[%s6975_s4 + $0x1a38] sm:$0xff] %v3158_v0  ;;  %5207 = vst [vmem:[%s6975_s4 + $0x1a40] sm:$0xff] %v3159_v5  ;;  %v12098_v59 = vld [vmem:[%s6889_s15 + $0x1bb0] sm:$0xff]  ;;  %v12101_v60 = vld [vmem:[%s6889_s15 + $0x1bb8] sm:$0xff]  ;;  %v3186_v0 = vadd.f32 %v7401_v13, %v11981_v15  ;;  %v3187_v5 = vadd.f32 %v7401_v13, %v11996_v22 }
 0x263   : > { %5208 = vst [vmem:[%s6975_s4 + $0x1a48] sm:$0xff] %v3160_v7  ;;  %5209 = vst [vmem:[%s6975_s4 + $0x1a50] sm:$0xff] %v3161_v8  ;;  %v12116_v1 = vld [vmem:[%s6889_s15 + $0x1bc0] sm:$0xff]  ;;  %v12119_v2 = vld [vmem:[%s6889_s15 + $0x1bc8] sm:$0xff]  ;;  %v3188_v7 = vadd.f32 %v7401_v13, %v11999_v23  ;;  %v3189_v8 = vadd.f32 %v7401_v13, %v12002_v24 }
 0x264   : > { %5210 = vst [vmem:[%s6975_s4 + $0x1a58] sm:$0xff] %v3162_v10  ;;  %5211 = vst [vmem:[%s6975_s4 + $0x1a60] sm:$0xff] %v3163_v16  ;;  %v12122_v3 = vld [vmem:[%s6889_s15 + $0x1bd0] sm:$0xff]  ;;  %v12125_v4 = vld [vmem:[%s6889_s15 + $0x1bd8] sm:$0xff]  ;;  %v3190_v10 = vadd.f32 %v7401_v13, %v12005_v26  ;;  %v3191_v16 = vadd.f32 %v7401_v13, %v12020_v31 }
 0x265   : > { %5212 = vst [vmem:[%s6975_s4 + $0x1a68] sm:$0xff] %v3164_v18  ;;  %5213 = vst [vmem:[%s6975_s4 + $0x1a70] sm:$0xff] %v3165_v20  ;;  %v12140_v11 = vld [vmem:[%s6889_s15 + $0x1be0] sm:$0xff]  ;;  %v12143_v12 = vld [vmem:[%s6889_s15 + $0x1be8] sm:$0xff]  ;;  %v3192_v18 = vadd.f32 %v7401_v13, %v12023_v33  ;;  %v3193_v20 = vadd.f32 %v7401_v13, %v12026_v34 }
 0x266   : > { %5214 = vst [vmem:[%s6975_s4 + $0x1a78] sm:$0xff] %v3166_v21  ;;  %5215 = vst [vmem:[%s6975_s4 + $0x1a80] sm:$0xff] %v3167_v27  ;;  %v12146_v14 = vld [vmem:[%s6889_s15 + $0x1bf0] sm:$0xff]  ;;  %v12149_v15 = vld [vmem:[%s6889_s15 + $0x1bf8] sm:$0xff]  ;;  %v3194_v21 = vadd.f32 %v7401_v13, %v12029_v35  ;;  %v3195_v27 = vadd.f32 %v7401_v13, %v12044_v41 }
 0x267   : > { %5216 = vst [vmem:[%s6975_s4 + $0x1a88] sm:$0xff] %v3168_v28  ;;  %5217 = vst [vmem:[%s6975_s4 + $0x1a90] sm:$0xff] %v3169_v29  ;;  %v12164_v22 = vld [vmem:[%s6889_s15 + $0x1c00] sm:$0xff]  ;;  %v12167_v23 = vld [vmem:[%s6889_s15 + $0x1c08] sm:$0xff]  ;;  %v3196_v28 = vadd.f32 %v7401_v13, %v12047_v42  ;;  %v3197_v29 = vadd.f32 %v7401_v13, %v12050_v43 }
 0x268   : > { %5218 = vst [vmem:[%s6975_s4 + $0x1a98] sm:$0xff] %v3170_v30  ;;  %5219 = vst [vmem:[%s6975_s4 + $0x1aa0] sm:$0xff] %v3171_v36  ;;  %v12170_v24 = vld [vmem:[%s6889_s15 + $0x1c10] sm:$0xff]  ;;  %v12173_v26 = vld [vmem:[%s6889_s15 + $0x1c18] sm:$0xff]  ;;  %v3198_v30 = vadd.f32 %v7401_v13, %v12053_v44  ;;  %v3199_v36 = vadd.f32 %v7401_v13, %v12068_v49 }
 0x269   : > { %5220 = vst [vmem:[%s6975_s4 + $0x1aa8] sm:$0xff] %v3172_v37  ;;  %5221 = vst [vmem:[%s6975_s4 + $0x1ab0] sm:$0xff] %v3173_v38  ;;  %v12188_v31 = vld [vmem:[%s6889_s15 + $0x1c20] sm:$0xff]  ;;  %v12191_v33 = vld [vmem:[%s6889_s15 + $0x1c28] sm:$0xff]  ;;  %v3200_v37 = vadd.f32 %v7401_v13, %v12071_v50  ;;  %v3201_v38 = vadd.f32 %v7401_v13, %v12074_v51 }
 0x26a   : > { %5222 = vst [vmem:[%s6975_s4 + $0x1ab8] sm:$0xff] %v3174_v39  ;;  %5223 = vst [vmem:[%s6975_s4 + $0x1ac0] sm:$0xff] %v3175_v45  ;;  %v12194_v34 = vld [vmem:[%s6889_s15 + $0x1c30] sm:$0xff]  ;;  %v12197_v35 = vld [vmem:[%s6889_s15 + $0x1c38] sm:$0xff]  ;;  %v3202_v39 = vadd.f32 %v7401_v13, %v12077_v52  ;;  %v3203_v45 = vadd.f32 %v7401_v13, %v12092_v57 }
 0x26b   : > { %5224 = vst [vmem:[%s6975_s4 + $0x1ac8] sm:$0xff] %v3176_v46  ;;  %5225 = vst [vmem:[%s6975_s4 + $0x1ad0] sm:$0xff] %v3177_v47  ;;  %v12212_v41 = vld [vmem:[%s6889_s15 + $0x1c40] sm:$0xff]  ;;  %v12215_v42 = vld [vmem:[%s6889_s15 + $0x1c48] sm:$0xff]  ;;  %v3204_v46 = vadd.f32 %v7401_v13, %v12095_v58  ;;  %v3205_v47 = vadd.f32 %v7401_v13, %v12098_v59 }
 0x26c   : > { %5226 = vst [vmem:[%s6975_s4 + $0x1ad8] sm:$0xff] %v3178_v48  ;;  %5227 = vst [vmem:[%s6975_s4 + $0x1ae0] sm:$0xff] %v3179_v53  ;;  %v12218_v43 = vld [vmem:[%s6889_s15 + $0x1c50] sm:$0xff]  ;;  %v12221_v44 = vld [vmem:[%s6889_s15 + $0x1c58] sm:$0xff]  ;;  %v3206_v48 = vadd.f32 %v7401_v13, %v12101_v60  ;;  %v3207_v53 = vadd.f32 %v7401_v13, %v12116_v1 }
 0x26d   : > { %5228 = vst [vmem:[%s6975_s4 + $0x1ae8] sm:$0xff] %v3180_v54  ;;  %5229 = vst [vmem:[%s6975_s4 + $0x1af0] sm:$0xff] %v3181_v55  ;;  %v12236_v49 = vld [vmem:[%s6889_s15 + $0x1c60] sm:$0xff]  ;;  %v12239_v50 = vld [vmem:[%s6889_s15 + $0x1c68] sm:$0xff]  ;;  %v3208_v54 = vadd.f32 %v7401_v13, %v12119_v2  ;;  %v3209_v55 = vadd.f32 %v7401_v13, %v12122_v3 }
 0x26e   : > { %5230 = vst [vmem:[%s6975_s4 + $0x1af8] sm:$0xff] %v3182_v56  ;;  %5231 = vst [vmem:[%s6975_s4 + $0x1b00] sm:$0xff] %v3183_v61  ;;  %v12242_v51 = vld [vmem:[%s6889_s15 + $0x1c70] sm:$0xff]  ;;  %v12245_v52 = vld [vmem:[%s6889_s15 + $0x1c78] sm:$0xff]  ;;  %v3210_v56 = vadd.f32 %v7401_v13, %v12125_v4  ;;  %v3211_v61 = vadd.f32 %v7401_v13, %v12140_v11 }
 0x26f   : > { %5232 = vst [vmem:[%s6975_s4 + $0x1b08] sm:$0xff] %v3184_v62  ;;  %5233 = vst [vmem:[%s6975_s4 + $0x1b10] sm:$0xff] %v3185_v63  ;;  %v12260_v57 = vld [vmem:[%s6889_s15 + $0x1c80] sm:$0xff]  ;;  %v12263_v58 = vld [vmem:[%s6889_s15 + $0x1c88] sm:$0xff]  ;;  %v3212_v62 = vadd.f32 %v7401_v13, %v12143_v12  ;;  %v3213_v63 = vadd.f32 %v7401_v13, %v12146_v14 }
 0x270   : > { %5234 = vst [vmem:[%s6975_s4 + $0x1b18] sm:$0xff] %v3186_v0  ;;  %5235 = vst [vmem:[%s6975_s4 + $0x1b20] sm:$0xff] %v3187_v5  ;;  %v12266_v59 = vld [vmem:[%s6889_s15 + $0x1c90] sm:$0xff]  ;;  %v12269_v60 = vld [vmem:[%s6889_s15 + $0x1c98] sm:$0xff]  ;;  %v3214_v0 = vadd.f32 %v7401_v13, %v12149_v15  ;;  %v3215_v5 = vadd.f32 %v7595_v19, %v12164_v22 }
 0x271   : > { %5236 = vst [vmem:[%s6975_s4 + $0x1b28] sm:$0xff] %v3188_v7  ;;  %5237 = vst [vmem:[%s6975_s4 + $0x1b30] sm:$0xff] %v3189_v8  ;;  %v12284_v1 = vld [vmem:[%s6889_s15 + $0x1ca0] sm:$0xff]  ;;  %v12287_v2 = vld [vmem:[%s6889_s15 + $0x1ca8] sm:$0xff]  ;;  %v3216_v7 = vadd.f32 %v7595_v19, %v12167_v23  ;;  %v3217_v8 = vadd.f32 %v7595_v19, %v12170_v24 }
 0x272   : > { %5238 = vst [vmem:[%s6975_s4 + $0x1b38] sm:$0xff] %v3190_v10  ;;  %5239 = vst [vmem:[%s6975_s4 + $0x1b40] sm:$0xff] %v3191_v16  ;;  %v12290_v3 = vld [vmem:[%s6889_s15 + $0x1cb0] sm:$0xff]  ;;  %v12293_v4 = vld [vmem:[%s6889_s15 + $0x1cb8] sm:$0xff]  ;;  %v3218_v10 = vadd.f32 %v7595_v19, %v12173_v26  ;;  %v3219_v16 = vadd.f32 %v7595_v19, %v12188_v31 }
 0x273   : > { %5240 = vst [vmem:[%s6975_s4 + $0x1b48] sm:$0xff] %v3192_v18  ;;  %5241 = vst [vmem:[%s6975_s4 + $0x1b50] sm:$0xff] %v3193_v20  ;;  %v12308_v11 = vld [vmem:[%s6889_s15 + $0x1cc0] sm:$0xff]  ;;  %v12311_v12 = vld [vmem:[%s6889_s15 + $0x1cc8] sm:$0xff]  ;;  %v3220_v18 = vadd.f32 %v7595_v19, %v12191_v33  ;;  %v3221_v20 = vadd.f32 %v7595_v19, %v12194_v34 }
 0x274   : > { %5242 = vst [vmem:[%s6975_s4 + $0x1b58] sm:$0xff] %v3194_v21  ;;  %5243 = vst [vmem:[%s6975_s4 + $0x1b60] sm:$0xff] %v3195_v27  ;;  %v12314_v14 = vld [vmem:[%s6889_s15 + $0x1cd0] sm:$0xff]  ;;  %v12317_v15 = vld [vmem:[%s6889_s15 + $0x1cd8] sm:$0xff]  ;;  %v3222_v21 = vadd.f32 %v7595_v19, %v12197_v35  ;;  %v3223_v27 = vadd.f32 %v7595_v19, %v12212_v41 }
 0x275   : > { %5244 = vst [vmem:[%s6975_s4 + $0x1b68] sm:$0xff] %v3196_v28  ;;  %5245 = vst [vmem:[%s6975_s4 + $0x1b70] sm:$0xff] %v3197_v29  ;;  %v12332_v22 = vld [vmem:[%s6889_s15 + $0x1ce0] sm:$0xff]  ;;  %v12335_v23 = vld [vmem:[%s6889_s15 + $0x1ce8] sm:$0xff]  ;;  %v3224_v28 = vadd.f32 %v7595_v19, %v12215_v42  ;;  %v3225_v29 = vadd.f32 %v7595_v19, %v12218_v43 }
 0x276   : > { %5246 = vst [vmem:[%s6975_s4 + $0x1b78] sm:$0xff] %v3198_v30  ;;  %5247 = vst [vmem:[%s6975_s4 + $0x1b80] sm:$0xff] %v3199_v36  ;;  %v12338_v24 = vld [vmem:[%s6889_s15 + $0x1cf0] sm:$0xff]  ;;  %v12341_v26 = vld [vmem:[%s6889_s15 + $0x1cf8] sm:$0xff]  ;;  %v3226_v30 = vadd.f32 %v7595_v19, %v12221_v44  ;;  %v3227_v36 = vadd.f32 %v7595_v19, %v12236_v49 }
 0x277   : > { %5248 = vst [vmem:[%s6975_s4 + $0x1b88] sm:$0xff] %v3200_v37  ;;  %5249 = vst [vmem:[%s6975_s4 + $0x1b90] sm:$0xff] %v3201_v38  ;;  %v12356_v31 = vld [vmem:[%s6889_s15 + $0x1d00] sm:$0xff]  ;;  %v12359_v33 = vld [vmem:[%s6889_s15 + $0x1d08] sm:$0xff]  ;;  %v3228_v37 = vadd.f32 %v7595_v19, %v12239_v50  ;;  %v3229_v38 = vadd.f32 %v7595_v19, %v12242_v51 }
 0x278   : > { %5250 = vst [vmem:[%s6975_s4 + $0x1b98] sm:$0xff] %v3202_v39  ;;  %5251 = vst [vmem:[%s6975_s4 + $0x1ba0] sm:$0xff] %v3203_v45  ;;  %v12362_v34 = vld [vmem:[%s6889_s15 + $0x1d10] sm:$0xff]  ;;  %v12365_v35 = vld [vmem:[%s6889_s15 + $0x1d18] sm:$0xff]  ;;  %v3230_v39 = vadd.f32 %v7595_v19, %v12245_v52  ;;  %v3231_v45 = vadd.f32 %v7595_v19, %v12260_v57 }
 0x279   : > { %5252 = vst [vmem:[%s6975_s4 + $0x1ba8] sm:$0xff] %v3204_v46  ;;  %5253 = vst [vmem:[%s6975_s4 + $0x1bb0] sm:$0xff] %v3205_v47  ;;  %v12380_v41 = vld [vmem:[%s6889_s15 + $0x1d20] sm:$0xff]  ;;  %v12383_v42 = vld [vmem:[%s6889_s15 + $0x1d28] sm:$0xff]  ;;  %v3232_v46 = vadd.f32 %v7595_v19, %v12263_v58  ;;  %v3233_v47 = vadd.f32 %v7595_v19, %v12266_v59 }
 0x27a   : > { %5254 = vst [vmem:[%s6975_s4 + $0x1bb8] sm:$0xff] %v3206_v48  ;;  %5255 = vst [vmem:[%s6975_s4 + $0x1bc0] sm:$0xff] %v3207_v53  ;;  %v12386_v43 = vld [vmem:[%s6889_s15 + $0x1d30] sm:$0xff]  ;;  %v12389_v44 = vld [vmem:[%s6889_s15 + $0x1d38] sm:$0xff]  ;;  %v3234_v48 = vadd.f32 %v7595_v19, %v12269_v60  ;;  %v3235_v53 = vadd.f32 %v7595_v19, %v12284_v1 }
 0x27b   : > { %5256 = vst [vmem:[%s6975_s4 + $0x1bc8] sm:$0xff] %v3208_v54  ;;  %5257 = vst [vmem:[%s6975_s4 + $0x1bd0] sm:$0xff] %v3209_v55  ;;  %v12404_v49 = vld [vmem:[%s6889_s15 + $0x1d40] sm:$0xff]  ;;  %v12407_v50 = vld [vmem:[%s6889_s15 + $0x1d48] sm:$0xff]  ;;  %v3236_v54 = vadd.f32 %v7595_v19, %v12287_v2  ;;  %v3237_v55 = vadd.f32 %v7595_v19, %v12290_v3 }
 0x27c   : > { %5258 = vst [vmem:[%s6975_s4 + $0x1bd8] sm:$0xff] %v3210_v56  ;;  %5259 = vst [vmem:[%s6975_s4 + $0x1be0] sm:$0xff] %v3211_v61  ;;  %v12410_v51 = vld [vmem:[%s6889_s15 + $0x1d50] sm:$0xff]  ;;  %v12413_v52 = vld [vmem:[%s6889_s15 + $0x1d58] sm:$0xff]  ;;  %v3238_v56 = vadd.f32 %v7595_v19, %v12293_v4  ;;  %v3239_v61 = vadd.f32 %v7595_v19, %v12308_v11 }
 0x27d   : > { %5260 = vst [vmem:[%s6975_s4 + $0x1be8] sm:$0xff] %v3212_v62  ;;  %5261 = vst [vmem:[%s6975_s4 + $0x1bf0] sm:$0xff] %v3213_v63  ;;  %v12428_v57 = vld [vmem:[%s6889_s15 + $0x1d60] sm:$0xff]  ;;  %v12431_v58 = vld [vmem:[%s6889_s15 + $0x1d68] sm:$0xff]  ;;  %v3240_v62 = vadd.f32 %v7595_v19, %v12311_v12  ;;  %v3241_v63 = vadd.f32 %v7595_v19, %v12314_v14 }
 0x27e   : > { %5262 = vst [vmem:[%s6975_s4 + $0x1bf8] sm:$0xff] %v3214_v0  ;;  %5263 = vst [vmem:[%s6975_s4 + $0x1c00] sm:$0xff] %v3215_v5  ;;  %v12434_v59 = vld [vmem:[%s6889_s15 + $0x1d70] sm:$0xff]  ;;  %v12437_v60 = vld [vmem:[%s6889_s15 + $0x1d78] sm:$0xff]  ;;  %v3242_v0 = vadd.f32 %v7595_v19, %v12317_v15  ;;  %v3243_v5 = vadd.f32 %v7595_v19, %v12332_v22 }
 0x27f   : > { %5264 = vst [vmem:[%s6975_s4 + $0x1c08] sm:$0xff] %v3216_v7  ;;  %5265 = vst [vmem:[%s6975_s4 + $0x1c10] sm:$0xff] %v3217_v8  ;;  %v12452_v1 = vld [vmem:[%s6889_s15 + $0x1d80] sm:$0xff]  ;;  %v12455_v2 = vld [vmem:[%s6889_s15 + $0x1d88] sm:$0xff]  ;;  %v3244_v7 = vadd.f32 %v7595_v19, %v12335_v23  ;;  %v3245_v8 = vadd.f32 %v7595_v19, %v12338_v24 }
 0x280   : > { %5266 = vst [vmem:[%s6975_s4 + $0x1c18] sm:$0xff] %v3218_v10  ;;  %5267 = vst [vmem:[%s6975_s4 + $0x1c20] sm:$0xff] %v3219_v16  ;;  %v12458_v3 = vld [vmem:[%s6889_s15 + $0x1d90] sm:$0xff]  ;;  %v12461_v4 = vld [vmem:[%s6889_s15 + $0x1d98] sm:$0xff]  ;;  %v3246_v10 = vadd.f32 %v7595_v19, %v12341_v26  ;;  %v3247_v16 = vadd.f32 %v7789_v25, %v12356_v31 }
 0x281   : > { %5268 = vst [vmem:[%s6975_s4 + $0x1c28] sm:$0xff] %v3220_v18  ;;  %5269 = vst [vmem:[%s6975_s4 + $0x1c30] sm:$0xff] %v3221_v20  ;;  %v12476_v11 = vld [vmem:[%s6889_s15 + $0x1da0] sm:$0xff]  ;;  %v12479_v12 = vld [vmem:[%s6889_s15 + $0x1da8] sm:$0xff]  ;;  %v3248_v18 = vadd.f32 %v7789_v25, %v12359_v33  ;;  %v3249_v20 = vadd.f32 %v7789_v25, %v12362_v34 }
 0x282   : > { %5270 = vst [vmem:[%s6975_s4 + $0x1c38] sm:$0xff] %v3222_v21  ;;  %5271 = vst [vmem:[%s6975_s4 + $0x1c40] sm:$0xff] %v3223_v27  ;;  %v12482_v14 = vld [vmem:[%s6889_s15 + $0x1db0] sm:$0xff]  ;;  %v12485_v15 = vld [vmem:[%s6889_s15 + $0x1db8] sm:$0xff]  ;;  %v3250_v21 = vadd.f32 %v7789_v25, %v12365_v35  ;;  %v3251_v27 = vadd.f32 %v7789_v25, %v12380_v41 }
 0x283   : > { %5272 = vst [vmem:[%s6975_s4 + $0x1c48] sm:$0xff] %v3224_v28  ;;  %5273 = vst [vmem:[%s6975_s4 + $0x1c50] sm:$0xff] %v3225_v29  ;;  %v12500_v22 = vld [vmem:[%s6889_s15 + $0x1dc0] sm:$0xff]  ;;  %v12503_v23 = vld [vmem:[%s6889_s15 + $0x1dc8] sm:$0xff]  ;;  %v3252_v28 = vadd.f32 %v7789_v25, %v12383_v42  ;;  %v3253_v29 = vadd.f32 %v7789_v25, %v12386_v43 }
 0x284   : > { %5274 = vst [vmem:[%s6975_s4 + $0x1c58] sm:$0xff] %v3226_v30  ;;  %5275 = vst [vmem:[%s6975_s4 + $0x1c60] sm:$0xff] %v3227_v36  ;;  %v12506_v24 = vld [vmem:[%s6889_s15 + $0x1dd0] sm:$0xff]  ;;  %v12509_v26 = vld [vmem:[%s6889_s15 + $0x1dd8] sm:$0xff]  ;;  %v3254_v30 = vadd.f32 %v7789_v25, %v12389_v44  ;;  %v3255_v36 = vadd.f32 %v7789_v25, %v12404_v49 }
 0x285   : > { %5276 = vst [vmem:[%s6975_s4 + $0x1c68] sm:$0xff] %v3228_v37  ;;  %5277 = vst [vmem:[%s6975_s4 + $0x1c70] sm:$0xff] %v3229_v38  ;;  %v12524_v31 = vld [vmem:[%s6889_s15 + $0x1de0] sm:$0xff]  ;;  %v12527_v33 = vld [vmem:[%s6889_s15 + $0x1de8] sm:$0xff]  ;;  %v3256_v37 = vadd.f32 %v7789_v25, %v12407_v50  ;;  %v3257_v38 = vadd.f32 %v7789_v25, %v12410_v51 }
 0x286   : > { %5278 = vst [vmem:[%s6975_s4 + $0x1c78] sm:$0xff] %v3230_v39  ;;  %5279 = vst [vmem:[%s6975_s4 + $0x1c80] sm:$0xff] %v3231_v45  ;;  %v12530_v34 = vld [vmem:[%s6889_s15 + $0x1df0] sm:$0xff]  ;;  %v12533_v35 = vld [vmem:[%s6889_s15 + $0x1df8] sm:$0xff]  ;;  %v3258_v39 = vadd.f32 %v7789_v25, %v12413_v52  ;;  %v3259_v45 = vadd.f32 %v7789_v25, %v12428_v57 }
 0x287   : > { %5280 = vst [vmem:[%s6975_s4 + $0x1c88] sm:$0xff] %v3232_v46  ;;  %5281 = vst [vmem:[%s6975_s4 + $0x1c90] sm:$0xff] %v3233_v47  ;;  %v12548_v41 = vld [vmem:[%s6889_s15 + $0x1e00] sm:$0xff]  ;;  %v12551_v42 = vld [vmem:[%s6889_s15 + $0x1e08] sm:$0xff]  ;;  %v3260_v46 = vadd.f32 %v7789_v25, %v12431_v58  ;;  %v3261_v47 = vadd.f32 %v7789_v25, %v12434_v59 }
 0x288   : > { %5282 = vst [vmem:[%s6975_s4 + $0x1c98] sm:$0xff] %v3234_v48  ;;  %5283 = vst [vmem:[%s6975_s4 + $0x1ca0] sm:$0xff] %v3235_v53  ;;  %v12554_v43 = vld [vmem:[%s6889_s15 + $0x1e10] sm:$0xff]  ;;  %v12557_v44 = vld [vmem:[%s6889_s15 + $0x1e18] sm:$0xff]  ;;  %v3262_v48 = vadd.f32 %v7789_v25, %v12437_v60  ;;  %v3263_v53 = vadd.f32 %v7789_v25, %v12452_v1 }
 0x289   : > { %5284 = vst [vmem:[%s6975_s4 + $0x1ca8] sm:$0xff] %v3236_v54  ;;  %5285 = vst [vmem:[%s6975_s4 + $0x1cb0] sm:$0xff] %v3237_v55  ;;  %v12572_v49 = vld [vmem:[%s6889_s15 + $0x1e20] sm:$0xff]  ;;  %v12575_v50 = vld [vmem:[%s6889_s15 + $0x1e28] sm:$0xff]  ;;  %v3264_v54 = vadd.f32 %v7789_v25, %v12455_v2  ;;  %v3265_v55 = vadd.f32 %v7789_v25, %v12458_v3 }
 0x28a   : > { %5286 = vst [vmem:[%s6975_s4 + $0x1cb8] sm:$0xff] %v3238_v56  ;;  %5287 = vst [vmem:[%s6975_s4 + $0x1cc0] sm:$0xff] %v3239_v61  ;;  %v12578_v51 = vld [vmem:[%s6889_s15 + $0x1e30] sm:$0xff]  ;;  %v12581_v52 = vld [vmem:[%s6889_s15 + $0x1e38] sm:$0xff]  ;;  %v3266_v56 = vadd.f32 %v7789_v25, %v12461_v4  ;;  %v3267_v61 = vadd.f32 %v7789_v25, %v12476_v11 }
 0x28b   : > { %5288 = vst [vmem:[%s6975_s4 + $0x1cc8] sm:$0xff] %v3240_v62  ;;  %5289 = vst [vmem:[%s6975_s4 + $0x1cd0] sm:$0xff] %v3241_v63  ;;  %v12596_v57 = vld [vmem:[%s6889_s15 + $0x1e40] sm:$0xff]  ;;  %v12599_v58 = vld [vmem:[%s6889_s15 + $0x1e48] sm:$0xff]  ;;  %v3268_v62 = vadd.f32 %v7789_v25, %v12479_v12  ;;  %v3269_v63 = vadd.f32 %v7789_v25, %v12482_v14 }
 0x28c   : > { %5290 = vst [vmem:[%s6975_s4 + $0x1cd8] sm:$0xff] %v3242_v0  ;;  %5291 = vst [vmem:[%s6975_s4 + $0x1ce0] sm:$0xff] %v3243_v5  ;;  %v12602_v59 = vld [vmem:[%s6889_s15 + $0x1e50] sm:$0xff]  ;;  %v12605_v60 = vld [vmem:[%s6889_s15 + $0x1e58] sm:$0xff]  ;;  %v3270_v0 = vadd.f32 %v7789_v25, %v12485_v15  ;;  %v3271_v5 = vadd.f32 %v7789_v25, %v12500_v22 }
 0x28d   : > { %5292 = vst [vmem:[%s6975_s4 + $0x1ce8] sm:$0xff] %v3244_v7  ;;  %5293 = vst [vmem:[%s6975_s4 + $0x1cf0] sm:$0xff] %v3245_v8  ;;  %v12620_v1 = vld [vmem:[%s6889_s15 + $0x1e60] sm:$0xff]  ;;  %v12623_v2 = vld [vmem:[%s6889_s15 + $0x1e68] sm:$0xff]  ;;  %v3272_v7 = vadd.f32 %v7789_v25, %v12503_v23  ;;  %v3273_v8 = vadd.f32 %v7789_v25, %v12506_v24 }
 0x28e   : > { %5294 = vst [vmem:[%s6975_s4 + $0x1cf8] sm:$0xff] %v3246_v10  ;;  %5295 = vst [vmem:[%s6975_s4 + $0x1d00] sm:$0xff] %v3247_v16  ;;  %v12626_v3 = vld [vmem:[%s6889_s15 + $0x1e70] sm:$0xff]  ;;  %v12629_v4 = vld [vmem:[%s6889_s15 + $0x1e78] sm:$0xff]  ;;  %v3274_v10 = vadd.f32 %v7789_v25, %v12509_v26  ;;  %v3275_v16 = vadd.f32 %v7789_v25, %v12524_v31 }
 0x28f   : > { %5296 = vst [vmem:[%s6975_s4 + $0x1d08] sm:$0xff] %v3248_v18  ;;  %5297 = vst [vmem:[%s6975_s4 + $0x1d10] sm:$0xff] %v3249_v20  ;;  %v12644_v11 = vld [vmem:[%s6889_s15 + $0x1e80] sm:$0xff]  ;;  %v12647_v12 = vld [vmem:[%s6889_s15 + $0x1e88] sm:$0xff]  ;;  %v3276_v18 = vadd.f32 %v7789_v25, %v12527_v33  ;;  %v3277_v20 = vadd.f32 %v7789_v25, %v12530_v34 }
 0x290   : > { %5298 = vst [vmem:[%s6975_s4 + $0x1d18] sm:$0xff] %v3250_v21  ;;  %5299 = vst [vmem:[%s6975_s4 + $0x1d20] sm:$0xff] %v3251_v27  ;;  %v12650_v14 = vld [vmem:[%s6889_s15 + $0x1e90] sm:$0xff]  ;;  %v12653_v15 = vld [vmem:[%s6889_s15 + $0x1e98] sm:$0xff]  ;;  %v3278_v21 = vadd.f32 %v7789_v25, %v12533_v35  ;;  %v3279_v27 = vadd.f32 %v7983_v32, %v12548_v41 }
 0x291   : > { %5300 = vst [vmem:[%s6975_s4 + $0x1d28] sm:$0xff] %v3252_v28  ;;  %5301 = vst [vmem:[%s6975_s4 + $0x1d30] sm:$0xff] %v3253_v29  ;;  %v12668_v22 = vld [vmem:[%s6889_s15 + $0x1ea0] sm:$0xff]  ;;  %v12671_v23 = vld [vmem:[%s6889_s15 + $0x1ea8] sm:$0xff]  ;;  %v3280_v28 = vadd.f32 %v7983_v32, %v12551_v42  ;;  %v3281_v29 = vadd.f32 %v7983_v32, %v12554_v43 }
 0x292   : > { %5302 = vst [vmem:[%s6975_s4 + $0x1d38] sm:$0xff] %v3254_v30  ;;  %5303 = vst [vmem:[%s6975_s4 + $0x1d40] sm:$0xff] %v3255_v36  ;;  %v12674_v24 = vld [vmem:[%s6889_s15 + $0x1eb0] sm:$0xff]  ;;  %v12677_v26 = vld [vmem:[%s6889_s15 + $0x1eb8] sm:$0xff]  ;;  %v3282_v30 = vadd.f32 %v7983_v32, %v12557_v44  ;;  %v3283_v36 = vadd.f32 %v7983_v32, %v12572_v49 }
 0x293   : > { %5304 = vst [vmem:[%s6975_s4 + $0x1d48] sm:$0xff] %v3256_v37  ;;  %5305 = vst [vmem:[%s6975_s4 + $0x1d50] sm:$0xff] %v3257_v38  ;;  %v12692_v31 = vld [vmem:[%s6889_s15 + $0x1ec0] sm:$0xff]  ;;  %v12695_v33 = vld [vmem:[%s6889_s15 + $0x1ec8] sm:$0xff]  ;;  %v3284_v37 = vadd.f32 %v7983_v32, %v12575_v50  ;;  %v3285_v38 = vadd.f32 %v7983_v32, %v12578_v51 }
 0x294   : > { %5306 = vst [vmem:[%s6975_s4 + $0x1d58] sm:$0xff] %v3258_v39  ;;  %5307 = vst [vmem:[%s6975_s4 + $0x1d60] sm:$0xff] %v3259_v45  ;;  %v12698_v34 = vld [vmem:[%s6889_s15 + $0x1ed0] sm:$0xff]  ;;  %v12701_v35 = vld [vmem:[%s6889_s15 + $0x1ed8] sm:$0xff]  ;;  %v3286_v39 = vadd.f32 %v7983_v32, %v12581_v52  ;;  %v3287_v45 = vadd.f32 %v7983_v32, %v12596_v57 }
 0x295   : > { %5308 = vst [vmem:[%s6975_s4 + $0x1d68] sm:$0xff] %v3260_v46  ;;  %5309 = vst [vmem:[%s6975_s4 + $0x1d70] sm:$0xff] %v3261_v47  ;;  %v12716_v41 = vld [vmem:[%s6889_s15 + $0x1ee0] sm:$0xff]  ;;  %v12719_v42 = vld [vmem:[%s6889_s15 + $0x1ee8] sm:$0xff]  ;;  %v3288_v46 = vadd.f32 %v7983_v32, %v12599_v58  ;;  %v3289_v47 = vadd.f32 %v7983_v32, %v12602_v59 }
 0x296   : > { %5310 = vst [vmem:[%s6975_s4 + $0x1d78] sm:$0xff] %v3262_v48  ;;  %5311 = vst [vmem:[%s6975_s4 + $0x1d80] sm:$0xff] %v3263_v53  ;;  %v12722_v43 = vld [vmem:[%s6889_s15 + $0x1ef0] sm:$0xff]  ;;  %v12725_v44 = vld [vmem:[%s6889_s15 + $0x1ef8] sm:$0xff]  ;;  %v3290_v48 = vadd.f32 %v7983_v32, %v12605_v60  ;;  %v3291_v53 = vadd.f32 %v7983_v32, %v12620_v1 }
 0x297   : > { %5312 = vst [vmem:[%s6975_s4 + $0x1d88] sm:$0xff] %v3264_v54  ;;  %5313 = vst [vmem:[%s6975_s4 + $0x1d90] sm:$0xff] %v3265_v55  ;;  %v12740_v49 = vld [vmem:[%s6889_s15 + $0x1f00] sm:$0xff]  ;;  %v12743_v50 = vld [vmem:[%s6889_s15 + $0x1f08] sm:$0xff]  ;;  %v3292_v54 = vadd.f32 %v7983_v32, %v12623_v2  ;;  %v3293_v55 = vadd.f32 %v7983_v32, %v12626_v3 }
 0x298   : > { %5314 = vst [vmem:[%s6975_s4 + $0x1d98] sm:$0xff] %v3266_v56  ;;  %5315 = vst [vmem:[%s6975_s4 + $0x1da0] sm:$0xff] %v3267_v61  ;;  %v12746_v51 = vld [vmem:[%s6889_s15 + $0x1f10] sm:$0xff]  ;;  %v12749_v52 = vld [vmem:[%s6889_s15 + $0x1f18] sm:$0xff]  ;;  %v3294_v56 = vadd.f32 %v7983_v32, %v12629_v4  ;;  %v3295_v61 = vadd.f32 %v7983_v32, %v12644_v11 }
 0x299   : > { %5316 = vst [vmem:[%s6975_s4 + $0x1da8] sm:$0xff] %v3268_v62  ;;  %5317 = vst [vmem:[%s6975_s4 + $0x1db0] sm:$0xff] %v3269_v63  ;;  %v12764_v57 = vld [vmem:[%s6889_s15 + $0x1f20] sm:$0xff]  ;;  %v12767_v58 = vld [vmem:[%s6889_s15 + $0x1f28] sm:$0xff]  ;;  %v3296_v62 = vadd.f32 %v7983_v32, %v12647_v12  ;;  %v3297_v63 = vadd.f32 %v7983_v32, %v12650_v14 }
 0x29a   : > { %5318 = vst [vmem:[%s6975_s4 + $0x1db8] sm:$0xff] %v3270_v0  ;;  %5319 = vst [vmem:[%s6975_s4 + $0x1dc0] sm:$0xff] %v3271_v5  ;;  %v12770_v59 = vld [vmem:[%s6889_s15 + $0x1f30] sm:$0xff]  ;;  %v12773_v60 = vld [vmem:[%s6889_s15 + $0x1f38] sm:$0xff]  ;;  %v3298_v0 = vadd.f32 %v7983_v32, %v12653_v15  ;;  %v3299_v5 = vadd.f32 %v7983_v32, %v12668_v22 }
 0x29b   : > { %5320 = vst [vmem:[%s6975_s4 + $0x1dc8] sm:$0xff] %v3272_v7  ;;  %5321 = vst [vmem:[%s6975_s4 + $0x1dd0] sm:$0xff] %v3273_v8  ;;  %v12788_v1 = vld [vmem:[%s6889_s15 + $0x1f40] sm:$0xff]  ;;  %v12791_v2 = vld [vmem:[%s6889_s15 + $0x1f48] sm:$0xff]  ;;  %v3300_v7 = vadd.f32 %v7983_v32, %v12671_v23  ;;  %v3301_v8 = vadd.f32 %v7983_v32, %v12674_v24 }
 0x29c   : > { %5322 = vst [vmem:[%s6975_s4 + $0x1dd8] sm:$0xff] %v3274_v10  ;;  %5323 = vst [vmem:[%s6975_s4 + $0x1de0] sm:$0xff] %v3275_v16  ;;  %v12794_v3 = vld [vmem:[%s6889_s15 + $0x1f50] sm:$0xff]  ;;  %v12797_v4 = vld [vmem:[%s6889_s15 + $0x1f58] sm:$0xff]  ;;  %v3302_v10 = vadd.f32 %v7983_v32, %v12677_v26  ;;  %v3303_v16 = vadd.f32 %v7983_v32, %v12692_v31 }
 0x29d   : > { %5324 = vst [vmem:[%s6975_s4 + $0x1de8] sm:$0xff] %v3276_v18  ;;  %5325 = vst [vmem:[%s6975_s4 + $0x1df0] sm:$0xff] %v3277_v20  ;;  %v12812_v11 = vld [vmem:[%s6889_s15 + $0x1f60] sm:$0xff]  ;;  %v12815_v12 = vld [vmem:[%s6889_s15 + $0x1f68] sm:$0xff]  ;;  %v3304_v18 = vadd.f32 %v7983_v32, %v12695_v33  ;;  %v3305_v20 = vadd.f32 %v7983_v32, %v12698_v34 }
 0x29e   : > { %5326 = vst [vmem:[%s6975_s4 + $0x1df8] sm:$0xff] %v3278_v21  ;;  %5327 = vst [vmem:[%s6975_s4 + $0x1e00] sm:$0xff] %v3279_v27  ;;  %v12818_v14 = vld [vmem:[%s6889_s15 + $0x1f70] sm:$0xff]  ;;  %v12821_v15 = vld [vmem:[%s6889_s15 + $0x1f78] sm:$0xff]  ;;  %v3306_v21 = vadd.f32 %v7983_v32, %v12701_v35  ;;  %v3307_v27 = vadd.f32 %v7983_v32, %v12716_v41 }
 0x29f   : > { %5328 = vst [vmem:[%s6975_s4 + $0x1e08] sm:$0xff] %v3280_v28  ;;  %5329 = vst [vmem:[%s6975_s4 + $0x1e10] sm:$0xff] %v3281_v29  ;;  %v12836_v22 = vld [vmem:[%s6889_s15 + $0x1f80] sm:$0xff]  ;;  %v12839_v23 = vld [vmem:[%s6889_s15 + $0x1f88] sm:$0xff]  ;;  %v3308_v28 = vadd.f32 %v7983_v32, %v12719_v42  ;;  %v3309_v29 = vadd.f32 %v7983_v32, %v12722_v43 }
 0x2a0   : > { %5330 = vst [vmem:[%s6975_s4 + $0x1e18] sm:$0xff] %v3282_v30  ;;  %5331 = vst [vmem:[%s6975_s4 + $0x1e20] sm:$0xff] %v3283_v36  ;;  %v12842_v24 = vld [vmem:[%s6889_s15 + $0x1f90] sm:$0xff]  ;;  %v12845_v26 = vld [vmem:[%s6889_s15 + $0x1f98] sm:$0xff]  ;;  %v3310_v30 = vadd.f32 %v7983_v32, %v12725_v44  ;;  %v3311_v36 = vadd.f32 %v8177_v40, %v12740_v49 }
 0x2a1   : > { %5332 = vst [vmem:[%s6975_s4 + $0x1e28] sm:$0xff] %v3284_v37  ;;  %5333 = vst [vmem:[%s6975_s4 + $0x1e30] sm:$0xff] %v3285_v38  ;;  %v12860_v31 = vld [vmem:[%s6889_s15 + $0x1fa0] sm:$0xff]  ;;  %v12863_v33 = vld [vmem:[%s6889_s15 + $0x1fa8] sm:$0xff]  ;;  %v3312_v37 = vadd.f32 %v8177_v40, %v12743_v50  ;;  %v3313_v38 = vadd.f32 %v8177_v40, %v12746_v51 }
 0x2a2   : > { %5334 = vst [vmem:[%s6975_s4 + $0x1e38] sm:$0xff] %v3286_v39  ;;  %5335 = vst [vmem:[%s6975_s4 + $0x1e40] sm:$0xff] %v3287_v45  ;;  %v12866_v34 = vld [vmem:[%s6889_s15 + $0x1fb0] sm:$0xff]  ;;  %v12869_v35 = vld [vmem:[%s6889_s15 + $0x1fb8] sm:$0xff]  ;;  %v3314_v39 = vadd.f32 %v8177_v40, %v12749_v52  ;;  %v3315_v45 = vadd.f32 %v8177_v40, %v12764_v57 }
 0x2a3   : > { %5336 = vst [vmem:[%s6975_s4 + $0x1e48] sm:$0xff] %v3288_v46  ;;  %5337 = vst [vmem:[%s6975_s4 + $0x1e50] sm:$0xff] %v3289_v47  ;;  %v12884_v41 = vld [vmem:[%s6889_s15 + $0x1fc0] sm:$0xff]  ;;  %v12887_v42 = vld [vmem:[%s6889_s15 + $0x1fc8] sm:$0xff]  ;;  %v3316_v46 = vadd.f32 %v8177_v40, %v12767_v58  ;;  %v3317_v47 = vadd.f32 %v8177_v40, %v12770_v59 }
 0x2a4   : > { %5338 = vst [vmem:[%s6975_s4 + $0x1e58] sm:$0xff] %v3290_v48  ;;  %5339 = vst [vmem:[%s6975_s4 + $0x1e60] sm:$0xff] %v3291_v53  ;;  %v12890_v43 = vld [vmem:[%s6889_s15 + $0x1fd0] sm:$0xff]  ;;  %v12893_v44 = vld [vmem:[%s6889_s15 + $0x1fd8] sm:$0xff]  ;;  %v3318_v48 = vadd.f32 %v8177_v40, %v12773_v60  ;;  %v3319_v53 = vadd.f32 %v8177_v40, %v12788_v1 }
 0x2a5   : > { %5340 = vst [vmem:[%s6975_s4 + $0x1e68] sm:$0xff] %v3292_v54  ;;  %5341 = vst [vmem:[%s6975_s4 + $0x1e70] sm:$0xff] %v3293_v55  ;;  %v12908_v49 = vld [vmem:[%s6889_s15 + $0x1fe0] sm:$0xff]  ;;  %v12911_v50 = vld [vmem:[%s6889_s15 + $0x1fe8] sm:$0xff]  ;;  %v3320_v54 = vadd.f32 %v8177_v40, %v12791_v2  ;;  %v3321_v55 = vadd.f32 %v8177_v40, %v12794_v3 }
 0x2a6   : > { %5342 = vst [vmem:[%s6975_s4 + $0x1e78] sm:$0xff] %v3294_v56  ;;  %5343 = vst [vmem:[%s6975_s4 + $0x1e80] sm:$0xff] %v3295_v61  ;;  %v12914_v51 = vld [vmem:[%s6889_s15 + $0x1ff0] sm:$0xff]  ;;  %v12917_v52 = vld [vmem:[%s6889_s15 + $0x1ff8] sm:$0xff]  ;;  %v3322_v56 = vadd.f32 %v8177_v40, %v12797_v4  ;;  %v3323_v61 = vadd.f32 %v8177_v40, %v12812_v11 }
 0x2a7   : > { %5344 = vst [vmem:[%s6975_s4 + $0x1e88] sm:$0xff] %v3296_v62  ;;  %5345 = vst [vmem:[%s6975_s4 + $0x1e90] sm:$0xff] %v3297_v63  ;;  %v12932_v57 = vld [vmem:[%s6889_s15 + $0x2000] sm:$0xff]  ;;  %v12935_v58 = vld [vmem:[%s6889_s15 + $0x2008] sm:$0xff]  ;;  %v3324_v62 = vadd.f32 %v8177_v40, %v12815_v12  ;;  %v3325_v63 = vadd.f32 %v8177_v40, %v12818_v14 }
 0x2a8   : > { %5346 = vst [vmem:[%s6975_s4 + $0x1e98] sm:$0xff] %v3298_v0  ;;  %5347 = vst [vmem:[%s6975_s4 + $0x1ea0] sm:$0xff] %v3299_v5  ;;  %v12938_v59 = vld [vmem:[%s6889_s15 + $0x2010] sm:$0xff]  ;;  %v12941_v60 = vld [vmem:[%s6889_s15 + $0x2018] sm:$0xff]  ;;  %v3326_v0 = vadd.f32 %v8177_v40, %v12821_v15  ;;  %v3327_v5 = vadd.f32 %v8177_v40, %v12836_v22 }
 0x2a9   : > { %5348 = vst [vmem:[%s6975_s4 + $0x1ea8] sm:$0xff] %v3300_v7  ;;  %5349 = vst [vmem:[%s6975_s4 + $0x1eb0] sm:$0xff] %v3301_v8  ;;  %v12956_v1 = vld [vmem:[%s6889_s15 + $0x2020] sm:$0xff]  ;;  %v12959_v2 = vld [vmem:[%s6889_s15 + $0x2028] sm:$0xff]  ;;  %v3328_v7 = vadd.f32 %v8177_v40, %v12839_v23  ;;  %v3329_v8 = vadd.f32 %v8177_v40, %v12842_v24 }
 0x2aa   : > { %5350 = vst [vmem:[%s6975_s4 + $0x1eb8] sm:$0xff] %v3302_v10  ;;  %5351 = vst [vmem:[%s6975_s4 + $0x1ec0] sm:$0xff] %v3303_v16  ;;  %v12962_v3 = vld [vmem:[%s6889_s15 + $0x2030] sm:$0xff]  ;;  %v12965_v4 = vld [vmem:[%s6889_s15 + $0x2038] sm:$0xff]  ;;  %v3330_v10 = vadd.f32 %v8177_v40, %v12845_v26  ;;  %v3331_v16 = vadd.f32 %v8177_v40, %v12860_v31 }
 0x2ab   : > { %5352 = vst [vmem:[%s6975_s4 + $0x1ec8] sm:$0xff] %v3304_v18  ;;  %5353 = vst [vmem:[%s6975_s4 + $0x1ed0] sm:$0xff] %v3305_v20  ;;  %v12980_v11 = vld [vmem:[%s6889_s15 + $0x2040] sm:$0xff]  ;;  %v12983_v12 = vld [vmem:[%s6889_s15 + $0x2048] sm:$0xff]  ;;  %v3332_v18 = vadd.f32 %v8177_v40, %v12863_v33  ;;  %v3333_v20 = vadd.f32 %v8177_v40, %v12866_v34 }
 0x2ac   : > { %5354 = vst [vmem:[%s6975_s4 + $0x1ed8] sm:$0xff] %v3306_v21  ;;  %5355 = vst [vmem:[%s6975_s4 + $0x1ee0] sm:$0xff] %v3307_v27  ;;  %v12986_v14 = vld [vmem:[%s6889_s15 + $0x2050] sm:$0xff]  ;;  %v12989_v15 = vld [vmem:[%s6889_s15 + $0x2058] sm:$0xff]  ;;  %v3334_v21 = vadd.f32 %v8177_v40, %v12869_v35  ;;  %v3335_v27 = vadd.f32 %v8177_v40, %v12884_v41 }
 0x2ad   : > { %5356 = vst [vmem:[%s6975_s4 + $0x1ee8] sm:$0xff] %v3308_v28  ;;  %5357 = vst [vmem:[%s6975_s4 + $0x1ef0] sm:$0xff] %v3309_v29  ;;  %v13004_v22 = vld [vmem:[%s6889_s15 + $0x2060] sm:$0xff]  ;;  %v13007_v23 = vld [vmem:[%s6889_s15 + $0x2068] sm:$0xff]  ;;  %v3336_v28 = vadd.f32 %v8177_v40, %v12887_v42  ;;  %v3337_v29 = vadd.f32 %v8177_v40, %v12890_v43 }
 0x2ae   : > { %5358 = vst [vmem:[%s6975_s4 + $0x1ef8] sm:$0xff] %v3310_v30  ;;  %5359 = vst [vmem:[%s6975_s4 + $0x1f00] sm:$0xff] %v3311_v36  ;;  %v13010_v24 = vld [vmem:[%s6889_s15 + $0x2070] sm:$0xff]  ;;  %v13013_v26 = vld [vmem:[%s6889_s15 + $0x2078] sm:$0xff]  ;;  %v3338_v30 = vadd.f32 %v8177_v40, %v12893_v44  ;;  %v3339_v36 = vadd.f32 %v8177_v40, %v12908_v49 }
 0x2af   : > { %5360 = vst [vmem:[%s6975_s4 + $0x1f08] sm:$0xff] %v3312_v37  ;;  %5361 = vst [vmem:[%s6975_s4 + $0x1f10] sm:$0xff] %v3313_v38  ;;  %v13028_v31 = vld [vmem:[%s6889_s15 + $0x2080] sm:$0xff]  ;;  %v13031_v33 = vld [vmem:[%s6889_s15 + $0x2088] sm:$0xff]  ;;  %v3340_v37 = vadd.f32 %v8177_v40, %v12911_v50  ;;  %v3341_v38 = vadd.f32 %v8177_v40, %v12914_v51 }
 0x2b0   : > { %5362 = vst [vmem:[%s6975_s4 + $0x1f18] sm:$0xff] %v3314_v39  ;;  %5363 = vst [vmem:[%s6975_s4 + $0x1f20] sm:$0xff] %v3315_v45  ;;  %v13034_v34 = vld [vmem:[%s6889_s15 + $0x2090] sm:$0xff]  ;;  %v13037_v35 = vld [vmem:[%s6889_s15 + $0x2098] sm:$0xff]  ;;  %v3342_v39 = vadd.f32 %v8177_v40, %v12917_v52  ;;  %v3343_v45 = vadd.f32 %v6927_v17, %v12932_v57 }
 0x2b1   : > { %5364 = vst [vmem:[%s6975_s4 + $0x1f28] sm:$0xff] %v3316_v46  ;;  %5365 = vst [vmem:[%s6975_s4 + $0x1f30] sm:$0xff] %v3317_v47  ;;  %v13052_v41 = vld [vmem:[%s6889_s15 + $0x20a0] sm:$0xff]  ;;  %v13055_v42 = vld [vmem:[%s6889_s15 + $0x20a8] sm:$0xff]  ;;  %v3344_v46 = vadd.f32 %v6927_v17, %v12935_v58  ;;  %v3345_v47 = vadd.f32 %v6927_v17, %v12938_v59 }
 0x2b2   : > { %5366 = vst [vmem:[%s6975_s4 + $0x1f38] sm:$0xff] %v3318_v48  ;;  %5367 = vst [vmem:[%s6975_s4 + $0x1f40] sm:$0xff] %v3319_v53  ;;  %v13058_v43 = vld [vmem:[%s6889_s15 + $0x20b0] sm:$0xff]  ;;  %v13061_v44 = vld [vmem:[%s6889_s15 + $0x20b8] sm:$0xff]  ;;  %v3346_v48 = vadd.f32 %v6927_v17, %v12941_v60  ;;  %v3347_v53 = vadd.f32 %v6927_v17, %v12956_v1 }
 0x2b3   : > { %5368 = vst [vmem:[%s6975_s4 + $0x1f48] sm:$0xff] %v3320_v54  ;;  %5369 = vst [vmem:[%s6975_s4 + $0x1f50] sm:$0xff] %v3321_v55  ;;  %v13076_v49 = vld [vmem:[%s6889_s15 + $0x20c0] sm:$0xff]  ;;  %v13079_v50 = vld [vmem:[%s6889_s15 + $0x20c8] sm:$0xff]  ;;  %v3348_v54 = vadd.f32 %v6927_v17, %v12959_v2  ;;  %v3349_v55 = vadd.f32 %v6927_v17, %v12962_v3 }
 0x2b4   : > { %5370 = vst [vmem:[%s6975_s4 + $0x1f58] sm:$0xff] %v3322_v56  ;;  %5371 = vst [vmem:[%s6975_s4 + $0x1f60] sm:$0xff] %v3323_v61  ;;  %v13082_v51 = vld [vmem:[%s6889_s15 + $0x20d0] sm:$0xff]  ;;  %v13085_v52 = vld [vmem:[%s6889_s15 + $0x20d8] sm:$0xff]  ;;  %v3350_v56 = vadd.f32 %v6927_v17, %v12965_v4  ;;  %v3351_v61 = vadd.f32 %v6927_v17, %v12980_v11 }
 0x2b5   : > { %5372 = vst [vmem:[%s6975_s4 + $0x1f68] sm:$0xff] %v3324_v62  ;;  %5373 = vst [vmem:[%s6975_s4 + $0x1f70] sm:$0xff] %v3325_v63  ;;  %v13100_v57 = vld [vmem:[%s6889_s15 + $0x20e0] sm:$0xff]  ;;  %v13103_v58 = vld [vmem:[%s6889_s15 + $0x20e8] sm:$0xff]  ;;  %v3352_v62 = vadd.f32 %v6927_v17, %v12983_v12  ;;  %v3353_v63 = vadd.f32 %v6927_v17, %v12986_v14 }
 0x2b6   : > { %5374 = vst [vmem:[%s6975_s4 + $0x1f78] sm:$0xff] %v3326_v0  ;;  %5375 = vst [vmem:[%s6975_s4 + $0x1f80] sm:$0xff] %v3327_v5  ;;  %v13106_v59 = vld [vmem:[%s6889_s15 + $0x20f0] sm:$0xff]  ;;  %v13109_v60 = vld [vmem:[%s6889_s15 + $0x20f8] sm:$0xff]  ;;  %v3354_v0 = vadd.f32 %v6927_v17, %v12989_v15  ;;  %v3355_v5 = vadd.f32 %v6927_v17, %v13004_v22 }
 0x2b7   : > { %5376 = vst [vmem:[%s6975_s4 + $0x1f88] sm:$0xff] %v3328_v7  ;;  %5377 = vst [vmem:[%s6975_s4 + $0x1f90] sm:$0xff] %v3329_v8  ;;  %v13124_v1 = vld [vmem:[%s6889_s15 + $0x2100] sm:$0xff]  ;;  %v13127_v2 = vld [vmem:[%s6889_s15 + $0x2108] sm:$0xff]  ;;  %v3356_v7 = vadd.f32 %v6927_v17, %v13007_v23  ;;  %v3357_v8 = vadd.f32 %v6927_v17, %v13010_v24 }
 0x2b8   : > { %5378 = vst [vmem:[%s6975_s4 + $0x1f98] sm:$0xff] %v3330_v10  ;;  %5379 = vst [vmem:[%s6975_s4 + $0x1fa0] sm:$0xff] %v3331_v16  ;;  %v13130_v3 = vld [vmem:[%s6889_s15 + $0x2110] sm:$0xff]  ;;  %v13133_v4 = vld [vmem:[%s6889_s15 + $0x2118] sm:$0xff]  ;;  %v3358_v10 = vadd.f32 %v6927_v17, %v13013_v26  ;;  %v3359_v16 = vadd.f32 %v6927_v17, %v13028_v31 }
 0x2b9   : > { %5380 = vst [vmem:[%s6975_s4 + $0x1fa8] sm:$0xff] %v3332_v18  ;;  %5381 = vst [vmem:[%s6975_s4 + $0x1fb0] sm:$0xff] %v3333_v20  ;;  %v13148_v11 = vld [vmem:[%s6889_s15 + $0x2120] sm:$0xff]  ;;  %v13151_v12 = vld [vmem:[%s6889_s15 + $0x2128] sm:$0xff]  ;;  %v3360_v18 = vadd.f32 %v6927_v17, %v13031_v33  ;;  %v3361_v20 = vadd.f32 %v6927_v17, %v13034_v34 }
 0x2ba   : > { %5382 = vst [vmem:[%s6975_s4 + $0x1fb8] sm:$0xff] %v3334_v21  ;;  %5383 = vst [vmem:[%s6975_s4 + $0x1fc0] sm:$0xff] %v3335_v27  ;;  %v13154_v14 = vld [vmem:[%s6889_s15 + $0x2130] sm:$0xff]  ;;  %v13157_v15 = vld [vmem:[%s6889_s15 + $0x2138] sm:$0xff]  ;;  %v3362_v21 = vadd.f32 %v6927_v17, %v13037_v35  ;;  %v3363_v27 = vadd.f32 %v6927_v17, %v13052_v41 }
 0x2bb   : > { %5384 = vst [vmem:[%s6975_s4 + $0x1fc8] sm:$0xff] %v3336_v28  ;;  %5385 = vst [vmem:[%s6975_s4 + $0x1fd0] sm:$0xff] %v3337_v29  ;;  %v13172_v22 = vld [vmem:[%s6889_s15 + $0x2140] sm:$0xff]  ;;  %v13175_v23 = vld [vmem:[%s6889_s15 + $0x2148] sm:$0xff]  ;;  %v3364_v28 = vadd.f32 %v6927_v17, %v13055_v42  ;;  %v3365_v29 = vadd.f32 %v6927_v17, %v13058_v43 }
 0x2bc   : > { %5386 = vst [vmem:[%s6975_s4 + $0x1fd8] sm:$0xff] %v3338_v30  ;;  %5387 = vst [vmem:[%s6975_s4 + $0x1fe0] sm:$0xff] %v3339_v36  ;;  %v13178_v24 = vld [vmem:[%s6889_s15 + $0x2150] sm:$0xff]  ;;  %v13181_v26 = vld [vmem:[%s6889_s15 + $0x2158] sm:$0xff]  ;;  %v3366_v30 = vadd.f32 %v6927_v17, %v13061_v44  ;;  %v3367_v36 = vadd.f32 %v6927_v17, %v13076_v49 }
 0x2bd   : > { %5388 = vst [vmem:[%s6975_s4 + $0x1fe8] sm:$0xff] %v3340_v37  ;;  %5389 = vst [vmem:[%s6975_s4 + $0x1ff0] sm:$0xff] %v3341_v38  ;;  %v13196_v31 = vld [vmem:[%s6889_s15 + $0x2160] sm:$0xff]  ;;  %v13199_v33 = vld [vmem:[%s6889_s15 + $0x2168] sm:$0xff]  ;;  %v3368_v37 = vadd.f32 %v6927_v17, %v13079_v50  ;;  %v3369_v38 = vadd.f32 %v6927_v17, %v13082_v51 }
 0x2be   : > { %5390 = vst [vmem:[%s6975_s4 + $0x1ff8] sm:$0xff] %v3342_v39  ;;  %5391 = vst [vmem:[%s6975_s4 + $0x2000] sm:$0xff] %v3343_v45  ;;  %v13202_v34 = vld [vmem:[%s6889_s15 + $0x2170] sm:$0xff]  ;;  %v13205_v35 = vld [vmem:[%s6889_s15 + $0x2178] sm:$0xff]  ;;  %v3370_v39 = vadd.f32 %v6927_v17, %v13085_v52  ;;  %v3371_v45 = vadd.f32 %v6927_v17, %v13100_v57 }
 0x2bf   : > { %5392 = vst [vmem:[%s6975_s4 + $0x2008] sm:$0xff] %v3344_v46  ;;  %5393 = vst [vmem:[%s6975_s4 + $0x2010] sm:$0xff] %v3345_v47  ;;  %v13220_v41 = vld [vmem:[%s6889_s15 + $0x2180] sm:$0xff]  ;;  %v13223_v42 = vld [vmem:[%s6889_s15 + $0x2188] sm:$0xff]  ;;  %v3372_v46 = vadd.f32 %v6927_v17, %v13103_v58  ;;  %v3373_v47 = vadd.f32 %v6927_v17, %v13106_v59 }
 0x2c0   : > { %5394 = vst [vmem:[%s6975_s4 + $0x2018] sm:$0xff] %v3346_v48  ;;  %5395 = vst [vmem:[%s6975_s4 + $0x2020] sm:$0xff] %v3347_v53  ;;  %v13226_v43 = vld [vmem:[%s6889_s15 + $0x2190] sm:$0xff]  ;;  %v13229_v44 = vld [vmem:[%s6889_s15 + $0x2198] sm:$0xff]  ;;  %v3374_v48 = vadd.f32 %v6927_v17, %v13109_v60  ;;  %v3375_v53 = vadd.f32 %v7021_v6, %v13124_v1 }
 0x2c1   : > { %5396 = vst [vmem:[%s6975_s4 + $0x2028] sm:$0xff] %v3348_v54  ;;  %5397 = vst [vmem:[%s6975_s4 + $0x2030] sm:$0xff] %v3349_v55  ;;  %v13244_v49 = vld [vmem:[%s6889_s15 + $0x21a0] sm:$0xff]  ;;  %v13247_v50 = vld [vmem:[%s6889_s15 + $0x21a8] sm:$0xff]  ;;  %v3376_v54 = vadd.f32 %v7021_v6, %v13127_v2  ;;  %v3377_v55 = vadd.f32 %v7021_v6, %v13130_v3 }
 0x2c2   : > { %5398 = vst [vmem:[%s6975_s4 + $0x2038] sm:$0xff] %v3350_v56  ;;  %5399 = vst [vmem:[%s6975_s4 + $0x2040] sm:$0xff] %v3351_v61  ;;  %v13250_v51 = vld [vmem:[%s6889_s15 + $0x21b0] sm:$0xff]  ;;  %v13253_v52 = vld [vmem:[%s6889_s15 + $0x21b8] sm:$0xff]  ;;  %v3378_v56 = vadd.f32 %v7021_v6, %v13133_v4  ;;  %v3379_v61 = vadd.f32 %v7021_v6, %v13148_v11 }
 0x2c3   : > { %5400 = vst [vmem:[%s6975_s4 + $0x2048] sm:$0xff] %v3352_v62  ;;  %5401 = vst [vmem:[%s6975_s4 + $0x2050] sm:$0xff] %v3353_v63  ;;  %v13268_v57 = vld [vmem:[%s6889_s15 + $0x21c0] sm:$0xff]  ;;  %v13271_v58 = vld [vmem:[%s6889_s15 + $0x21c8] sm:$0xff]  ;;  %v3380_v62 = vadd.f32 %v7021_v6, %v13151_v12  ;;  %v3381_v63 = vadd.f32 %v7021_v6, %v13154_v14 }
 0x2c4   : > { %5402 = vst [vmem:[%s6975_s4 + $0x2058] sm:$0xff] %v3354_v0  ;;  %5403 = vst [vmem:[%s6975_s4 + $0x2060] sm:$0xff] %v3355_v5  ;;  %v13274_v59 = vld [vmem:[%s6889_s15 + $0x21d0] sm:$0xff]  ;;  %v13277_v60 = vld [vmem:[%s6889_s15 + $0x21d8] sm:$0xff]  ;;  %v3382_v0 = vadd.f32 %v7021_v6, %v13157_v15  ;;  %v3383_v5 = vadd.f32 %v7021_v6, %v13172_v22 }
 0x2c5   : > { %5404 = vst [vmem:[%s6975_s4 + $0x2068] sm:$0xff] %v3356_v7  ;;  %5405 = vst [vmem:[%s6975_s4 + $0x2070] sm:$0xff] %v3357_v8  ;;  %v13292_v1 = vld [vmem:[%s6889_s15 + $0x21e0] sm:$0xff]  ;;  %v13295_v2 = vld [vmem:[%s6889_s15 + $0x21e8] sm:$0xff]  ;;  %v3384_v7 = vadd.f32 %v7021_v6, %v13175_v23  ;;  %v3385_v8 = vadd.f32 %v7021_v6, %v13178_v24 }
 0x2c6   : > { %5406 = vst [vmem:[%s6975_s4 + $0x2078] sm:$0xff] %v3358_v10  ;;  %5407 = vst [vmem:[%s6975_s4 + $0x2080] sm:$0xff] %v3359_v16  ;;  %v13298_v3 = vld [vmem:[%s6889_s15 + $0x21f0] sm:$0xff]  ;;  %v13301_v4 = vld [vmem:[%s6889_s15 + $0x21f8] sm:$0xff]  ;;  %v3386_v10 = vadd.f32 %v7021_v6, %v13181_v26  ;;  %v3387_v16 = vadd.f32 %v7021_v6, %v13196_v31 }
 0x2c7   : > { %5408 = vst [vmem:[%s6975_s4 + $0x2088] sm:$0xff] %v3360_v18  ;;  %5409 = vst [vmem:[%s6975_s4 + $0x2090] sm:$0xff] %v3361_v20  ;;  %v13316_v11 = vld [vmem:[%s6889_s15 + $0x2200] sm:$0xff]  ;;  %v13319_v12 = vld [vmem:[%s6889_s15 + $0x2208] sm:$0xff]  ;;  %v3388_v18 = vadd.f32 %v7021_v6, %v13199_v33  ;;  %v3389_v20 = vadd.f32 %v7021_v6, %v13202_v34 }
 0x2c8   : > { %5410 = vst [vmem:[%s6975_s4 + $0x2098] sm:$0xff] %v3362_v21  ;;  %5411 = vst [vmem:[%s6975_s4 + $0x20a0] sm:$0xff] %v3363_v27  ;;  %v13322_v14 = vld [vmem:[%s6889_s15 + $0x2210] sm:$0xff]  ;;  %v13325_v15 = vld [vmem:[%s6889_s15 + $0x2218] sm:$0xff]  ;;  %v3390_v21 = vadd.f32 %v7021_v6, %v13205_v35  ;;  %v3391_v27 = vadd.f32 %v7021_v6, %v13220_v41 }
 0x2c9   : > { %5412 = vst [vmem:[%s6975_s4 + $0x20a8] sm:$0xff] %v3364_v28  ;;  %5413 = vst [vmem:[%s6975_s4 + $0x20b0] sm:$0xff] %v3365_v29  ;;  %v13340_v22 = vld [vmem:[%s6889_s15 + $0x2220] sm:$0xff]  ;;  %v13343_v23 = vld [vmem:[%s6889_s15 + $0x2228] sm:$0xff]  ;;  %v3392_v28 = vadd.f32 %v7021_v6, %v13223_v42  ;;  %v3393_v29 = vadd.f32 %v7021_v6, %v13226_v43 }
 0x2ca   : > { %5414 = vst [vmem:[%s6975_s4 + $0x20b8] sm:$0xff] %v3366_v30  ;;  %5415 = vst [vmem:[%s6975_s4 + $0x20c0] sm:$0xff] %v3367_v36  ;;  %v13346_v24 = vld [vmem:[%s6889_s15 + $0x2230] sm:$0xff]  ;;  %v13349_v26 = vld [vmem:[%s6889_s15 + $0x2238] sm:$0xff]  ;;  %v3394_v30 = vadd.f32 %v7021_v6, %v13229_v44  ;;  %v3395_v36 = vadd.f32 %v7021_v6, %v13244_v49 }
 0x2cb   : > { %5416 = vst [vmem:[%s6975_s4 + $0x20c8] sm:$0xff] %v3368_v37  ;;  %5417 = vst [vmem:[%s6975_s4 + $0x20d0] sm:$0xff] %v3369_v38  ;;  %v13364_v31 = vld [vmem:[%s6889_s15 + $0x2240] sm:$0xff]  ;;  %v13367_v33 = vld [vmem:[%s6889_s15 + $0x2248] sm:$0xff]  ;;  %v3396_v37 = vadd.f32 %v7021_v6, %v13247_v50  ;;  %v3397_v38 = vadd.f32 %v7021_v6, %v13250_v51 }
 0x2cc   : > { %5418 = vst [vmem:[%s6975_s4 + $0x20d8] sm:$0xff] %v3370_v39  ;;  %5419 = vst [vmem:[%s6975_s4 + $0x20e0] sm:$0xff] %v3371_v45  ;;  %v13370_v34 = vld [vmem:[%s6889_s15 + $0x2250] sm:$0xff]  ;;  %v13373_v35 = vld [vmem:[%s6889_s15 + $0x2258] sm:$0xff]  ;;  %v3398_v39 = vadd.f32 %v7021_v6, %v13253_v52  ;;  %v3399_v45 = vadd.f32 %v7021_v6, %v13268_v57 }
 0x2cd   : > { %5420 = vst [vmem:[%s6975_s4 + $0x20e8] sm:$0xff] %v3372_v46  ;;  %5421 = vst [vmem:[%s6975_s4 + $0x20f0] sm:$0xff] %v3373_v47  ;;  %v13388_v41 = vld [vmem:[%s6889_s15 + $0x2260] sm:$0xff]  ;;  %v13391_v42 = vld [vmem:[%s6889_s15 + $0x2268] sm:$0xff]  ;;  %v3400_v46 = vadd.f32 %v7021_v6, %v13271_v58  ;;  %v3401_v47 = vadd.f32 %v7021_v6, %v13274_v59 }
 0x2ce   : > { %5422 = vst [vmem:[%s6975_s4 + $0x20f8] sm:$0xff] %v3374_v48  ;;  %5423 = vst [vmem:[%s6975_s4 + $0x2100] sm:$0xff] %v3375_v53  ;;  %v13394_v43 = vld [vmem:[%s6889_s15 + $0x2270] sm:$0xff]  ;;  %v13397_v44 = vld [vmem:[%s6889_s15 + $0x2278] sm:$0xff]  ;;  %v3402_v48 = vadd.f32 %v7021_v6, %v13277_v60  ;;  %v3403_v53 = vadd.f32 %v7021_v6, %v13292_v1 }
 0x2cf   : > { %5424 = vst [vmem:[%s6975_s4 + $0x2108] sm:$0xff] %v3376_v54  ;;  %5425 = vst [vmem:[%s6975_s4 + $0x2110] sm:$0xff] %v3377_v55  ;;  %v13412_v49 = vld [vmem:[%s6889_s15 + $0x2280] sm:$0xff]  ;;  %v13415_v50 = vld [vmem:[%s6889_s15 + $0x2288] sm:$0xff]  ;;  %v3404_v54 = vadd.f32 %v7021_v6, %v13295_v2  ;;  %v3405_v55 = vadd.f32 %v7021_v6, %v13298_v3 }
 0x2d0   : > { %5426 = vst [vmem:[%s6975_s4 + $0x2118] sm:$0xff] %v3378_v56  ;;  %5427 = vst [vmem:[%s6975_s4 + $0x2120] sm:$0xff] %v3379_v61  ;;  %v13418_v51 = vld [vmem:[%s6889_s15 + $0x2290] sm:$0xff]  ;;  %v13421_v52 = vld [vmem:[%s6889_s15 + $0x2298] sm:$0xff]  ;;  %v3406_v56 = vadd.f32 %v7021_v6, %v13301_v4  ;;  %v3407_v61 = vadd.f32 %v7207_v9, %v13316_v11 }
 0x2d1   : > { %5428 = vst [vmem:[%s6975_s4 + $0x2128] sm:$0xff] %v3380_v62  ;;  %5429 = vst [vmem:[%s6975_s4 + $0x2130] sm:$0xff] %v3381_v63  ;;  %v13436_v57 = vld [vmem:[%s6889_s15 + $0x22a0] sm:$0xff]  ;;  %v13439_v58 = vld [vmem:[%s6889_s15 + $0x22a8] sm:$0xff]  ;;  %v3408_v62 = vadd.f32 %v7207_v9, %v13319_v12  ;;  %v3409_v63 = vadd.f32 %v7207_v9, %v13322_v14 }
 0x2d2   : > { %5430 = vst [vmem:[%s6975_s4 + $0x2138] sm:$0xff] %v3382_v0  ;;  %5431 = vst [vmem:[%s6975_s4 + $0x2140] sm:$0xff] %v3383_v5  ;;  %v13442_v59 = vld [vmem:[%s6889_s15 + $0x22b0] sm:$0xff]  ;;  %v13445_v60 = vld [vmem:[%s6889_s15 + $0x22b8] sm:$0xff]  ;;  %v3410_v0 = vadd.f32 %v7207_v9, %v13325_v15  ;;  %v3411_v5 = vadd.f32 %v7207_v9, %v13340_v22 }
 0x2d3   : > { %5432 = vst [vmem:[%s6975_s4 + $0x2148] sm:$0xff] %v3384_v7  ;;  %5433 = vst [vmem:[%s6975_s4 + $0x2150] sm:$0xff] %v3385_v8  ;;  %v13460_v1 = vld [vmem:[%s6889_s15 + $0x22c0] sm:$0xff]  ;;  %v13463_v2 = vld [vmem:[%s6889_s15 + $0x22c8] sm:$0xff]  ;;  %v3412_v7 = vadd.f32 %v7207_v9, %v13343_v23  ;;  %v3413_v8 = vadd.f32 %v7207_v9, %v13346_v24 }
 0x2d4   : > { %5434 = vst [vmem:[%s6975_s4 + $0x2158] sm:$0xff] %v3386_v10  ;;  %5435 = vst [vmem:[%s6975_s4 + $0x2160] sm:$0xff] %v3387_v16  ;;  %v13466_v3 = vld [vmem:[%s6889_s15 + $0x22d0] sm:$0xff]  ;;  %v13469_v4 = vld [vmem:[%s6889_s15 + $0x22d8] sm:$0xff]  ;;  %v3414_v10 = vadd.f32 %v7207_v9, %v13349_v26  ;;  %v3415_v16 = vadd.f32 %v7207_v9, %v13364_v31 }
 0x2d5   : > { %5436 = vst [vmem:[%s6975_s4 + $0x2168] sm:$0xff] %v3388_v18  ;;  %5437 = vst [vmem:[%s6975_s4 + $0x2170] sm:$0xff] %v3389_v20  ;;  %v13484_v11 = vld [vmem:[%s6889_s15 + $0x22e0] sm:$0xff]  ;;  %v13487_v12 = vld [vmem:[%s6889_s15 + $0x22e8] sm:$0xff]  ;;  %v3416_v18 = vadd.f32 %v7207_v9, %v13367_v33  ;;  %v3417_v20 = vadd.f32 %v7207_v9, %v13370_v34 }
 0x2d6   : > { %5438 = vst [vmem:[%s6975_s4 + $0x2178] sm:$0xff] %v3390_v21  ;;  %5439 = vst [vmem:[%s6975_s4 + $0x2180] sm:$0xff] %v3391_v27  ;;  %v13490_v14 = vld [vmem:[%s6889_s15 + $0x22f0] sm:$0xff]  ;;  %v13493_v15 = vld [vmem:[%s6889_s15 + $0x22f8] sm:$0xff]  ;;  %v3418_v21 = vadd.f32 %v7207_v9, %v13373_v35  ;;  %v3419_v27 = vadd.f32 %v7207_v9, %v13388_v41 }
 0x2d7   : > { %5440 = vst [vmem:[%s6975_s4 + $0x2188] sm:$0xff] %v3392_v28  ;;  %5441 = vst [vmem:[%s6975_s4 + $0x2190] sm:$0xff] %v3393_v29  ;;  %v13508_v22 = vld [vmem:[%s6889_s15 + $0x2300] sm:$0xff]  ;;  %v13511_v23 = vld [vmem:[%s6889_s15 + $0x2308] sm:$0xff]  ;;  %v3420_v28 = vadd.f32 %v7207_v9, %v13391_v42  ;;  %v3421_v29 = vadd.f32 %v7207_v9, %v13394_v43 }
 0x2d8   : > { %5442 = vst [vmem:[%s6975_s4 + $0x2198] sm:$0xff] %v3394_v30  ;;  %5443 = vst [vmem:[%s6975_s4 + $0x21a0] sm:$0xff] %v3395_v36  ;;  %v13514_v24 = vld [vmem:[%s6889_s15 + $0x2310] sm:$0xff]  ;;  %v13517_v26 = vld [vmem:[%s6889_s15 + $0x2318] sm:$0xff]  ;;  %v3422_v30 = vadd.f32 %v7207_v9, %v13397_v44  ;;  %v3423_v36 = vadd.f32 %v7207_v9, %v13412_v49 }
 0x2d9   : > { %5444 = vst [vmem:[%s6975_s4 + $0x21a8] sm:$0xff] %v3396_v37  ;;  %5445 = vst [vmem:[%s6975_s4 + $0x21b0] sm:$0xff] %v3397_v38  ;;  %v13532_v31 = vld [vmem:[%s6889_s15 + $0x2320] sm:$0xff]  ;;  %v13535_v33 = vld [vmem:[%s6889_s15 + $0x2328] sm:$0xff]  ;;  %v3424_v37 = vadd.f32 %v7207_v9, %v13415_v50  ;;  %v3425_v38 = vadd.f32 %v7207_v9, %v13418_v51 }
 0x2da   : > { %5446 = vst [vmem:[%s6975_s4 + $0x21b8] sm:$0xff] %v3398_v39  ;;  %5447 = vst [vmem:[%s6975_s4 + $0x21c0] sm:$0xff] %v3399_v45  ;;  %v13538_v34 = vld [vmem:[%s6889_s15 + $0x2330] sm:$0xff]  ;;  %v13541_v35 = vld [vmem:[%s6889_s15 + $0x2338] sm:$0xff]  ;;  %v3426_v39 = vadd.f32 %v7207_v9, %v13421_v52  ;;  %v3427_v45 = vadd.f32 %v7207_v9, %v13436_v57 }
 0x2db   : > { %5448 = vst [vmem:[%s6975_s4 + $0x21c8] sm:$0xff] %v3400_v46  ;;  %5449 = vst [vmem:[%s6975_s4 + $0x21d0] sm:$0xff] %v3401_v47  ;;  %v13556_v41 = vld [vmem:[%s6889_s15 + $0x2340] sm:$0xff]  ;;  %v13559_v42 = vld [vmem:[%s6889_s15 + $0x2348] sm:$0xff]  ;;  %v3428_v46 = vadd.f32 %v7207_v9, %v13439_v58  ;;  %v3429_v47 = vadd.f32 %v7207_v9, %v13442_v59 }
 0x2dc   : > { %5450 = vst [vmem:[%s6975_s4 + $0x21d8] sm:$0xff] %v3402_v48  ;;  %5451 = vst [vmem:[%s6975_s4 + $0x21e0] sm:$0xff] %v3403_v53  ;;  %v13562_v43 = vld [vmem:[%s6889_s15 + $0x2350] sm:$0xff]  ;;  %v13565_v44 = vld [vmem:[%s6889_s15 + $0x2358] sm:$0xff]  ;;  %v3430_v48 = vadd.f32 %v7207_v9, %v13445_v60  ;;  %v3431_v53 = vadd.f32 %v7207_v9, %v13460_v1 }
 0x2dd   : > { %5452 = vst [vmem:[%s6975_s4 + $0x21e8] sm:$0xff] %v3404_v54  ;;  %5453 = vst [vmem:[%s6975_s4 + $0x21f0] sm:$0xff] %v3405_v55  ;;  %v13580_v49 = vld [vmem:[%s6889_s15 + $0x2360] sm:$0xff]  ;;  %v13583_v50 = vld [vmem:[%s6889_s15 + $0x2368] sm:$0xff]  ;;  %v3432_v54 = vadd.f32 %v7207_v9, %v13463_v2  ;;  %v3433_v55 = vadd.f32 %v7207_v9, %v13466_v3 }
 0x2de   : > { %5454 = vst [vmem:[%s6975_s4 + $0x21f8] sm:$0xff] %v3406_v56  ;;  %5455 = vst [vmem:[%s6975_s4 + $0x2200] sm:$0xff] %v3407_v61  ;;  %v13586_v51 = vld [vmem:[%s6889_s15 + $0x2370] sm:$0xff]  ;;  %v13589_v52 = vld [vmem:[%s6889_s15 + $0x2378] sm:$0xff]  ;;  %v3434_v56 = vadd.f32 %v7207_v9, %v13469_v4  ;;  %v3435_v61 = vadd.f32 %v7207_v9, %v13484_v11 }
 0x2df   : > { %5456 = vst [vmem:[%s6975_s4 + $0x2208] sm:$0xff] %v3408_v62  ;;  %5457 = vst [vmem:[%s6975_s4 + $0x2210] sm:$0xff] %v3409_v63  ;;  %v13604_v57 = vld [vmem:[%s6889_s15 + $0x2380] sm:$0xff]  ;;  %v13607_v58 = vld [vmem:[%s6889_s15 + $0x2388] sm:$0xff]  ;;  %v3436_v62 = vadd.f32 %v7207_v9, %v13487_v12  ;;  %v3437_v63 = vadd.f32 %v7207_v9, %v13490_v14 }
 0x2e0   : > { %5458 = vst [vmem:[%s6975_s4 + $0x2218] sm:$0xff] %v3410_v0  ;;  %5459 = vst [vmem:[%s6975_s4 + $0x2220] sm:$0xff] %v3411_v5  ;;  %v13610_v59 = vld [vmem:[%s6889_s15 + $0x2390] sm:$0xff]  ;;  %v13613_v60 = vld [vmem:[%s6889_s15 + $0x2398] sm:$0xff]  ;;  %v3438_v0 = vadd.f32 %v7207_v9, %v13493_v15  ;;  %v3439_v5 = vadd.f32 %v7401_v13, %v13508_v22 }
 0x2e1   : > { %5460 = vst [vmem:[%s6975_s4 + $0x2228] sm:$0xff] %v3412_v7  ;;  %5461 = vst [vmem:[%s6975_s4 + $0x2230] sm:$0xff] %v3413_v8  ;;  %v13628_v1 = vld [vmem:[%s6889_s15 + $0x23a0] sm:$0xff]  ;;  %v13631_v2 = vld [vmem:[%s6889_s15 + $0x23a8] sm:$0xff]  ;;  %v3440_v7 = vadd.f32 %v7401_v13, %v13511_v23  ;;  %v3441_v8 = vadd.f32 %v7401_v13, %v13514_v24 }
 0x2e2   : > { %5462 = vst [vmem:[%s6975_s4 + $0x2238] sm:$0xff] %v3414_v10  ;;  %5463 = vst [vmem:[%s6975_s4 + $0x2240] sm:$0xff] %v3415_v16  ;;  %v13634_v3 = vld [vmem:[%s6889_s15 + $0x23b0] sm:$0xff]  ;;  %v13637_v4 = vld [vmem:[%s6889_s15 + $0x23b8] sm:$0xff]  ;;  %v3442_v10 = vadd.f32 %v7401_v13, %v13517_v26  ;;  %v3443_v16 = vadd.f32 %v7401_v13, %v13532_v31 }
 0x2e3   : > { %5464 = vst [vmem:[%s6975_s4 + $0x2248] sm:$0xff] %v3416_v18  ;;  %5465 = vst [vmem:[%s6975_s4 + $0x2250] sm:$0xff] %v3417_v20  ;;  %v13652_v11 = vld [vmem:[%s6889_s15 + $0x23c0] sm:$0xff]  ;;  %v13655_v12 = vld [vmem:[%s6889_s15 + $0x23c8] sm:$0xff]  ;;  %v3444_v18 = vadd.f32 %v7401_v13, %v13535_v33  ;;  %v3445_v20 = vadd.f32 %v7401_v13, %v13538_v34 }
 0x2e4   : > { %5466 = vst [vmem:[%s6975_s4 + $0x2258] sm:$0xff] %v3418_v21  ;;  %5467 = vst [vmem:[%s6975_s4 + $0x2260] sm:$0xff] %v3419_v27  ;;  %v13658_v14 = vld [vmem:[%s6889_s15 + $0x23d0] sm:$0xff]  ;;  %v13661_v15 = vld [vmem:[%s6889_s15 + $0x23d8] sm:$0xff]  ;;  %v3446_v21 = vadd.f32 %v7401_v13, %v13541_v35  ;;  %v3447_v27 = vadd.f32 %v7401_v13, %v13556_v41 }
 0x2e5   : > { %5468 = vst [vmem:[%s6975_s4 + $0x2268] sm:$0xff] %v3420_v28  ;;  %5469 = vst [vmem:[%s6975_s4 + $0x2270] sm:$0xff] %v3421_v29  ;;  %v13676_v22 = vld [vmem:[%s6889_s15 + $0x23e0] sm:$0xff]  ;;  %v13679_v23 = vld [vmem:[%s6889_s15 + $0x23e8] sm:$0xff]  ;;  %v3448_v28 = vadd.f32 %v7401_v13, %v13559_v42  ;;  %v3449_v29 = vadd.f32 %v7401_v13, %v13562_v43 }
 0x2e6   : > { %5470 = vst [vmem:[%s6975_s4 + $0x2278] sm:$0xff] %v3422_v30  ;;  %5471 = vst [vmem:[%s6975_s4 + $0x2280] sm:$0xff] %v3423_v36  ;;  %v13682_v24 = vld [vmem:[%s6889_s15 + $0x23f0] sm:$0xff]  ;;  %v13685_v26 = vld [vmem:[%s6889_s15 + $0x23f8] sm:$0xff]  ;;  %v3450_v30 = vadd.f32 %v7401_v13, %v13565_v44  ;;  %v3451_v36 = vadd.f32 %v7401_v13, %v13580_v49 }
 0x2e7   : > { %5472 = vst [vmem:[%s6975_s4 + $0x2288] sm:$0xff] %v3424_v37  ;;  %5473 = vst [vmem:[%s6975_s4 + $0x2290] sm:$0xff] %v3425_v38  ;;  %v13700_v31 = vld [vmem:[%s6889_s15 + $0x2400] sm:$0xff]  ;;  %v13703_v33 = vld [vmem:[%s6889_s15 + $0x2408] sm:$0xff]  ;;  %v3452_v37 = vadd.f32 %v7401_v13, %v13583_v50  ;;  %v3453_v38 = vadd.f32 %v7401_v13, %v13586_v51 }
 0x2e8   : > { %5474 = vst [vmem:[%s6975_s4 + $0x2298] sm:$0xff] %v3426_v39  ;;  %5475 = vst [vmem:[%s6975_s4 + $0x22a0] sm:$0xff] %v3427_v45  ;;  %v13706_v34 = vld [vmem:[%s6889_s15 + $0x2410] sm:$0xff]  ;;  %v13709_v35 = vld [vmem:[%s6889_s15 + $0x2418] sm:$0xff]  ;;  %v3454_v39 = vadd.f32 %v7401_v13, %v13589_v52  ;;  %v3455_v45 = vadd.f32 %v7401_v13, %v13604_v57 }
 0x2e9   : > { %5476 = vst [vmem:[%s6975_s4 + $0x22a8] sm:$0xff] %v3428_v46  ;;  %5477 = vst [vmem:[%s6975_s4 + $0x22b0] sm:$0xff] %v3429_v47  ;;  %v13724_v41 = vld [vmem:[%s6889_s15 + $0x2420] sm:$0xff]  ;;  %v13727_v42 = vld [vmem:[%s6889_s15 + $0x2428] sm:$0xff]  ;;  %v3456_v46 = vadd.f32 %v7401_v13, %v13607_v58  ;;  %v3457_v47 = vadd.f32 %v7401_v13, %v13610_v59 }
 0x2ea   : > { %5478 = vst [vmem:[%s6975_s4 + $0x22b8] sm:$0xff] %v3430_v48  ;;  %5479 = vst [vmem:[%s6975_s4 + $0x22c0] sm:$0xff] %v3431_v53  ;;  %v13730_v43 = vld [vmem:[%s6889_s15 + $0x2430] sm:$0xff]  ;;  %v13733_v44 = vld [vmem:[%s6889_s15 + $0x2438] sm:$0xff]  ;;  %v3458_v48 = vadd.f32 %v7401_v13, %v13613_v60  ;;  %v3459_v53 = vadd.f32 %v7401_v13, %v13628_v1 }
 0x2eb   : > { %5480 = vst [vmem:[%s6975_s4 + $0x22c8] sm:$0xff] %v3432_v54  ;;  %5481 = vst [vmem:[%s6975_s4 + $0x22d0] sm:$0xff] %v3433_v55  ;;  %v13748_v49 = vld [vmem:[%s6889_s15 + $0x2440] sm:$0xff]  ;;  %v13751_v50 = vld [vmem:[%s6889_s15 + $0x2448] sm:$0xff]  ;;  %v3460_v54 = vadd.f32 %v7401_v13, %v13631_v2  ;;  %v3461_v55 = vadd.f32 %v7401_v13, %v13634_v3 }
 0x2ec   : > { %5482 = vst [vmem:[%s6975_s4 + $0x22d8] sm:$0xff] %v3434_v56  ;;  %5483 = vst [vmem:[%s6975_s4 + $0x22e0] sm:$0xff] %v3435_v61  ;;  %v13754_v51 = vld [vmem:[%s6889_s15 + $0x2450] sm:$0xff]  ;;  %v13757_v52 = vld [vmem:[%s6889_s15 + $0x2458] sm:$0xff]  ;;  %v3462_v56 = vadd.f32 %v7401_v13, %v13637_v4  ;;  %v3463_v61 = vadd.f32 %v7401_v13, %v13652_v11 }
 0x2ed   : > { %5484 = vst [vmem:[%s6975_s4 + $0x22e8] sm:$0xff] %v3436_v62  ;;  %5485 = vst [vmem:[%s6975_s4 + $0x22f0] sm:$0xff] %v3437_v63  ;;  %v13772_v57 = vld [vmem:[%s6889_s15 + $0x2460] sm:$0xff]  ;;  %v13775_v58 = vld [vmem:[%s6889_s15 + $0x2468] sm:$0xff]  ;;  %v3464_v62 = vadd.f32 %v7401_v13, %v13655_v12  ;;  %v3465_v63 = vadd.f32 %v7401_v13, %v13658_v14 }
 0x2ee   : > { %5486 = vst [vmem:[%s6975_s4 + $0x22f8] sm:$0xff] %v3438_v0  ;;  %5487 = vst [vmem:[%s6975_s4 + $0x2300] sm:$0xff] %v3439_v5  ;;  %v13778_v59 = vld [vmem:[%s6889_s15 + $0x2470] sm:$0xff]  ;;  %v13781_v60 = vld [vmem:[%s6889_s15 + $0x2478] sm:$0xff]  ;;  %v3466_v0 = vadd.f32 %v7401_v13, %v13661_v15  ;;  %v3467_v5 = vadd.f32 %v7401_v13, %v13676_v22 }
 0x2ef   : > { %5488 = vst [vmem:[%s6975_s4 + $0x2308] sm:$0xff] %v3440_v7  ;;  %5489 = vst [vmem:[%s6975_s4 + $0x2310] sm:$0xff] %v3441_v8  ;;  %v13796_v1 = vld [vmem:[%s6889_s15 + $0x2480] sm:$0xff]  ;;  %v13799_v2 = vld [vmem:[%s6889_s15 + $0x2488] sm:$0xff]  ;;  %v3468_v7 = vadd.f32 %v7401_v13, %v13679_v23  ;;  %v3469_v8 = vadd.f32 %v7401_v13, %v13682_v24 }
 0x2f0   : > { %5490 = vst [vmem:[%s6975_s4 + $0x2318] sm:$0xff] %v3442_v10  ;;  %5491 = vst [vmem:[%s6975_s4 + $0x2320] sm:$0xff] %v3443_v16  ;;  %v13802_v3 = vld [vmem:[%s6889_s15 + $0x2490] sm:$0xff]  ;;  %v13805_v4 = vld [vmem:[%s6889_s15 + $0x2498] sm:$0xff]  ;;  %v3470_v10 = vadd.f32 %v7401_v13, %v13685_v26  ;;  %v3471_v16 = vadd.f32 %v7595_v19, %v13700_v31 }
 0x2f1   : > { %5492 = vst [vmem:[%s6975_s4 + $0x2328] sm:$0xff] %v3444_v18  ;;  %5493 = vst [vmem:[%s6975_s4 + $0x2330] sm:$0xff] %v3445_v20  ;;  %v13820_v11 = vld [vmem:[%s6889_s15 + $0x24a0] sm:$0xff]  ;;  %v13823_v12 = vld [vmem:[%s6889_s15 + $0x24a8] sm:$0xff]  ;;  %v3472_v18 = vadd.f32 %v7595_v19, %v13703_v33  ;;  %v3473_v20 = vadd.f32 %v7595_v19, %v13706_v34 }
 0x2f2   : > { %5494 = vst [vmem:[%s6975_s4 + $0x2338] sm:$0xff] %v3446_v21  ;;  %5495 = vst [vmem:[%s6975_s4 + $0x2340] sm:$0xff] %v3447_v27  ;;  %v13826_v14 = vld [vmem:[%s6889_s15 + $0x24b0] sm:$0xff]  ;;  %v13829_v15 = vld [vmem:[%s6889_s15 + $0x24b8] sm:$0xff]  ;;  %v3474_v21 = vadd.f32 %v7595_v19, %v13709_v35  ;;  %v3475_v27 = vadd.f32 %v7595_v19, %v13724_v41 }
 0x2f3   : > { %5496 = vst [vmem:[%s6975_s4 + $0x2348] sm:$0xff] %v3448_v28  ;;  %5497 = vst [vmem:[%s6975_s4 + $0x2350] sm:$0xff] %v3449_v29  ;;  %v13844_v22 = vld [vmem:[%s6889_s15 + $0x24c0] sm:$0xff]  ;;  %v13847_v23 = vld [vmem:[%s6889_s15 + $0x24c8] sm:$0xff]  ;;  %v3476_v28 = vadd.f32 %v7595_v19, %v13727_v42  ;;  %v3477_v29 = vadd.f32 %v7595_v19, %v13730_v43 }
 0x2f4   : > { %5498 = vst [vmem:[%s6975_s4 + $0x2358] sm:$0xff] %v3450_v30  ;;  %5499 = vst [vmem:[%s6975_s4 + $0x2360] sm:$0xff] %v3451_v36  ;;  %v13850_v24 = vld [vmem:[%s6889_s15 + $0x24d0] sm:$0xff]  ;;  %v13853_v26 = vld [vmem:[%s6889_s15 + $0x24d8] sm:$0xff]  ;;  %v3478_v30 = vadd.f32 %v7595_v19, %v13733_v44  ;;  %v3479_v36 = vadd.f32 %v7595_v19, %v13748_v49 }
 0x2f5   : > { %5500 = vst [vmem:[%s6975_s4 + $0x2368] sm:$0xff] %v3452_v37  ;;  %5501 = vst [vmem:[%s6975_s4 + $0x2370] sm:$0xff] %v3453_v38  ;;  %v13868_v31 = vld [vmem:[%s6889_s15 + $0x24e0] sm:$0xff]  ;;  %v13871_v33 = vld [vmem:[%s6889_s15 + $0x24e8] sm:$0xff]  ;;  %v3480_v37 = vadd.f32 %v7595_v19, %v13751_v50  ;;  %v3481_v38 = vadd.f32 %v7595_v19, %v13754_v51 }
 0x2f6   : > { %5502 = vst [vmem:[%s6975_s4 + $0x2378] sm:$0xff] %v3454_v39  ;;  %5503 = vst [vmem:[%s6975_s4 + $0x2380] sm:$0xff] %v3455_v45  ;;  %v13874_v34 = vld [vmem:[%s6889_s15 + $0x24f0] sm:$0xff]  ;;  %v13877_v35 = vld [vmem:[%s6889_s15 + $0x24f8] sm:$0xff]  ;;  %v3482_v39 = vadd.f32 %v7595_v19, %v13757_v52  ;;  %v3483_v45 = vadd.f32 %v7595_v19, %v13772_v57 }
 0x2f7   : > { %5504 = vst [vmem:[%s6975_s4 + $0x2388] sm:$0xff] %v3456_v46  ;;  %5505 = vst [vmem:[%s6975_s4 + $0x2390] sm:$0xff] %v3457_v47  ;;  %v13892_v41 = vld [vmem:[%s6889_s15 + $0x2500] sm:$0xff]  ;;  %v13895_v42 = vld [vmem:[%s6889_s15 + $0x2508] sm:$0xff]  ;;  %v3484_v46 = vadd.f32 %v7595_v19, %v13775_v58  ;;  %v3485_v47 = vadd.f32 %v7595_v19, %v13778_v59 }
 0x2f8   : > { %5506 = vst [vmem:[%s6975_s4 + $0x2398] sm:$0xff] %v3458_v48  ;;  %5507 = vst [vmem:[%s6975_s4 + $0x23a0] sm:$0xff] %v3459_v53  ;;  %v13898_v43 = vld [vmem:[%s6889_s15 + $0x2510] sm:$0xff]  ;;  %v13901_v44 = vld [vmem:[%s6889_s15 + $0x2518] sm:$0xff]  ;;  %v3486_v48 = vadd.f32 %v7595_v19, %v13781_v60  ;;  %v3487_v53 = vadd.f32 %v7595_v19, %v13796_v1 }
 0x2f9   : > { %5508 = vst [vmem:[%s6975_s4 + $0x23a8] sm:$0xff] %v3460_v54  ;;  %5509 = vst [vmem:[%s6975_s4 + $0x23b0] sm:$0xff] %v3461_v55  ;;  %v13916_v49 = vld [vmem:[%s6889_s15 + $0x2520] sm:$0xff]  ;;  %v13919_v50 = vld [vmem:[%s6889_s15 + $0x2528] sm:$0xff]  ;;  %v3488_v54 = vadd.f32 %v7595_v19, %v13799_v2  ;;  %v3489_v55 = vadd.f32 %v7595_v19, %v13802_v3 }
 0x2fa   : > { %5510 = vst [vmem:[%s6975_s4 + $0x23b8] sm:$0xff] %v3462_v56  ;;  %5511 = vst [vmem:[%s6975_s4 + $0x23c0] sm:$0xff] %v3463_v61  ;;  %v13922_v51 = vld [vmem:[%s6889_s15 + $0x2530] sm:$0xff]  ;;  %v13925_v52 = vld [vmem:[%s6889_s15 + $0x2538] sm:$0xff]  ;;  %v3490_v56 = vadd.f32 %v7595_v19, %v13805_v4  ;;  %v3491_v61 = vadd.f32 %v7595_v19, %v13820_v11 }
 0x2fb   : > { %5512 = vst [vmem:[%s6975_s4 + $0x23c8] sm:$0xff] %v3464_v62  ;;  %5513 = vst [vmem:[%s6975_s4 + $0x23d0] sm:$0xff] %v3465_v63  ;;  %v13940_v57 = vld [vmem:[%s6889_s15 + $0x2540] sm:$0xff]  ;;  %v13943_v58 = vld [vmem:[%s6889_s15 + $0x2548] sm:$0xff]  ;;  %v3492_v62 = vadd.f32 %v7595_v19, %v13823_v12  ;;  %v3493_v63 = vadd.f32 %v7595_v19, %v13826_v14 }
 0x2fc   : > { %5514 = vst [vmem:[%s6975_s4 + $0x23d8] sm:$0xff] %v3466_v0  ;;  %5515 = vst [vmem:[%s6975_s4 + $0x23e0] sm:$0xff] %v3467_v5  ;;  %v13946_v59 = vld [vmem:[%s6889_s15 + $0x2550] sm:$0xff]  ;;  %v13949_v60 = vld [vmem:[%s6889_s15 + $0x2558] sm:$0xff]  ;;  %v3494_v0 = vadd.f32 %v7595_v19, %v13829_v15  ;;  %v3495_v5 = vadd.f32 %v7595_v19, %v13844_v22 }
 0x2fd   : > { %5516 = vst [vmem:[%s6975_s4 + $0x23e8] sm:$0xff] %v3468_v7  ;;  %5517 = vst [vmem:[%s6975_s4 + $0x23f0] sm:$0xff] %v3469_v8  ;;  %v13964_v1 = vld [vmem:[%s6889_s15 + $0x2560] sm:$0xff]  ;;  %v13967_v2 = vld [vmem:[%s6889_s15 + $0x2568] sm:$0xff]  ;;  %v3496_v7 = vadd.f32 %v7595_v19, %v13847_v23  ;;  %v3497_v8 = vadd.f32 %v7595_v19, %v13850_v24 }
 0x2fe   : > { %5518 = vst [vmem:[%s6975_s4 + $0x23f8] sm:$0xff] %v3470_v10  ;;  %5519 = vst [vmem:[%s6975_s4 + $0x2400] sm:$0xff] %v3471_v16  ;;  %v13970_v3 = vld [vmem:[%s6889_s15 + $0x2570] sm:$0xff]  ;;  %v13973_v4 = vld [vmem:[%s6889_s15 + $0x2578] sm:$0xff]  ;;  %v3498_v10 = vadd.f32 %v7595_v19, %v13853_v26  ;;  %v3499_v16 = vadd.f32 %v7595_v19, %v13868_v31 }
 0x2ff   : > { %5520 = vst [vmem:[%s6975_s4 + $0x2408] sm:$0xff] %v3472_v18  ;;  %5521 = vst [vmem:[%s6975_s4 + $0x2410] sm:$0xff] %v3473_v20  ;;  %v13988_v11 = vld [vmem:[%s6889_s15 + $0x2580] sm:$0xff]  ;;  %v13991_v12 = vld [vmem:[%s6889_s15 + $0x2588] sm:$0xff]  ;;  %v3500_v18 = vadd.f32 %v7595_v19, %v13871_v33  ;;  %v3501_v20 = vadd.f32 %v7595_v19, %v13874_v34 }
 0x300   : > { %5522 = vst [vmem:[%s6975_s4 + $0x2418] sm:$0xff] %v3474_v21  ;;  %5523 = vst [vmem:[%s6975_s4 + $0x2420] sm:$0xff] %v3475_v27  ;;  %v13994_v14 = vld [vmem:[%s6889_s15 + $0x2590] sm:$0xff]  ;;  %v13997_v15 = vld [vmem:[%s6889_s15 + $0x2598] sm:$0xff]  ;;  %v3502_v21 = vadd.f32 %v7595_v19, %v13877_v35  ;;  %v3503_v27 = vadd.f32 %v7789_v25, %v13892_v41 }
 0x301   : > { %5524 = vst [vmem:[%s6975_s4 + $0x2428] sm:$0xff] %v3476_v28  ;;  %5525 = vst [vmem:[%s6975_s4 + $0x2430] sm:$0xff] %v3477_v29  ;;  %v14012_v22 = vld [vmem:[%s6889_s15 + $0x25a0] sm:$0xff]  ;;  %v14015_v23 = vld [vmem:[%s6889_s15 + $0x25a8] sm:$0xff]  ;;  %v3504_v28 = vadd.f32 %v7789_v25, %v13895_v42  ;;  %v3505_v29 = vadd.f32 %v7789_v25, %v13898_v43 }
 0x302   : > { %5526 = vst [vmem:[%s6975_s4 + $0x2438] sm:$0xff] %v3478_v30  ;;  %5527 = vst [vmem:[%s6975_s4 + $0x2440] sm:$0xff] %v3479_v36  ;;  %v14018_v24 = vld [vmem:[%s6889_s15 + $0x25b0] sm:$0xff]  ;;  %v14021_v26 = vld [vmem:[%s6889_s15 + $0x25b8] sm:$0xff]  ;;  %v3506_v30 = vadd.f32 %v7789_v25, %v13901_v44  ;;  %v3507_v36 = vadd.f32 %v7789_v25, %v13916_v49 }
 0x303   : > { %5528 = vst [vmem:[%s6975_s4 + $0x2448] sm:$0xff] %v3480_v37  ;;  %5529 = vst [vmem:[%s6975_s4 + $0x2450] sm:$0xff] %v3481_v38  ;;  %v14036_v31 = vld [vmem:[%s6889_s15 + $0x25c0] sm:$0xff]  ;;  %v14039_v33 = vld [vmem:[%s6889_s15 + $0x25c8] sm:$0xff]  ;;  %v3508_v37 = vadd.f32 %v7789_v25, %v13919_v50  ;;  %v3509_v38 = vadd.f32 %v7789_v25, %v13922_v51 }
 0x304   : > { %5530 = vst [vmem:[%s6975_s4 + $0x2458] sm:$0xff] %v3482_v39  ;;  %5531 = vst [vmem:[%s6975_s4 + $0x2460] sm:$0xff] %v3483_v45  ;;  %v14042_v34 = vld [vmem:[%s6889_s15 + $0x25d0] sm:$0xff]  ;;  %v14045_v35 = vld [vmem:[%s6889_s15 + $0x25d8] sm:$0xff]  ;;  %v3510_v39 = vadd.f32 %v7789_v25, %v13925_v52  ;;  %v3511_v45 = vadd.f32 %v7789_v25, %v13940_v57 }
 0x305   : > { %5532 = vst [vmem:[%s6975_s4 + $0x2468] sm:$0xff] %v3484_v46  ;;  %5533 = vst [vmem:[%s6975_s4 + $0x2470] sm:$0xff] %v3485_v47  ;;  %v14060_v41 = vld [vmem:[%s6889_s15 + $0x25e0] sm:$0xff]  ;;  %v14063_v42 = vld [vmem:[%s6889_s15 + $0x25e8] sm:$0xff]  ;;  %v3512_v46 = vadd.f32 %v7789_v25, %v13943_v58  ;;  %v3513_v47 = vadd.f32 %v7789_v25, %v13946_v59 }
 0x306   : > { %5534 = vst [vmem:[%s6975_s4 + $0x2478] sm:$0xff] %v3486_v48  ;;  %5535 = vst [vmem:[%s6975_s4 + $0x2480] sm:$0xff] %v3487_v53  ;;  %v14066_v43 = vld [vmem:[%s6889_s15 + $0x25f0] sm:$0xff]  ;;  %v14069_v44 = vld [vmem:[%s6889_s15 + $0x25f8] sm:$0xff]  ;;  %v3514_v48 = vadd.f32 %v7789_v25, %v13949_v60  ;;  %v3515_v53 = vadd.f32 %v7789_v25, %v13964_v1 }
 0x307   : > { %5536 = vst [vmem:[%s6975_s4 + $0x2488] sm:$0xff] %v3488_v54  ;;  %5537 = vst [vmem:[%s6975_s4 + $0x2490] sm:$0xff] %v3489_v55  ;;  %v14084_v49 = vld [vmem:[%s6889_s15 + $0x2600] sm:$0xff]  ;;  %v14087_v50 = vld [vmem:[%s6889_s15 + $0x2608] sm:$0xff]  ;;  %v3516_v54 = vadd.f32 %v7789_v25, %v13967_v2  ;;  %v3517_v55 = vadd.f32 %v7789_v25, %v13970_v3 }
 0x308   : > { %5538 = vst [vmem:[%s6975_s4 + $0x2498] sm:$0xff] %v3490_v56  ;;  %5539 = vst [vmem:[%s6975_s4 + $0x24a0] sm:$0xff] %v3491_v61  ;;  %v14090_v51 = vld [vmem:[%s6889_s15 + $0x2610] sm:$0xff]  ;;  %v14093_v52 = vld [vmem:[%s6889_s15 + $0x2618] sm:$0xff]  ;;  %v3518_v56 = vadd.f32 %v7789_v25, %v13973_v4  ;;  %v3519_v61 = vadd.f32 %v7789_v25, %v13988_v11 }
 0x309   : > { %5540 = vst [vmem:[%s6975_s4 + $0x24a8] sm:$0xff] %v3492_v62  ;;  %5541 = vst [vmem:[%s6975_s4 + $0x24b0] sm:$0xff] %v3493_v63  ;;  %v14108_v57 = vld [vmem:[%s6889_s15 + $0x2620] sm:$0xff]  ;;  %v14111_v58 = vld [vmem:[%s6889_s15 + $0x2628] sm:$0xff]  ;;  %v3520_v62 = vadd.f32 %v7789_v25, %v13991_v12  ;;  %v3521_v63 = vadd.f32 %v7789_v25, %v13994_v14 }
 0x30a   : > { %5542 = vst [vmem:[%s6975_s4 + $0x24b8] sm:$0xff] %v3494_v0  ;;  %5543 = vst [vmem:[%s6975_s4 + $0x24c0] sm:$0xff] %v3495_v5  ;;  %v14114_v59 = vld [vmem:[%s6889_s15 + $0x2630] sm:$0xff]  ;;  %v14117_v60 = vld [vmem:[%s6889_s15 + $0x2638] sm:$0xff]  ;;  %v3522_v0 = vadd.f32 %v7789_v25, %v13997_v15  ;;  %v3523_v5 = vadd.f32 %v7789_v25, %v14012_v22 }
 0x30b   : > { %5544 = vst [vmem:[%s6975_s4 + $0x24c8] sm:$0xff] %v3496_v7  ;;  %5545 = vst [vmem:[%s6975_s4 + $0x24d0] sm:$0xff] %v3497_v8  ;;  %v14132_v1 = vld [vmem:[%s6889_s15 + $0x2640] sm:$0xff]  ;;  %v14135_v2 = vld [vmem:[%s6889_s15 + $0x2648] sm:$0xff]  ;;  %v3524_v7 = vadd.f32 %v7789_v25, %v14015_v23  ;;  %v3525_v8 = vadd.f32 %v7789_v25, %v14018_v24 }
 0x30c   : > { %5546 = vst [vmem:[%s6975_s4 + $0x24d8] sm:$0xff] %v3498_v10  ;;  %5547 = vst [vmem:[%s6975_s4 + $0x24e0] sm:$0xff] %v3499_v16  ;;  %v14138_v3 = vld [vmem:[%s6889_s15 + $0x2650] sm:$0xff]  ;;  %v14141_v4 = vld [vmem:[%s6889_s15 + $0x2658] sm:$0xff]  ;;  %v3526_v10 = vadd.f32 %v7789_v25, %v14021_v26  ;;  %v3527_v16 = vadd.f32 %v7789_v25, %v14036_v31 }
 0x30d   : > { %5548 = vst [vmem:[%s6975_s4 + $0x24e8] sm:$0xff] %v3500_v18  ;;  %5549 = vst [vmem:[%s6975_s4 + $0x24f0] sm:$0xff] %v3501_v20  ;;  %v14156_v11 = vld [vmem:[%s6889_s15 + $0x2660] sm:$0xff]  ;;  %v14159_v12 = vld [vmem:[%s6889_s15 + $0x2668] sm:$0xff]  ;;  %v3528_v18 = vadd.f32 %v7789_v25, %v14039_v33  ;;  %v3529_v20 = vadd.f32 %v7789_v25, %v14042_v34 }
 0x30e   : > { %5550 = vst [vmem:[%s6975_s4 + $0x24f8] sm:$0xff] %v3502_v21  ;;  %5551 = vst [vmem:[%s6975_s4 + $0x2500] sm:$0xff] %v3503_v27  ;;  %v14162_v14 = vld [vmem:[%s6889_s15 + $0x2670] sm:$0xff]  ;;  %v14165_v15 = vld [vmem:[%s6889_s15 + $0x2678] sm:$0xff]  ;;  %v3530_v21 = vadd.f32 %v7789_v25, %v14045_v35  ;;  %v3531_v27 = vadd.f32 %v7789_v25, %v14060_v41 }
 0x30f   : > { %5552 = vst [vmem:[%s6975_s4 + $0x2508] sm:$0xff] %v3504_v28  ;;  %5553 = vst [vmem:[%s6975_s4 + $0x2510] sm:$0xff] %v3505_v29  ;;  %v14180_v22 = vld [vmem:[%s6889_s15 + $0x2680] sm:$0xff]  ;;  %v14183_v23 = vld [vmem:[%s6889_s15 + $0x2688] sm:$0xff]  ;;  %v3532_v28 = vadd.f32 %v7789_v25, %v14063_v42  ;;  %v3533_v29 = vadd.f32 %v7789_v25, %v14066_v43 }
 0x310   : > { %5554 = vst [vmem:[%s6975_s4 + $0x2518] sm:$0xff] %v3506_v30  ;;  %5555 = vst [vmem:[%s6975_s4 + $0x2520] sm:$0xff] %v3507_v36  ;;  %v14186_v24 = vld [vmem:[%s6889_s15 + $0x2690] sm:$0xff]  ;;  %v14189_v26 = vld [vmem:[%s6889_s15 + $0x2698] sm:$0xff]  ;;  %v3534_v30 = vadd.f32 %v7789_v25, %v14069_v44  ;;  %v3535_v36 = vadd.f32 %v7983_v32, %v14084_v49 }
 0x311   : > { %5556 = vst [vmem:[%s6975_s4 + $0x2528] sm:$0xff] %v3508_v37  ;;  %5557 = vst [vmem:[%s6975_s4 + $0x2530] sm:$0xff] %v3509_v38  ;;  %v14204_v31 = vld [vmem:[%s6889_s15 + $0x26a0] sm:$0xff]  ;;  %v14207_v33 = vld [vmem:[%s6889_s15 + $0x26a8] sm:$0xff]  ;;  %v3536_v37 = vadd.f32 %v7983_v32, %v14087_v50  ;;  %v3537_v38 = vadd.f32 %v7983_v32, %v14090_v51 }
 0x312   : > { %5558 = vst [vmem:[%s6975_s4 + $0x2538] sm:$0xff] %v3510_v39  ;;  %5559 = vst [vmem:[%s6975_s4 + $0x2540] sm:$0xff] %v3511_v45  ;;  %v14210_v34 = vld [vmem:[%s6889_s15 + $0x26b0] sm:$0xff]  ;;  %v14213_v35 = vld [vmem:[%s6889_s15 + $0x26b8] sm:$0xff]  ;;  %v3538_v39 = vadd.f32 %v7983_v32, %v14093_v52  ;;  %v3539_v45 = vadd.f32 %v7983_v32, %v14108_v57 }
 0x313   : > { %5560 = vst [vmem:[%s6975_s4 + $0x2548] sm:$0xff] %v3512_v46  ;;  %5561 = vst [vmem:[%s6975_s4 + $0x2550] sm:$0xff] %v3513_v47  ;;  %v14228_v41 = vld [vmem:[%s6889_s15 + $0x26c0] sm:$0xff]  ;;  %v14231_v42 = vld [vmem:[%s6889_s15 + $0x26c8] sm:$0xff]  ;;  %v3540_v46 = vadd.f32 %v7983_v32, %v14111_v58  ;;  %v3541_v47 = vadd.f32 %v7983_v32, %v14114_v59 }
 0x314   : > { %5562 = vst [vmem:[%s6975_s4 + $0x2558] sm:$0xff] %v3514_v48  ;;  %5563 = vst [vmem:[%s6975_s4 + $0x2560] sm:$0xff] %v3515_v53  ;;  %v14234_v43 = vld [vmem:[%s6889_s15 + $0x26d0] sm:$0xff]  ;;  %v14237_v44 = vld [vmem:[%s6889_s15 + $0x26d8] sm:$0xff]  ;;  %v3542_v48 = vadd.f32 %v7983_v32, %v14117_v60  ;;  %v3543_v53 = vadd.f32 %v7983_v32, %v14132_v1 }
 0x315   : > { %5564 = vst [vmem:[%s6975_s4 + $0x2568] sm:$0xff] %v3516_v54  ;;  %5565 = vst [vmem:[%s6975_s4 + $0x2570] sm:$0xff] %v3517_v55  ;;  %v14252_v49 = vld [vmem:[%s6889_s15 + $0x26e0] sm:$0xff]  ;;  %v14255_v50 = vld [vmem:[%s6889_s15 + $0x26e8] sm:$0xff]  ;;  %v3544_v54 = vadd.f32 %v7983_v32, %v14135_v2  ;;  %v3545_v55 = vadd.f32 %v7983_v32, %v14138_v3 }
 0x316   : > { %5566 = vst [vmem:[%s6975_s4 + $0x2578] sm:$0xff] %v3518_v56  ;;  %5567 = vst [vmem:[%s6975_s4 + $0x2580] sm:$0xff] %v3519_v61  ;;  %v14258_v51 = vld [vmem:[%s6889_s15 + $0x26f0] sm:$0xff]  ;;  %v14261_v52 = vld [vmem:[%s6889_s15 + $0x26f8] sm:$0xff]  ;;  %v3546_v56 = vadd.f32 %v7983_v32, %v14141_v4  ;;  %v3547_v61 = vadd.f32 %v7983_v32, %v14156_v11 }
 0x317   : > { %5568 = vst [vmem:[%s6975_s4 + $0x2588] sm:$0xff] %v3520_v62  ;;  %5569 = vst [vmem:[%s6975_s4 + $0x2590] sm:$0xff] %v3521_v63  ;;  %v14276_v57 = vld [vmem:[%s6889_s15 + $0x2700] sm:$0xff]  ;;  %v14279_v58 = vld [vmem:[%s6889_s15 + $0x2708] sm:$0xff]  ;;  %v3548_v62 = vadd.f32 %v7983_v32, %v14159_v12  ;;  %v3549_v63 = vadd.f32 %v7983_v32, %v14162_v14 }
 0x318   : > { %5570 = vst [vmem:[%s6975_s4 + $0x2598] sm:$0xff] %v3522_v0  ;;  %5571 = vst [vmem:[%s6975_s4 + $0x25a0] sm:$0xff] %v3523_v5  ;;  %v14282_v59 = vld [vmem:[%s6889_s15 + $0x2710] sm:$0xff]  ;;  %v14285_v60 = vld [vmem:[%s6889_s15 + $0x2718] sm:$0xff]  ;;  %v3550_v0 = vadd.f32 %v7983_v32, %v14165_v15  ;;  %v3551_v5 = vadd.f32 %v7983_v32, %v14180_v22 }
 0x319   : > { %5572 = vst [vmem:[%s6975_s4 + $0x25a8] sm:$0xff] %v3524_v7  ;;  %5573 = vst [vmem:[%s6975_s4 + $0x25b0] sm:$0xff] %v3525_v8  ;;  %v14300_v1 = vld [vmem:[%s6889_s15 + $0x2720] sm:$0xff]  ;;  %v14303_v2 = vld [vmem:[%s6889_s15 + $0x2728] sm:$0xff]  ;;  %v3552_v7 = vadd.f32 %v7983_v32, %v14183_v23  ;;  %v3553_v8 = vadd.f32 %v7983_v32, %v14186_v24 }
 0x31a   : > { %5574 = vst [vmem:[%s6975_s4 + $0x25b8] sm:$0xff] %v3526_v10  ;;  %5575 = vst [vmem:[%s6975_s4 + $0x25c0] sm:$0xff] %v3527_v16  ;;  %v14306_v3 = vld [vmem:[%s6889_s15 + $0x2730] sm:$0xff]  ;;  %v14309_v4 = vld [vmem:[%s6889_s15 + $0x2738] sm:$0xff]  ;;  %v3554_v10 = vadd.f32 %v7983_v32, %v14189_v26  ;;  %v3555_v16 = vadd.f32 %v7983_v32, %v14204_v31 }
 0x31b   : > { %5576 = vst [vmem:[%s6975_s4 + $0x25c8] sm:$0xff] %v3528_v18  ;;  %5577 = vst [vmem:[%s6975_s4 + $0x25d0] sm:$0xff] %v3529_v20  ;;  %v14324_v11 = vld [vmem:[%s6889_s15 + $0x2740] sm:$0xff]  ;;  %v14327_v12 = vld [vmem:[%s6889_s15 + $0x2748] sm:$0xff]  ;;  %v3556_v18 = vadd.f32 %v7983_v32, %v14207_v33  ;;  %v3557_v20 = vadd.f32 %v7983_v32, %v14210_v34 }
 0x31c   : > { %5578 = vst [vmem:[%s6975_s4 + $0x25d8] sm:$0xff] %v3530_v21  ;;  %5579 = vst [vmem:[%s6975_s4 + $0x25e0] sm:$0xff] %v3531_v27  ;;  %v14330_v14 = vld [vmem:[%s6889_s15 + $0x2750] sm:$0xff]  ;;  %v14333_v15 = vld [vmem:[%s6889_s15 + $0x2758] sm:$0xff]  ;;  %v3558_v21 = vadd.f32 %v7983_v32, %v14213_v35  ;;  %v3559_v27 = vadd.f32 %v7983_v32, %v14228_v41 }
 0x31d   : > { %5580 = vst [vmem:[%s6975_s4 + $0x25e8] sm:$0xff] %v3532_v28  ;;  %5581 = vst [vmem:[%s6975_s4 + $0x25f0] sm:$0xff] %v3533_v29  ;;  %v14348_v22 = vld [vmem:[%s6889_s15 + $0x2760] sm:$0xff]  ;;  %v14351_v23 = vld [vmem:[%s6889_s15 + $0x2768] sm:$0xff]  ;;  %v3560_v28 = vadd.f32 %v7983_v32, %v14231_v42  ;;  %v3561_v29 = vadd.f32 %v7983_v32, %v14234_v43 }
 0x31e   : > { %5582 = vst [vmem:[%s6975_s4 + $0x25f8] sm:$0xff] %v3534_v30  ;;  %5583 = vst [vmem:[%s6975_s4 + $0x2600] sm:$0xff] %v3535_v36  ;;  %v14354_v24 = vld [vmem:[%s6889_s15 + $0x2770] sm:$0xff]  ;;  %v14357_v26 = vld [vmem:[%s6889_s15 + $0x2778] sm:$0xff]  ;;  %v3562_v30 = vadd.f32 %v7983_v32, %v14237_v44  ;;  %v3563_v36 = vadd.f32 %v7983_v32, %v14252_v49 }
 0x31f   : > { %5584 = vst [vmem:[%s6975_s4 + $0x2608] sm:$0xff] %v3536_v37  ;;  %5585 = vst [vmem:[%s6975_s4 + $0x2610] sm:$0xff] %v3537_v38  ;;  %v14372_v31 = vld [vmem:[%s6889_s15 + $0x2780] sm:$0xff]  ;;  %v14375_v33 = vld [vmem:[%s6889_s15 + $0x2788] sm:$0xff]  ;;  %v3564_v37 = vadd.f32 %v7983_v32, %v14255_v50  ;;  %v3565_v38 = vadd.f32 %v7983_v32, %v14258_v51 }
 0x320   : > { %5586 = vst [vmem:[%s6975_s4 + $0x2618] sm:$0xff] %v3538_v39  ;;  %5587 = vst [vmem:[%s6975_s4 + $0x2620] sm:$0xff] %v3539_v45  ;;  %v14378_v34 = vld [vmem:[%s6889_s15 + $0x2790] sm:$0xff]  ;;  %v14381_v35 = vld [vmem:[%s6889_s15 + $0x2798] sm:$0xff]  ;;  %v3566_v39 = vadd.f32 %v7983_v32, %v14261_v52  ;;  %v3567_v45 = vadd.f32 %v8177_v40, %v14276_v57 }
 0x321   : > { %5588 = vst [vmem:[%s6975_s4 + $0x2628] sm:$0xff] %v3540_v46  ;;  %5589 = vst [vmem:[%s6975_s4 + $0x2630] sm:$0xff] %v3541_v47  ;;  %v14396_v41 = vld [vmem:[%s6889_s15 + $0x27a0] sm:$0xff]  ;;  %v14399_v42 = vld [vmem:[%s6889_s15 + $0x27a8] sm:$0xff]  ;;  %v3568_v46 = vadd.f32 %v8177_v40, %v14279_v58  ;;  %v3569_v47 = vadd.f32 %v8177_v40, %v14282_v59 }
 0x322   : > { %5590 = vst [vmem:[%s6975_s4 + $0x2638] sm:$0xff] %v3542_v48  ;;  %5591 = vst [vmem:[%s6975_s4 + $0x2640] sm:$0xff] %v3543_v53  ;;  %v14402_v43 = vld [vmem:[%s6889_s15 + $0x27b0] sm:$0xff]  ;;  %v14405_v44 = vld [vmem:[%s6889_s15 + $0x27b8] sm:$0xff]  ;;  %v3570_v48 = vadd.f32 %v8177_v40, %v14285_v60  ;;  %v3571_v53 = vadd.f32 %v8177_v40, %v14300_v1 }
 0x323   : > { %5592 = vst [vmem:[%s6975_s4 + $0x2648] sm:$0xff] %v3544_v54  ;;  %5593 = vst [vmem:[%s6975_s4 + $0x2650] sm:$0xff] %v3545_v55  ;;  %v14420_v49 = vld [vmem:[%s6889_s15 + $0x27c0] sm:$0xff]  ;;  %v14423_v50 = vld [vmem:[%s6889_s15 + $0x27c8] sm:$0xff]  ;;  %v3572_v54 = vadd.f32 %v8177_v40, %v14303_v2  ;;  %v3573_v55 = vadd.f32 %v8177_v40, %v14306_v3 }
 0x324   : > { %5594 = vst [vmem:[%s6975_s4 + $0x2658] sm:$0xff] %v3546_v56  ;;  %5595 = vst [vmem:[%s6975_s4 + $0x2660] sm:$0xff] %v3547_v61  ;;  %v14426_v51 = vld [vmem:[%s6889_s15 + $0x27d0] sm:$0xff]  ;;  %v14429_v52 = vld [vmem:[%s6889_s15 + $0x27d8] sm:$0xff]  ;;  %v3574_v56 = vadd.f32 %v8177_v40, %v14309_v4  ;;  %v3575_v61 = vadd.f32 %v8177_v40, %v14324_v11 }
 0x325   : > { %5596 = vst [vmem:[%s6975_s4 + $0x2668] sm:$0xff] %v3548_v62  ;;  %5597 = vst [vmem:[%s6975_s4 + $0x2670] sm:$0xff] %v3549_v63  ;;  %v14444_v57 = vld [vmem:[%s6889_s15 + $0x27e0] sm:$0xff]  ;;  %v14447_v58 = vld [vmem:[%s6889_s15 + $0x27e8] sm:$0xff]  ;;  %v3576_v62 = vadd.f32 %v8177_v40, %v14327_v12  ;;  %v3577_v63 = vadd.f32 %v8177_v40, %v14330_v14 }
 0x326   : > { %5598 = vst [vmem:[%s6975_s4 + $0x2678] sm:$0xff] %v3550_v0  ;;  %5599 = vst [vmem:[%s6975_s4 + $0x2680] sm:$0xff] %v3551_v5  ;;  %v14450_v59 = vld [vmem:[%s6889_s15 + $0x27f0] sm:$0xff]  ;;  %v14453_v60 = vld [vmem:[%s6889_s15 + $0x27f8] sm:$0xff]  ;;  %v3578_v0 = vadd.f32 %v8177_v40, %v14333_v15  ;;  %v3579_v5 = vadd.f32 %v8177_v40, %v14348_v22 }
 0x327   : > { %5600 = vst [vmem:[%s6975_s4 + $0x2688] sm:$0xff] %v3552_v7  ;;  %5601 = vst [vmem:[%s6975_s4 + $0x2690] sm:$0xff] %v3553_v8  ;;  %v14468_v1 = vld [vmem:[%s6889_s15 + $0x2800] sm:$0xff]  ;;  %v14471_v2 = vld [vmem:[%s6889_s15 + $0x2808] sm:$0xff]  ;;  %v3580_v7 = vadd.f32 %v8177_v40, %v14351_v23  ;;  %v3581_v8 = vadd.f32 %v8177_v40, %v14354_v24 }
 0x328   : > { %5602 = vst [vmem:[%s6975_s4 + $0x2698] sm:$0xff] %v3554_v10  ;;  %5603 = vst [vmem:[%s6975_s4 + $0x26a0] sm:$0xff] %v3555_v16  ;;  %v14474_v3 = vld [vmem:[%s6889_s15 + $0x2810] sm:$0xff]  ;;  %v14477_v4 = vld [vmem:[%s6889_s15 + $0x2818] sm:$0xff]  ;;  %v3582_v10 = vadd.f32 %v8177_v40, %v14357_v26  ;;  %v3583_v16 = vadd.f32 %v8177_v40, %v14372_v31 }
 0x329   : > { %5604 = vst [vmem:[%s6975_s4 + $0x26a8] sm:$0xff] %v3556_v18  ;;  %5605 = vst [vmem:[%s6975_s4 + $0x26b0] sm:$0xff] %v3557_v20  ;;  %v14492_v11 = vld [vmem:[%s6889_s15 + $0x2820] sm:$0xff]  ;;  %v14495_v12 = vld [vmem:[%s6889_s15 + $0x2828] sm:$0xff]  ;;  %v3584_v18 = vadd.f32 %v8177_v40, %v14375_v33  ;;  %v3585_v20 = vadd.f32 %v8177_v40, %v14378_v34 }
 0x32a   : > { %5606 = vst [vmem:[%s6975_s4 + $0x26b8] sm:$0xff] %v3558_v21  ;;  %5607 = vst [vmem:[%s6975_s4 + $0x26c0] sm:$0xff] %v3559_v27  ;;  %v14498_v14 = vld [vmem:[%s6889_s15 + $0x2830] sm:$0xff]  ;;  %v14501_v15 = vld [vmem:[%s6889_s15 + $0x2838] sm:$0xff]  ;;  %v3586_v21 = vadd.f32 %v8177_v40, %v14381_v35  ;;  %v3587_v27 = vadd.f32 %v8177_v40, %v14396_v41 }
 0x32b   : > { %5608 = vst [vmem:[%s6975_s4 + $0x26c8] sm:$0xff] %v3560_v28  ;;  %5609 = vst [vmem:[%s6975_s4 + $0x26d0] sm:$0xff] %v3561_v29  ;;  %v14516_v22 = vld [vmem:[%s6889_s15 + $0x2840] sm:$0xff]  ;;  %v14519_v23 = vld [vmem:[%s6889_s15 + $0x2848] sm:$0xff]  ;;  %v3588_v28 = vadd.f32 %v8177_v40, %v14399_v42  ;;  %v3589_v29 = vadd.f32 %v8177_v40, %v14402_v43 }
 0x32c   : > { %5610 = vst [vmem:[%s6975_s4 + $0x26d8] sm:$0xff] %v3562_v30  ;;  %5611 = vst [vmem:[%s6975_s4 + $0x26e0] sm:$0xff] %v3563_v36  ;;  %v14522_v24 = vld [vmem:[%s6889_s15 + $0x2850] sm:$0xff]  ;;  %v14525_v26 = vld [vmem:[%s6889_s15 + $0x2858] sm:$0xff]  ;;  %v3590_v30 = vadd.f32 %v8177_v40, %v14405_v44  ;;  %v3591_v36 = vadd.f32 %v8177_v40, %v14420_v49 }
 0x32d   : > { %5612 = vst [vmem:[%s6975_s4 + $0x26e8] sm:$0xff] %v3564_v37  ;;  %5613 = vst [vmem:[%s6975_s4 + $0x26f0] sm:$0xff] %v3565_v38  ;;  %v14540_v31 = vld [vmem:[%s6889_s15 + $0x2860] sm:$0xff]  ;;  %v14543_v33 = vld [vmem:[%s6889_s15 + $0x2868] sm:$0xff]  ;;  %v3592_v37 = vadd.f32 %v8177_v40, %v14423_v50  ;;  %v3593_v38 = vadd.f32 %v8177_v40, %v14426_v51 }
 0x32e   : > { %5614 = vst [vmem:[%s6975_s4 + $0x26f8] sm:$0xff] %v3566_v39  ;;  %5615 = vst [vmem:[%s6975_s4 + $0x2700] sm:$0xff] %v3567_v45  ;;  %v14546_v34 = vld [vmem:[%s6889_s15 + $0x2870] sm:$0xff]  ;;  %v14549_v35 = vld [vmem:[%s6889_s15 + $0x2878] sm:$0xff]  ;;  %v3594_v39 = vadd.f32 %v8177_v40, %v14429_v52  ;;  %v3595_v45 = vadd.f32 %v8177_v40, %v14444_v57 }
 0x32f   : > { %5616 = vst [vmem:[%s6975_s4 + $0x2708] sm:$0xff] %v3568_v46  ;;  %5617 = vst [vmem:[%s6975_s4 + $0x2710] sm:$0xff] %v3569_v47  ;;  %v14564_v41 = vld [vmem:[%s6889_s15 + $0x2880] sm:$0xff]  ;;  %v14567_v42 = vld [vmem:[%s6889_s15 + $0x2888] sm:$0xff]  ;;  %v3596_v46 = vadd.f32 %v8177_v40, %v14447_v58  ;;  %v3597_v47 = vadd.f32 %v8177_v40, %v14450_v59 }
 0x330   : > { %5618 = vst [vmem:[%s6975_s4 + $0x2718] sm:$0xff] %v3570_v48  ;;  %5619 = vst [vmem:[%s6975_s4 + $0x2720] sm:$0xff] %v3571_v53  ;;  %v14570_v43 = vld [vmem:[%s6889_s15 + $0x2890] sm:$0xff]  ;;  %v14573_v44 = vld [vmem:[%s6889_s15 + $0x2898] sm:$0xff]  ;;  %v3598_v48 = vadd.f32 %v8177_v40, %v14453_v60  ;;  %v3599_v53 = vadd.f32 %v6927_v17, %v14468_v1 }
 0x331   : > { %5620 = vst [vmem:[%s6975_s4 + $0x2728] sm:$0xff] %v3572_v54  ;;  %5621 = vst [vmem:[%s6975_s4 + $0x2730] sm:$0xff] %v3573_v55  ;;  %v14588_v49 = vld [vmem:[%s6889_s15 + $0x28a0] sm:$0xff]  ;;  %v14591_v50 = vld [vmem:[%s6889_s15 + $0x28a8] sm:$0xff]  ;;  %v3600_v54 = vadd.f32 %v6927_v17, %v14471_v2  ;;  %v3601_v55 = vadd.f32 %v6927_v17, %v14474_v3 }
 0x332   : > { %5622 = vst [vmem:[%s6975_s4 + $0x2738] sm:$0xff] %v3574_v56  ;;  %5623 = vst [vmem:[%s6975_s4 + $0x2740] sm:$0xff] %v3575_v61  ;;  %v14594_v51 = vld [vmem:[%s6889_s15 + $0x28b0] sm:$0xff]  ;;  %v14597_v52 = vld [vmem:[%s6889_s15 + $0x28b8] sm:$0xff]  ;;  %v3602_v56 = vadd.f32 %v6927_v17, %v14477_v4  ;;  %v3603_v61 = vadd.f32 %v6927_v17, %v14492_v11 }
 0x333   : > { %5624 = vst [vmem:[%s6975_s4 + $0x2748] sm:$0xff] %v3576_v62  ;;  %5625 = vst [vmem:[%s6975_s4 + $0x2750] sm:$0xff] %v3577_v63  ;;  %v14612_v57 = vld [vmem:[%s6889_s15 + $0x28c0] sm:$0xff]  ;;  %v14615_v58 = vld [vmem:[%s6889_s15 + $0x28c8] sm:$0xff]  ;;  %v3604_v62 = vadd.f32 %v6927_v17, %v14495_v12  ;;  %v3605_v63 = vadd.f32 %v6927_v17, %v14498_v14 }
 0x334   : > { %5626 = vst [vmem:[%s6975_s4 + $0x2758] sm:$0xff] %v3578_v0  ;;  %5627 = vst [vmem:[%s6975_s4 + $0x2760] sm:$0xff] %v3579_v5  ;;  %v14618_v59 = vld [vmem:[%s6889_s15 + $0x28d0] sm:$0xff]  ;;  %v14621_v60 = vld [vmem:[%s6889_s15 + $0x28d8] sm:$0xff]  ;;  %v3606_v0 = vadd.f32 %v6927_v17, %v14501_v15  ;;  %v3607_v5 = vadd.f32 %v6927_v17, %v14516_v22 }
 0x335   : > { %5628 = vst [vmem:[%s6975_s4 + $0x2768] sm:$0xff] %v3580_v7  ;;  %5629 = vst [vmem:[%s6975_s4 + $0x2770] sm:$0xff] %v3581_v8  ;;  %v14636_v1 = vld [vmem:[%s6889_s15 + $0x28e0] sm:$0xff]  ;;  %v14639_v2 = vld [vmem:[%s6889_s15 + $0x28e8] sm:$0xff]  ;;  %v3608_v7 = vadd.f32 %v6927_v17, %v14519_v23  ;;  %v3609_v8 = vadd.f32 %v6927_v17, %v14522_v24 }
 0x336   : > { %5630 = vst [vmem:[%s6975_s4 + $0x2778] sm:$0xff] %v3582_v10  ;;  %5631 = vst [vmem:[%s6975_s4 + $0x2780] sm:$0xff] %v3583_v16  ;;  %v14642_v3 = vld [vmem:[%s6889_s15 + $0x28f0] sm:$0xff]  ;;  %v14645_v4 = vld [vmem:[%s6889_s15 + $0x28f8] sm:$0xff]  ;;  %v3610_v10 = vadd.f32 %v6927_v17, %v14525_v26  ;;  %v3611_v16 = vadd.f32 %v6927_v17, %v14540_v31 }
 0x337   : > { %5632 = vst [vmem:[%s6975_s4 + $0x2788] sm:$0xff] %v3584_v18  ;;  %5633 = vst [vmem:[%s6975_s4 + $0x2790] sm:$0xff] %v3585_v20  ;;  %v14660_v11 = vld [vmem:[%s6889_s15 + $0x2900] sm:$0xff]  ;;  %v14663_v12 = vld [vmem:[%s6889_s15 + $0x2908] sm:$0xff]  ;;  %v3612_v18 = vadd.f32 %v6927_v17, %v14543_v33  ;;  %v3613_v20 = vadd.f32 %v6927_v17, %v14546_v34 }
 0x338   : > { %5634 = vst [vmem:[%s6975_s4 + $0x2798] sm:$0xff] %v3586_v21  ;;  %5635 = vst [vmem:[%s6975_s4 + $0x27a0] sm:$0xff] %v3587_v27  ;;  %v14666_v14 = vld [vmem:[%s6889_s15 + $0x2910] sm:$0xff]  ;;  %v14669_v15 = vld [vmem:[%s6889_s15 + $0x2918] sm:$0xff]  ;;  %v3614_v21 = vadd.f32 %v6927_v17, %v14549_v35  ;;  %v3615_v27 = vadd.f32 %v6927_v17, %v14564_v41 }
 0x339   : > { %5636 = vst [vmem:[%s6975_s4 + $0x27a8] sm:$0xff] %v3588_v28  ;;  %5637 = vst [vmem:[%s6975_s4 + $0x27b0] sm:$0xff] %v3589_v29  ;;  %v14684_v22 = vld [vmem:[%s6889_s15 + $0x2920] sm:$0xff]  ;;  %v14687_v23 = vld [vmem:[%s6889_s15 + $0x2928] sm:$0xff]  ;;  %v3616_v28 = vadd.f32 %v6927_v17, %v14567_v42  ;;  %v3617_v29 = vadd.f32 %v6927_v17, %v14570_v43 }
 0x33a   : > { %5638 = vst [vmem:[%s6975_s4 + $0x27b8] sm:$0xff] %v3590_v30  ;;  %5639 = vst [vmem:[%s6975_s4 + $0x27c0] sm:$0xff] %v3591_v36  ;;  %v14690_v24 = vld [vmem:[%s6889_s15 + $0x2930] sm:$0xff]  ;;  %v14693_v26 = vld [vmem:[%s6889_s15 + $0x2938] sm:$0xff]  ;;  %v3618_v30 = vadd.f32 %v6927_v17, %v14573_v44  ;;  %v3619_v36 = vadd.f32 %v6927_v17, %v14588_v49 }
 0x33b   : > { %5640 = vst [vmem:[%s6975_s4 + $0x27c8] sm:$0xff] %v3592_v37  ;;  %5641 = vst [vmem:[%s6975_s4 + $0x27d0] sm:$0xff] %v3593_v38  ;;  %v14708_v31 = vld [vmem:[%s6889_s15 + $0x2940] sm:$0xff]  ;;  %v14711_v33 = vld [vmem:[%s6889_s15 + $0x2948] sm:$0xff]  ;;  %v3620_v37 = vadd.f32 %v6927_v17, %v14591_v50  ;;  %v3621_v38 = vadd.f32 %v6927_v17, %v14594_v51 }
 0x33c   : > { %5642 = vst [vmem:[%s6975_s4 + $0x27d8] sm:$0xff] %v3594_v39  ;;  %5643 = vst [vmem:[%s6975_s4 + $0x27e0] sm:$0xff] %v3595_v45  ;;  %v14714_v34 = vld [vmem:[%s6889_s15 + $0x2950] sm:$0xff]  ;;  %v14717_v35 = vld [vmem:[%s6889_s15 + $0x2958] sm:$0xff]  ;;  %v3622_v39 = vadd.f32 %v6927_v17, %v14597_v52  ;;  %v3623_v45 = vadd.f32 %v6927_v17, %v14612_v57 }
 0x33d   : > { %5644 = vst [vmem:[%s6975_s4 + $0x27e8] sm:$0xff] %v3596_v46  ;;  %5645 = vst [vmem:[%s6975_s4 + $0x27f0] sm:$0xff] %v3597_v47  ;;  %v14732_v41 = vld [vmem:[%s6889_s15 + $0x2960] sm:$0xff]  ;;  %v14735_v42 = vld [vmem:[%s6889_s15 + $0x2968] sm:$0xff]  ;;  %v3624_v46 = vadd.f32 %v6927_v17, %v14615_v58  ;;  %v3625_v47 = vadd.f32 %v6927_v17, %v14618_v59 }
 0x33e   : > { %5646 = vst [vmem:[%s6975_s4 + $0x27f8] sm:$0xff] %v3598_v48  ;;  %5647 = vst [vmem:[%s6975_s4 + $0x2800] sm:$0xff] %v3599_v53  ;;  %v14738_v43 = vld [vmem:[%s6889_s15 + $0x2970] sm:$0xff]  ;;  %v14741_v44 = vld [vmem:[%s6889_s15 + $0x2978] sm:$0xff]  ;;  %v3626_v48 = vadd.f32 %v6927_v17, %v14621_v60  ;;  %v3627_v53 = vadd.f32 %v6927_v17, %v14636_v1 }
 0x33f   : > { %5648 = vst [vmem:[%s6975_s4 + $0x2808] sm:$0xff] %v3600_v54  ;;  %5649 = vst [vmem:[%s6975_s4 + $0x2810] sm:$0xff] %v3601_v55  ;;  %v14756_v49 = vld [vmem:[%s6889_s15 + $0x2980] sm:$0xff]  ;;  %v14759_v50 = vld [vmem:[%s6889_s15 + $0x2988] sm:$0xff]  ;;  %v3628_v54 = vadd.f32 %v6927_v17, %v14639_v2  ;;  %v3629_v55 = vadd.f32 %v6927_v17, %v14642_v3 }
 0x340   : > { %5650 = vst [vmem:[%s6975_s4 + $0x2818] sm:$0xff] %v3602_v56  ;;  %5651 = vst [vmem:[%s6975_s4 + $0x2820] sm:$0xff] %v3603_v61  ;;  %v14762_v51 = vld [vmem:[%s6889_s15 + $0x2990] sm:$0xff]  ;;  %v14765_v52 = vld [vmem:[%s6889_s15 + $0x2998] sm:$0xff]  ;;  %v3630_v56 = vadd.f32 %v6927_v17, %v14645_v4  ;;  %v3631_v61 = vadd.f32 %v7021_v6, %v14660_v11 }
 0x341   : > { %5652 = vst [vmem:[%s6975_s4 + $0x2828] sm:$0xff] %v3604_v62  ;;  %5653 = vst [vmem:[%s6975_s4 + $0x2830] sm:$0xff] %v3605_v63  ;;  %v14780_v57 = vld [vmem:[%s6889_s15 + $0x29a0] sm:$0xff]  ;;  %v14783_v58 = vld [vmem:[%s6889_s15 + $0x29a8] sm:$0xff]  ;;  %v3632_v62 = vadd.f32 %v7021_v6, %v14663_v12  ;;  %v3633_v63 = vadd.f32 %v7021_v6, %v14666_v14 }
 0x342   : > { %5654 = vst [vmem:[%s6975_s4 + $0x2838] sm:$0xff] %v3606_v0  ;;  %5655 = vst [vmem:[%s6975_s4 + $0x2840] sm:$0xff] %v3607_v5  ;;  %v14786_v59 = vld [vmem:[%s6889_s15 + $0x29b0] sm:$0xff]  ;;  %v14789_v60 = vld [vmem:[%s6889_s15 + $0x29b8] sm:$0xff]  ;;  %v3634_v0 = vadd.f32 %v7021_v6, %v14669_v15  ;;  %v3635_v5 = vadd.f32 %v7021_v6, %v14684_v22 }
 0x343   : > { %5656 = vst [vmem:[%s6975_s4 + $0x2848] sm:$0xff] %v3608_v7  ;;  %5657 = vst [vmem:[%s6975_s4 + $0x2850] sm:$0xff] %v3609_v8  ;;  %v14804_v1 = vld [vmem:[%s6889_s15 + $0x29c0] sm:$0xff]  ;;  %v14807_v2 = vld [vmem:[%s6889_s15 + $0x29c8] sm:$0xff]  ;;  %v3636_v7 = vadd.f32 %v7021_v6, %v14687_v23  ;;  %v3637_v8 = vadd.f32 %v7021_v6, %v14690_v24 }
 0x344   : > { %5658 = vst [vmem:[%s6975_s4 + $0x2858] sm:$0xff] %v3610_v10  ;;  %5659 = vst [vmem:[%s6975_s4 + $0x2860] sm:$0xff] %v3611_v16  ;;  %v14810_v3 = vld [vmem:[%s6889_s15 + $0x29d0] sm:$0xff]  ;;  %v14813_v4 = vld [vmem:[%s6889_s15 + $0x29d8] sm:$0xff]  ;;  %v3638_v10 = vadd.f32 %v7021_v6, %v14693_v26  ;;  %v3639_v16 = vadd.f32 %v7021_v6, %v14708_v31 }
 0x345   : > { %5660 = vst [vmem:[%s6975_s4 + $0x2868] sm:$0xff] %v3612_v18  ;;  %5661 = vst [vmem:[%s6975_s4 + $0x2870] sm:$0xff] %v3613_v20  ;;  %v14828_v11 = vld [vmem:[%s6889_s15 + $0x29e0] sm:$0xff]  ;;  %v14831_v12 = vld [vmem:[%s6889_s15 + $0x29e8] sm:$0xff]  ;;  %v3640_v18 = vadd.f32 %v7021_v6, %v14711_v33  ;;  %v3641_v20 = vadd.f32 %v7021_v6, %v14714_v34 }
 0x346   : > { %5662 = vst [vmem:[%s6975_s4 + $0x2878] sm:$0xff] %v3614_v21  ;;  %5663 = vst [vmem:[%s6975_s4 + $0x2880] sm:$0xff] %v3615_v27  ;;  %v14834_v14 = vld [vmem:[%s6889_s15 + $0x29f0] sm:$0xff]  ;;  %v14837_v15 = vld [vmem:[%s6889_s15 + $0x29f8] sm:$0xff]  ;;  %v3642_v21 = vadd.f32 %v7021_v6, %v14717_v35  ;;  %v3643_v27 = vadd.f32 %v7021_v6, %v14732_v41 }
 0x347   : > { %5664 = vst [vmem:[%s6975_s4 + $0x2888] sm:$0xff] %v3616_v28  ;;  %5665 = vst [vmem:[%s6975_s4 + $0x2890] sm:$0xff] %v3617_v29  ;;  %v14852_v22 = vld [vmem:[%s6889_s15 + $0x2a00] sm:$0xff]  ;;  %v14855_v23 = vld [vmem:[%s6889_s15 + $0x2a08] sm:$0xff]  ;;  %v3644_v28 = vadd.f32 %v7021_v6, %v14735_v42  ;;  %v3645_v29 = vadd.f32 %v7021_v6, %v14738_v43 }
 0x348   : > { %5666 = vst [vmem:[%s6975_s4 + $0x2898] sm:$0xff] %v3618_v30  ;;  %5667 = vst [vmem:[%s6975_s4 + $0x28a0] sm:$0xff] %v3619_v36  ;;  %v14858_v24 = vld [vmem:[%s6889_s15 + $0x2a10] sm:$0xff]  ;;  %v14861_v26 = vld [vmem:[%s6889_s15 + $0x2a18] sm:$0xff]  ;;  %v3646_v30 = vadd.f32 %v7021_v6, %v14741_v44  ;;  %v3647_v36 = vadd.f32 %v7021_v6, %v14756_v49 }
 0x349   : > { %5668 = vst [vmem:[%s6975_s4 + $0x28a8] sm:$0xff] %v3620_v37  ;;  %5669 = vst [vmem:[%s6975_s4 + $0x28b0] sm:$0xff] %v3621_v38  ;;  %v14876_v31 = vld [vmem:[%s6889_s15 + $0x2a20] sm:$0xff]  ;;  %v14879_v33 = vld [vmem:[%s6889_s15 + $0x2a28] sm:$0xff]  ;;  %v3648_v37 = vadd.f32 %v7021_v6, %v14759_v50  ;;  %v3649_v38 = vadd.f32 %v7021_v6, %v14762_v51 }
 0x34a   : > { %5670 = vst [vmem:[%s6975_s4 + $0x28b8] sm:$0xff] %v3622_v39  ;;  %5671 = vst [vmem:[%s6975_s4 + $0x28c0] sm:$0xff] %v3623_v45  ;;  %v14882_v34 = vld [vmem:[%s6889_s15 + $0x2a30] sm:$0xff]  ;;  %v14885_v35 = vld [vmem:[%s6889_s15 + $0x2a38] sm:$0xff]  ;;  %v3650_v39 = vadd.f32 %v7021_v6, %v14765_v52  ;;  %v3651_v45 = vadd.f32 %v7021_v6, %v14780_v57 }
 0x34b   : > { %5672 = vst [vmem:[%s6975_s4 + $0x28c8] sm:$0xff] %v3624_v46  ;;  %5673 = vst [vmem:[%s6975_s4 + $0x28d0] sm:$0xff] %v3625_v47  ;;  %v14900_v41 = vld [vmem:[%s6889_s15 + $0x2a40] sm:$0xff]  ;;  %v14903_v42 = vld [vmem:[%s6889_s15 + $0x2a48] sm:$0xff]  ;;  %v3652_v46 = vadd.f32 %v7021_v6, %v14783_v58  ;;  %v3653_v47 = vadd.f32 %v7021_v6, %v14786_v59 }
 0x34c   : > { %5674 = vst [vmem:[%s6975_s4 + $0x28d8] sm:$0xff] %v3626_v48  ;;  %5675 = vst [vmem:[%s6975_s4 + $0x28e0] sm:$0xff] %v3627_v53  ;;  %v14906_v43 = vld [vmem:[%s6889_s15 + $0x2a50] sm:$0xff]  ;;  %v14909_v44 = vld [vmem:[%s6889_s15 + $0x2a58] sm:$0xff]  ;;  %v3654_v48 = vadd.f32 %v7021_v6, %v14789_v60  ;;  %v3655_v53 = vadd.f32 %v7021_v6, %v14804_v1 }
 0x34d   : > { %5676 = vst [vmem:[%s6975_s4 + $0x28e8] sm:$0xff] %v3628_v54  ;;  %5677 = vst [vmem:[%s6975_s4 + $0x28f0] sm:$0xff] %v3629_v55  ;;  %v14924_v49 = vld [vmem:[%s6889_s15 + $0x2a60] sm:$0xff]  ;;  %v14927_v50 = vld [vmem:[%s6889_s15 + $0x2a68] sm:$0xff]  ;;  %v3656_v54 = vadd.f32 %v7021_v6, %v14807_v2  ;;  %v3657_v55 = vadd.f32 %v7021_v6, %v14810_v3 }
 0x34e   : > { %5678 = vst [vmem:[%s6975_s4 + $0x28f8] sm:$0xff] %v3630_v56  ;;  %5679 = vst [vmem:[%s6975_s4 + $0x2900] sm:$0xff] %v3631_v61  ;;  %v14930_v51 = vld [vmem:[%s6889_s15 + $0x2a70] sm:$0xff]  ;;  %v14933_v52 = vld [vmem:[%s6889_s15 + $0x2a78] sm:$0xff]  ;;  %v3658_v56 = vadd.f32 %v7021_v6, %v14813_v4  ;;  %v3659_v61 = vadd.f32 %v7021_v6, %v14828_v11 }
 0x34f   : > { %5680 = vst [vmem:[%s6975_s4 + $0x2908] sm:$0xff] %v3632_v62  ;;  %5681 = vst [vmem:[%s6975_s4 + $0x2910] sm:$0xff] %v3633_v63  ;;  %v14948_v57 = vld [vmem:[%s6889_s15 + $0x2a80] sm:$0xff]  ;;  %v14951_v58 = vld [vmem:[%s6889_s15 + $0x2a88] sm:$0xff]  ;;  %v3660_v62 = vadd.f32 %v7021_v6, %v14831_v12  ;;  %v3661_v63 = vadd.f32 %v7021_v6, %v14834_v14 }
 0x350   : > { %5682 = vst [vmem:[%s6975_s4 + $0x2918] sm:$0xff] %v3634_v0  ;;  %5683 = vst [vmem:[%s6975_s4 + $0x2920] sm:$0xff] %v3635_v5  ;;  %v14954_v59 = vld [vmem:[%s6889_s15 + $0x2a90] sm:$0xff]  ;;  %v14957_v60 = vld [vmem:[%s6889_s15 + $0x2a98] sm:$0xff]  ;;  %v3662_v0 = vadd.f32 %v7021_v6, %v14837_v15  ;;  %v3663_v5 = vadd.f32 %v7207_v9, %v14852_v22 }
 0x351   : > { %5684 = vst [vmem:[%s6975_s4 + $0x2928] sm:$0xff] %v3636_v7  ;;  %5685 = vst [vmem:[%s6975_s4 + $0x2930] sm:$0xff] %v3637_v8  ;;  %v14972_v1 = vld [vmem:[%s6889_s15 + $0x2aa0] sm:$0xff]  ;;  %v14975_v2 = vld [vmem:[%s6889_s15 + $0x2aa8] sm:$0xff]  ;;  %v3664_v7 = vadd.f32 %v7207_v9, %v14855_v23  ;;  %v3665_v8 = vadd.f32 %v7207_v9, %v14858_v24 }
 0x352   : > { %5686 = vst [vmem:[%s6975_s4 + $0x2938] sm:$0xff] %v3638_v10  ;;  %5687 = vst [vmem:[%s6975_s4 + $0x2940] sm:$0xff] %v3639_v16  ;;  %v14978_v3 = vld [vmem:[%s6889_s15 + $0x2ab0] sm:$0xff]  ;;  %v14981_v4 = vld [vmem:[%s6889_s15 + $0x2ab8] sm:$0xff]  ;;  %v3666_v10 = vadd.f32 %v7207_v9, %v14861_v26  ;;  %v3667_v16 = vadd.f32 %v7207_v9, %v14876_v31 }
 0x353   : > { %5688 = vst [vmem:[%s6975_s4 + $0x2948] sm:$0xff] %v3640_v18  ;;  %5689 = vst [vmem:[%s6975_s4 + $0x2950] sm:$0xff] %v3641_v20  ;;  %v14996_v11 = vld [vmem:[%s6889_s15 + $0x2ac0] sm:$0xff]  ;;  %v14999_v12 = vld [vmem:[%s6889_s15 + $0x2ac8] sm:$0xff]  ;;  %v3668_v18 = vadd.f32 %v7207_v9, %v14879_v33  ;;  %v3669_v20 = vadd.f32 %v7207_v9, %v14882_v34 }
 0x354   : > { %5690 = vst [vmem:[%s6975_s4 + $0x2958] sm:$0xff] %v3642_v21  ;;  %5691 = vst [vmem:[%s6975_s4 + $0x2960] sm:$0xff] %v3643_v27  ;;  %v15002_v14 = vld [vmem:[%s6889_s15 + $0x2ad0] sm:$0xff]  ;;  %v15005_v15 = vld [vmem:[%s6889_s15 + $0x2ad8] sm:$0xff]  ;;  %v3670_v21 = vadd.f32 %v7207_v9, %v14885_v35  ;;  %v3671_v27 = vadd.f32 %v7207_v9, %v14900_v41 }
 0x355   : > { %5692 = vst [vmem:[%s6975_s4 + $0x2968] sm:$0xff] %v3644_v28  ;;  %5693 = vst [vmem:[%s6975_s4 + $0x2970] sm:$0xff] %v3645_v29  ;;  %v15020_v22 = vld [vmem:[%s6889_s15 + $0x2ae0] sm:$0xff]  ;;  %v15023_v23 = vld [vmem:[%s6889_s15 + $0x2ae8] sm:$0xff]  ;;  %v3672_v28 = vadd.f32 %v7207_v9, %v14903_v42  ;;  %v3673_v29 = vadd.f32 %v7207_v9, %v14906_v43 }
 0x356   : > { %5694 = vst [vmem:[%s6975_s4 + $0x2978] sm:$0xff] %v3646_v30  ;;  %5695 = vst [vmem:[%s6975_s4 + $0x2980] sm:$0xff] %v3647_v36  ;;  %v15026_v24 = vld [vmem:[%s6889_s15 + $0x2af0] sm:$0xff]  ;;  %v15029_v26 = vld [vmem:[%s6889_s15 + $0x2af8] sm:$0xff]  ;;  %v3674_v30 = vadd.f32 %v7207_v9, %v14909_v44  ;;  %v3675_v36 = vadd.f32 %v7207_v9, %v14924_v49 }
 0x357   : > { %5696 = vst [vmem:[%s6975_s4 + $0x2988] sm:$0xff] %v3648_v37  ;;  %5697 = vst [vmem:[%s6975_s4 + $0x2990] sm:$0xff] %v3649_v38  ;;  %v15044_v31 = vld [vmem:[%s6889_s15 + $0x2b00] sm:$0xff]  ;;  %v15047_v33 = vld [vmem:[%s6889_s15 + $0x2b08] sm:$0xff]  ;;  %v3676_v37 = vadd.f32 %v7207_v9, %v14927_v50  ;;  %v3677_v38 = vadd.f32 %v7207_v9, %v14930_v51 }
 0x358   : > { %5698 = vst [vmem:[%s6975_s4 + $0x2998] sm:$0xff] %v3650_v39  ;;  %5699 = vst [vmem:[%s6975_s4 + $0x29a0] sm:$0xff] %v3651_v45  ;;  %v15050_v34 = vld [vmem:[%s6889_s15 + $0x2b10] sm:$0xff]  ;;  %v15053_v35 = vld [vmem:[%s6889_s15 + $0x2b18] sm:$0xff]  ;;  %v3678_v39 = vadd.f32 %v7207_v9, %v14933_v52  ;;  %v3679_v45 = vadd.f32 %v7207_v9, %v14948_v57 }
 0x359   : > { %5700 = vst [vmem:[%s6975_s4 + $0x29a8] sm:$0xff] %v3652_v46  ;;  %5701 = vst [vmem:[%s6975_s4 + $0x29b0] sm:$0xff] %v3653_v47  ;;  %v15068_v41 = vld [vmem:[%s6889_s15 + $0x2b20] sm:$0xff]  ;;  %v15071_v42 = vld [vmem:[%s6889_s15 + $0x2b28] sm:$0xff]  ;;  %v3680_v46 = vadd.f32 %v7207_v9, %v14951_v58  ;;  %v3681_v47 = vadd.f32 %v7207_v9, %v14954_v59 }
 0x35a   : > { %5702 = vst [vmem:[%s6975_s4 + $0x29b8] sm:$0xff] %v3654_v48  ;;  %5703 = vst [vmem:[%s6975_s4 + $0x29c0] sm:$0xff] %v3655_v53  ;;  %v15074_v43 = vld [vmem:[%s6889_s15 + $0x2b30] sm:$0xff]  ;;  %v15077_v44 = vld [vmem:[%s6889_s15 + $0x2b38] sm:$0xff]  ;;  %v3682_v48 = vadd.f32 %v7207_v9, %v14957_v60  ;;  %v3683_v53 = vadd.f32 %v7207_v9, %v14972_v1 }
 0x35b   : > { %5704 = vst [vmem:[%s6975_s4 + $0x29c8] sm:$0xff] %v3656_v54  ;;  %5705 = vst [vmem:[%s6975_s4 + $0x29d0] sm:$0xff] %v3657_v55  ;;  %v15092_v49 = vld [vmem:[%s6889_s15 + $0x2b40] sm:$0xff]  ;;  %v15095_v50 = vld [vmem:[%s6889_s15 + $0x2b48] sm:$0xff]  ;;  %v3684_v54 = vadd.f32 %v7207_v9, %v14975_v2  ;;  %v3685_v55 = vadd.f32 %v7207_v9, %v14978_v3 }
 0x35c   : > { %5706 = vst [vmem:[%s6975_s4 + $0x29d8] sm:$0xff] %v3658_v56  ;;  %5707 = vst [vmem:[%s6975_s4 + $0x29e0] sm:$0xff] %v3659_v61  ;;  %v15098_v51 = vld [vmem:[%s6889_s15 + $0x2b50] sm:$0xff]  ;;  %v15101_v52 = vld [vmem:[%s6889_s15 + $0x2b58] sm:$0xff]  ;;  %v3686_v56 = vadd.f32 %v7207_v9, %v14981_v4  ;;  %v3687_v61 = vadd.f32 %v7207_v9, %v14996_v11 }
 0x35d   : > { %5708 = vst [vmem:[%s6975_s4 + $0x29e8] sm:$0xff] %v3660_v62  ;;  %5709 = vst [vmem:[%s6975_s4 + $0x29f0] sm:$0xff] %v3661_v63  ;;  %v15116_v57 = vld [vmem:[%s6889_s15 + $0x2b60] sm:$0xff]  ;;  %v15119_v58 = vld [vmem:[%s6889_s15 + $0x2b68] sm:$0xff]  ;;  %v3688_v62 = vadd.f32 %v7207_v9, %v14999_v12  ;;  %v3689_v63 = vadd.f32 %v7207_v9, %v15002_v14 }
 0x35e   : > { %5710 = vst [vmem:[%s6975_s4 + $0x29f8] sm:$0xff] %v3662_v0  ;;  %5711 = vst [vmem:[%s6975_s4 + $0x2a00] sm:$0xff] %v3663_v5  ;;  %v15122_v59 = vld [vmem:[%s6889_s15 + $0x2b70] sm:$0xff]  ;;  %v15125_v60 = vld [vmem:[%s6889_s15 + $0x2b78] sm:$0xff]  ;;  %v3690_v0 = vadd.f32 %v7207_v9, %v15005_v15  ;;  %v3691_v5 = vadd.f32 %v7207_v9, %v15020_v22 }
 0x35f   : > { %5712 = vst [vmem:[%s6975_s4 + $0x2a08] sm:$0xff] %v3664_v7  ;;  %5713 = vst [vmem:[%s6975_s4 + $0x2a10] sm:$0xff] %v3665_v8  ;;  %v15140_v1 = vld [vmem:[%s6889_s15 + $0x2b80] sm:$0xff]  ;;  %v15143_v2 = vld [vmem:[%s6889_s15 + $0x2b88] sm:$0xff]  ;;  %v3692_v7 = vadd.f32 %v7207_v9, %v15023_v23  ;;  %v3693_v8 = vadd.f32 %v7207_v9, %v15026_v24 }
 0x360   : > { %5714 = vst [vmem:[%s6975_s4 + $0x2a18] sm:$0xff] %v3666_v10  ;;  %5715 = vst [vmem:[%s6975_s4 + $0x2a20] sm:$0xff] %v3667_v16  ;;  %v15146_v3 = vld [vmem:[%s6889_s15 + $0x2b90] sm:$0xff]  ;;  %v15149_v4 = vld [vmem:[%s6889_s15 + $0x2b98] sm:$0xff]  ;;  %v3694_v10 = vadd.f32 %v7207_v9, %v15029_v26  ;;  %v3695_v16 = vadd.f32 %v7401_v13, %v15044_v31 }
 0x361   : > { %5716 = vst [vmem:[%s6975_s4 + $0x2a28] sm:$0xff] %v3668_v18  ;;  %5717 = vst [vmem:[%s6975_s4 + $0x2a30] sm:$0xff] %v3669_v20  ;;  %v15164_v11 = vld [vmem:[%s6889_s15 + $0x2ba0] sm:$0xff]  ;;  %v15167_v12 = vld [vmem:[%s6889_s15 + $0x2ba8] sm:$0xff]  ;;  %v3696_v18 = vadd.f32 %v7401_v13, %v15047_v33  ;;  %v3697_v20 = vadd.f32 %v7401_v13, %v15050_v34 }
 0x362   : > { %5718 = vst [vmem:[%s6975_s4 + $0x2a38] sm:$0xff] %v3670_v21  ;;  %5719 = vst [vmem:[%s6975_s4 + $0x2a40] sm:$0xff] %v3671_v27  ;;  %v15170_v14 = vld [vmem:[%s6889_s15 + $0x2bb0] sm:$0xff]  ;;  %v15173_v15 = vld [vmem:[%s6889_s15 + $0x2bb8] sm:$0xff]  ;;  %v3698_v21 = vadd.f32 %v7401_v13, %v15053_v35  ;;  %v3699_v27 = vadd.f32 %v7401_v13, %v15068_v41 }
 0x363   : > { %5720 = vst [vmem:[%s6975_s4 + $0x2a48] sm:$0xff] %v3672_v28  ;;  %5721 = vst [vmem:[%s6975_s4 + $0x2a50] sm:$0xff] %v3673_v29  ;;  %v15188_v22 = vld [vmem:[%s6889_s15 + $0x2bc0] sm:$0xff]  ;;  %v15191_v23 = vld [vmem:[%s6889_s15 + $0x2bc8] sm:$0xff]  ;;  %v3700_v28 = vadd.f32 %v7401_v13, %v15071_v42  ;;  %v3701_v29 = vadd.f32 %v7401_v13, %v15074_v43 }
 0x364   : > { %5722 = vst [vmem:[%s6975_s4 + $0x2a58] sm:$0xff] %v3674_v30  ;;  %5723 = vst [vmem:[%s6975_s4 + $0x2a60] sm:$0xff] %v3675_v36  ;;  %v15194_v24 = vld [vmem:[%s6889_s15 + $0x2bd0] sm:$0xff]  ;;  %v15197_v26 = vld [vmem:[%s6889_s15 + $0x2bd8] sm:$0xff]  ;;  %v3702_v30 = vadd.f32 %v7401_v13, %v15077_v44  ;;  %v3703_v36 = vadd.f32 %v7401_v13, %v15092_v49 }
 0x365   : > { %5724 = vst [vmem:[%s6975_s4 + $0x2a68] sm:$0xff] %v3676_v37  ;;  %5725 = vst [vmem:[%s6975_s4 + $0x2a70] sm:$0xff] %v3677_v38  ;;  %v15212_v31 = vld [vmem:[%s6889_s15 + $0x2be0] sm:$0xff]  ;;  %v15215_v33 = vld [vmem:[%s6889_s15 + $0x2be8] sm:$0xff]  ;;  %v3704_v37 = vadd.f32 %v7401_v13, %v15095_v50  ;;  %v3705_v38 = vadd.f32 %v7401_v13, %v15098_v51 }
 0x366   : > { %5726 = vst [vmem:[%s6975_s4 + $0x2a78] sm:$0xff] %v3678_v39  ;;  %5727 = vst [vmem:[%s6975_s4 + $0x2a80] sm:$0xff] %v3679_v45  ;;  %v15218_v34 = vld [vmem:[%s6889_s15 + $0x2bf0] sm:$0xff]  ;;  %v15221_v35 = vld [vmem:[%s6889_s15 + $0x2bf8] sm:$0xff]  ;;  %v3706_v39 = vadd.f32 %v7401_v13, %v15101_v52  ;;  %v3707_v45 = vadd.f32 %v7401_v13, %v15116_v57 }
 0x367   : > { %5728 = vst [vmem:[%s6975_s4 + $0x2a88] sm:$0xff] %v3680_v46  ;;  %5729 = vst [vmem:[%s6975_s4 + $0x2a90] sm:$0xff] %v3681_v47  ;;  %v15236_v41 = vld [vmem:[%s6889_s15 + $0x2c00] sm:$0xff]  ;;  %v15239_v42 = vld [vmem:[%s6889_s15 + $0x2c08] sm:$0xff]  ;;  %v3708_v46 = vadd.f32 %v7401_v13, %v15119_v58  ;;  %v3709_v47 = vadd.f32 %v7401_v13, %v15122_v59 }
 0x368   : > { %5730 = vst [vmem:[%s6975_s4 + $0x2a98] sm:$0xff] %v3682_v48  ;;  %5731 = vst [vmem:[%s6975_s4 + $0x2aa0] sm:$0xff] %v3683_v53  ;;  %v15242_v43 = vld [vmem:[%s6889_s15 + $0x2c10] sm:$0xff]  ;;  %v15245_v44 = vld [vmem:[%s6889_s15 + $0x2c18] sm:$0xff]  ;;  %v3710_v48 = vadd.f32 %v7401_v13, %v15125_v60  ;;  %v3711_v53 = vadd.f32 %v7401_v13, %v15140_v1 }
 0x369   : > { %5732 = vst [vmem:[%s6975_s4 + $0x2aa8] sm:$0xff] %v3684_v54  ;;  %5733 = vst [vmem:[%s6975_s4 + $0x2ab0] sm:$0xff] %v3685_v55  ;;  %v15260_v49 = vld [vmem:[%s6889_s15 + $0x2c20] sm:$0xff]  ;;  %v15263_v50 = vld [vmem:[%s6889_s15 + $0x2c28] sm:$0xff]  ;;  %v3712_v54 = vadd.f32 %v7401_v13, %v15143_v2  ;;  %v3713_v55 = vadd.f32 %v7401_v13, %v15146_v3 }
 0x36a   : > { %5734 = vst [vmem:[%s6975_s4 + $0x2ab8] sm:$0xff] %v3686_v56  ;;  %5735 = vst [vmem:[%s6975_s4 + $0x2ac0] sm:$0xff] %v3687_v61  ;;  %v15266_v51 = vld [vmem:[%s6889_s15 + $0x2c30] sm:$0xff]  ;;  %v15269_v52 = vld [vmem:[%s6889_s15 + $0x2c38] sm:$0xff]  ;;  %v3714_v56 = vadd.f32 %v7401_v13, %v15149_v4  ;;  %v3715_v61 = vadd.f32 %v7401_v13, %v15164_v11 }
 0x36b   : > { %5736 = vst [vmem:[%s6975_s4 + $0x2ac8] sm:$0xff] %v3688_v62  ;;  %5737 = vst [vmem:[%s6975_s4 + $0x2ad0] sm:$0xff] %v3689_v63  ;;  %v15284_v57 = vld [vmem:[%s6889_s15 + $0x2c40] sm:$0xff]  ;;  %v15287_v58 = vld [vmem:[%s6889_s15 + $0x2c48] sm:$0xff]  ;;  %v3716_v62 = vadd.f32 %v7401_v13, %v15167_v12  ;;  %v3717_v63 = vadd.f32 %v7401_v13, %v15170_v14 }
 0x36c   : > { %5738 = vst [vmem:[%s6975_s4 + $0x2ad8] sm:$0xff] %v3690_v0  ;;  %5739 = vst [vmem:[%s6975_s4 + $0x2ae0] sm:$0xff] %v3691_v5  ;;  %v15290_v59 = vld [vmem:[%s6889_s15 + $0x2c50] sm:$0xff]  ;;  %v15293_v60 = vld [vmem:[%s6889_s15 + $0x2c58] sm:$0xff]  ;;  %v3718_v0 = vadd.f32 %v7401_v13, %v15173_v15  ;;  %v3719_v5 = vadd.f32 %v7401_v13, %v15188_v22 }
 0x36d   : > { %5740 = vst [vmem:[%s6975_s4 + $0x2ae8] sm:$0xff] %v3692_v7  ;;  %5741 = vst [vmem:[%s6975_s4 + $0x2af0] sm:$0xff] %v3693_v8  ;;  %v15308_v1 = vld [vmem:[%s6889_s15 + $0x2c60] sm:$0xff]  ;;  %v15311_v2 = vld [vmem:[%s6889_s15 + $0x2c68] sm:$0xff]  ;;  %v3720_v7 = vadd.f32 %v7401_v13, %v15191_v23  ;;  %v3721_v8 = vadd.f32 %v7401_v13, %v15194_v24 }
 0x36e   : > { %5742 = vst [vmem:[%s6975_s4 + $0x2af8] sm:$0xff] %v3694_v10  ;;  %5743 = vst [vmem:[%s6975_s4 + $0x2b00] sm:$0xff] %v3695_v16  ;;  %v15314_v3 = vld [vmem:[%s6889_s15 + $0x2c70] sm:$0xff]  ;;  %v15317_v4 = vld [vmem:[%s6889_s15 + $0x2c78] sm:$0xff]  ;;  %v3722_v10 = vadd.f32 %v7401_v13, %v15197_v26  ;;  %v3723_v16 = vadd.f32 %v7401_v13, %v15212_v31 }
 0x36f   : > { %5744 = vst [vmem:[%s6975_s4 + $0x2b08] sm:$0xff] %v3696_v18  ;;  %5745 = vst [vmem:[%s6975_s4 + $0x2b10] sm:$0xff] %v3697_v20  ;;  %v15332_v11 = vld [vmem:[%s6889_s15 + $0x2c80] sm:$0xff]  ;;  %v15335_v12 = vld [vmem:[%s6889_s15 + $0x2c88] sm:$0xff]  ;;  %v3724_v18 = vadd.f32 %v7401_v13, %v15215_v33  ;;  %v3725_v20 = vadd.f32 %v7401_v13, %v15218_v34 }
 0x370   : > { %5746 = vst [vmem:[%s6975_s4 + $0x2b18] sm:$0xff] %v3698_v21  ;;  %5747 = vst [vmem:[%s6975_s4 + $0x2b20] sm:$0xff] %v3699_v27  ;;  %v15338_v14 = vld [vmem:[%s6889_s15 + $0x2c90] sm:$0xff]  ;;  %v15341_v15 = vld [vmem:[%s6889_s15 + $0x2c98] sm:$0xff]  ;;  %v3726_v21 = vadd.f32 %v7401_v13, %v15221_v35  ;;  %v3727_v27 = vadd.f32 %v7595_v19, %v15236_v41 }
 0x371   : > { %5748 = vst [vmem:[%s6975_s4 + $0x2b28] sm:$0xff] %v3700_v28  ;;  %5749 = vst [vmem:[%s6975_s4 + $0x2b30] sm:$0xff] %v3701_v29  ;;  %v15356_v22 = vld [vmem:[%s6889_s15 + $0x2ca0] sm:$0xff]  ;;  %v15359_v23 = vld [vmem:[%s6889_s15 + $0x2ca8] sm:$0xff]  ;;  %v3728_v28 = vadd.f32 %v7595_v19, %v15239_v42  ;;  %v3729_v29 = vadd.f32 %v7595_v19, %v15242_v43 }
 0x372   : > { %5750 = vst [vmem:[%s6975_s4 + $0x2b38] sm:$0xff] %v3702_v30  ;;  %5751 = vst [vmem:[%s6975_s4 + $0x2b40] sm:$0xff] %v3703_v36  ;;  %v15362_v24 = vld [vmem:[%s6889_s15 + $0x2cb0] sm:$0xff]  ;;  %v15365_v26 = vld [vmem:[%s6889_s15 + $0x2cb8] sm:$0xff]  ;;  %v3730_v30 = vadd.f32 %v7595_v19, %v15245_v44  ;;  %v3731_v36 = vadd.f32 %v7595_v19, %v15260_v49 }
 0x373   : > { %5752 = vst [vmem:[%s6975_s4 + $0x2b48] sm:$0xff] %v3704_v37  ;;  %5753 = vst [vmem:[%s6975_s4 + $0x2b50] sm:$0xff] %v3705_v38  ;;  %v15380_v31 = vld [vmem:[%s6889_s15 + $0x2cc0] sm:$0xff]  ;;  %v15383_v33 = vld [vmem:[%s6889_s15 + $0x2cc8] sm:$0xff]  ;;  %v3732_v37 = vadd.f32 %v7595_v19, %v15263_v50  ;;  %v3733_v38 = vadd.f32 %v7595_v19, %v15266_v51 }
 0x374   : > { %5754 = vst [vmem:[%s6975_s4 + $0x2b58] sm:$0xff] %v3706_v39  ;;  %5755 = vst [vmem:[%s6975_s4 + $0x2b60] sm:$0xff] %v3707_v45  ;;  %v15386_v34 = vld [vmem:[%s6889_s15 + $0x2cd0] sm:$0xff]  ;;  %v15389_v35 = vld [vmem:[%s6889_s15 + $0x2cd8] sm:$0xff]  ;;  %v3734_v39 = vadd.f32 %v7595_v19, %v15269_v52  ;;  %v3735_v45 = vadd.f32 %v7595_v19, %v15284_v57 }
 0x375   : > { %5756 = vst [vmem:[%s6975_s4 + $0x2b68] sm:$0xff] %v3708_v46  ;;  %5757 = vst [vmem:[%s6975_s4 + $0x2b70] sm:$0xff] %v3709_v47  ;;  %v15404_v41 = vld [vmem:[%s6889_s15 + $0x2ce0] sm:$0xff]  ;;  %v15407_v42 = vld [vmem:[%s6889_s15 + $0x2ce8] sm:$0xff]  ;;  %v3736_v46 = vadd.f32 %v7595_v19, %v15287_v58  ;;  %v3737_v47 = vadd.f32 %v7595_v19, %v15290_v59 }
 0x376   : > { %5758 = vst [vmem:[%s6975_s4 + $0x2b78] sm:$0xff] %v3710_v48  ;;  %5759 = vst [vmem:[%s6975_s4 + $0x2b80] sm:$0xff] %v3711_v53  ;;  %v15410_v43 = vld [vmem:[%s6889_s15 + $0x2cf0] sm:$0xff]  ;;  %v15413_v44 = vld [vmem:[%s6889_s15 + $0x2cf8] sm:$0xff]  ;;  %v3738_v48 = vadd.f32 %v7595_v19, %v15293_v60  ;;  %v3739_v53 = vadd.f32 %v7595_v19, %v15308_v1 }
 0x377   : > { %5760 = vst [vmem:[%s6975_s4 + $0x2b88] sm:$0xff] %v3712_v54  ;;  %5761 = vst [vmem:[%s6975_s4 + $0x2b90] sm:$0xff] %v3713_v55  ;;  %v15428_v49 = vld [vmem:[%s6889_s15 + $0x2d00] sm:$0xff]  ;;  %v15431_v50 = vld [vmem:[%s6889_s15 + $0x2d08] sm:$0xff]  ;;  %v3740_v54 = vadd.f32 %v7595_v19, %v15311_v2  ;;  %v3741_v55 = vadd.f32 %v7595_v19, %v15314_v3 }
 0x378   : > { %5762 = vst [vmem:[%s6975_s4 + $0x2b98] sm:$0xff] %v3714_v56  ;;  %5763 = vst [vmem:[%s6975_s4 + $0x2ba0] sm:$0xff] %v3715_v61  ;;  %v15434_v51 = vld [vmem:[%s6889_s15 + $0x2d10] sm:$0xff]  ;;  %v15437_v52 = vld [vmem:[%s6889_s15 + $0x2d18] sm:$0xff]  ;;  %v3742_v56 = vadd.f32 %v7595_v19, %v15317_v4  ;;  %v3743_v61 = vadd.f32 %v7595_v19, %v15332_v11 }
 0x379   : > { %5764 = vst [vmem:[%s6975_s4 + $0x2ba8] sm:$0xff] %v3716_v62  ;;  %5765 = vst [vmem:[%s6975_s4 + $0x2bb0] sm:$0xff] %v3717_v63  ;;  %v15452_v57 = vld [vmem:[%s6889_s15 + $0x2d20] sm:$0xff]  ;;  %v15455_v58 = vld [vmem:[%s6889_s15 + $0x2d28] sm:$0xff]  ;;  %v3744_v62 = vadd.f32 %v7595_v19, %v15335_v12  ;;  %v3745_v63 = vadd.f32 %v7595_v19, %v15338_v14 }
 0x37a   : > { %5766 = vst [vmem:[%s6975_s4 + $0x2bb8] sm:$0xff] %v3718_v0  ;;  %5767 = vst [vmem:[%s6975_s4 + $0x2bc0] sm:$0xff] %v3719_v5  ;;  %v15458_v59 = vld [vmem:[%s6889_s15 + $0x2d30] sm:$0xff]  ;;  %v15461_v60 = vld [vmem:[%s6889_s15 + $0x2d38] sm:$0xff]  ;;  %v3746_v0 = vadd.f32 %v7595_v19, %v15341_v15  ;;  %v3747_v5 = vadd.f32 %v7595_v19, %v15356_v22 }
 0x37b   : > { %5768 = vst [vmem:[%s6975_s4 + $0x2bc8] sm:$0xff] %v3720_v7  ;;  %5769 = vst [vmem:[%s6975_s4 + $0x2bd0] sm:$0xff] %v3721_v8  ;;  %v15476_v1 = vld [vmem:[%s6889_s15 + $0x2d40] sm:$0xff]  ;;  %v15479_v2 = vld [vmem:[%s6889_s15 + $0x2d48] sm:$0xff]  ;;  %v3748_v7 = vadd.f32 %v7595_v19, %v15359_v23  ;;  %v3749_v8 = vadd.f32 %v7595_v19, %v15362_v24 }
 0x37c   : > { %5770 = vst [vmem:[%s6975_s4 + $0x2bd8] sm:$0xff] %v3722_v10  ;;  %5771 = vst [vmem:[%s6975_s4 + $0x2be0] sm:$0xff] %v3723_v16  ;;  %v15482_v3 = vld [vmem:[%s6889_s15 + $0x2d50] sm:$0xff]  ;;  %v15485_v4 = vld [vmem:[%s6889_s15 + $0x2d58] sm:$0xff]  ;;  %v3750_v10 = vadd.f32 %v7595_v19, %v15365_v26  ;;  %v3751_v16 = vadd.f32 %v7595_v19, %v15380_v31 }
 0x37d   : > { %5772 = vst [vmem:[%s6975_s4 + $0x2be8] sm:$0xff] %v3724_v18  ;;  %5773 = vst [vmem:[%s6975_s4 + $0x2bf0] sm:$0xff] %v3725_v20  ;;  %v15500_v11 = vld [vmem:[%s6889_s15 + $0x2d60] sm:$0xff]  ;;  %v15503_v12 = vld [vmem:[%s6889_s15 + $0x2d68] sm:$0xff]  ;;  %v3752_v18 = vadd.f32 %v7595_v19, %v15383_v33  ;;  %v3753_v20 = vadd.f32 %v7595_v19, %v15386_v34 }
 0x37e   : > { %5774 = vst [vmem:[%s6975_s4 + $0x2bf8] sm:$0xff] %v3726_v21  ;;  %5775 = vst [vmem:[%s6975_s4 + $0x2c00] sm:$0xff] %v3727_v27  ;;  %v15506_v14 = vld [vmem:[%s6889_s15 + $0x2d70] sm:$0xff]  ;;  %v15509_v15 = vld [vmem:[%s6889_s15 + $0x2d78] sm:$0xff]  ;;  %v3754_v21 = vadd.f32 %v7595_v19, %v15389_v35  ;;  %v3755_v27 = vadd.f32 %v7595_v19, %v15404_v41 }
 0x37f   : > { %5776 = vst [vmem:[%s6975_s4 + $0x2c08] sm:$0xff] %v3728_v28  ;;  %5777 = vst [vmem:[%s6975_s4 + $0x2c10] sm:$0xff] %v3729_v29  ;;  %v15524_v22 = vld [vmem:[%s6889_s15 + $0x2d80] sm:$0xff]  ;;  %v15527_v23 = vld [vmem:[%s6889_s15 + $0x2d88] sm:$0xff]  ;;  %v3756_v28 = vadd.f32 %v7595_v19, %v15407_v42  ;;  %v3757_v29 = vadd.f32 %v7595_v19, %v15410_v43 }
 0x380   : > { %5778 = vst [vmem:[%s6975_s4 + $0x2c18] sm:$0xff] %v3730_v30  ;;  %5779 = vst [vmem:[%s6975_s4 + $0x2c20] sm:$0xff] %v3731_v36  ;;  %v15530_v24 = vld [vmem:[%s6889_s15 + $0x2d90] sm:$0xff]  ;;  %v15533_v26 = vld [vmem:[%s6889_s15 + $0x2d98] sm:$0xff]  ;;  %v3758_v30 = vadd.f32 %v7595_v19, %v15413_v44  ;;  %v3759_v36 = vadd.f32 %v7789_v25, %v15428_v49 }
 0x381   : > { %5780 = vst [vmem:[%s6975_s4 + $0x2c28] sm:$0xff] %v3732_v37  ;;  %5781 = vst [vmem:[%s6975_s4 + $0x2c30] sm:$0xff] %v3733_v38  ;;  %v15548_v31 = vld [vmem:[%s6889_s15 + $0x2da0] sm:$0xff]  ;;  %v15551_v33 = vld [vmem:[%s6889_s15 + $0x2da8] sm:$0xff]  ;;  %v3760_v37 = vadd.f32 %v7789_v25, %v15431_v50  ;;  %v3761_v38 = vadd.f32 %v7789_v25, %v15434_v51 }
 0x382   : > { %5782 = vst [vmem:[%s6975_s4 + $0x2c38] sm:$0xff] %v3734_v39  ;;  %5783 = vst [vmem:[%s6975_s4 + $0x2c40] sm:$0xff] %v3735_v45  ;;  %v15554_v34 = vld [vmem:[%s6889_s15 + $0x2db0] sm:$0xff]  ;;  %v15557_v35 = vld [vmem:[%s6889_s15 + $0x2db8] sm:$0xff]  ;;  %v3762_v39 = vadd.f32 %v7789_v25, %v15437_v52  ;;  %v3763_v45 = vadd.f32 %v7789_v25, %v15452_v57 }
 0x383   : > { %5784 = vst [vmem:[%s6975_s4 + $0x2c48] sm:$0xff] %v3736_v46  ;;  %5785 = vst [vmem:[%s6975_s4 + $0x2c50] sm:$0xff] %v3737_v47  ;;  %v15572_v41 = vld [vmem:[%s6889_s15 + $0x2dc0] sm:$0xff]  ;;  %v15575_v42 = vld [vmem:[%s6889_s15 + $0x2dc8] sm:$0xff]  ;;  %v3764_v46 = vadd.f32 %v7789_v25, %v15455_v58  ;;  %v3765_v47 = vadd.f32 %v7789_v25, %v15458_v59 }
 0x384   : > { %5786 = vst [vmem:[%s6975_s4 + $0x2c58] sm:$0xff] %v3738_v48  ;;  %5787 = vst [vmem:[%s6975_s4 + $0x2c60] sm:$0xff] %v3739_v53  ;;  %v15578_v43 = vld [vmem:[%s6889_s15 + $0x2dd0] sm:$0xff]  ;;  %v15581_v44 = vld [vmem:[%s6889_s15 + $0x2dd8] sm:$0xff]  ;;  %v3766_v48 = vadd.f32 %v7789_v25, %v15461_v60  ;;  %v3767_v53 = vadd.f32 %v7789_v25, %v15476_v1 }
 0x385   : > { %5788 = vst [vmem:[%s6975_s4 + $0x2c68] sm:$0xff] %v3740_v54  ;;  %5789 = vst [vmem:[%s6975_s4 + $0x2c70] sm:$0xff] %v3741_v55  ;;  %v15596_v49 = vld [vmem:[%s6889_s15 + $0x2de0] sm:$0xff]  ;;  %v15599_v50 = vld [vmem:[%s6889_s15 + $0x2de8] sm:$0xff]  ;;  %v3768_v54 = vadd.f32 %v7789_v25, %v15479_v2  ;;  %v3769_v55 = vadd.f32 %v7789_v25, %v15482_v3 }
 0x386   : > { %5790 = vst [vmem:[%s6975_s4 + $0x2c78] sm:$0xff] %v3742_v56  ;;  %5791 = vst [vmem:[%s6975_s4 + $0x2c80] sm:$0xff] %v3743_v61  ;;  %v15602_v51 = vld [vmem:[%s6889_s15 + $0x2df0] sm:$0xff]  ;;  %v15605_v52 = vld [vmem:[%s6889_s15 + $0x2df8] sm:$0xff]  ;;  %v3770_v56 = vadd.f32 %v7789_v25, %v15485_v4  ;;  %v3771_v61 = vadd.f32 %v7789_v25, %v15500_v11 }
 0x387   : > { %5792 = vst [vmem:[%s6975_s4 + $0x2c88] sm:$0xff] %v3744_v62  ;;  %5793 = vst [vmem:[%s6975_s4 + $0x2c90] sm:$0xff] %v3745_v63  ;;  %v15620_v57 = vld [vmem:[%s6889_s15 + $0x2e00] sm:$0xff]  ;;  %v15623_v58 = vld [vmem:[%s6889_s15 + $0x2e08] sm:$0xff]  ;;  %v3772_v62 = vadd.f32 %v7789_v25, %v15503_v12  ;;  %v3773_v63 = vadd.f32 %v7789_v25, %v15506_v14 }
 0x388   : > { %5794 = vst [vmem:[%s6975_s4 + $0x2c98] sm:$0xff] %v3746_v0  ;;  %5795 = vst [vmem:[%s6975_s4 + $0x2ca0] sm:$0xff] %v3747_v5  ;;  %v15626_v59 = vld [vmem:[%s6889_s15 + $0x2e10] sm:$0xff]  ;;  %v15629_v60 = vld [vmem:[%s6889_s15 + $0x2e18] sm:$0xff]  ;;  %v3774_v0 = vadd.f32 %v7789_v25, %v15509_v15  ;;  %v3775_v5 = vadd.f32 %v7789_v25, %v15524_v22 }
 0x389   : > { %5796 = vst [vmem:[%s6975_s4 + $0x2ca8] sm:$0xff] %v3748_v7  ;;  %5797 = vst [vmem:[%s6975_s4 + $0x2cb0] sm:$0xff] %v3749_v8  ;;  %v15644_v1 = vld [vmem:[%s6889_s15 + $0x2e20] sm:$0xff]  ;;  %v15647_v2 = vld [vmem:[%s6889_s15 + $0x2e28] sm:$0xff]  ;;  %v3776_v7 = vadd.f32 %v7789_v25, %v15527_v23  ;;  %v3777_v8 = vadd.f32 %v7789_v25, %v15530_v24 }
 0x38a   : > { %5798 = vst [vmem:[%s6975_s4 + $0x2cb8] sm:$0xff] %v3750_v10  ;;  %5799 = vst [vmem:[%s6975_s4 + $0x2cc0] sm:$0xff] %v3751_v16  ;;  %v15650_v3 = vld [vmem:[%s6889_s15 + $0x2e30] sm:$0xff]  ;;  %v15653_v4 = vld [vmem:[%s6889_s15 + $0x2e38] sm:$0xff]  ;;  %v3778_v10 = vadd.f32 %v7789_v25, %v15533_v26  ;;  %v3779_v16 = vadd.f32 %v7789_v25, %v15548_v31 }
 0x38b   : > { %5800 = vst [vmem:[%s6975_s4 + $0x2cc8] sm:$0xff] %v3752_v18  ;;  %5801 = vst [vmem:[%s6975_s4 + $0x2cd0] sm:$0xff] %v3753_v20  ;;  %v15668_v11 = vld [vmem:[%s6889_s15 + $0x2e40] sm:$0xff]  ;;  %v15671_v12 = vld [vmem:[%s6889_s15 + $0x2e48] sm:$0xff]  ;;  %v3780_v18 = vadd.f32 %v7789_v25, %v15551_v33  ;;  %v3781_v20 = vadd.f32 %v7789_v25, %v15554_v34 }
 0x38c   : > { %5802 = vst [vmem:[%s6975_s4 + $0x2cd8] sm:$0xff] %v3754_v21  ;;  %5803 = vst [vmem:[%s6975_s4 + $0x2ce0] sm:$0xff] %v3755_v27  ;;  %v15674_v14 = vld [vmem:[%s6889_s15 + $0x2e50] sm:$0xff]  ;;  %v15677_v15 = vld [vmem:[%s6889_s15 + $0x2e58] sm:$0xff]  ;;  %v3782_v21 = vadd.f32 %v7789_v25, %v15557_v35  ;;  %v3783_v27 = vadd.f32 %v7789_v25, %v15572_v41 }
 0x38d   : > { %5804 = vst [vmem:[%s6975_s4 + $0x2ce8] sm:$0xff] %v3756_v28  ;;  %5805 = vst [vmem:[%s6975_s4 + $0x2cf0] sm:$0xff] %v3757_v29  ;;  %v15692_v22 = vld [vmem:[%s6889_s15 + $0x2e60] sm:$0xff]  ;;  %v15695_v23 = vld [vmem:[%s6889_s15 + $0x2e68] sm:$0xff]  ;;  %v3784_v28 = vadd.f32 %v7789_v25, %v15575_v42  ;;  %v3785_v29 = vadd.f32 %v7789_v25, %v15578_v43 }
 0x38e   : > { %5806 = vst [vmem:[%s6975_s4 + $0x2cf8] sm:$0xff] %v3758_v30  ;;  %5807 = vst [vmem:[%s6975_s4 + $0x2d00] sm:$0xff] %v3759_v36  ;;  %v15698_v24 = vld [vmem:[%s6889_s15 + $0x2e70] sm:$0xff]  ;;  %v15701_v26 = vld [vmem:[%s6889_s15 + $0x2e78] sm:$0xff]  ;;  %v3786_v30 = vadd.f32 %v7789_v25, %v15581_v44  ;;  %v3787_v36 = vadd.f32 %v7789_v25, %v15596_v49 }
 0x38f   : > { %5808 = vst [vmem:[%s6975_s4 + $0x2d08] sm:$0xff] %v3760_v37  ;;  %5809 = vst [vmem:[%s6975_s4 + $0x2d10] sm:$0xff] %v3761_v38  ;;  %v15716_v31 = vld [vmem:[%s6889_s15 + $0x2e80] sm:$0xff]  ;;  %v15719_v33 = vld [vmem:[%s6889_s15 + $0x2e88] sm:$0xff]  ;;  %v3788_v37 = vadd.f32 %v7789_v25, %v15599_v50  ;;  %v3789_v38 = vadd.f32 %v7789_v25, %v15602_v51 }
 0x390   : > { %5810 = vst [vmem:[%s6975_s4 + $0x2d18] sm:$0xff] %v3762_v39  ;;  %5811 = vst [vmem:[%s6975_s4 + $0x2d20] sm:$0xff] %v3763_v45  ;;  %v15722_v34 = vld [vmem:[%s6889_s15 + $0x2e90] sm:$0xff]  ;;  %v15725_v35 = vld [vmem:[%s6889_s15 + $0x2e98] sm:$0xff]  ;;  %v3790_v39 = vadd.f32 %v7789_v25, %v15605_v52  ;;  %v3791_v45 = vadd.f32 %v7983_v32, %v15620_v57 }
 0x391   : > { %5812 = vst [vmem:[%s6975_s4 + $0x2d28] sm:$0xff] %v3764_v46  ;;  %5813 = vst [vmem:[%s6975_s4 + $0x2d30] sm:$0xff] %v3765_v47  ;;  %v15740_v41 = vld [vmem:[%s6889_s15 + $0x2ea0] sm:$0xff]  ;;  %v15743_v42 = vld [vmem:[%s6889_s15 + $0x2ea8] sm:$0xff]  ;;  %v3792_v46 = vadd.f32 %v7983_v32, %v15623_v58  ;;  %v3793_v47 = vadd.f32 %v7983_v32, %v15626_v59 }
 0x392   : > { %5814 = vst [vmem:[%s6975_s4 + $0x2d38] sm:$0xff] %v3766_v48  ;;  %5815 = vst [vmem:[%s6975_s4 + $0x2d40] sm:$0xff] %v3767_v53  ;;  %v15746_v43 = vld [vmem:[%s6889_s15 + $0x2eb0] sm:$0xff]  ;;  %v15749_v44 = vld [vmem:[%s6889_s15 + $0x2eb8] sm:$0xff]  ;;  %v3794_v48 = vadd.f32 %v7983_v32, %v15629_v60  ;;  %v3795_v53 = vadd.f32 %v7983_v32, %v15644_v1 }
 0x393   : > { %5816 = vst [vmem:[%s6975_s4 + $0x2d48] sm:$0xff] %v3768_v54  ;;  %5817 = vst [vmem:[%s6975_s4 + $0x2d50] sm:$0xff] %v3769_v55  ;;  %v15764_v49 = vld [vmem:[%s6889_s15 + $0x2ec0] sm:$0xff]  ;;  %v15767_v50 = vld [vmem:[%s6889_s15 + $0x2ec8] sm:$0xff]  ;;  %v3796_v54 = vadd.f32 %v7983_v32, %v15647_v2  ;;  %v3797_v55 = vadd.f32 %v7983_v32, %v15650_v3 }
 0x394   : > { %5818 = vst [vmem:[%s6975_s4 + $0x2d58] sm:$0xff] %v3770_v56  ;;  %5819 = vst [vmem:[%s6975_s4 + $0x2d60] sm:$0xff] %v3771_v61  ;;  %v15770_v51 = vld [vmem:[%s6889_s15 + $0x2ed0] sm:$0xff]  ;;  %v15773_v52 = vld [vmem:[%s6889_s15 + $0x2ed8] sm:$0xff]  ;;  %v3798_v56 = vadd.f32 %v7983_v32, %v15653_v4  ;;  %v3799_v61 = vadd.f32 %v7983_v32, %v15668_v11 }
 0x395   : > { %5820 = vst [vmem:[%s6975_s4 + $0x2d68] sm:$0xff] %v3772_v62  ;;  %5821 = vst [vmem:[%s6975_s4 + $0x2d70] sm:$0xff] %v3773_v63  ;;  %v15788_v57 = vld [vmem:[%s6889_s15 + $0x2ee0] sm:$0xff]  ;;  %v15791_v58 = vld [vmem:[%s6889_s15 + $0x2ee8] sm:$0xff]  ;;  %v3800_v62 = vadd.f32 %v7983_v32, %v15671_v12  ;;  %v3801_v63 = vadd.f32 %v7983_v32, %v15674_v14 }
 0x396   : > { %5822 = vst [vmem:[%s6975_s4 + $0x2d78] sm:$0xff] %v3774_v0  ;;  %5823 = vst [vmem:[%s6975_s4 + $0x2d80] sm:$0xff] %v3775_v5  ;;  %v15794_v59 = vld [vmem:[%s6889_s15 + $0x2ef0] sm:$0xff]  ;;  %v15797_v60 = vld [vmem:[%s6889_s15 + $0x2ef8] sm:$0xff]  ;;  %v3802_v0 = vadd.f32 %v7983_v32, %v15677_v15  ;;  %v3803_v5 = vadd.f32 %v7983_v32, %v15692_v22 }
 0x397   : > { %5824 = vst [vmem:[%s6975_s4 + $0x2d88] sm:$0xff] %v3776_v7  ;;  %5825 = vst [vmem:[%s6975_s4 + $0x2d90] sm:$0xff] %v3777_v8  ;;  %v15812_v1 = vld [vmem:[%s6889_s15 + $0x2f00] sm:$0xff]  ;;  %v15815_v2 = vld [vmem:[%s6889_s15 + $0x2f08] sm:$0xff]  ;;  %v3804_v7 = vadd.f32 %v7983_v32, %v15695_v23  ;;  %v3805_v8 = vadd.f32 %v7983_v32, %v15698_v24 }
 0x398   : > { %5826 = vst [vmem:[%s6975_s4 + $0x2d98] sm:$0xff] %v3778_v10  ;;  %5827 = vst [vmem:[%s6975_s4 + $0x2da0] sm:$0xff] %v3779_v16  ;;  %v15818_v3 = vld [vmem:[%s6889_s15 + $0x2f10] sm:$0xff]  ;;  %v15821_v4 = vld [vmem:[%s6889_s15 + $0x2f18] sm:$0xff]  ;;  %v3806_v10 = vadd.f32 %v7983_v32, %v15701_v26  ;;  %v3807_v16 = vadd.f32 %v7983_v32, %v15716_v31 }
 0x399   : > { %5828 = vst [vmem:[%s6975_s4 + $0x2da8] sm:$0xff] %v3780_v18  ;;  %5829 = vst [vmem:[%s6975_s4 + $0x2db0] sm:$0xff] %v3781_v20  ;;  %v15836_v11 = vld [vmem:[%s6889_s15 + $0x2f20] sm:$0xff]  ;;  %v15839_v12 = vld [vmem:[%s6889_s15 + $0x2f28] sm:$0xff]  ;;  %v3808_v18 = vadd.f32 %v7983_v32, %v15719_v33  ;;  %v3809_v20 = vadd.f32 %v7983_v32, %v15722_v34 }
 0x39a   : > { %5830 = vst [vmem:[%s6975_s4 + $0x2db8] sm:$0xff] %v3782_v21  ;;  %5831 = vst [vmem:[%s6975_s4 + $0x2dc0] sm:$0xff] %v3783_v27  ;;  %v15842_v14 = vld [vmem:[%s6889_s15 + $0x2f30] sm:$0xff]  ;;  %v15845_v15 = vld [vmem:[%s6889_s15 + $0x2f38] sm:$0xff]  ;;  %v3810_v21 = vadd.f32 %v7983_v32, %v15725_v35  ;;  %v3811_v27 = vadd.f32 %v7983_v32, %v15740_v41 }
 0x39b   : > { %5832 = vst [vmem:[%s6975_s4 + $0x2dc8] sm:$0xff] %v3784_v28  ;;  %5833 = vst [vmem:[%s6975_s4 + $0x2dd0] sm:$0xff] %v3785_v29  ;;  %v15860_v22 = vld [vmem:[%s6889_s15 + $0x2f40] sm:$0xff]  ;;  %v15863_v23 = vld [vmem:[%s6889_s15 + $0x2f48] sm:$0xff]  ;;  %v3812_v28 = vadd.f32 %v7983_v32, %v15743_v42  ;;  %v3813_v29 = vadd.f32 %v7983_v32, %v15746_v43 }
 0x39c   : > { %5834 = vst [vmem:[%s6975_s4 + $0x2dd8] sm:$0xff] %v3786_v30  ;;  %5835 = vst [vmem:[%s6975_s4 + $0x2de0] sm:$0xff] %v3787_v36  ;;  %v15866_v24 = vld [vmem:[%s6889_s15 + $0x2f50] sm:$0xff]  ;;  %v15869_v26 = vld [vmem:[%s6889_s15 + $0x2f58] sm:$0xff]  ;;  %v3814_v30 = vadd.f32 %v7983_v32, %v15749_v44  ;;  %v3815_v36 = vadd.f32 %v7983_v32, %v15764_v49 }
 0x39d   : > { %5836 = vst [vmem:[%s6975_s4 + $0x2de8] sm:$0xff] %v3788_v37  ;;  %5837 = vst [vmem:[%s6975_s4 + $0x2df0] sm:$0xff] %v3789_v38  ;;  %v15884_v31 = vld [vmem:[%s6889_s15 + $0x2f60] sm:$0xff]  ;;  %v15887_v33 = vld [vmem:[%s6889_s15 + $0x2f68] sm:$0xff]  ;;  %v3816_v37 = vadd.f32 %v7983_v32, %v15767_v50  ;;  %v3817_v38 = vadd.f32 %v7983_v32, %v15770_v51 }
 0x39e   : > { %5838 = vst [vmem:[%s6975_s4 + $0x2df8] sm:$0xff] %v3790_v39  ;;  %5839 = vst [vmem:[%s6975_s4 + $0x2e00] sm:$0xff] %v3791_v45  ;;  %v15890_v34 = vld [vmem:[%s6889_s15 + $0x2f70] sm:$0xff]  ;;  %v15893_v35 = vld [vmem:[%s6889_s15 + $0x2f78] sm:$0xff]  ;;  %v3818_v39 = vadd.f32 %v7983_v32, %v15773_v52  ;;  %v3819_v45 = vadd.f32 %v7983_v32, %v15788_v57 }
 0x39f   : > { %5840 = vst [vmem:[%s6975_s4 + $0x2e08] sm:$0xff] %v3792_v46  ;;  %5841 = vst [vmem:[%s6975_s4 + $0x2e10] sm:$0xff] %v3793_v47  ;;  %v15908_v41 = vld [vmem:[%s6889_s15 + $0x2f80] sm:$0xff]  ;;  %v15911_v42 = vld [vmem:[%s6889_s15 + $0x2f88] sm:$0xff]  ;;  %v3820_v46 = vadd.f32 %v7983_v32, %v15791_v58  ;;  %v3821_v47 = vadd.f32 %v7983_v32, %v15794_v59 }
 0x3a0   : > { %5842 = vst [vmem:[%s6975_s4 + $0x2e18] sm:$0xff] %v3794_v48  ;;  %5843 = vst [vmem:[%s6975_s4 + $0x2e20] sm:$0xff] %v3795_v53  ;;  %v15914_v43 = vld [vmem:[%s6889_s15 + $0x2f90] sm:$0xff]  ;;  %v15917_v44 = vld [vmem:[%s6889_s15 + $0x2f98] sm:$0xff]  ;;  %v3822_v48 = vadd.f32 %v7983_v32, %v15797_v60  ;;  %v3823_v53 = vadd.f32 %v8177_v40, %v15812_v1 }
 0x3a1   : > { %5844 = vst [vmem:[%s6975_s4 + $0x2e28] sm:$0xff] %v3796_v54  ;;  %5845 = vst [vmem:[%s6975_s4 + $0x2e30] sm:$0xff] %v3797_v55  ;;  %v15932_v49 = vld [vmem:[%s6889_s15 + $0x2fa0] sm:$0xff]  ;;  %v15935_v50 = vld [vmem:[%s6889_s15 + $0x2fa8] sm:$0xff]  ;;  %v3824_v54 = vadd.f32 %v8177_v40, %v15815_v2  ;;  %v3825_v55 = vadd.f32 %v8177_v40, %v15818_v3 }
 0x3a2   : > { %5846 = vst [vmem:[%s6975_s4 + $0x2e38] sm:$0xff] %v3798_v56  ;;  %5847 = vst [vmem:[%s6975_s4 + $0x2e40] sm:$0xff] %v3799_v61  ;;  %v15938_v51 = vld [vmem:[%s6889_s15 + $0x2fb0] sm:$0xff]  ;;  %v15941_v52 = vld [vmem:[%s6889_s15 + $0x2fb8] sm:$0xff]  ;;  %v3826_v56 = vadd.f32 %v8177_v40, %v15821_v4  ;;  %v3827_v61 = vadd.f32 %v8177_v40, %v15836_v11 }
 0x3a3   : > { %5848 = vst [vmem:[%s6975_s4 + $0x2e48] sm:$0xff] %v3800_v62  ;;  %5849 = vst [vmem:[%s6975_s4 + $0x2e50] sm:$0xff] %v3801_v63  ;;  %v15956_v57 = vld [vmem:[%s6889_s15 + $0x2fc0] sm:$0xff]  ;;  %v15959_v58 = vld [vmem:[%s6889_s15 + $0x2fc8] sm:$0xff]  ;;  %v3828_v62 = vadd.f32 %v8177_v40, %v15839_v12  ;;  %v3829_v63 = vadd.f32 %v8177_v40, %v15842_v14 }
 0x3a4   : > { %5850 = vst [vmem:[%s6975_s4 + $0x2e58] sm:$0xff] %v3802_v0  ;;  %5851 = vst [vmem:[%s6975_s4 + $0x2e60] sm:$0xff] %v3803_v5  ;;  %v15962_v59 = vld [vmem:[%s6889_s15 + $0x2fd0] sm:$0xff]  ;;  %v15965_v60 = vld [vmem:[%s6889_s15 + $0x2fd8] sm:$0xff]  ;;  %v3830_v0 = vadd.f32 %v8177_v40, %v15845_v15  ;;  %v3831_v5 = vadd.f32 %v8177_v40, %v15860_v22 }
 0x3a5   : > { %5852 = vst [vmem:[%s6975_s4 + $0x2e68] sm:$0xff] %v3804_v7  ;;  %5853 = vst [vmem:[%s6975_s4 + $0x2e70] sm:$0xff] %v3805_v8  ;;  %v15980_v1 = vld [vmem:[%s6889_s15 + $0x2fe0] sm:$0xff]  ;;  %v15983_v2 = vld [vmem:[%s6889_s15 + $0x2fe8] sm:$0xff]  ;;  %v3832_v7 = vadd.f32 %v8177_v40, %v15863_v23  ;;  %v3833_v8 = vadd.f32 %v8177_v40, %v15866_v24 }
 0x3a6   : > { %5854 = vst [vmem:[%s6975_s4 + $0x2e78] sm:$0xff] %v3806_v10  ;;  %5855 = vst [vmem:[%s6975_s4 + $0x2e80] sm:$0xff] %v3807_v16  ;;  %v15986_v3 = vld [vmem:[%s6889_s15 + $0x2ff0] sm:$0xff]  ;;  %v15989_v4 = vld [vmem:[%s6889_s15 + $0x2ff8] sm:$0xff]  ;;  %v3834_v10 = vadd.f32 %v8177_v40, %v15869_v26  ;;  %v3835_v16 = vadd.f32 %v8177_v40, %v15884_v31 }
 0x3a7   : > { %5856 = vst [vmem:[%s6975_s4 + $0x2e88] sm:$0xff] %v3808_v18  ;;  %5857 = vst [vmem:[%s6975_s4 + $0x2e90] sm:$0xff] %v3809_v20  ;;  %v16004_v11 = vld [vmem:[%s6889_s15 + $0x3000] sm:$0xff]  ;;  %v16007_v12 = vld [vmem:[%s6889_s15 + $0x3008] sm:$0xff]  ;;  %v3836_v18 = vadd.f32 %v8177_v40, %v15887_v33  ;;  %v3837_v20 = vadd.f32 %v8177_v40, %v15890_v34 }
 0x3a8   : > { %5858 = vst [vmem:[%s6975_s4 + $0x2e98] sm:$0xff] %v3810_v21  ;;  %5859 = vst [vmem:[%s6975_s4 + $0x2ea0] sm:$0xff] %v3811_v27  ;;  %v16010_v14 = vld [vmem:[%s6889_s15 + $0x3010] sm:$0xff]  ;;  %v16013_v15 = vld [vmem:[%s6889_s15 + $0x3018] sm:$0xff]  ;;  %v3838_v21 = vadd.f32 %v8177_v40, %v15893_v35  ;;  %v3839_v27 = vadd.f32 %v8177_v40, %v15908_v41 }
 0x3a9   : > { %5860 = vst [vmem:[%s6975_s4 + $0x2ea8] sm:$0xff] %v3812_v28  ;;  %5861 = vst [vmem:[%s6975_s4 + $0x2eb0] sm:$0xff] %v3813_v29  ;;  %v16028_v22 = vld [vmem:[%s6889_s15 + $0x3020] sm:$0xff]  ;;  %v16031_v23 = vld [vmem:[%s6889_s15 + $0x3028] sm:$0xff]  ;;  %v3840_v28 = vadd.f32 %v8177_v40, %v15911_v42  ;;  %v3841_v29 = vadd.f32 %v8177_v40, %v15914_v43 }
 0x3aa   : > { %5862 = vst [vmem:[%s6975_s4 + $0x2eb8] sm:$0xff] %v3814_v30  ;;  %5863 = vst [vmem:[%s6975_s4 + $0x2ec0] sm:$0xff] %v3815_v36  ;;  %v16034_v24 = vld [vmem:[%s6889_s15 + $0x3030] sm:$0xff]  ;;  %v16037_v26 = vld [vmem:[%s6889_s15 + $0x3038] sm:$0xff]  ;;  %v3842_v30 = vadd.f32 %v8177_v40, %v15917_v44  ;;  %v3843_v36 = vadd.f32 %v8177_v40, %v15932_v49 }
 0x3ab   : > { %5864 = vst [vmem:[%s6975_s4 + $0x2ec8] sm:$0xff] %v3816_v37  ;;  %5865 = vst [vmem:[%s6975_s4 + $0x2ed0] sm:$0xff] %v3817_v38  ;;  %v16052_v31 = vld [vmem:[%s6889_s15 + $0x3040] sm:$0xff]  ;;  %v16055_v33 = vld [vmem:[%s6889_s15 + $0x3048] sm:$0xff]  ;;  %v3844_v37 = vadd.f32 %v8177_v40, %v15935_v50  ;;  %v3845_v38 = vadd.f32 %v8177_v40, %v15938_v51 }
 0x3ac   : > { %5866 = vst [vmem:[%s6975_s4 + $0x2ed8] sm:$0xff] %v3818_v39  ;;  %5867 = vst [vmem:[%s6975_s4 + $0x2ee0] sm:$0xff] %v3819_v45  ;;  %v16058_v34 = vld [vmem:[%s6889_s15 + $0x3050] sm:$0xff]  ;;  %v16061_v35 = vld [vmem:[%s6889_s15 + $0x3058] sm:$0xff]  ;;  %v3846_v39 = vadd.f32 %v8177_v40, %v15941_v52  ;;  %v3847_v45 = vadd.f32 %v8177_v40, %v15956_v57 }
 0x3ad   : > { %5868 = vst [vmem:[%s6975_s4 + $0x2ee8] sm:$0xff] %v3820_v46  ;;  %5869 = vst [vmem:[%s6975_s4 + $0x2ef0] sm:$0xff] %v3821_v47  ;;  %v16076_v41 = vld [vmem:[%s6889_s15 + $0x3060] sm:$0xff]  ;;  %v16079_v42 = vld [vmem:[%s6889_s15 + $0x3068] sm:$0xff]  ;;  %v3848_v46 = vadd.f32 %v8177_v40, %v15959_v58  ;;  %v3849_v47 = vadd.f32 %v8177_v40, %v15962_v59 }
 0x3ae   : > { %5870 = vst [vmem:[%s6975_s4 + $0x2ef8] sm:$0xff] %v3822_v48  ;;  %5871 = vst [vmem:[%s6975_s4 + $0x2f00] sm:$0xff] %v3823_v53  ;;  %v16082_v43 = vld [vmem:[%s6889_s15 + $0x3070] sm:$0xff]  ;;  %v16085_v44 = vld [vmem:[%s6889_s15 + $0x3078] sm:$0xff]  ;;  %v3850_v48 = vadd.f32 %v8177_v40, %v15965_v60  ;;  %v3851_v53 = vadd.f32 %v8177_v40, %v15980_v1 }
 0x3af   : > { %5872 = vst [vmem:[%s6975_s4 + $0x2f08] sm:$0xff] %v3824_v54  ;;  %5873 = vst [vmem:[%s6975_s4 + $0x2f10] sm:$0xff] %v3825_v55  ;;  %v16100_v49 = vld [vmem:[%s6889_s15 + $0x3080] sm:$0xff]  ;;  %v16103_v50 = vld [vmem:[%s6889_s15 + $0x3088] sm:$0xff]  ;;  %v3852_v54 = vadd.f32 %v8177_v40, %v15983_v2  ;;  %v3853_v55 = vadd.f32 %v8177_v40, %v15986_v3 }
 0x3b0   : > { %5874 = vst [vmem:[%s6975_s4 + $0x2f18] sm:$0xff] %v3826_v56  ;;  %5875 = vst [vmem:[%s6975_s4 + $0x2f20] sm:$0xff] %v3827_v61  ;;  %v16106_v51 = vld [vmem:[%s6889_s15 + $0x3090] sm:$0xff]  ;;  %v16109_v52 = vld [vmem:[%s6889_s15 + $0x3098] sm:$0xff]  ;;  %v3854_v56 = vadd.f32 %v8177_v40, %v15989_v4  ;;  %v3855_v61 = vadd.f32 %v6927_v17, %v16004_v11 }
 0x3b1   : > { %5876 = vst [vmem:[%s6975_s4 + $0x2f28] sm:$0xff] %v3828_v62  ;;  %5877 = vst [vmem:[%s6975_s4 + $0x2f30] sm:$0xff] %v3829_v63  ;;  %v16124_v57 = vld [vmem:[%s6889_s15 + $0x30a0] sm:$0xff]  ;;  %v16127_v58 = vld [vmem:[%s6889_s15 + $0x30a8] sm:$0xff]  ;;  %v3856_v62 = vadd.f32 %v6927_v17, %v16007_v12  ;;  %v3857_v63 = vadd.f32 %v6927_v17, %v16010_v14 }
 0x3b2   : > { %5878 = vst [vmem:[%s6975_s4 + $0x2f38] sm:$0xff] %v3830_v0  ;;  %5879 = vst [vmem:[%s6975_s4 + $0x2f40] sm:$0xff] %v3831_v5  ;;  %v16130_v59 = vld [vmem:[%s6889_s15 + $0x30b0] sm:$0xff]  ;;  %v16133_v60 = vld [vmem:[%s6889_s15 + $0x30b8] sm:$0xff]  ;;  %v3858_v0 = vadd.f32 %v6927_v17, %v16013_v15  ;;  %v3859_v5 = vadd.f32 %v6927_v17, %v16028_v22 }
 0x3b3   : > { %5880 = vst [vmem:[%s6975_s4 + $0x2f48] sm:$0xff] %v3832_v7  ;;  %5881 = vst [vmem:[%s6975_s4 + $0x2f50] sm:$0xff] %v3833_v8  ;;  %v16148_v1 = vld [vmem:[%s6889_s15 + $0x30c0] sm:$0xff]  ;;  %v16151_v2 = vld [vmem:[%s6889_s15 + $0x30c8] sm:$0xff]  ;;  %v3860_v7 = vadd.f32 %v6927_v17, %v16031_v23  ;;  %v3861_v8 = vadd.f32 %v6927_v17, %v16034_v24 }
 0x3b4   : > { %5882 = vst [vmem:[%s6975_s4 + $0x2f58] sm:$0xff] %v3834_v10  ;;  %5883 = vst [vmem:[%s6975_s4 + $0x2f60] sm:$0xff] %v3835_v16  ;;  %v16154_v3 = vld [vmem:[%s6889_s15 + $0x30d0] sm:$0xff]  ;;  %v16157_v4 = vld [vmem:[%s6889_s15 + $0x30d8] sm:$0xff]  ;;  %v3862_v10 = vadd.f32 %v6927_v17, %v16037_v26  ;;  %v3863_v16 = vadd.f32 %v6927_v17, %v16052_v31 }
 0x3b5   : > { %5884 = vst [vmem:[%s6975_s4 + $0x2f68] sm:$0xff] %v3836_v18  ;;  %5885 = vst [vmem:[%s6975_s4 + $0x2f70] sm:$0xff] %v3837_v20  ;;  %v16172_v11 = vld [vmem:[%s6889_s15 + $0x30e0] sm:$0xff]  ;;  %v16175_v12 = vld [vmem:[%s6889_s15 + $0x30e8] sm:$0xff]  ;;  %v3864_v18 = vadd.f32 %v6927_v17, %v16055_v33  ;;  %v3865_v20 = vadd.f32 %v6927_v17, %v16058_v34 }
 0x3b6   : > { %5886 = vst [vmem:[%s6975_s4 + $0x2f78] sm:$0xff] %v3838_v21  ;;  %5887 = vst [vmem:[%s6975_s4 + $0x2f80] sm:$0xff] %v3839_v27  ;;  %v16178_v14 = vld [vmem:[%s6889_s15 + $0x30f0] sm:$0xff]  ;;  %v16181_v15 = vld [vmem:[%s6889_s15 + $0x30f8] sm:$0xff]  ;;  %v3866_v21 = vadd.f32 %v6927_v17, %v16061_v35  ;;  %v3867_v27 = vadd.f32 %v6927_v17, %v16076_v41 }
 0x3b7   : > { %5888 = vst [vmem:[%s6975_s4 + $0x2f88] sm:$0xff] %v3840_v28  ;;  %5889 = vst [vmem:[%s6975_s4 + $0x2f90] sm:$0xff] %v3841_v29  ;;  %v16196_v22 = vld [vmem:[%s6889_s15 + $0x3100] sm:$0xff]  ;;  %v16199_v23 = vld [vmem:[%s6889_s15 + $0x3108] sm:$0xff]  ;;  %v3868_v28 = vadd.f32 %v6927_v17, %v16079_v42  ;;  %v3869_v29 = vadd.f32 %v6927_v17, %v16082_v43 }
 0x3b8   : > { %5890 = vst [vmem:[%s6975_s4 + $0x2f98] sm:$0xff] %v3842_v30  ;;  %5891 = vst [vmem:[%s6975_s4 + $0x2fa0] sm:$0xff] %v3843_v36  ;;  %v16202_v24 = vld [vmem:[%s6889_s15 + $0x3110] sm:$0xff]  ;;  %v16205_v26 = vld [vmem:[%s6889_s15 + $0x3118] sm:$0xff]  ;;  %v3870_v30 = vadd.f32 %v6927_v17, %v16085_v44  ;;  %v3871_v36 = vadd.f32 %v6927_v17, %v16100_v49 }
 0x3b9   : > { %5892 = vst [vmem:[%s6975_s4 + $0x2fa8] sm:$0xff] %v3844_v37  ;;  %5893 = vst [vmem:[%s6975_s4 + $0x2fb0] sm:$0xff] %v3845_v38  ;;  %v16220_v31 = vld [vmem:[%s6889_s15 + $0x3120] sm:$0xff]  ;;  %v16223_v33 = vld [vmem:[%s6889_s15 + $0x3128] sm:$0xff]  ;;  %v3872_v37 = vadd.f32 %v6927_v17, %v16103_v50  ;;  %v3873_v38 = vadd.f32 %v6927_v17, %v16106_v51 }
 0x3ba   : > { %5894 = vst [vmem:[%s6975_s4 + $0x2fb8] sm:$0xff] %v3846_v39  ;;  %5895 = vst [vmem:[%s6975_s4 + $0x2fc0] sm:$0xff] %v3847_v45  ;;  %v16226_v34 = vld [vmem:[%s6889_s15 + $0x3130] sm:$0xff]  ;;  %v16229_v35 = vld [vmem:[%s6889_s15 + $0x3138] sm:$0xff]  ;;  %v3874_v39 = vadd.f32 %v6927_v17, %v16109_v52  ;;  %v3875_v45 = vadd.f32 %v6927_v17, %v16124_v57 }
 0x3bb   : > { %5896 = vst [vmem:[%s6975_s4 + $0x2fc8] sm:$0xff] %v3848_v46  ;;  %5897 = vst [vmem:[%s6975_s4 + $0x2fd0] sm:$0xff] %v3849_v47  ;;  %v16244_v41 = vld [vmem:[%s6889_s15 + $0x3140] sm:$0xff]  ;;  %v16247_v42 = vld [vmem:[%s6889_s15 + $0x3148] sm:$0xff]  ;;  %v3876_v46 = vadd.f32 %v6927_v17, %v16127_v58  ;;  %v3877_v47 = vadd.f32 %v6927_v17, %v16130_v59 }
 0x3bc   : > { %5898 = vst [vmem:[%s6975_s4 + $0x2fd8] sm:$0xff] %v3850_v48  ;;  %5899 = vst [vmem:[%s6975_s4 + $0x2fe0] sm:$0xff] %v3851_v53  ;;  %v16250_v43 = vld [vmem:[%s6889_s15 + $0x3150] sm:$0xff]  ;;  %v16253_v44 = vld [vmem:[%s6889_s15 + $0x3158] sm:$0xff]  ;;  %v3878_v48 = vadd.f32 %v6927_v17, %v16133_v60  ;;  %v3879_v53 = vadd.f32 %v6927_v17, %v16148_v1 }
 0x3bd   : > { %5900 = vst [vmem:[%s6975_s4 + $0x2fe8] sm:$0xff] %v3852_v54  ;;  %5901 = vst [vmem:[%s6975_s4 + $0x2ff0] sm:$0xff] %v3853_v55  ;;  %v16268_v49 = vld [vmem:[%s6889_s15 + $0x3160] sm:$0xff]  ;;  %v16271_v50 = vld [vmem:[%s6889_s15 + $0x3168] sm:$0xff]  ;;  %v3880_v54 = vadd.f32 %v6927_v17, %v16151_v2  ;;  %v3881_v55 = vadd.f32 %v6927_v17, %v16154_v3 }
 0x3be   : > { %5902 = vst [vmem:[%s6975_s4 + $0x2ff8] sm:$0xff] %v3854_v56  ;;  %5903 = vst [vmem:[%s6975_s4 + $0x3000] sm:$0xff] %v3855_v61  ;;  %v16274_v51 = vld [vmem:[%s6889_s15 + $0x3170] sm:$0xff]  ;;  %v16277_v52 = vld [vmem:[%s6889_s15 + $0x3178] sm:$0xff]  ;;  %v3882_v56 = vadd.f32 %v6927_v17, %v16157_v4  ;;  %v3883_v61 = vadd.f32 %v6927_v17, %v16172_v11 }
 0x3bf   : > { %5904 = vst [vmem:[%s6975_s4 + $0x3008] sm:$0xff] %v3856_v62  ;;  %5905 = vst [vmem:[%s6975_s4 + $0x3010] sm:$0xff] %v3857_v63  ;;  %v16292_v57 = vld [vmem:[%s6889_s15 + $0x3180] sm:$0xff]  ;;  %v16295_v58 = vld [vmem:[%s6889_s15 + $0x3188] sm:$0xff]  ;;  %v3884_v62 = vadd.f32 %v6927_v17, %v16175_v12  ;;  %v3885_v63 = vadd.f32 %v6927_v17, %v16178_v14 }
 0x3c0   : > { %5906 = vst [vmem:[%s6975_s4 + $0x3018] sm:$0xff] %v3858_v0  ;;  %5907 = vst [vmem:[%s6975_s4 + $0x3020] sm:$0xff] %v3859_v5  ;;  %v16298_v59 = vld [vmem:[%s6889_s15 + $0x3190] sm:$0xff]  ;;  %v16301_v60 = vld [vmem:[%s6889_s15 + $0x3198] sm:$0xff]  ;;  %v3886_v0 = vadd.f32 %v6927_v17, %v16181_v15  ;;  %v3887_v5 = vadd.f32 %v7021_v6, %v16196_v22 }
 0x3c1   : > { %5908 = vst [vmem:[%s6975_s4 + $0x3028] sm:$0xff] %v3860_v7  ;;  %5909 = vst [vmem:[%s6975_s4 + $0x3030] sm:$0xff] %v3861_v8  ;;  %v16316_v1 = vld [vmem:[%s6889_s15 + $0x31a0] sm:$0xff]  ;;  %v16319_v2 = vld [vmem:[%s6889_s15 + $0x31a8] sm:$0xff]  ;;  %v3888_v7 = vadd.f32 %v7021_v6, %v16199_v23  ;;  %v3889_v8 = vadd.f32 %v7021_v6, %v16202_v24 }
 0x3c2   : > { %5910 = vst [vmem:[%s6975_s4 + $0x3038] sm:$0xff] %v3862_v10  ;;  %5911 = vst [vmem:[%s6975_s4 + $0x3040] sm:$0xff] %v3863_v16  ;;  %v16322_v3 = vld [vmem:[%s6889_s15 + $0x31b0] sm:$0xff]  ;;  %v16325_v4 = vld [vmem:[%s6889_s15 + $0x31b8] sm:$0xff]  ;;  %v3890_v10 = vadd.f32 %v7021_v6, %v16205_v26  ;;  %v3891_v16 = vadd.f32 %v7021_v6, %v16220_v31 }
 0x3c3   : > { %5912 = vst [vmem:[%s6975_s4 + $0x3048] sm:$0xff] %v3864_v18  ;;  %5913 = vst [vmem:[%s6975_s4 + $0x3050] sm:$0xff] %v3865_v20  ;;  %v16340_v11 = vld [vmem:[%s6889_s15 + $0x31c0] sm:$0xff]  ;;  %v16343_v12 = vld [vmem:[%s6889_s15 + $0x31c8] sm:$0xff]  ;;  %v3892_v18 = vadd.f32 %v7021_v6, %v16223_v33  ;;  %v3893_v20 = vadd.f32 %v7021_v6, %v16226_v34 }
 0x3c4   : > { %5914 = vst [vmem:[%s6975_s4 + $0x3058] sm:$0xff] %v3866_v21  ;;  %5915 = vst [vmem:[%s6975_s4 + $0x3060] sm:$0xff] %v3867_v27  ;;  %v16346_v14 = vld [vmem:[%s6889_s15 + $0x31d0] sm:$0xff]  ;;  %v16349_v15 = vld [vmem:[%s6889_s15 + $0x31d8] sm:$0xff]  ;;  %v3894_v21 = vadd.f32 %v7021_v6, %v16229_v35  ;;  %v3895_v27 = vadd.f32 %v7021_v6, %v16244_v41 }
 0x3c5   : > { %5916 = vst [vmem:[%s6975_s4 + $0x3068] sm:$0xff] %v3868_v28  ;;  %5917 = vst [vmem:[%s6975_s4 + $0x3070] sm:$0xff] %v3869_v29  ;;  %v16364_v22 = vld [vmem:[%s6889_s15 + $0x31e0] sm:$0xff]  ;;  %v16367_v23 = vld [vmem:[%s6889_s15 + $0x31e8] sm:$0xff]  ;;  %v3896_v28 = vadd.f32 %v7021_v6, %v16247_v42  ;;  %v3897_v29 = vadd.f32 %v7021_v6, %v16250_v43 }
 0x3c6   : > { %5918 = vst [vmem:[%s6975_s4 + $0x3078] sm:$0xff] %v3870_v30  ;;  %5919 = vst [vmem:[%s6975_s4 + $0x3080] sm:$0xff] %v3871_v36  ;;  %v16370_v24 = vld [vmem:[%s6889_s15 + $0x31f0] sm:$0xff]  ;;  %v16373_v26 = vld [vmem:[%s6889_s15 + $0x31f8] sm:$0xff]  ;;  %v3898_v30 = vadd.f32 %v7021_v6, %v16253_v44  ;;  %v3899_v36 = vadd.f32 %v7021_v6, %v16268_v49 }
 0x3c7   : > { %5920 = vst [vmem:[%s6975_s4 + $0x3088] sm:$0xff] %v3872_v37  ;;  %5921 = vst [vmem:[%s6975_s4 + $0x3090] sm:$0xff] %v3873_v38  ;;  %v16388_v31 = vld [vmem:[%s6889_s15 + $0x3200] sm:$0xff]  ;;  %v16391_v33 = vld [vmem:[%s6889_s15 + $0x3208] sm:$0xff]  ;;  %v3900_v37 = vadd.f32 %v7021_v6, %v16271_v50  ;;  %v3901_v38 = vadd.f32 %v7021_v6, %v16274_v51 }
 0x3c8   : > { %5922 = vst [vmem:[%s6975_s4 + $0x3098] sm:$0xff] %v3874_v39  ;;  %5923 = vst [vmem:[%s6975_s4 + $0x30a0] sm:$0xff] %v3875_v45  ;;  %v16394_v34 = vld [vmem:[%s6889_s15 + $0x3210] sm:$0xff]  ;;  %v16397_v35 = vld [vmem:[%s6889_s15 + $0x3218] sm:$0xff]  ;;  %v3902_v39 = vadd.f32 %v7021_v6, %v16277_v52  ;;  %v3903_v45 = vadd.f32 %v7021_v6, %v16292_v57 }
 0x3c9   : > { %5924 = vst [vmem:[%s6975_s4 + $0x30a8] sm:$0xff] %v3876_v46  ;;  %5925 = vst [vmem:[%s6975_s4 + $0x30b0] sm:$0xff] %v3877_v47  ;;  %v16412_v41 = vld [vmem:[%s6889_s15 + $0x3220] sm:$0xff]  ;;  %v16415_v42 = vld [vmem:[%s6889_s15 + $0x3228] sm:$0xff]  ;;  %v3904_v46 = vadd.f32 %v7021_v6, %v16295_v58  ;;  %v3905_v47 = vadd.f32 %v7021_v6, %v16298_v59 }
 0x3ca   : > { %5926 = vst [vmem:[%s6975_s4 + $0x30b8] sm:$0xff] %v3878_v48  ;;  %5927 = vst [vmem:[%s6975_s4 + $0x30c0] sm:$0xff] %v3879_v53  ;;  %v16418_v43 = vld [vmem:[%s6889_s15 + $0x3230] sm:$0xff]  ;;  %v16421_v44 = vld [vmem:[%s6889_s15 + $0x3238] sm:$0xff]  ;;  %v3906_v48 = vadd.f32 %v7021_v6, %v16301_v60  ;;  %v3907_v53 = vadd.f32 %v7021_v6, %v16316_v1 }
 0x3cb   : > { %5928 = vst [vmem:[%s6975_s4 + $0x30c8] sm:$0xff] %v3880_v54  ;;  %5929 = vst [vmem:[%s6975_s4 + $0x30d0] sm:$0xff] %v3881_v55  ;;  %v16436_v49 = vld [vmem:[%s6889_s15 + $0x3240] sm:$0xff]  ;;  %v16439_v50 = vld [vmem:[%s6889_s15 + $0x3248] sm:$0xff]  ;;  %v3908_v54 = vadd.f32 %v7021_v6, %v16319_v2  ;;  %v3909_v55 = vadd.f32 %v7021_v6, %v16322_v3 }
 0x3cc   : > { %5930 = vst [vmem:[%s6975_s4 + $0x30d8] sm:$0xff] %v3882_v56  ;;  %5931 = vst [vmem:[%s6975_s4 + $0x30e0] sm:$0xff] %v3883_v61  ;;  %v16442_v51 = vld [vmem:[%s6889_s15 + $0x3250] sm:$0xff]  ;;  %v16445_v52 = vld [vmem:[%s6889_s15 + $0x3258] sm:$0xff]  ;;  %v3910_v56 = vadd.f32 %v7021_v6, %v16325_v4  ;;  %v3911_v61 = vadd.f32 %v7021_v6, %v16340_v11 }
 0x3cd   : > { %5932 = vst [vmem:[%s6975_s4 + $0x30e8] sm:$0xff] %v3884_v62  ;;  %5933 = vst [vmem:[%s6975_s4 + $0x30f0] sm:$0xff] %v3885_v63  ;;  %v16460_v57 = vld [vmem:[%s6889_s15 + $0x3260] sm:$0xff]  ;;  %v16463_v58 = vld [vmem:[%s6889_s15 + $0x3268] sm:$0xff]  ;;  %v3912_v62 = vadd.f32 %v7021_v6, %v16343_v12  ;;  %v3913_v63 = vadd.f32 %v7021_v6, %v16346_v14 }
 0x3ce   : > { %5934 = vst [vmem:[%s6975_s4 + $0x30f8] sm:$0xff] %v3886_v0  ;;  %5935 = vst [vmem:[%s6975_s4 + $0x3100] sm:$0xff] %v3887_v5  ;;  %v16466_v59 = vld [vmem:[%s6889_s15 + $0x3270] sm:$0xff]  ;;  %v16469_v60 = vld [vmem:[%s6889_s15 + $0x3278] sm:$0xff]  ;;  %v3914_v0 = vadd.f32 %v7021_v6, %v16349_v15  ;;  %v3915_v5 = vadd.f32 %v7021_v6, %v16364_v22 }
 0x3cf   : > { %5936 = vst [vmem:[%s6975_s4 + $0x3108] sm:$0xff] %v3888_v7  ;;  %5937 = vst [vmem:[%s6975_s4 + $0x3110] sm:$0xff] %v3889_v8  ;;  %v16484_v1 = vld [vmem:[%s6889_s15 + $0x3280] sm:$0xff]  ;;  %v16487_v2 = vld [vmem:[%s6889_s15 + $0x3288] sm:$0xff]  ;;  %v3916_v7 = vadd.f32 %v7021_v6, %v16367_v23  ;;  %v3917_v8 = vadd.f32 %v7021_v6, %v16370_v24 }
 0x3d0   : > { %5938 = vst [vmem:[%s6975_s4 + $0x3118] sm:$0xff] %v3890_v10  ;;  %5939 = vst [vmem:[%s6975_s4 + $0x3120] sm:$0xff] %v3891_v16  ;;  %v16490_v3 = vld [vmem:[%s6889_s15 + $0x3290] sm:$0xff]  ;;  %v16493_v4 = vld [vmem:[%s6889_s15 + $0x3298] sm:$0xff]  ;;  %v3918_v10 = vadd.f32 %v7021_v6, %v16373_v26  ;;  %v3919_v16 = vadd.f32 %v7207_v9, %v16388_v31 }
 0x3d1   : > { %5940 = vst [vmem:[%s6975_s4 + $0x3128] sm:$0xff] %v3892_v18  ;;  %5941 = vst [vmem:[%s6975_s4 + $0x3130] sm:$0xff] %v3893_v20  ;;  %v16508_v11 = vld [vmem:[%s6889_s15 + $0x32a0] sm:$0xff]  ;;  %v16511_v12 = vld [vmem:[%s6889_s15 + $0x32a8] sm:$0xff]  ;;  %v3920_v18 = vadd.f32 %v7207_v9, %v16391_v33  ;;  %v3921_v20 = vadd.f32 %v7207_v9, %v16394_v34 }
 0x3d2   : > { %5942 = vst [vmem:[%s6975_s4 + $0x3138] sm:$0xff] %v3894_v21  ;;  %5943 = vst [vmem:[%s6975_s4 + $0x3140] sm:$0xff] %v3895_v27  ;;  %v16514_v14 = vld [vmem:[%s6889_s15 + $0x32b0] sm:$0xff]  ;;  %v16517_v15 = vld [vmem:[%s6889_s15 + $0x32b8] sm:$0xff]  ;;  %v3922_v21 = vadd.f32 %v7207_v9, %v16397_v35  ;;  %v3923_v27 = vadd.f32 %v7207_v9, %v16412_v41 }
 0x3d3   : > { %5944 = vst [vmem:[%s6975_s4 + $0x3148] sm:$0xff] %v3896_v28  ;;  %5945 = vst [vmem:[%s6975_s4 + $0x3150] sm:$0xff] %v3897_v29  ;;  %v16532_v22 = vld [vmem:[%s6889_s15 + $0x32c0] sm:$0xff]  ;;  %v16535_v23 = vld [vmem:[%s6889_s15 + $0x32c8] sm:$0xff]  ;;  %v3924_v28 = vadd.f32 %v7207_v9, %v16415_v42  ;;  %v3925_v29 = vadd.f32 %v7207_v9, %v16418_v43 }
 0x3d4   : > { %5946 = vst [vmem:[%s6975_s4 + $0x3158] sm:$0xff] %v3898_v30  ;;  %5947 = vst [vmem:[%s6975_s4 + $0x3160] sm:$0xff] %v3899_v36  ;;  %v16538_v24 = vld [vmem:[%s6889_s15 + $0x32d0] sm:$0xff]  ;;  %v16541_v26 = vld [vmem:[%s6889_s15 + $0x32d8] sm:$0xff]  ;;  %v3926_v30 = vadd.f32 %v7207_v9, %v16421_v44  ;;  %v3927_v36 = vadd.f32 %v7207_v9, %v16436_v49 }
 0x3d5   : > { %5948 = vst [vmem:[%s6975_s4 + $0x3168] sm:$0xff] %v3900_v37  ;;  %5949 = vst [vmem:[%s6975_s4 + $0x3170] sm:$0xff] %v3901_v38  ;;  %v16556_v31 = vld [vmem:[%s6889_s15 + $0x32e0] sm:$0xff]  ;;  %v16559_v33 = vld [vmem:[%s6889_s15 + $0x32e8] sm:$0xff]  ;;  %v3928_v37 = vadd.f32 %v7207_v9, %v16439_v50  ;;  %v3929_v38 = vadd.f32 %v7207_v9, %v16442_v51 }
 0x3d6   : > { %5950 = vst [vmem:[%s6975_s4 + $0x3178] sm:$0xff] %v3902_v39  ;;  %5951 = vst [vmem:[%s6975_s4 + $0x3180] sm:$0xff] %v3903_v45  ;;  %v16562_v34 = vld [vmem:[%s6889_s15 + $0x32f0] sm:$0xff]  ;;  %v16565_v35 = vld [vmem:[%s6889_s15 + $0x32f8] sm:$0xff]  ;;  %v3930_v39 = vadd.f32 %v7207_v9, %v16445_v52  ;;  %v3931_v45 = vadd.f32 %v7207_v9, %v16460_v57 }
 0x3d7   : > { %5952 = vst [vmem:[%s6975_s4 + $0x3188] sm:$0xff] %v3904_v46  ;;  %5953 = vst [vmem:[%s6975_s4 + $0x3190] sm:$0xff] %v3905_v47  ;;  %v16580_v41 = vld [vmem:[%s6889_s15 + $0x3300] sm:$0xff]  ;;  %v16583_v42 = vld [vmem:[%s6889_s15 + $0x3308] sm:$0xff]  ;;  %v3932_v46 = vadd.f32 %v7207_v9, %v16463_v58  ;;  %v3933_v47 = vadd.f32 %v7207_v9, %v16466_v59 }
 0x3d8   : > { %5954 = vst [vmem:[%s6975_s4 + $0x3198] sm:$0xff] %v3906_v48  ;;  %5955 = vst [vmem:[%s6975_s4 + $0x31a0] sm:$0xff] %v3907_v53  ;;  %v16586_v43 = vld [vmem:[%s6889_s15 + $0x3310] sm:$0xff]  ;;  %v16589_v44 = vld [vmem:[%s6889_s15 + $0x3318] sm:$0xff]  ;;  %v3934_v48 = vadd.f32 %v7207_v9, %v16469_v60  ;;  %v3935_v53 = vadd.f32 %v7207_v9, %v16484_v1 }
 0x3d9   : > { %5956 = vst [vmem:[%s6975_s4 + $0x31a8] sm:$0xff] %v3908_v54  ;;  %5957 = vst [vmem:[%s6975_s4 + $0x31b0] sm:$0xff] %v3909_v55  ;;  %v16604_v49 = vld [vmem:[%s6889_s15 + $0x3320] sm:$0xff]  ;;  %v16607_v50 = vld [vmem:[%s6889_s15 + $0x3328] sm:$0xff]  ;;  %v3936_v54 = vadd.f32 %v7207_v9, %v16487_v2  ;;  %v3937_v55 = vadd.f32 %v7207_v9, %v16490_v3 }
 0x3da   : > { %5958 = vst [vmem:[%s6975_s4 + $0x31b8] sm:$0xff] %v3910_v56  ;;  %5959 = vst [vmem:[%s6975_s4 + $0x31c0] sm:$0xff] %v3911_v61  ;;  %v16610_v51 = vld [vmem:[%s6889_s15 + $0x3330] sm:$0xff]  ;;  %v16613_v52 = vld [vmem:[%s6889_s15 + $0x3338] sm:$0xff]  ;;  %v3938_v56 = vadd.f32 %v7207_v9, %v16493_v4  ;;  %v3939_v61 = vadd.f32 %v7207_v9, %v16508_v11 }
 0x3db   : > { %5960 = vst [vmem:[%s6975_s4 + $0x31c8] sm:$0xff] %v3912_v62  ;;  %5961 = vst [vmem:[%s6975_s4 + $0x31d0] sm:$0xff] %v3913_v63  ;;  %v16628_v57 = vld [vmem:[%s6889_s15 + $0x3340] sm:$0xff]  ;;  %v16631_v58 = vld [vmem:[%s6889_s15 + $0x3348] sm:$0xff]  ;;  %v3940_v62 = vadd.f32 %v7207_v9, %v16511_v12  ;;  %v3941_v63 = vadd.f32 %v7207_v9, %v16514_v14 }
 0x3dc   : > { %5962 = vst [vmem:[%s6975_s4 + $0x31d8] sm:$0xff] %v3914_v0  ;;  %5963 = vst [vmem:[%s6975_s4 + $0x31e0] sm:$0xff] %v3915_v5  ;;  %v16634_v59 = vld [vmem:[%s6889_s15 + $0x3350] sm:$0xff]  ;;  %v16637_v60 = vld [vmem:[%s6889_s15 + $0x3358] sm:$0xff]  ;;  %v3942_v0 = vadd.f32 %v7207_v9, %v16517_v15  ;;  %v3943_v5 = vadd.f32 %v7207_v9, %v16532_v22 }
 0x3dd   : > { %5964 = vst [vmem:[%s6975_s4 + $0x31e8] sm:$0xff] %v3916_v7  ;;  %5965 = vst [vmem:[%s6975_s4 + $0x31f0] sm:$0xff] %v3917_v8  ;;  %v16652_v1 = vld [vmem:[%s6889_s15 + $0x3360] sm:$0xff]  ;;  %v16655_v2 = vld [vmem:[%s6889_s15 + $0x3368] sm:$0xff]  ;;  %v3944_v7 = vadd.f32 %v7207_v9, %v16535_v23  ;;  %v3945_v8 = vadd.f32 %v7207_v9, %v16538_v24 }
 0x3de   : > { %5966 = vst [vmem:[%s6975_s4 + $0x31f8] sm:$0xff] %v3918_v10  ;;  %5967 = vst [vmem:[%s6975_s4 + $0x3200] sm:$0xff] %v3919_v16  ;;  %v16658_v3 = vld [vmem:[%s6889_s15 + $0x3370] sm:$0xff]  ;;  %v16661_v4 = vld [vmem:[%s6889_s15 + $0x3378] sm:$0xff]  ;;  %v3946_v10 = vadd.f32 %v7207_v9, %v16541_v26  ;;  %v3947_v16 = vadd.f32 %v7207_v9, %v16556_v31 }
 0x3df   : > { %5968 = vst [vmem:[%s6975_s4 + $0x3208] sm:$0xff] %v3920_v18  ;;  %5969 = vst [vmem:[%s6975_s4 + $0x3210] sm:$0xff] %v3921_v20  ;;  %v16676_v11 = vld [vmem:[%s6889_s15 + $0x3380] sm:$0xff]  ;;  %v16679_v12 = vld [vmem:[%s6889_s15 + $0x3388] sm:$0xff]  ;;  %v3948_v18 = vadd.f32 %v7207_v9, %v16559_v33  ;;  %v3949_v20 = vadd.f32 %v7207_v9, %v16562_v34 }
 0x3e0   : > { %5970 = vst [vmem:[%s6975_s4 + $0x3218] sm:$0xff] %v3922_v21  ;;  %5971 = vst [vmem:[%s6975_s4 + $0x3220] sm:$0xff] %v3923_v27  ;;  %v16682_v14 = vld [vmem:[%s6889_s15 + $0x3390] sm:$0xff]  ;;  %v16685_v15 = vld [vmem:[%s6889_s15 + $0x3398] sm:$0xff]  ;;  %v3950_v21 = vadd.f32 %v7207_v9, %v16565_v35  ;;  %v3951_v27 = vadd.f32 %v7401_v13, %v16580_v41 }
 0x3e1   : > { %5972 = vst [vmem:[%s6975_s4 + $0x3228] sm:$0xff] %v3924_v28  ;;  %5973 = vst [vmem:[%s6975_s4 + $0x3230] sm:$0xff] %v3925_v29  ;;  %v16700_v22 = vld [vmem:[%s6889_s15 + $0x33a0] sm:$0xff]  ;;  %v16703_v23 = vld [vmem:[%s6889_s15 + $0x33a8] sm:$0xff]  ;;  %v3952_v28 = vadd.f32 %v7401_v13, %v16583_v42  ;;  %v3953_v29 = vadd.f32 %v7401_v13, %v16586_v43 }
 0x3e2   : > { %5974 = vst [vmem:[%s6975_s4 + $0x3238] sm:$0xff] %v3926_v30  ;;  %5975 = vst [vmem:[%s6975_s4 + $0x3240] sm:$0xff] %v3927_v36  ;;  %v16706_v24 = vld [vmem:[%s6889_s15 + $0x33b0] sm:$0xff]  ;;  %v16709_v26 = vld [vmem:[%s6889_s15 + $0x33b8] sm:$0xff]  ;;  %v3954_v30 = vadd.f32 %v7401_v13, %v16589_v44  ;;  %v3955_v36 = vadd.f32 %v7401_v13, %v16604_v49 }
 0x3e3   : > { %5976 = vst [vmem:[%s6975_s4 + $0x3248] sm:$0xff] %v3928_v37  ;;  %5977 = vst [vmem:[%s6975_s4 + $0x3250] sm:$0xff] %v3929_v38  ;;  %v16724_v31 = vld [vmem:[%s6889_s15 + $0x33c0] sm:$0xff]  ;;  %v16727_v33 = vld [vmem:[%s6889_s15 + $0x33c8] sm:$0xff]  ;;  %v3956_v37 = vadd.f32 %v7401_v13, %v16607_v50  ;;  %v3957_v38 = vadd.f32 %v7401_v13, %v16610_v51 }
 0x3e4   : > { %5978 = vst [vmem:[%s6975_s4 + $0x3258] sm:$0xff] %v3930_v39  ;;  %5979 = vst [vmem:[%s6975_s4 + $0x3260] sm:$0xff] %v3931_v45  ;;  %v16730_v34 = vld [vmem:[%s6889_s15 + $0x33d0] sm:$0xff]  ;;  %v16733_v35 = vld [vmem:[%s6889_s15 + $0x33d8] sm:$0xff]  ;;  %v3958_v39 = vadd.f32 %v7401_v13, %v16613_v52  ;;  %v3959_v45 = vadd.f32 %v7401_v13, %v16628_v57 }
 0x3e5   : > { %5980 = vst [vmem:[%s6975_s4 + $0x3268] sm:$0xff] %v3932_v46  ;;  %5981 = vst [vmem:[%s6975_s4 + $0x3270] sm:$0xff] %v3933_v47  ;;  %v16748_v41 = vld [vmem:[%s6889_s15 + $0x33e0] sm:$0xff]  ;;  %v16751_v42 = vld [vmem:[%s6889_s15 + $0x33e8] sm:$0xff]  ;;  %v3960_v46 = vadd.f32 %v7401_v13, %v16631_v58  ;;  %v3961_v47 = vadd.f32 %v7401_v13, %v16634_v59 }
 0x3e6   : > { %5982 = vst [vmem:[%s6975_s4 + $0x3278] sm:$0xff] %v3934_v48  ;;  %5983 = vst [vmem:[%s6975_s4 + $0x3280] sm:$0xff] %v3935_v53  ;;  %v16754_v43 = vld [vmem:[%s6889_s15 + $0x33f0] sm:$0xff]  ;;  %v16757_v44 = vld [vmem:[%s6889_s15 + $0x33f8] sm:$0xff]  ;;  %v3962_v48 = vadd.f32 %v7401_v13, %v16637_v60  ;;  %v3963_v53 = vadd.f32 %v7401_v13, %v16652_v1 }
 0x3e7   : > { %5984 = vst [vmem:[%s6975_s4 + $0x3288] sm:$0xff] %v3936_v54  ;;  %5985 = vst [vmem:[%s6975_s4 + $0x3290] sm:$0xff] %v3937_v55  ;;  %v16772_v49 = vld [vmem:[%s6889_s15 + $0x3400] sm:$0xff]  ;;  %v16775_v50 = vld [vmem:[%s6889_s15 + $0x3408] sm:$0xff]  ;;  %v3964_v54 = vadd.f32 %v7401_v13, %v16655_v2  ;;  %v3965_v55 = vadd.f32 %v7401_v13, %v16658_v3 }
 0x3e8   : > { %5986 = vst [vmem:[%s6975_s4 + $0x3298] sm:$0xff] %v3938_v56  ;;  %5987 = vst [vmem:[%s6975_s4 + $0x32a0] sm:$0xff] %v3939_v61  ;;  %v16778_v51 = vld [vmem:[%s6889_s15 + $0x3410] sm:$0xff]  ;;  %v16781_v52 = vld [vmem:[%s6889_s15 + $0x3418] sm:$0xff]  ;;  %v3966_v56 = vadd.f32 %v7401_v13, %v16661_v4  ;;  %v3967_v61 = vadd.f32 %v7401_v13, %v16676_v11 }
 0x3e9   : > { %5988 = vst [vmem:[%s6975_s4 + $0x32a8] sm:$0xff] %v3940_v62  ;;  %5989 = vst [vmem:[%s6975_s4 + $0x32b0] sm:$0xff] %v3941_v63  ;;  %v16796_v57 = vld [vmem:[%s6889_s15 + $0x3420] sm:$0xff]  ;;  %v16799_v58 = vld [vmem:[%s6889_s15 + $0x3428] sm:$0xff]  ;;  %v3968_v62 = vadd.f32 %v7401_v13, %v16679_v12  ;;  %v3969_v63 = vadd.f32 %v7401_v13, %v16682_v14 }
 0x3ea   : > { %5990 = vst [vmem:[%s6975_s4 + $0x32b8] sm:$0xff] %v3942_v0  ;;  %5991 = vst [vmem:[%s6975_s4 + $0x32c0] sm:$0xff] %v3943_v5  ;;  %v16802_v59 = vld [vmem:[%s6889_s15 + $0x3430] sm:$0xff]  ;;  %v16805_v60 = vld [vmem:[%s6889_s15 + $0x3438] sm:$0xff]  ;;  %v3970_v0 = vadd.f32 %v7401_v13, %v16685_v15  ;;  %v3971_v5 = vadd.f32 %v7401_v13, %v16700_v22 }
 0x3eb   : > { %5992 = vst [vmem:[%s6975_s4 + $0x32c8] sm:$0xff] %v3944_v7  ;;  %5993 = vst [vmem:[%s6975_s4 + $0x32d0] sm:$0xff] %v3945_v8  ;;  %v16820_v1 = vld [vmem:[%s6889_s15 + $0x3440] sm:$0xff]  ;;  %v16823_v2 = vld [vmem:[%s6889_s15 + $0x3448] sm:$0xff]  ;;  %v3972_v7 = vadd.f32 %v7401_v13, %v16703_v23  ;;  %v3973_v8 = vadd.f32 %v7401_v13, %v16706_v24 }
 0x3ec   : > { %5994 = vst [vmem:[%s6975_s4 + $0x32d8] sm:$0xff] %v3946_v10  ;;  %5995 = vst [vmem:[%s6975_s4 + $0x32e0] sm:$0xff] %v3947_v16  ;;  %v16826_v3 = vld [vmem:[%s6889_s15 + $0x3450] sm:$0xff]  ;;  %v16829_v4 = vld [vmem:[%s6889_s15 + $0x3458] sm:$0xff]  ;;  %v3974_v10 = vadd.f32 %v7401_v13, %v16709_v26  ;;  %v3975_v16 = vadd.f32 %v7401_v13, %v16724_v31 }
 0x3ed   : > { %5996 = vst [vmem:[%s6975_s4 + $0x32e8] sm:$0xff] %v3948_v18  ;;  %5997 = vst [vmem:[%s6975_s4 + $0x32f0] sm:$0xff] %v3949_v20  ;;  %v16844_v11 = vld [vmem:[%s6889_s15 + $0x3460] sm:$0xff]  ;;  %v16847_v12 = vld [vmem:[%s6889_s15 + $0x3468] sm:$0xff]  ;;  %v3976_v18 = vadd.f32 %v7401_v13, %v16727_v33  ;;  %v3977_v20 = vadd.f32 %v7401_v13, %v16730_v34 }
 0x3ee   : > { %5998 = vst [vmem:[%s6975_s4 + $0x32f8] sm:$0xff] %v3950_v21  ;;  %5999 = vst [vmem:[%s6975_s4 + $0x3300] sm:$0xff] %v3951_v27  ;;  %v16850_v14 = vld [vmem:[%s6889_s15 + $0x3470] sm:$0xff]  ;;  %v16853_v15 = vld [vmem:[%s6889_s15 + $0x3478] sm:$0xff]  ;;  %v3978_v21 = vadd.f32 %v7401_v13, %v16733_v35  ;;  %v3979_v27 = vadd.f32 %v7401_v13, %v16748_v41 }
 0x3ef   : > { %6000 = vst [vmem:[%s6975_s4 + $0x3308] sm:$0xff] %v3952_v28  ;;  %6001 = vst [vmem:[%s6975_s4 + $0x3310] sm:$0xff] %v3953_v29  ;;  %v16868_v22 = vld [vmem:[%s6889_s15 + $0x3480] sm:$0xff]  ;;  %v16871_v23 = vld [vmem:[%s6889_s15 + $0x3488] sm:$0xff]  ;;  %v3980_v28 = vadd.f32 %v7401_v13, %v16751_v42  ;;  %v3981_v29 = vadd.f32 %v7401_v13, %v16754_v43 }
 0x3f0   : > { %6002 = vst [vmem:[%s6975_s4 + $0x3318] sm:$0xff] %v3954_v30  ;;  %6003 = vst [vmem:[%s6975_s4 + $0x3320] sm:$0xff] %v3955_v36  ;;  %v16874_v24 = vld [vmem:[%s6889_s15 + $0x3490] sm:$0xff]  ;;  %v16877_v26 = vld [vmem:[%s6889_s15 + $0x3498] sm:$0xff]  ;;  %v3982_v30 = vadd.f32 %v7401_v13, %v16757_v44  ;;  %v3983_v36 = vadd.f32 %v7595_v19, %v16772_v49 }
 0x3f1   : > { %6004 = vst [vmem:[%s6975_s4 + $0x3328] sm:$0xff] %v3956_v37  ;;  %6005 = vst [vmem:[%s6975_s4 + $0x3330] sm:$0xff] %v3957_v38  ;;  %v16892_v31 = vld [vmem:[%s6889_s15 + $0x34a0] sm:$0xff]  ;;  %v16895_v33 = vld [vmem:[%s6889_s15 + $0x34a8] sm:$0xff]  ;;  %v3984_v37 = vadd.f32 %v7595_v19, %v16775_v50  ;;  %v3985_v38 = vadd.f32 %v7595_v19, %v16778_v51 }
 0x3f2   : > { %6006 = vst [vmem:[%s6975_s4 + $0x3338] sm:$0xff] %v3958_v39  ;;  %6007 = vst [vmem:[%s6975_s4 + $0x3340] sm:$0xff] %v3959_v45  ;;  %v16898_v34 = vld [vmem:[%s6889_s15 + $0x34b0] sm:$0xff]  ;;  %v16901_v35 = vld [vmem:[%s6889_s15 + $0x34b8] sm:$0xff]  ;;  %v3986_v39 = vadd.f32 %v7595_v19, %v16781_v52  ;;  %v3987_v45 = vadd.f32 %v7595_v19, %v16796_v57 }
 0x3f3   : > { %6008 = vst [vmem:[%s6975_s4 + $0x3348] sm:$0xff] %v3960_v46  ;;  %6009 = vst [vmem:[%s6975_s4 + $0x3350] sm:$0xff] %v3961_v47  ;;  %v16916_v41 = vld [vmem:[%s6889_s15 + $0x34c0] sm:$0xff]  ;;  %v16919_v42 = vld [vmem:[%s6889_s15 + $0x34c8] sm:$0xff]  ;;  %v3988_v46 = vadd.f32 %v7595_v19, %v16799_v58  ;;  %v3989_v47 = vadd.f32 %v7595_v19, %v16802_v59 }
 0x3f4   : > { %6010 = vst [vmem:[%s6975_s4 + $0x3358] sm:$0xff] %v3962_v48  ;;  %6011 = vst [vmem:[%s6975_s4 + $0x3360] sm:$0xff] %v3963_v53  ;;  %v16922_v43 = vld [vmem:[%s6889_s15 + $0x34d0] sm:$0xff]  ;;  %v16925_v44 = vld [vmem:[%s6889_s15 + $0x34d8] sm:$0xff]  ;;  %v3990_v48 = vadd.f32 %v7595_v19, %v16805_v60  ;;  %v3991_v53 = vadd.f32 %v7595_v19, %v16820_v1 }
 0x3f5   : > { %6012 = vst [vmem:[%s6975_s4 + $0x3368] sm:$0xff] %v3964_v54  ;;  %6013 = vst [vmem:[%s6975_s4 + $0x3370] sm:$0xff] %v3965_v55  ;;  %v16940_v49 = vld [vmem:[%s6889_s15 + $0x34e0] sm:$0xff]  ;;  %v16943_v50 = vld [vmem:[%s6889_s15 + $0x34e8] sm:$0xff]  ;;  %v3992_v54 = vadd.f32 %v7595_v19, %v16823_v2  ;;  %v3993_v55 = vadd.f32 %v7595_v19, %v16826_v3 }
 0x3f6   : > { %6014 = vst [vmem:[%s6975_s4 + $0x3378] sm:$0xff] %v3966_v56  ;;  %6015 = vst [vmem:[%s6975_s4 + $0x3380] sm:$0xff] %v3967_v61  ;;  %v16946_v51 = vld [vmem:[%s6889_s15 + $0x34f0] sm:$0xff]  ;;  %v16949_v52 = vld [vmem:[%s6889_s15 + $0x34f8] sm:$0xff]  ;;  %v3994_v56 = vadd.f32 %v7595_v19, %v16829_v4  ;;  %v3995_v61 = vadd.f32 %v7595_v19, %v16844_v11 }
 0x3f7   : > { %6016 = vst [vmem:[%s6975_s4 + $0x3388] sm:$0xff] %v3968_v62  ;;  %6017 = vst [vmem:[%s6975_s4 + $0x3390] sm:$0xff] %v3969_v63  ;;  %v16964_v57 = vld [vmem:[%s6889_s15 + $0x3500] sm:$0xff]  ;;  %v16967_v58 = vld [vmem:[%s6889_s15 + $0x3508] sm:$0xff]  ;;  %v3996_v62 = vadd.f32 %v7595_v19, %v16847_v12  ;;  %v3997_v63 = vadd.f32 %v7595_v19, %v16850_v14 }
 0x3f8   : > { %6018 = vst [vmem:[%s6975_s4 + $0x3398] sm:$0xff] %v3970_v0  ;;  %6019 = vst [vmem:[%s6975_s4 + $0x33a0] sm:$0xff] %v3971_v5  ;;  %v16970_v59 = vld [vmem:[%s6889_s15 + $0x3510] sm:$0xff]  ;;  %v16973_v60 = vld [vmem:[%s6889_s15 + $0x3518] sm:$0xff]  ;;  %v3998_v0 = vadd.f32 %v7595_v19, %v16853_v15  ;;  %v3999_v5 = vadd.f32 %v7595_v19, %v16868_v22 }
 0x3f9   : > { %6020 = vst [vmem:[%s6975_s4 + $0x33a8] sm:$0xff] %v3972_v7  ;;  %6021 = vst [vmem:[%s6975_s4 + $0x33b0] sm:$0xff] %v3973_v8  ;;  %v16988_v1 = vld [vmem:[%s6889_s15 + $0x3520] sm:$0xff]  ;;  %v16991_v2 = vld [vmem:[%s6889_s15 + $0x3528] sm:$0xff]  ;;  %v4000_v7 = vadd.f32 %v7595_v19, %v16871_v23  ;;  %v4001_v8 = vadd.f32 %v7595_v19, %v16874_v24 }
 0x3fa   : > { %6022 = vst [vmem:[%s6975_s4 + $0x33b8] sm:$0xff] %v3974_v10  ;;  %6023 = vst [vmem:[%s6975_s4 + $0x33c0] sm:$0xff] %v3975_v16  ;;  %v16994_v3 = vld [vmem:[%s6889_s15 + $0x3530] sm:$0xff]  ;;  %v16997_v4 = vld [vmem:[%s6889_s15 + $0x3538] sm:$0xff]  ;;  %v4002_v10 = vadd.f32 %v7595_v19, %v16877_v26  ;;  %v4003_v16 = vadd.f32 %v7595_v19, %v16892_v31 }
 0x3fb   : > { %6024 = vst [vmem:[%s6975_s4 + $0x33c8] sm:$0xff] %v3976_v18  ;;  %6025 = vst [vmem:[%s6975_s4 + $0x33d0] sm:$0xff] %v3977_v20  ;;  %v17012_v11 = vld [vmem:[%s6889_s15 + $0x3540] sm:$0xff]  ;;  %v17015_v12 = vld [vmem:[%s6889_s15 + $0x3548] sm:$0xff]  ;;  %v4004_v18 = vadd.f32 %v7595_v19, %v16895_v33  ;;  %v4005_v20 = vadd.f32 %v7595_v19, %v16898_v34 }
 0x3fc   : > { %6026 = vst [vmem:[%s6975_s4 + $0x33d8] sm:$0xff] %v3978_v21  ;;  %6027 = vst [vmem:[%s6975_s4 + $0x33e0] sm:$0xff] %v3979_v27  ;;  %v17018_v14 = vld [vmem:[%s6889_s15 + $0x3550] sm:$0xff]  ;;  %v17021_v15 = vld [vmem:[%s6889_s15 + $0x3558] sm:$0xff]  ;;  %v4006_v21 = vadd.f32 %v7595_v19, %v16901_v35  ;;  %v4007_v27 = vadd.f32 %v7595_v19, %v16916_v41 }
 0x3fd   : > { %6028 = vst [vmem:[%s6975_s4 + $0x33e8] sm:$0xff] %v3980_v28  ;;  %6029 = vst [vmem:[%s6975_s4 + $0x33f0] sm:$0xff] %v3981_v29  ;;  %v17036_v22 = vld [vmem:[%s6889_s15 + $0x3560] sm:$0xff]  ;;  %v17039_v23 = vld [vmem:[%s6889_s15 + $0x3568] sm:$0xff]  ;;  %v4008_v28 = vadd.f32 %v7595_v19, %v16919_v42  ;;  %v4009_v29 = vadd.f32 %v7595_v19, %v16922_v43 }
 0x3fe   : > { %6030 = vst [vmem:[%s6975_s4 + $0x33f8] sm:$0xff] %v3982_v30  ;;  %6031 = vst [vmem:[%s6975_s4 + $0x3400] sm:$0xff] %v3983_v36  ;;  %v17042_v24 = vld [vmem:[%s6889_s15 + $0x3570] sm:$0xff]  ;;  %v17045_v26 = vld [vmem:[%s6889_s15 + $0x3578] sm:$0xff]  ;;  %v4010_v30 = vadd.f32 %v7595_v19, %v16925_v44  ;;  %v4011_v36 = vadd.f32 %v7595_v19, %v16940_v49 }
 0x3ff   : > { %6032 = vst [vmem:[%s6975_s4 + $0x3408] sm:$0xff] %v3984_v37  ;;  %6033 = vst [vmem:[%s6975_s4 + $0x3410] sm:$0xff] %v3985_v38  ;;  %v17060_v31 = vld [vmem:[%s6889_s15 + $0x3580] sm:$0xff]  ;;  %v17063_v33 = vld [vmem:[%s6889_s15 + $0x3588] sm:$0xff]  ;;  %v4012_v37 = vadd.f32 %v7595_v19, %v16943_v50  ;;  %v4013_v38 = vadd.f32 %v7595_v19, %v16946_v51 }
 0x400   : > { %6034 = vst [vmem:[%s6975_s4 + $0x3418] sm:$0xff] %v3986_v39  ;;  %6035 = vst [vmem:[%s6975_s4 + $0x3420] sm:$0xff] %v3987_v45  ;;  %v17066_v34 = vld [vmem:[%s6889_s15 + $0x3590] sm:$0xff]  ;;  %v17069_v35 = vld [vmem:[%s6889_s15 + $0x3598] sm:$0xff]  ;;  %v4014_v39 = vadd.f32 %v7595_v19, %v16949_v52  ;;  %v4015_v45 = vadd.f32 %v7789_v25, %v16964_v57 }
 0x401   : > { %6036 = vst [vmem:[%s6975_s4 + $0x3428] sm:$0xff] %v3988_v46  ;;  %6037 = vst [vmem:[%s6975_s4 + $0x3430] sm:$0xff] %v3989_v47  ;;  %v17084_v41 = vld [vmem:[%s6889_s15 + $0x35a0] sm:$0xff]  ;;  %v17087_v42 = vld [vmem:[%s6889_s15 + $0x35a8] sm:$0xff]  ;;  %v4016_v46 = vadd.f32 %v7789_v25, %v16967_v58  ;;  %v4017_v47 = vadd.f32 %v7789_v25, %v16970_v59 }
 0x402   : > { %6038 = vst [vmem:[%s6975_s4 + $0x3438] sm:$0xff] %v3990_v48  ;;  %6039 = vst [vmem:[%s6975_s4 + $0x3440] sm:$0xff] %v3991_v53  ;;  %v17090_v43 = vld [vmem:[%s6889_s15 + $0x35b0] sm:$0xff]  ;;  %v17093_v44 = vld [vmem:[%s6889_s15 + $0x35b8] sm:$0xff]  ;;  %v4018_v48 = vadd.f32 %v7789_v25, %v16973_v60  ;;  %v4019_v53 = vadd.f32 %v7789_v25, %v16988_v1 }
 0x403   : > { %6040 = vst [vmem:[%s6975_s4 + $0x3448] sm:$0xff] %v3992_v54  ;;  %6041 = vst [vmem:[%s6975_s4 + $0x3450] sm:$0xff] %v3993_v55  ;;  %v17108_v49 = vld [vmem:[%s6889_s15 + $0x35c0] sm:$0xff]  ;;  %v17111_v50 = vld [vmem:[%s6889_s15 + $0x35c8] sm:$0xff]  ;;  %v4020_v54 = vadd.f32 %v7789_v25, %v16991_v2  ;;  %v4021_v55 = vadd.f32 %v7789_v25, %v16994_v3 }
 0x404   : > { %6042 = vst [vmem:[%s6975_s4 + $0x3458] sm:$0xff] %v3994_v56  ;;  %6043 = vst [vmem:[%s6975_s4 + $0x3460] sm:$0xff] %v3995_v61  ;;  %v17114_v51 = vld [vmem:[%s6889_s15 + $0x35d0] sm:$0xff]  ;;  %v17117_v52 = vld [vmem:[%s6889_s15 + $0x35d8] sm:$0xff]  ;;  %v4022_v56 = vadd.f32 %v7789_v25, %v16997_v4  ;;  %v4023_v61 = vadd.f32 %v7789_v25, %v17012_v11 }
 0x405   : > { %6044 = vst [vmem:[%s6975_s4 + $0x3468] sm:$0xff] %v3996_v62  ;;  %6045 = vst [vmem:[%s6975_s4 + $0x3470] sm:$0xff] %v3997_v63  ;;  %v17132_v57 = vld [vmem:[%s6889_s15 + $0x35e0] sm:$0xff]  ;;  %v17135_v58 = vld [vmem:[%s6889_s15 + $0x35e8] sm:$0xff]  ;;  %v4024_v62 = vadd.f32 %v7789_v25, %v17015_v12  ;;  %v4025_v63 = vadd.f32 %v7789_v25, %v17018_v14 }
 0x406   : > { %6046 = vst [vmem:[%s6975_s4 + $0x3478] sm:$0xff] %v3998_v0  ;;  %6047 = vst [vmem:[%s6975_s4 + $0x3480] sm:$0xff] %v3999_v5  ;;  %v17138_v59 = vld [vmem:[%s6889_s15 + $0x35f0] sm:$0xff]  ;;  %v17141_v60 = vld [vmem:[%s6889_s15 + $0x35f8] sm:$0xff]  ;;  %v4026_v0 = vadd.f32 %v7789_v25, %v17021_v15  ;;  %v4027_v5 = vadd.f32 %v7789_v25, %v17036_v22 }
 0x407   : > { %6048 = vst [vmem:[%s6975_s4 + $0x3488] sm:$0xff] %v4000_v7  ;;  %6049 = vst [vmem:[%s6975_s4 + $0x3490] sm:$0xff] %v4001_v8  ;;  %v17156_v1 = vld [vmem:[%s6889_s15 + $0x3600] sm:$0xff]  ;;  %v17159_v2 = vld [vmem:[%s6889_s15 + $0x3608] sm:$0xff]  ;;  %v4028_v7 = vadd.f32 %v7789_v25, %v17039_v23  ;;  %v4029_v8 = vadd.f32 %v7789_v25, %v17042_v24 }
 0x408   : > { %6050 = vst [vmem:[%s6975_s4 + $0x3498] sm:$0xff] %v4002_v10  ;;  %6051 = vst [vmem:[%s6975_s4 + $0x34a0] sm:$0xff] %v4003_v16  ;;  %v17162_v3 = vld [vmem:[%s6889_s15 + $0x3610] sm:$0xff]  ;;  %v17165_v4 = vld [vmem:[%s6889_s15 + $0x3618] sm:$0xff]  ;;  %v4030_v10 = vadd.f32 %v7789_v25, %v17045_v26  ;;  %v4031_v16 = vadd.f32 %v7789_v25, %v17060_v31 }
 0x409   : > { %6052 = vst [vmem:[%s6975_s4 + $0x34a8] sm:$0xff] %v4004_v18  ;;  %6053 = vst [vmem:[%s6975_s4 + $0x34b0] sm:$0xff] %v4005_v20  ;;  %v17180_v11 = vld [vmem:[%s6889_s15 + $0x3620] sm:$0xff]  ;;  %v17183_v12 = vld [vmem:[%s6889_s15 + $0x3628] sm:$0xff]  ;;  %v4032_v18 = vadd.f32 %v7789_v25, %v17063_v33  ;;  %v4033_v20 = vadd.f32 %v7789_v25, %v17066_v34 }
 0x40a   : > { %6054 = vst [vmem:[%s6975_s4 + $0x34b8] sm:$0xff] %v4006_v21  ;;  %6055 = vst [vmem:[%s6975_s4 + $0x34c0] sm:$0xff] %v4007_v27  ;;  %v17186_v14 = vld [vmem:[%s6889_s15 + $0x3630] sm:$0xff]  ;;  %v17189_v15 = vld [vmem:[%s6889_s15 + $0x3638] sm:$0xff]  ;;  %v4034_v21 = vadd.f32 %v7789_v25, %v17069_v35  ;;  %v4035_v27 = vadd.f32 %v7789_v25, %v17084_v41 }
 0x40b   : > { %6056 = vst [vmem:[%s6975_s4 + $0x34c8] sm:$0xff] %v4008_v28  ;;  %6057 = vst [vmem:[%s6975_s4 + $0x34d0] sm:$0xff] %v4009_v29  ;;  %v17204_v22 = vld [vmem:[%s6889_s15 + $0x3640] sm:$0xff]  ;;  %v17207_v23 = vld [vmem:[%s6889_s15 + $0x3648] sm:$0xff]  ;;  %v4036_v28 = vadd.f32 %v7789_v25, %v17087_v42  ;;  %v4037_v29 = vadd.f32 %v7789_v25, %v17090_v43 }
 0x40c   : > { %6058 = vst [vmem:[%s6975_s4 + $0x34d8] sm:$0xff] %v4010_v30  ;;  %6059 = vst [vmem:[%s6975_s4 + $0x34e0] sm:$0xff] %v4011_v36  ;;  %v17210_v24 = vld [vmem:[%s6889_s15 + $0x3650] sm:$0xff]  ;;  %v17213_v26 = vld [vmem:[%s6889_s15 + $0x3658] sm:$0xff]  ;;  %v4038_v30 = vadd.f32 %v7789_v25, %v17093_v44  ;;  %v4039_v36 = vadd.f32 %v7789_v25, %v17108_v49 }
 0x40d   : > { %6060 = vst [vmem:[%s6975_s4 + $0x34e8] sm:$0xff] %v4012_v37  ;;  %6061 = vst [vmem:[%s6975_s4 + $0x34f0] sm:$0xff] %v4013_v38  ;;  %v17228_v31 = vld [vmem:[%s6889_s15 + $0x3660] sm:$0xff]  ;;  %v17231_v33 = vld [vmem:[%s6889_s15 + $0x3668] sm:$0xff]  ;;  %v4040_v37 = vadd.f32 %v7789_v25, %v17111_v50  ;;  %v4041_v38 = vadd.f32 %v7789_v25, %v17114_v51 }
 0x40e   : > { %6062 = vst [vmem:[%s6975_s4 + $0x34f8] sm:$0xff] %v4014_v39  ;;  %6063 = vst [vmem:[%s6975_s4 + $0x3500] sm:$0xff] %v4015_v45  ;;  %v17234_v34 = vld [vmem:[%s6889_s15 + $0x3670] sm:$0xff]  ;;  %v17237_v35 = vld [vmem:[%s6889_s15 + $0x3678] sm:$0xff]  ;;  %v4042_v39 = vadd.f32 %v7789_v25, %v17117_v52  ;;  %v4043_v45 = vadd.f32 %v7789_v25, %v17132_v57 }
 0x40f   : > { %6064 = vst [vmem:[%s6975_s4 + $0x3508] sm:$0xff] %v4016_v46  ;;  %6065 = vst [vmem:[%s6975_s4 + $0x3510] sm:$0xff] %v4017_v47  ;;  %v17252_v41 = vld [vmem:[%s6889_s15 + $0x3680] sm:$0xff]  ;;  %v17255_v42 = vld [vmem:[%s6889_s15 + $0x3688] sm:$0xff]  ;;  %v4044_v46 = vadd.f32 %v7789_v25, %v17135_v58  ;;  %v4045_v47 = vadd.f32 %v7789_v25, %v17138_v59 }
 0x410   : > { %6066 = vst [vmem:[%s6975_s4 + $0x3518] sm:$0xff] %v4018_v48  ;;  %6067 = vst [vmem:[%s6975_s4 + $0x3520] sm:$0xff] %v4019_v53  ;;  %v17258_v43 = vld [vmem:[%s6889_s15 + $0x3690] sm:$0xff]  ;;  %v17261_v44 = vld [vmem:[%s6889_s15 + $0x3698] sm:$0xff]  ;;  %v4046_v48 = vadd.f32 %v7789_v25, %v17141_v60  ;;  %v4047_v53 = vadd.f32 %v7983_v32, %v17156_v1 }
 0x411   : > { %6068 = vst [vmem:[%s6975_s4 + $0x3528] sm:$0xff] %v4020_v54  ;;  %6069 = vst [vmem:[%s6975_s4 + $0x3530] sm:$0xff] %v4021_v55  ;;  %v17276_v49 = vld [vmem:[%s6889_s15 + $0x36a0] sm:$0xff]  ;;  %v17279_v50 = vld [vmem:[%s6889_s15 + $0x36a8] sm:$0xff]  ;;  %v4048_v54 = vadd.f32 %v7983_v32, %v17159_v2  ;;  %v4049_v55 = vadd.f32 %v7983_v32, %v17162_v3 }
 0x412   : > { %6070 = vst [vmem:[%s6975_s4 + $0x3538] sm:$0xff] %v4022_v56  ;;  %6071 = vst [vmem:[%s6975_s4 + $0x3540] sm:$0xff] %v4023_v61  ;;  %v17282_v51 = vld [vmem:[%s6889_s15 + $0x36b0] sm:$0xff]  ;;  %v17285_v52 = vld [vmem:[%s6889_s15 + $0x36b8] sm:$0xff]  ;;  %v4050_v56 = vadd.f32 %v7983_v32, %v17165_v4  ;;  %v4051_v61 = vadd.f32 %v7983_v32, %v17180_v11 }
 0x413   : > { %6072 = vst [vmem:[%s6975_s4 + $0x3548] sm:$0xff] %v4024_v62  ;;  %6073 = vst [vmem:[%s6975_s4 + $0x3550] sm:$0xff] %v4025_v63  ;;  %v17300_v57 = vld [vmem:[%s6889_s15 + $0x36c0] sm:$0xff]  ;;  %v17303_v58 = vld [vmem:[%s6889_s15 + $0x36c8] sm:$0xff]  ;;  %v4052_v62 = vadd.f32 %v7983_v32, %v17183_v12  ;;  %v4053_v63 = vadd.f32 %v7983_v32, %v17186_v14 }
 0x414   : > { %6074 = vst [vmem:[%s6975_s4 + $0x3558] sm:$0xff] %v4026_v0  ;;  %6075 = vst [vmem:[%s6975_s4 + $0x3560] sm:$0xff] %v4027_v5  ;;  %v17306_v59 = vld [vmem:[%s6889_s15 + $0x36d0] sm:$0xff]  ;;  %v17309_v60 = vld [vmem:[%s6889_s15 + $0x36d8] sm:$0xff]  ;;  %v4054_v0 = vadd.f32 %v7983_v32, %v17189_v15  ;;  %v4055_v5 = vadd.f32 %v7983_v32, %v17204_v22 }
 0x415   : > { %6076 = vst [vmem:[%s6975_s4 + $0x3568] sm:$0xff] %v4028_v7  ;;  %6077 = vst [vmem:[%s6975_s4 + $0x3570] sm:$0xff] %v4029_v8  ;;  %v17324_v1 = vld [vmem:[%s6889_s15 + $0x36e0] sm:$0xff]  ;;  %v17327_v2 = vld [vmem:[%s6889_s15 + $0x36e8] sm:$0xff]  ;;  %v4056_v7 = vadd.f32 %v7983_v32, %v17207_v23  ;;  %v4057_v8 = vadd.f32 %v7983_v32, %v17210_v24 }
 0x416   : > { %6078 = vst [vmem:[%s6975_s4 + $0x3578] sm:$0xff] %v4030_v10  ;;  %6079 = vst [vmem:[%s6975_s4 + $0x3580] sm:$0xff] %v4031_v16  ;;  %v17330_v3 = vld [vmem:[%s6889_s15 + $0x36f0] sm:$0xff]  ;;  %v17333_v4 = vld [vmem:[%s6889_s15 + $0x36f8] sm:$0xff]  ;;  %v4058_v10 = vadd.f32 %v7983_v32, %v17213_v26  ;;  %v4059_v16 = vadd.f32 %v7983_v32, %v17228_v31 }
 0x417   : > { %6080 = vst [vmem:[%s6975_s4 + $0x3588] sm:$0xff] %v4032_v18  ;;  %6081 = vst [vmem:[%s6975_s4 + $0x3590] sm:$0xff] %v4033_v20  ;;  %v17348_v11 = vld [vmem:[%s6889_s15 + $0x3700] sm:$0xff]  ;;  %v17351_v12 = vld [vmem:[%s6889_s15 + $0x3708] sm:$0xff]  ;;  %v4060_v18 = vadd.f32 %v7983_v32, %v17231_v33  ;;  %v4061_v20 = vadd.f32 %v7983_v32, %v17234_v34 }
 0x418   : > { %6082 = vst [vmem:[%s6975_s4 + $0x3598] sm:$0xff] %v4034_v21  ;;  %6083 = vst [vmem:[%s6975_s4 + $0x35a0] sm:$0xff] %v4035_v27  ;;  %v17354_v14 = vld [vmem:[%s6889_s15 + $0x3710] sm:$0xff]  ;;  %v17357_v15 = vld [vmem:[%s6889_s15 + $0x3718] sm:$0xff]  ;;  %v4062_v21 = vadd.f32 %v7983_v32, %v17237_v35  ;;  %v4063_v27 = vadd.f32 %v7983_v32, %v17252_v41 }
 0x419   : > { %6084 = vst [vmem:[%s6975_s4 + $0x35a8] sm:$0xff] %v4036_v28  ;;  %6085 = vst [vmem:[%s6975_s4 + $0x35b0] sm:$0xff] %v4037_v29  ;;  %v17372_v22 = vld [vmem:[%s6889_s15 + $0x3720] sm:$0xff]  ;;  %v17375_v23 = vld [vmem:[%s6889_s15 + $0x3728] sm:$0xff]  ;;  %v4064_v28 = vadd.f32 %v7983_v32, %v17255_v42  ;;  %v4065_v29 = vadd.f32 %v7983_v32, %v17258_v43 }
 0x41a   : > { %6086 = vst [vmem:[%s6975_s4 + $0x35b8] sm:$0xff] %v4038_v30  ;;  %6087 = vst [vmem:[%s6975_s4 + $0x35c0] sm:$0xff] %v4039_v36  ;;  %v17378_v24 = vld [vmem:[%s6889_s15 + $0x3730] sm:$0xff]  ;;  %v17381_v26 = vld [vmem:[%s6889_s15 + $0x3738] sm:$0xff]  ;;  %v4066_v30 = vadd.f32 %v7983_v32, %v17261_v44  ;;  %v4067_v36 = vadd.f32 %v7983_v32, %v17276_v49 }
 0x41b   : > { %6088 = vst [vmem:[%s6975_s4 + $0x35c8] sm:$0xff] %v4040_v37  ;;  %6089 = vst [vmem:[%s6975_s4 + $0x35d0] sm:$0xff] %v4041_v38  ;;  %v17396_v31 = vld [vmem:[%s6889_s15 + $0x3740] sm:$0xff]  ;;  %v17399_v33 = vld [vmem:[%s6889_s15 + $0x3748] sm:$0xff]  ;;  %v4068_v37 = vadd.f32 %v7983_v32, %v17279_v50  ;;  %v4069_v38 = vadd.f32 %v7983_v32, %v17282_v51 }
 0x41c   : > { %6090 = vst [vmem:[%s6975_s4 + $0x35d8] sm:$0xff] %v4042_v39  ;;  %6091 = vst [vmem:[%s6975_s4 + $0x35e0] sm:$0xff] %v4043_v45  ;;  %v17402_v34 = vld [vmem:[%s6889_s15 + $0x3750] sm:$0xff]  ;;  %v17405_v35 = vld [vmem:[%s6889_s15 + $0x3758] sm:$0xff]  ;;  %v4070_v39 = vadd.f32 %v7983_v32, %v17285_v52  ;;  %v4071_v45 = vadd.f32 %v7983_v32, %v17300_v57 }
 0x41d   : > { %6092 = vst [vmem:[%s6975_s4 + $0x35e8] sm:$0xff] %v4044_v46  ;;  %6093 = vst [vmem:[%s6975_s4 + $0x35f0] sm:$0xff] %v4045_v47  ;;  %v17420_v41 = vld [vmem:[%s6889_s15 + $0x3760] sm:$0xff]  ;;  %v17423_v42 = vld [vmem:[%s6889_s15 + $0x3768] sm:$0xff]  ;;  %v4072_v46 = vadd.f32 %v7983_v32, %v17303_v58  ;;  %v4073_v47 = vadd.f32 %v7983_v32, %v17306_v59 }
 0x41e   : > { %6094 = vst [vmem:[%s6975_s4 + $0x35f8] sm:$0xff] %v4046_v48  ;;  %6095 = vst [vmem:[%s6975_s4 + $0x3600] sm:$0xff] %v4047_v53  ;;  %v17426_v43 = vld [vmem:[%s6889_s15 + $0x3770] sm:$0xff]  ;;  %v17429_v44 = vld [vmem:[%s6889_s15 + $0x3778] sm:$0xff]  ;;  %v4074_v48 = vadd.f32 %v7983_v32, %v17309_v60  ;;  %v4075_v53 = vadd.f32 %v7983_v32, %v17324_v1 }
 0x41f   : > { %6096 = vst [vmem:[%s6975_s4 + $0x3608] sm:$0xff] %v4048_v54  ;;  %6097 = vst [vmem:[%s6975_s4 + $0x3610] sm:$0xff] %v4049_v55  ;;  %v17444_v49 = vld [vmem:[%s6889_s15 + $0x3780] sm:$0xff]  ;;  %v17447_v50 = vld [vmem:[%s6889_s15 + $0x3788] sm:$0xff]  ;;  %v4076_v54 = vadd.f32 %v7983_v32, %v17327_v2  ;;  %v4077_v55 = vadd.f32 %v7983_v32, %v17330_v3 }
 0x420   : > { %6098 = vst [vmem:[%s6975_s4 + $0x3618] sm:$0xff] %v4050_v56  ;;  %6099 = vst [vmem:[%s6975_s4 + $0x3620] sm:$0xff] %v4051_v61  ;;  %v17450_v51 = vld [vmem:[%s6889_s15 + $0x3790] sm:$0xff]  ;;  %v17453_v52 = vld [vmem:[%s6889_s15 + $0x3798] sm:$0xff]  ;;  %v4078_v56 = vadd.f32 %v7983_v32, %v17333_v4  ;;  %v4079_v61 = vadd.f32 %v8177_v40, %v17348_v11 }
 0x421   : > { %6100 = vst [vmem:[%s6975_s4 + $0x3628] sm:$0xff] %v4052_v62  ;;  %6101 = vst [vmem:[%s6975_s4 + $0x3630] sm:$0xff] %v4053_v63  ;;  %v17468_v57 = vld [vmem:[%s6889_s15 + $0x37a0] sm:$0xff]  ;;  %v17471_v58 = vld [vmem:[%s6889_s15 + $0x37a8] sm:$0xff]  ;;  %v4080_v62 = vadd.f32 %v8177_v40, %v17351_v12  ;;  %v4081_v63 = vadd.f32 %v8177_v40, %v17354_v14 }
 0x422   : > { %6102 = vst [vmem:[%s6975_s4 + $0x3638] sm:$0xff] %v4054_v0  ;;  %6103 = vst [vmem:[%s6975_s4 + $0x3640] sm:$0xff] %v4055_v5  ;;  %v17474_v59 = vld [vmem:[%s6889_s15 + $0x37b0] sm:$0xff]  ;;  %v17477_v60 = vld [vmem:[%s6889_s15 + $0x37b8] sm:$0xff]  ;;  %v4082_v0 = vadd.f32 %v8177_v40, %v17357_v15  ;;  %v4083_v5 = vadd.f32 %v8177_v40, %v17372_v22 }
 0x423   : > { %6104 = vst [vmem:[%s6975_s4 + $0x3648] sm:$0xff] %v4056_v7  ;;  %6105 = vst [vmem:[%s6975_s4 + $0x3650] sm:$0xff] %v4057_v8  ;;  %v17492_v1 = vld [vmem:[%s6889_s15 + $0x37c0] sm:$0xff]  ;;  %v17495_v2 = vld [vmem:[%s6889_s15 + $0x37c8] sm:$0xff]  ;;  %v4084_v7 = vadd.f32 %v8177_v40, %v17375_v23  ;;  %v4085_v8 = vadd.f32 %v8177_v40, %v17378_v24 }
 0x424   : > { %6106 = vst [vmem:[%s6975_s4 + $0x3658] sm:$0xff] %v4058_v10  ;;  %6107 = vst [vmem:[%s6975_s4 + $0x3660] sm:$0xff] %v4059_v16  ;;  %v17498_v3 = vld [vmem:[%s6889_s15 + $0x37d0] sm:$0xff]  ;;  %v17501_v4 = vld [vmem:[%s6889_s15 + $0x37d8] sm:$0xff]  ;;  %v4086_v10 = vadd.f32 %v8177_v40, %v17381_v26  ;;  %v4087_v16 = vadd.f32 %v8177_v40, %v17396_v31 }
 0x425   : > { %6108 = vst [vmem:[%s6975_s4 + $0x3668] sm:$0xff] %v4060_v18  ;;  %6109 = vst [vmem:[%s6975_s4 + $0x3670] sm:$0xff] %v4061_v20  ;;  %v17516_v11 = vld [vmem:[%s6889_s15 + $0x37e0] sm:$0xff]  ;;  %v17519_v12 = vld [vmem:[%s6889_s15 + $0x37e8] sm:$0xff]  ;;  %v4088_v18 = vadd.f32 %v8177_v40, %v17399_v33  ;;  %v4089_v20 = vadd.f32 %v8177_v40, %v17402_v34 }
 0x426   : > { %6110 = vst [vmem:[%s6975_s4 + $0x3678] sm:$0xff] %v4062_v21  ;;  %6111 = vst [vmem:[%s6975_s4 + $0x3680] sm:$0xff] %v4063_v27  ;;  %v17522_v14 = vld [vmem:[%s6889_s15 + $0x37f0] sm:$0xff]  ;;  %v17525_v15 = vld [vmem:[%s6889_s15 + $0x37f8] sm:$0xff]  ;;  %v4090_v21 = vadd.f32 %v8177_v40, %v17405_v35  ;;  %v4091_v27 = vadd.f32 %v8177_v40, %v17420_v41 }
 0x427   : > { %6112 = vst [vmem:[%s6975_s4 + $0x3688] sm:$0xff] %v4064_v28  ;;  %6113 = vst [vmem:[%s6975_s4 + $0x3690] sm:$0xff] %v4065_v29  ;;  %v17540_v22 = vld [vmem:[%s6889_s15 + $0x3800] sm:$0xff]  ;;  %v17543_v23 = vld [vmem:[%s6889_s15 + $0x3808] sm:$0xff]  ;;  %v4092_v28 = vadd.f32 %v8177_v40, %v17423_v42  ;;  %v4093_v29 = vadd.f32 %v8177_v40, %v17426_v43 }
 0x428   : > { %6114 = vst [vmem:[%s6975_s4 + $0x3698] sm:$0xff] %v4066_v30  ;;  %6115 = vst [vmem:[%s6975_s4 + $0x36a0] sm:$0xff] %v4067_v36  ;;  %v17546_v24 = vld [vmem:[%s6889_s15 + $0x3810] sm:$0xff]  ;;  %v17549_v26 = vld [vmem:[%s6889_s15 + $0x3818] sm:$0xff]  ;;  %v4094_v30 = vadd.f32 %v8177_v40, %v17429_v44  ;;  %v4095_v36 = vadd.f32 %v8177_v40, %v17444_v49 }
 0x429   : > { %6116 = vst [vmem:[%s6975_s4 + $0x36a8] sm:$0xff] %v4068_v37  ;;  %6117 = vst [vmem:[%s6975_s4 + $0x36b0] sm:$0xff] %v4069_v38  ;;  %v17564_v31 = vld [vmem:[%s6889_s15 + $0x3820] sm:$0xff]  ;;  %v17567_v33 = vld [vmem:[%s6889_s15 + $0x3828] sm:$0xff]  ;;  %v4096_v37 = vadd.f32 %v8177_v40, %v17447_v50  ;;  %v4097_v38 = vadd.f32 %v8177_v40, %v17450_v51 }
 0x42a   : > { %6118 = vst [vmem:[%s6975_s4 + $0x36b8] sm:$0xff] %v4070_v39  ;;  %6119 = vst [vmem:[%s6975_s4 + $0x36c0] sm:$0xff] %v4071_v45  ;;  %v17570_v34 = vld [vmem:[%s6889_s15 + $0x3830] sm:$0xff]  ;;  %v17573_v35 = vld [vmem:[%s6889_s15 + $0x3838] sm:$0xff]  ;;  %v4098_v39 = vadd.f32 %v8177_v40, %v17453_v52  ;;  %v4099_v45 = vadd.f32 %v8177_v40, %v17468_v57 }
 0x42b   : > { %6120 = vst [vmem:[%s6975_s4 + $0x36c8] sm:$0xff] %v4072_v46  ;;  %6121 = vst [vmem:[%s6975_s4 + $0x36d0] sm:$0xff] %v4073_v47  ;;  %v17588_v41 = vld [vmem:[%s6889_s15 + $0x3840] sm:$0xff]  ;;  %v17591_v42 = vld [vmem:[%s6889_s15 + $0x3848] sm:$0xff]  ;;  %v4100_v46 = vadd.f32 %v8177_v40, %v17471_v58  ;;  %v4101_v47 = vadd.f32 %v8177_v40, %v17474_v59 }
 0x42c   : > { %6122 = vst [vmem:[%s6975_s4 + $0x36d8] sm:$0xff] %v4074_v48  ;;  %6123 = vst [vmem:[%s6975_s4 + $0x36e0] sm:$0xff] %v4075_v53  ;;  %v17594_v43 = vld [vmem:[%s6889_s15 + $0x3850] sm:$0xff]  ;;  %v17597_v44 = vld [vmem:[%s6889_s15 + $0x3858] sm:$0xff]  ;;  %v4102_v48 = vadd.f32 %v8177_v40, %v17477_v60  ;;  %v4103_v53 = vadd.f32 %v8177_v40, %v17492_v1 }
 0x42d   : > { %6124 = vst [vmem:[%s6975_s4 + $0x36e8] sm:$0xff] %v4076_v54  ;;  %6125 = vst [vmem:[%s6975_s4 + $0x36f0] sm:$0xff] %v4077_v55  ;;  %v17612_v49 = vld [vmem:[%s6889_s15 + $0x3860] sm:$0xff]  ;;  %v17615_v50 = vld [vmem:[%s6889_s15 + $0x3868] sm:$0xff]  ;;  %v4104_v54 = vadd.f32 %v8177_v40, %v17495_v2  ;;  %v4105_v55 = vadd.f32 %v8177_v40, %v17498_v3 }
 0x42e   : > { %6126 = vst [vmem:[%s6975_s4 + $0x36f8] sm:$0xff] %v4078_v56  ;;  %6127 = vst [vmem:[%s6975_s4 + $0x3700] sm:$0xff] %v4079_v61  ;;  %v17618_v51 = vld [vmem:[%s6889_s15 + $0x3870] sm:$0xff]  ;;  %v17621_v52 = vld [vmem:[%s6889_s15 + $0x3878] sm:$0xff]  ;;  %v4106_v56 = vadd.f32 %v8177_v40, %v17501_v4  ;;  %v4107_v61 = vadd.f32 %v8177_v40, %v17516_v11 }
 0x42f   : > { %6128 = vst [vmem:[%s6975_s4 + $0x3708] sm:$0xff] %v4080_v62  ;;  %6129 = vst [vmem:[%s6975_s4 + $0x3710] sm:$0xff] %v4081_v63  ;;  %v17636_v57 = vld [vmem:[%s6889_s15 + $0x3880] sm:$0xff]  ;;  %v17639_v58 = vld [vmem:[%s6889_s15 + $0x3888] sm:$0xff]  ;;  %v4108_v62 = vadd.f32 %v8177_v40, %v17519_v12  ;;  %v4109_v63 = vadd.f32 %v8177_v40, %v17522_v14 }
 0x430   : > { %6130 = vst [vmem:[%s6975_s4 + $0x3718] sm:$0xff] %v4082_v0  ;;  %6131 = vst [vmem:[%s6975_s4 + $0x3720] sm:$0xff] %v4083_v5  ;;  %v17642_v59 = vld [vmem:[%s6889_s15 + $0x3890] sm:$0xff]  ;;  %v17645_v60 = vld [vmem:[%s6889_s15 + $0x3898] sm:$0xff]  ;;  %v4110_v0 = vadd.f32 %v8177_v40, %v17525_v15  ;;  %v4111_v5 = vadd.f32 %v6927_v17, %v17540_v22 }
 0x431   : > { %6132 = vst [vmem:[%s6975_s4 + $0x3728] sm:$0xff] %v4084_v7  ;;  %6133 = vst [vmem:[%s6975_s4 + $0x3730] sm:$0xff] %v4085_v8  ;;  %v17660_v1 = vld [vmem:[%s6889_s15 + $0x38a0] sm:$0xff]  ;;  %v17663_v2 = vld [vmem:[%s6889_s15 + $0x38a8] sm:$0xff]  ;;  %v4112_v7 = vadd.f32 %v6927_v17, %v17543_v23  ;;  %v4113_v8 = vadd.f32 %v6927_v17, %v17546_v24 }
 0x432   : > { %6134 = vst [vmem:[%s6975_s4 + $0x3738] sm:$0xff] %v4086_v10  ;;  %6135 = vst [vmem:[%s6975_s4 + $0x3740] sm:$0xff] %v4087_v16  ;;  %v17666_v3 = vld [vmem:[%s6889_s15 + $0x38b0] sm:$0xff]  ;;  %v17669_v4 = vld [vmem:[%s6889_s15 + $0x38b8] sm:$0xff]  ;;  %v4114_v10 = vadd.f32 %v6927_v17, %v17549_v26  ;;  %v4115_v16 = vadd.f32 %v6927_v17, %v17564_v31 }
 0x433   : > { %6136 = vst [vmem:[%s6975_s4 + $0x3748] sm:$0xff] %v4088_v18  ;;  %6137 = vst [vmem:[%s6975_s4 + $0x3750] sm:$0xff] %v4089_v20  ;;  %v17684_v11 = vld [vmem:[%s6889_s15 + $0x38c0] sm:$0xff]  ;;  %v17687_v12 = vld [vmem:[%s6889_s15 + $0x38c8] sm:$0xff]  ;;  %v4116_v18 = vadd.f32 %v6927_v17, %v17567_v33  ;;  %v4117_v20 = vadd.f32 %v6927_v17, %v17570_v34 }
 0x434   : > { %6138 = vst [vmem:[%s6975_s4 + $0x3758] sm:$0xff] %v4090_v21  ;;  %6139 = vst [vmem:[%s6975_s4 + $0x3760] sm:$0xff] %v4091_v27  ;;  %v17690_v14 = vld [vmem:[%s6889_s15 + $0x38d0] sm:$0xff]  ;;  %v17693_v15 = vld [vmem:[%s6889_s15 + $0x38d8] sm:$0xff]  ;;  %v4118_v21 = vadd.f32 %v6927_v17, %v17573_v35  ;;  %v4119_v27 = vadd.f32 %v6927_v17, %v17588_v41 }
 0x435   : > { %6140 = vst [vmem:[%s6975_s4 + $0x3768] sm:$0xff] %v4092_v28  ;;  %6141 = vst [vmem:[%s6975_s4 + $0x3770] sm:$0xff] %v4093_v29  ;;  %v17708_v22 = vld [vmem:[%s6889_s15 + $0x38e0] sm:$0xff]  ;;  %v17711_v23 = vld [vmem:[%s6889_s15 + $0x38e8] sm:$0xff]  ;;  %v4120_v28 = vadd.f32 %v6927_v17, %v17591_v42  ;;  %v4121_v29 = vadd.f32 %v6927_v17, %v17594_v43 }
 0x436   : > { %6142 = vst [vmem:[%s6975_s4 + $0x3778] sm:$0xff] %v4094_v30  ;;  %6143 = vst [vmem:[%s6975_s4 + $0x3780] sm:$0xff] %v4095_v36  ;;  %v17714_v24 = vld [vmem:[%s6889_s15 + $0x38f0] sm:$0xff]  ;;  %v17717_v26 = vld [vmem:[%s6889_s15 + $0x38f8] sm:$0xff]  ;;  %v4122_v30 = vadd.f32 %v6927_v17, %v17597_v44  ;;  %v4123_v36 = vadd.f32 %v6927_v17, %v17612_v49 }
 0x437   : > { %6144 = vst [vmem:[%s6975_s4 + $0x3788] sm:$0xff] %v4096_v37  ;;  %6145 = vst [vmem:[%s6975_s4 + $0x3790] sm:$0xff] %v4097_v38  ;;  %v17732_v31 = vld [vmem:[%s6889_s15 + $0x3900] sm:$0xff]  ;;  %v17735_v33 = vld [vmem:[%s6889_s15 + $0x3908] sm:$0xff]  ;;  %v4124_v37 = vadd.f32 %v6927_v17, %v17615_v50  ;;  %v4125_v38 = vadd.f32 %v6927_v17, %v17618_v51 }
 0x438   : > { %6146 = vst [vmem:[%s6975_s4 + $0x3798] sm:$0xff] %v4098_v39  ;;  %6147 = vst [vmem:[%s6975_s4 + $0x37a0] sm:$0xff] %v4099_v45  ;;  %v17738_v34 = vld [vmem:[%s6889_s15 + $0x3910] sm:$0xff]  ;;  %v17741_v35 = vld [vmem:[%s6889_s15 + $0x3918] sm:$0xff]  ;;  %v4126_v39 = vadd.f32 %v6927_v17, %v17621_v52  ;;  %v4127_v45 = vadd.f32 %v6927_v17, %v17636_v57 }
 0x439   : > { %6148 = vst [vmem:[%s6975_s4 + $0x37a8] sm:$0xff] %v4100_v46  ;;  %6149 = vst [vmem:[%s6975_s4 + $0x37b0] sm:$0xff] %v4101_v47  ;;  %v17756_v41 = vld [vmem:[%s6889_s15 + $0x3920] sm:$0xff]  ;;  %v17759_v42 = vld [vmem:[%s6889_s15 + $0x3928] sm:$0xff]  ;;  %v4128_v46 = vadd.f32 %v6927_v17, %v17639_v58  ;;  %v4129_v47 = vadd.f32 %v6927_v17, %v17642_v59 }
 0x43a   : > { %6150 = vst [vmem:[%s6975_s4 + $0x37b8] sm:$0xff] %v4102_v48  ;;  %6151 = vst [vmem:[%s6975_s4 + $0x37c0] sm:$0xff] %v4103_v53  ;;  %v17762_v43 = vld [vmem:[%s6889_s15 + $0x3930] sm:$0xff]  ;;  %v17765_v44 = vld [vmem:[%s6889_s15 + $0x3938] sm:$0xff]  ;;  %v4130_v48 = vadd.f32 %v6927_v17, %v17645_v60  ;;  %v4131_v53 = vadd.f32 %v6927_v17, %v17660_v1 }
 0x43b   : > { %6152 = vst [vmem:[%s6975_s4 + $0x37c8] sm:$0xff] %v4104_v54  ;;  %6153 = vst [vmem:[%s6975_s4 + $0x37d0] sm:$0xff] %v4105_v55  ;;  %v17780_v49 = vld [vmem:[%s6889_s15 + $0x3940] sm:$0xff]  ;;  %v17783_v50 = vld [vmem:[%s6889_s15 + $0x3948] sm:$0xff]  ;;  %v4132_v54 = vadd.f32 %v6927_v17, %v17663_v2  ;;  %v4133_v55 = vadd.f32 %v6927_v17, %v17666_v3 }
 0x43c   : > { %6154 = vst [vmem:[%s6975_s4 + $0x37d8] sm:$0xff] %v4106_v56  ;;  %6155 = vst [vmem:[%s6975_s4 + $0x37e0] sm:$0xff] %v4107_v61  ;;  %v17786_v51 = vld [vmem:[%s6889_s15 + $0x3950] sm:$0xff]  ;;  %v17789_v52 = vld [vmem:[%s6889_s15 + $0x3958] sm:$0xff]  ;;  %v4134_v56 = vadd.f32 %v6927_v17, %v17669_v4  ;;  %v4135_v61 = vadd.f32 %v6927_v17, %v17684_v11 }
 0x43d   : > { %6156 = vst [vmem:[%s6975_s4 + $0x37e8] sm:$0xff] %v4108_v62  ;;  %6157 = vst [vmem:[%s6975_s4 + $0x37f0] sm:$0xff] %v4109_v63  ;;  %v17804_v57 = vld [vmem:[%s6889_s15 + $0x3960] sm:$0xff]  ;;  %v17807_v58 = vld [vmem:[%s6889_s15 + $0x3968] sm:$0xff]  ;;  %v4136_v62 = vadd.f32 %v6927_v17, %v17687_v12  ;;  %v4137_v63 = vadd.f32 %v6927_v17, %v17690_v14 }
 0x43e   : > { %6158 = vst [vmem:[%s6975_s4 + $0x37f8] sm:$0xff] %v4110_v0  ;;  %6159 = vst [vmem:[%s6975_s4 + $0x3800] sm:$0xff] %v4111_v5  ;;  %v17810_v59 = vld [vmem:[%s6889_s15 + $0x3970] sm:$0xff]  ;;  %v17813_v60 = vld [vmem:[%s6889_s15 + $0x3978] sm:$0xff]  ;;  %v4138_v0 = vadd.f32 %v6927_v17, %v17693_v15  ;;  %v4139_v5 = vadd.f32 %v6927_v17, %v17708_v22 }
 0x43f   : > { %6160 = vst [vmem:[%s6975_s4 + $0x3808] sm:$0xff] %v4112_v7  ;;  %6161 = vst [vmem:[%s6975_s4 + $0x3810] sm:$0xff] %v4113_v8  ;;  %v17828_v1 = vld [vmem:[%s6889_s15 + $0x3980] sm:$0xff]  ;;  %v17831_v2 = vld [vmem:[%s6889_s15 + $0x3988] sm:$0xff]  ;;  %v4140_v7 = vadd.f32 %v6927_v17, %v17711_v23  ;;  %v4141_v8 = vadd.f32 %v6927_v17, %v17714_v24 }
 0x440   : > { %6162 = vst [vmem:[%s6975_s4 + $0x3818] sm:$0xff] %v4114_v10  ;;  %6163 = vst [vmem:[%s6975_s4 + $0x3820] sm:$0xff] %v4115_v16  ;;  %v17834_v3 = vld [vmem:[%s6889_s15 + $0x3990] sm:$0xff]  ;;  %v17837_v4 = vld [vmem:[%s6889_s15 + $0x3998] sm:$0xff]  ;;  %v4142_v10 = vadd.f32 %v6927_v17, %v17717_v26  ;;  %v4143_v17 = vadd.f32 %v7021_v6, %v17732_v31  ;;  %v4144_v16 = vadd.f32 %v7021_v6, %v17735_v33 }
 0x441   : > { %6164 = vst [vmem:[%s6975_s4 + $0x3828] sm:$0xff] %v4116_v18  ;;  %6165 = vst [vmem:[%s6975_s4 + $0x3830] sm:$0xff] %v4117_v20  ;;  %v17852_v11 = vld [vmem:[%s6889_s15 + $0x39a0] sm:$0xff]  ;;  %v17855_v12 = vld [vmem:[%s6889_s15 + $0x39a8] sm:$0xff]  ;;  %v4145_v18 = vadd.f32 %v7021_v6, %v17738_v34  ;;  %v4146_v20 = vadd.f32 %v7021_v6, %v17741_v35  ;;  %v4147_v26 = vadd.f32 %v7021_v6, %v17756_v41 }
 0x442   : > { %6166 = vst [vmem:[%s6975_s4 + $0x3838] sm:$0xff] %v4118_v21  ;;  %6167 = vst [vmem:[%s6975_s4 + $0x3840] sm:$0xff] %v4119_v27  ;;  %v17858_v14 = vld [vmem:[%s6889_s15 + $0x39b0] sm:$0xff]  ;;  %v17861_v15 = vld [vmem:[%s6889_s15 + $0x39b8] sm:$0xff]  ;;  %v4148_v27 = vadd.f32 %v7021_v6, %v17759_v42  ;;  %v4151_v35 = vadd.f32 %v7021_v6, %v17780_v49 }
 0x443   : > { %6168 = vst [vmem:[%s6975_s4 + $0x3848] sm:$0xff] %v4120_v28  ;;  %6169 = vst [vmem:[%s6975_s4 + $0x3850] sm:$0xff] %v4121_v29  ;;  %v17876_v21 = vld [vmem:[%s6889_s15 + $0x39c0] sm:$0xff]  ;;  %v17879_v22 = vld [vmem:[%s6889_s15 + $0x39c8] sm:$0xff]  ;;  %v4149_v28 = vadd.f32 %v7021_v6, %v17762_v43  ;;  %v4150_v29 = vadd.f32 %v7021_v6, %v17765_v44  ;;  %v4155_v44 = vadd.f32 %v7021_v6, %v17804_v57 }
 0x444   : > { %6170 = vst [vmem:[%s6975_s4 + $0x3858] sm:$0xff] %v4122_v30  ;;  %6171 = vst [vmem:[%s6975_s4 + $0x3860] sm:$0xff] %v4123_v36  ;;  %v17882_v23 = vld [vmem:[%s6889_s15 + $0x39d0] sm:$0xff]  ;;  %v17885_v24 = vld [vmem:[%s6889_s15 + $0x39d8] sm:$0xff]  ;;  %v4152_v36 = vadd.f32 %v7021_v6, %v17783_v50 }
 0x445   : > { %6172 = vst [vmem:[%s6975_s4 + $0x3868] sm:$0xff] %v4124_v37  ;;  %6173 = vst [vmem:[%s6975_s4 + $0x3870] sm:$0xff] %v4125_v38  ;;  %v17900_v30 = vld [vmem:[%s6889_s15 + $0x39e0] sm:$0xff]  ;;  %v17903_v31 = vld [vmem:[%s6889_s15 + $0x39e8] sm:$0xff]  ;;  %v4153_v37 = vadd.f32 %v7021_v6, %v17786_v51  ;;  %v4154_v38 = vadd.f32 %v7021_v6, %v17789_v52  ;;  %v4159_v52 = vadd.f32 %v7021_v6, %v17828_v1 }
 0x446   : > { %6174 = vst [vmem:[%s6975_s4 + $0x3878] sm:$0xff] %v4126_v39  ;;  %6175 = vst [vmem:[%s6975_s4 + $0x3880] sm:$0xff] %v4127_v45  ;;  %v17906_v33 = vld [vmem:[%s6889_s15 + $0x39f0] sm:$0xff]  ;;  %v17909_v34 = vld [vmem:[%s6889_s15 + $0x39f8] sm:$0xff]  ;;  %v4156_v45 = vadd.f32 %v7021_v6, %v17807_v58 }
 0x447   : > { %6176 = vst [vmem:[%s6975_s4 + $0x3888] sm:$0xff] %v4128_v46  ;;  %6177 = vst [vmem:[%s6975_s4 + $0x3890] sm:$0xff] %v4129_v47  ;;  %v17924_v39 = vld [vmem:[%s6889_s15 + $0x3a00] sm:$0xff]  ;;  %v17927_v41 = vld [vmem:[%s6889_s15 + $0x3a08] sm:$0xff]  ;;  %v4157_v46 = vadd.f32 %v7021_v6, %v17810_v59  ;;  %v4158_v47 = vadd.f32 %v7021_v6, %v17813_v60  ;;  %v4163_v60 = vadd.f32 %v7021_v6, %v17852_v11 }
 0x448   : > { %6178 = vst [vmem:[%s6975_s4 + $0x3898] sm:$0xff] %v4130_v48  ;;  %6179 = vst [vmem:[%s6975_s4 + $0x38a0] sm:$0xff] %v4131_v53  ;;  %v17930_v42 = vld [vmem:[%s6889_s15 + $0x3a10] sm:$0xff]  ;;  %v17933_v43 = vld [vmem:[%s6889_s15 + $0x3a18] sm:$0xff]  ;;  %v4160_v53 = vadd.f32 %v7021_v6, %v17831_v2 }
 0x449   : > { %6180 = vst [vmem:[%s6975_s4 + $0x38a8] sm:$0xff] %v4132_v54  ;;  %6181 = vst [vmem:[%s6975_s4 + $0x38b0] sm:$0xff] %v4133_v55  ;;  %v17948_v48 = vld [vmem:[%s6889_s15 + $0x3a20] sm:$0xff]  ;;  %v17951_v49 = vld [vmem:[%s6889_s15 + $0x3a28] sm:$0xff]  ;;  %v4161_v54 = vadd.f32 %v7021_v6, %v17834_v3  ;;  %v4162_v55 = vadd.f32 %v7021_v6, %v17837_v4  ;;  %v4167_v4 = vadd.f32 %v7021_v6, %v17876_v21 }
 0x44a   : > { %6182 = vst [vmem:[%s6975_s4 + $0x38b8] sm:$0xff] %v4134_v56  ;;  %6183 = vst [vmem:[%s6975_s4 + $0x38c0] sm:$0xff] %v4135_v61  ;;  %v17954_v50 = vld [vmem:[%s6889_s15 + $0x3a30] sm:$0xff]  ;;  %v17957_v51 = vld [vmem:[%s6889_s15 + $0x3a38] sm:$0xff]  ;;  %v4164_v61 = vadd.f32 %v7021_v6, %v17855_v12 }
 0x44b   : > { %6184 = vst [vmem:[%s6975_s4 + $0x38c8] sm:$0xff] %v4136_v62  ;;  %6185 = vst [vmem:[%s6975_s4 + $0x38d0] sm:$0xff] %v4137_v63  ;;  %v17972_v56 = vld [vmem:[%s6889_s15 + $0x3a40] sm:$0xff]  ;;  %v17975_v57 = vld [vmem:[%s6889_s15 + $0x3a48] sm:$0xff]  ;;  %v4165_v62 = vadd.f32 %v7021_v6, %v17858_v14  ;;  %v4166_v63 = vadd.f32 %v7021_v6, %v17861_v15  ;;  %v4171_v15 = vadd.f32 %v7021_v6, %v17900_v30 }
 0x44c   : > { %6186 = vst [vmem:[%s6975_s4 + $0x38d8] sm:$0xff] %v4138_v0  ;;  %6187 = vst [vmem:[%s6975_s4 + $0x38e0] sm:$0xff] %v4139_v5  ;;  %v17978_v58 = vld [vmem:[%s6889_s15 + $0x3a50] sm:$0xff]  ;;  %v17981_v59 = vld [vmem:[%s6889_s15 + $0x3a58] sm:$0xff]  ;;  %v4168_v5 = vadd.f32 %v7021_v6, %v17879_v22 }
 0x44d   : > { %6188 = vst [vmem:[%s6975_s4 + $0x38e8] sm:$0xff] %v4140_v7  ;;  %6189 = vst [vmem:[%s6975_s4 + $0x38f0] sm:$0xff] %v4141_v8  ;;  %v17996_v0 = vld [vmem:[%s6889_s15 + $0x3a60] sm:$0xff]  ;;  %v17999_v1 = vld [vmem:[%s6889_s15 + $0x3a68] sm:$0xff]  ;;  %v4169_v7 = vadd.f32 %v7021_v6, %v17882_v23  ;;  %v4170_v8 = vadd.f32 %v7021_v6, %v17885_v24  ;;  %v4176_v24 = vadd.f32 %v7207_v9, %v17927_v41 }
 0x44e   : > { %6190 = vst [vmem:[%s6975_s4 + $0x38f8] sm:$0xff] %v4142_v10  ;;  %6191 = vst [vmem:[%s6975_s4 + $0x3900] sm:$0xff] %v4143_v17  ;;  %v18002_v2 = vld [vmem:[%s6889_s15 + $0x3a70] sm:$0xff]  ;;  %v18005_v3 = vld [vmem:[%s6889_s15 + $0x3a78] sm:$0xff]  ;;  %v4172_v17 = vadd.f32 %v7021_v6, %v17903_v31 }
 0x44f   : > { %6192 = vst [vmem:[%s6975_s4 + $0x3908] sm:$0xff] %v4144_v16  ;;  %6193 = vst [vmem:[%s6975_s4 + $0x3910] sm:$0xff] %v4145_v18  ;;  %v18020_v10 = vld [vmem:[%s6889_s15 + $0x3a80] sm:$0xff]  ;;  %v18023_v11 = vld [vmem:[%s6889_s15 + $0x3a88] sm:$0xff]  ;;  %v4173_v16 = vadd.f32 %v7021_v6, %v17906_v33  ;;  %v4174_v18 = vadd.f32 %v7021_v6, %v17909_v34  ;;  %v4175_v6 = vadd.f32 %v7207_v9, %v17924_v39 }
 0x450   : > { %6194 = vst [vmem:[%s6975_s4 + $0x3918] sm:$0xff] %v4146_v20  ;;  %6195 = vst [vmem:[%s6975_s4 + $0x3920] sm:$0xff] %v4147_v26  ;;  %v18026_v12 = vld [vmem:[%s6889_s15 + $0x3a90] sm:$0xff]  ;;  %v18029_v14 = vld [vmem:[%s6889_s15 + $0x3a98] sm:$0xff]  ;;  %v4177_v26 = vadd.f32 %v7207_v9, %v17930_v42  ;;  %v4179_v33 = vadd.f32 %v7207_v9, %v17948_v48  ;;  %v4180_v34 = vadd.f32 %v7207_v9, %v17951_v49 }
 0x451   : > { %6196 = vst [vmem:[%s6975_s4 + $0x3928] sm:$0xff] %v4148_v27  ;;  %6197 = vst [vmem:[%s6975_s4 + $0x3930] sm:$0xff] %v4149_v28  ;;  %v18044_v20 = vld [vmem:[%s6889_s15 + $0x3aa0] sm:$0xff]  ;;  %v18047_v21 = vld [vmem:[%s6889_s15 + $0x3aa8] sm:$0xff]  ;;  %v4178_v27 = vadd.f32 %v7207_v9, %v17933_v43  ;;  %v4183_v42 = vadd.f32 %v7207_v9, %v17972_v56  ;;  %v4184_v43 = vadd.f32 %v7207_v9, %v17975_v57 }
 0x452   : > { %6198 = vst [vmem:[%s6975_s4 + $0x3938] sm:$0xff] %v4150_v29  ;;  %6199 = vst [vmem:[%s6975_s4 + $0x3940] sm:$0xff] %v4151_v35  ;;  %v18050_v22 = vld [vmem:[%s6889_s15 + $0x3ab0] sm:$0xff]  ;;  %v18053_v23 = vld [vmem:[%s6889_s15 + $0x3ab8] sm:$0xff]  ;;  %v4181_v35 = vadd.f32 %v7207_v9, %v17954_v50  ;;  %v4187_v50 = vadd.f32 %v7207_v9, %v17996_v0 }
 0x453   : > { %6200 = vst [vmem:[%s6975_s4 + $0x3948] sm:$0xff] %v4152_v36  ;;  %6201 = vst [vmem:[%s6975_s4 + $0x3950] sm:$0xff] %v4153_v37  ;;  %v18068_v28 = vld [vmem:[%s6889_s15 + $0x3ac0] sm:$0xff]  ;;  %v18071_v29 = vld [vmem:[%s6889_s15 + $0x3ac8] sm:$0xff]  ;;  %v4182_v36 = vadd.f32 %v7207_v9, %v17957_v51  ;;  %v4188_v51 = vadd.f32 %v7207_v9, %v17999_v1 }
 0x454   : > { %6202 = vst [vmem:[%s6975_s4 + $0x3958] sm:$0xff] %v4154_v38  ;;  %6203 = vst [vmem:[%s6975_s4 + $0x3960] sm:$0xff] %v4155_v44  ;;  %v18074_v30 = vld [vmem:[%s6889_s15 + $0x3ad0] sm:$0xff]  ;;  %v18077_v31 = vld [vmem:[%s6889_s15 + $0x3ad8] sm:$0xff]  ;;  %v4185_v44 = vadd.f32 %v7207_v9, %v17978_v58  ;;  %v4191_v58 = vadd.f32 %v7207_v9, %v18020_v10 }
 0x455   : > { %6204 = vst [vmem:[%s6975_s4 + $0x3968] sm:$0xff] %v4156_v45  ;;  %6205 = vst [vmem:[%s6975_s4 + $0x3970] sm:$0xff] %v4157_v46  ;;  %v18092_v37 = vld [vmem:[%s6889_s15 + $0x3ae0] sm:$0xff]  ;;  %v18095_v38 = vld [vmem:[%s6889_s15 + $0x3ae8] sm:$0xff]  ;;  %v4186_v45 = vadd.f32 %v7207_v9, %v17981_v59  ;;  %v4192_v59 = vadd.f32 %v7207_v9, %v18023_v11 }
 0x456   : > { %6206 = vst [vmem:[%s6975_s4 + $0x3978] sm:$0xff] %v4158_v47  ;;  %6207 = vst [vmem:[%s6975_s4 + $0x3980] sm:$0xff] %v4159_v52  ;;  %v18098_v39 = vld [vmem:[%s6889_s15 + $0x3af0] sm:$0xff]  ;;  %v18101_v41 = vld [vmem:[%s6889_s15 + $0x3af8] sm:$0xff]  ;;  %v4189_v52 = vadd.f32 %v7207_v9, %v18002_v2  ;;  %v4195_v2 = vadd.f32 %v7207_v9, %v18044_v20 }
 0x457   : > { %6208 = vst [vmem:[%s6975_s4 + $0x3988] sm:$0xff] %v4160_v53  ;;  %6209 = vst [vmem:[%s6975_s4 + $0x3990] sm:$0xff] %v4161_v54  ;;  %v18116_v46 = vld [vmem:[%s6889_s15 + $0x3b00] sm:$0xff]  ;;  %v18119_v47 = vld [vmem:[%s6889_s15 + $0x3b08] sm:$0xff]  ;;  %v4190_v53 = vadd.f32 %v7207_v9, %v18005_v3  ;;  %v4196_v3 = vadd.f32 %v7207_v9, %v18047_v21 }
 0x458   : > { %6210 = vst [vmem:[%s6975_s4 + $0x3998] sm:$0xff] %v4162_v55  ;;  %6211 = vst [vmem:[%s6975_s4 + $0x39a0] sm:$0xff] %v4163_v60  ;;  %v18122_v48 = vld [vmem:[%s6889_s15 + $0x3b10] sm:$0xff]  ;;  %v18125_v49 = vld [vmem:[%s6889_s15 + $0x3b18] sm:$0xff]  ;;  %v4193_v60 = vadd.f32 %v7207_v9, %v18026_v12  ;;  %v4199_v12 = vadd.f32 %v7207_v9, %v18068_v28 }
 0x459   : > { %6212 = vst [vmem:[%s6975_s4 + $0x39a8] sm:$0xff] %v4164_v61  ;;  %6213 = vst [vmem:[%s6975_s4 + $0x39b0] sm:$0xff] %v4165_v62  ;;  %v18140_v54 = vld [vmem:[%s6889_s15 + $0x3b20] sm:$0xff]  ;;  %v18143_v55 = vld [vmem:[%s6889_s15 + $0x3b28] sm:$0xff]  ;;  %v4194_v61 = vadd.f32 %v7207_v9, %v18029_v14  ;;  %v4200_v14 = vadd.f32 %v7207_v9, %v18071_v29 }
 0x45a   : > { %6214 = vst [vmem:[%s6975_s4 + $0x39b8] sm:$0xff] %v4166_v63  ;;  %6215 = vst [vmem:[%s6975_s4 + $0x39c0] sm:$0xff] %v4167_v4  ;;  %v18146_v56 = vld [vmem:[%s6889_s15 + $0x3b30] sm:$0xff]  ;;  %v18149_v57 = vld [vmem:[%s6889_s15 + $0x3b38] sm:$0xff]  ;;  %v4197_v4 = vadd.f32 %v7207_v9, %v18050_v22  ;;  %v4203_v22 = vadd.f32 %v7207_v9, %v18092_v37 }
 0x45b   : > { %6216 = vst [vmem:[%s6975_s4 + $0x39c8] sm:$0xff] %v4168_v5  ;;  %6217 = vst [vmem:[%s6975_s4 + $0x39d0] sm:$0xff] %v4169_v7  ;;  %v18164_v62 = vld [vmem:[%s6889_s15 + $0x3b40] sm:$0xff]  ;;  %v18167_v63 = vld [vmem:[%s6889_s15 + $0x3b48] sm:$0xff]  ;;  %v4198_v5 = vadd.f32 %v7207_v9, %v18053_v23  ;;  %v4204_v23 = vadd.f32 %v7207_v9, %v18095_v38  ;;  %v4211_v38 = vadd.f32 %v7401_v13, %v18140_v54 }
 0x45c   : > { %6218 = vst [vmem:[%s6975_s4 + $0x39d8] sm:$0xff] %v4170_v8  ;;  %6219 = vst [vmem:[%s6975_s4 + $0x39e0] sm:$0xff] %v4171_v15  ;;  %v18170_v0 = vld [vmem:[%s6889_s15 + $0x3b50] sm:$0xff]  ;;  %v18173_v1 = vld [vmem:[%s6889_s15 + $0x3b58] sm:$0xff]  ;;  %v4201_v15 = vadd.f32 %v7207_v9, %v18074_v30  ;;  %v4208_v30 = vadd.f32 %v7401_v13, %v18119_v47  ;;  %v4215_v47 = vadd.f32 %v7401_v13, %v18164_v62 }
 0x45d   : > { %6220 = vst [vmem:[%s6975_s4 + $0x39e8] sm:$0xff] %v4172_v17  ;;  %6221 = vst [vmem:[%s6975_s4 + $0x39f0] sm:$0xff] %v4173_v16  ;;  %v18188_v7 = vld [vmem:[%s6889_s15 + $0x3b60] sm:$0xff]  ;;  %v18191_v8 = vld [vmem:[%s6889_s15 + $0x3b68] sm:$0xff]  ;;  %v4202_v17 = vadd.f32 %v7207_v9, %v18077_v31  ;;  %v4209_v31 = vadd.f32 %v7401_v13, %v18122_v48  ;;  %v4216_v48 = vadd.f32 %v7401_v13, %v18167_v63 }
 0x45e   : > { %6222 = vst [vmem:[%s6975_s4 + $0x39f8] sm:$0xff] %v4174_v18  ;;  %6223 = vst [vmem:[%s6975_s4 + $0x3a00] sm:$0xff] %v4175_v6  ;;  %v18194_v10 = vld [vmem:[%s6889_s15 + $0x3b70] sm:$0xff]  ;;  %v18197_v11 = vld [vmem:[%s6889_s15 + $0x3b78] sm:$0xff]  ;;  %v4205_v6 = vadd.f32 %v7207_v9, %v18098_v39  ;;  %v4212_v39 = vadd.f32 %v7401_v13, %v18143_v55  ;;  %v4219_v55 = vadd.f32 %v7401_v13, %v18188_v7 }
 0x45f   : > { %6224 = vst [vmem:[%s6975_s4 + $0x3a08] sm:$0xff] %v4176_v24  ;;  %6225 = vst [vmem:[%s6975_s4 + $0x3a10] sm:$0xff] %v4177_v26  ;;  %v18212_v16 = vld [vmem:[%s6889_s15 + $0x3b80] sm:$0xff]  ;;  %v18215_v18 = vld [vmem:[%s6889_s15 + $0x3b88] sm:$0xff]  ;;  %v4206_v24 = vadd.f32 %v7207_v9, %v18101_v41  ;;  %v4207_v9 = vadd.f32 %v7401_v13, %v18116_v46  ;;  %v4213_v41 = vadd.f32 %v7401_v13, %v18146_v56 }
 0x460   : > { %6226 = vst [vmem:[%s6975_s4 + $0x3a18] sm:$0xff] %v4178_v27  ;;  %6227 = vst [vmem:[%s6975_s4 + $0x3a20] sm:$0xff] %v4179_v33  ;;  %v18218_v20 = vld [vmem:[%s6889_s15 + $0x3b90] sm:$0xff]  ;;  %v18221_v21 = vld [vmem:[%s6889_s15 + $0x3b98] sm:$0xff]  ;;  %v4210_v33 = vadd.f32 %v7401_v13, %v18125_v49  ;;  %v4217_v49 = vadd.f32 %v7401_v13, %v18170_v0  ;;  %v4220_v56 = vadd.f32 %v7401_v13, %v18191_v8 }
 0x461   : > { %6228 = vst [vmem:[%s6975_s4 + $0x3a28] sm:$0xff] %v4180_v34  ;;  %6229 = vst [vmem:[%s6975_s4 + $0x3a30] sm:$0xff] %v4181_v35  ;;  %v18236_v26 = vld [vmem:[%s6889_s15 + $0x3ba0] sm:$0xff]  ;;  %v18239_v27 = vld [vmem:[%s6889_s15 + $0x3ba8] sm:$0xff]  ;;  %v4223_v63 = vadd.f32 %v7401_v13, %v18212_v16  ;;  %v4224_v0 = vadd.f32 %v7401_v13, %v18215_v18 }
 0x462   : > { %6230 = vst [vmem:[%s6975_s4 + $0x3a38] sm:$0xff] %v4182_v36  ;;  %6231 = vst [vmem:[%s6975_s4 + $0x3a40] sm:$0xff] %v4183_v42  ;;  %v18242_v28 = vld [vmem:[%s6889_s15 + $0x3bb0] sm:$0xff]  ;;  %v18245_v29 = vld [vmem:[%s6889_s15 + $0x3bb8] sm:$0xff]  ;;  %v4214_v42 = vadd.f32 %v7401_v13, %v18149_v57  ;;  %v4221_v57 = vadd.f32 %v7401_v13, %v18194_v10  ;;  %v4227_v8 = vadd.f32 %v7401_v13, %v18236_v26 }
 0x463   : > { %6232 = vst [vmem:[%s6975_s4 + $0x3a48] sm:$0xff] %v4184_v43  ;;  %6233 = vst [vmem:[%s6975_s4 + $0x3a50] sm:$0xff] %v4185_v44  ;;  %v18260_v34 = vld [vmem:[%s6889_s15 + $0x3bc0] sm:$0xff]  ;;  %v18263_v35 = vld [vmem:[%s6889_s15 + $0x3bc8] sm:$0xff]  ;;  %v4228_v10 = vadd.f32 %v7401_v13, %v18239_v27 }
 0x464   : > { %6234 = vst [vmem:[%s6975_s4 + $0x3a58] sm:$0xff] %v4186_v45  ;;  %6235 = vst [vmem:[%s6975_s4 + $0x3a60] sm:$0xff] %v4187_v50  ;;  %v18266_v36 = vld [vmem:[%s6889_s15 + $0x3bd0] sm:$0xff]  ;;  %v18269_v37 = vld [vmem:[%s6889_s15 + $0x3bd8] sm:$0xff]  ;;  %v4218_v50 = vadd.f32 %v7401_v13, %v18173_v1  ;;  %v4225_v1 = vadd.f32 %v7401_v13, %v18218_v20  ;;  %v4231_v18 = vadd.f32 %v7401_v13, %v18260_v34 }
 0x465   : > { %6236 = vst [vmem:[%s6975_s4 + $0x3a68] sm:$0xff] %v4188_v51  ;;  %6237 = vst [vmem:[%s6975_s4 + $0x3a70] sm:$0xff] %v4189_v52  ;;  %v18284_v43 = vld [vmem:[%s6889_s15 + $0x3be0] sm:$0xff]  ;;  %v18287_v44 = vld [vmem:[%s6889_s15 + $0x3be8] sm:$0xff]  ;;  %v4232_v20 = vadd.f32 %v7401_v13, %v18263_v35 }
 0x466   : > { %6238 = vst [vmem:[%s6975_s4 + $0x3a78] sm:$0xff] %v4190_v53  ;;  %6239 = vst [vmem:[%s6975_s4 + $0x3a80] sm:$0xff] %v4191_v58  ;;  %v18290_v45 = vld [vmem:[%s6889_s15 + $0x3bf0] sm:$0xff]  ;;  %v18293_v46 = vld [vmem:[%s6889_s15 + $0x3bf8] sm:$0xff]  ;;  %v4222_v58 = vadd.f32 %v7401_v13, %v18197_v11  ;;  %v4229_v11 = vadd.f32 %v7401_v13, %v18242_v28  ;;  %v4235_v27 = vadd.f32 %v7401_v13, %v18284_v43 }
 0x467   : > { %6240 = vst [vmem:[%s6975_s4 + $0x3a88] sm:$0xff] %v4192_v59  ;;  %6241 = vst [vmem:[%s6975_s4 + $0x3a90] sm:$0xff] %v4193_v60  ;;  %v18308_v51 = vld [vmem:[%s6889_s15 + $0x3c00] sm:$0xff]  ;;  %v18311_v52 = vld [vmem:[%s6889_s15 + $0x3c08] sm:$0xff]  ;;  %v4236_v28 = vadd.f32 %v7401_v13, %v18287_v44 }
 0x468   : > { %6242 = vst [vmem:[%s6975_s4 + $0x3a98] sm:$0xff] %v4194_v61  ;;  %6243 = vst [vmem:[%s6975_s4 + $0x3aa0] sm:$0xff] %v4195_v2  ;;  %v18314_v53 = vld [vmem:[%s6889_s15 + $0x3c10] sm:$0xff]  ;;  %v18317_v54 = vld [vmem:[%s6889_s15 + $0x3c18] sm:$0xff]  ;;  %v4226_v2 = vadd.f32 %v7401_v13, %v18221_v21  ;;  %v4233_v21 = vadd.f32 %v7401_v13, %v18266_v36  ;;  %v4240_v35 = vadd.f32 %v7595_v19, %v18311_v52 }
 0x469   : > { %6244 = vst [vmem:[%s6975_s4 + $0x3aa8] sm:$0xff] %v4196_v3  ;;  %6245 = vst [vmem:[%s6975_s4 + $0x3ab0] sm:$0xff] %v4197_v4  ;;  %v18332_v59 = vld [vmem:[%s6889_s15 + $0x3c20] sm:$0xff]  ;;  %v18335_v60 = vld [vmem:[%s6889_s15 + $0x3c28] sm:$0xff]  ;;  %v4241_v36 = vadd.f32 %v7595_v19, %v18314_v53 }
 0x46a   : > { %6246 = vst [vmem:[%s6975_s4 + $0x3ab8] sm:$0xff] %v4198_v5  ;;  %6247 = vst [vmem:[%s6975_s4 + $0x3ac0] sm:$0xff] %v4199_v12  ;;  %v18338_v61 = vld [vmem:[%s6889_s15 + $0x3c30] sm:$0xff]  ;;  %v18341_v62 = vld [vmem:[%s6889_s15 + $0x3c38] sm:$0xff]  ;;  %v4230_v12 = vadd.f32 %v7401_v13, %v18245_v29  ;;  %v4237_v29 = vadd.f32 %v7401_v13, %v18290_v45  ;;  %v4243_v43 = vadd.f32 %v7595_v19, %v18332_v59 }
 0x46b   : > { %6248 = vst [vmem:[%s6975_s4 + $0x3ac8] sm:$0xff] %v4200_v14  ;;  %6249 = vst [vmem:[%s6975_s4 + $0x3ad0] sm:$0xff] %v4201_v15  ;;  %v18356_v3 = vld [vmem:[%s6889_s15 + $0x3c40] sm:$0xff]  ;;  %v18359_v4 = vld [vmem:[%s6889_s15 + $0x3c48] sm:$0xff]  ;;  %v4244_v44 = vadd.f32 %v7595_v19, %v18335_v60  ;;  %v4245_v45 = vadd.f32 %v7595_v19, %v18338_v61 }
 0x46c   : > { %6250 = vst [vmem:[%s6975_s4 + $0x3ad8] sm:$0xff] %v4202_v17  ;;  %6251 = vst [vmem:[%s6975_s4 + $0x3ae0] sm:$0xff] %v4203_v22  ;;  %v18362_v5 = vld [vmem:[%s6889_s15 + $0x3c50] sm:$0xff]  ;;  %v18365_v7 = vld [vmem:[%s6889_s15 + $0x3c58] sm:$0xff]  ;;  %v4234_v22 = vadd.f32 %v7401_v13, %v18269_v37  ;;  %v4242_v37 = vadd.f32 %v7595_v19, %v18317_v54  ;;  %v4248_v52 = vadd.f32 %v7595_v19, %v18359_v4 }
 0x46d   : > { %6252 = vst [vmem:[%s6975_s4 + $0x3ae8] sm:$0xff] %v4204_v23  ;;  %6253 = vst [vmem:[%s6975_s4 + $0x3af0] sm:$0xff] %v4205_v6  ;;  %v18380_v14 = vld [vmem:[%s6889_s15 + $0x3c60] sm:$0xff]  ;;  %v18383_v15 = vld [vmem:[%s6889_s15 + $0x3c68] sm:$0xff]  ;;  %v4249_v53 = vadd.f32 %v7595_v19, %v18362_v5  ;;  %v4250_v54 = vadd.f32 %v7595_v19, %v18365_v7 }
 0x46e   : > { %6254 = vst [vmem:[%s6975_s4 + $0x3af8] sm:$0xff] %v4206_v24  ;;  %6255 = vst [vmem:[%s6975_s4 + $0x3b00] sm:$0xff] %v4207_v9  ;;  %v18386_v17 = vld [vmem:[%s6889_s15 + $0x3c70] sm:$0xff]  ;;  %v18389_v16 = vld [vmem:[%s6889_s15 + $0x3c78] sm:$0xff]  ;;  %v4238_v9 = vadd.f32 %v7401_v13, %v18293_v46  ;;  %v4239_v13 = vadd.f32 %v7595_v19, %v18308_v51  ;;  %v4246_v46 = vadd.f32 %v7595_v19, %v18341_v62 }
 0x46f   : > { %6256 = vst [vmem:[%s6975_s4 + $0x3b08] sm:$0xff] %v4208_v30  ;;  %6257 = vst [vmem:[%s6975_s4 + $0x3b10] sm:$0xff] %v4209_v31  ;;  %v18404_v23 = vld [vmem:[%s6889_s15 + $0x3c80] sm:$0xff]  ;;  %v18407_v6 = vld [vmem:[%s6889_s15 + $0x3c88] sm:$0xff]  ;;  %v4247_v51 = vadd.f32 %v7595_v19, %v18356_v3  ;;  %v4251_v59 = vadd.f32 %v7595_v19, %v18380_v14  ;;  %v4252_v60 = vadd.f32 %v7595_v19, %v18383_v15 }
 0x470   : > { %6258 = vst [vmem:[%s6975_s4 + $0x3b18] sm:$0xff] %v4210_v33  ;;  %6259 = vst [vmem:[%s6975_s4 + $0x3b20] sm:$0xff] %v4211_v38  ;;  %v18410_v24 = vld [vmem:[%s6889_s15 + $0x3c90] sm:$0xff]  ;;  %v18413_v26 = vld [vmem:[%s6889_s15 + $0x3c98] sm:$0xff]  ;;  %v4253_v61 = vadd.f32 %v7595_v19, %v18386_v17  ;;  %v4254_v62 = vadd.f32 %v7595_v19, %v18389_v16  ;;  %v4255_v3 = vadd.f32 %v7595_v19, %v18404_v23 }
 0x471   : > { %6260 = vst [vmem:[%s6975_s4 + $0x3b28] sm:$0xff] %v4212_v39  ;;  %6261 = vst [vmem:[%s6975_s4 + $0x3b30] sm:$0xff] %v4213_v41  ;;  %v18428_v30 = vld [vmem:[%s6889_s15 + $0x3ca0] sm:$0xff]  ;;  %v18431_v31 = vld [vmem:[%s6889_s15 + $0x3ca8] sm:$0xff]  ;;  %v4256_v4 = vadd.f32 %v7595_v19, %v18407_v6  ;;  %v4257_v5 = vadd.f32 %v7595_v19, %v18410_v24  ;;  %v4258_v7 = vadd.f32 %v7595_v19, %v18413_v26 }
 0x472   : > { %6262 = vst [vmem:[%s6975_s4 + $0x3b38] sm:$0xff] %v4214_v42  ;;  %6263 = vst [vmem:[%s6975_s4 + $0x3b40] sm:$0xff] %v4215_v47  ;;  %v18434_v33 = vld [vmem:[%s6889_s15 + $0x3cb0] sm:$0xff]  ;;  %v18437_v34 = vld [vmem:[%s6889_s15 + $0x3cb8] sm:$0xff]  ;;  %v4259_v14 = vadd.f32 %v7595_v19, %v18428_v30  ;;  %v4260_v15 = vadd.f32 %v7595_v19, %v18431_v31 }
 0x473   : > { %6264 = vst [vmem:[%s6975_s4 + $0x3b48] sm:$0xff] %v4216_v48  ;;  %6265 = vst [vmem:[%s6975_s4 + $0x3b50] sm:$0xff] %v4217_v49  ;;  %v18452_v38 = vld [vmem:[%s6889_s15 + $0x3cc0] sm:$0xff]  ;;  %v18455_v39 = vld [vmem:[%s6889_s15 + $0x3cc8] sm:$0xff]  ;;  %v4261_v17 = vadd.f32 %v7595_v19, %v18434_v33  ;;  %v4262_v16 = vadd.f32 %v7595_v19, %v18437_v34 }
 0x474   : > { %6266 = vst [vmem:[%s6975_s4 + $0x3b58] sm:$0xff] %v4218_v50  ;;  %6267 = vst [vmem:[%s6975_s4 + $0x3b60] sm:$0xff] %v4219_v55  ;;  %v18458_v41 = vld [vmem:[%s6889_s15 + $0x3cd0] sm:$0xff]  ;;  %v18461_v42 = vld [vmem:[%s6889_s15 + $0x3cd8] sm:$0xff]  ;;  %v4263_v23 = vadd.f32 %v7595_v19, %v18452_v38  ;;  %v4264_v6 = vadd.f32 %v7595_v19, %v18455_v39 }
 0x475   : > { %6268 = vst [vmem:[%s6975_s4 + $0x3b68] sm:$0xff] %v4220_v56  ;;  %6269 = vst [vmem:[%s6975_s4 + $0x3b70] sm:$0xff] %v4221_v57  ;;  %v18476_v47 = vld [vmem:[%s6889_s15 + $0x3ce0] sm:$0xff]  ;;  %v18479_v48 = vld [vmem:[%s6889_s15 + $0x3ce8] sm:$0xff]  ;;  %v4265_v24 = vadd.f32 %v7595_v19, %v18458_v41  ;;  %v4266_v26 = vadd.f32 %v7595_v19, %v18461_v42 }
 0x476   : > { %6270 = vst [vmem:[%s6975_s4 + $0x3b78] sm:$0xff] %v4222_v58  ;;  %6271 = vst [vmem:[%s6975_s4 + $0x3b80] sm:$0xff] %v4223_v63  ;;  %v18482_v49 = vld [vmem:[%s6889_s15 + $0x3cf0] sm:$0xff]  ;;  %v18485_v50 = vld [vmem:[%s6889_s15 + $0x3cf8] sm:$0xff]  ;;  %v4267_v30 = vadd.f32 %v7595_v19, %v18476_v47  ;;  %v4268_v31 = vadd.f32 %v7595_v19, %v18479_v48 }
 0x477   : > { %6272 = vst [vmem:[%s6975_s4 + $0x3b88] sm:$0xff] %v4224_v0  ;;  %6273 = vst [vmem:[%s6975_s4 + $0x3b90] sm:$0xff] %v4225_v1  ;;  %v18500_v55 = vld [vmem:[%s6889_s15 + $0x3d00] sm:$0xff]  ;;  %v18503_v56 = vld [vmem:[%s6889_s15 + $0x3d08] sm:$0xff]  ;;  %v4269_v33 = vadd.f32 %v7595_v19, %v18482_v49  ;;  %v4270_v34 = vadd.f32 %v7595_v19, %v18485_v50 }
 0x478   : > { %6274 = vst [vmem:[%s6975_s4 + $0x3b98] sm:$0xff] %v4226_v2  ;;  %6275 = vst [vmem:[%s6975_s4 + $0x3ba0] sm:$0xff] %v4227_v8  ;;  %v18506_v57 = vld [vmem:[%s6889_s15 + $0x3d10] sm:$0xff]  ;;  %v18509_v58 = vld [vmem:[%s6889_s15 + $0x3d18] sm:$0xff]  ;;  %v4271_v19 = vadd.f32 %v7789_v25, %v18500_v55  ;;  %v4272_v38 = vadd.f32 %v7789_v25, %v18503_v56 }
 0x479   : > { %6276 = vst [vmem:[%s6975_s4 + $0x3ba8] sm:$0xff] %v4228_v10  ;;  %6277 = vst [vmem:[%s6975_s4 + $0x3bb0] sm:$0xff] %v4229_v11  ;;  %v18524_v63 = vld [vmem:[%s6889_s15 + $0x3d20] sm:$0xff]  ;;  %v18527_v0 = vld [vmem:[%s6889_s15 + $0x3d28] sm:$0xff]  ;;  %v4273_v39 = vadd.f32 %v7789_v25, %v18506_v57  ;;  %v4274_v41 = vadd.f32 %v7789_v25, %v18509_v58 }
 0x47a   : > { %6278 = vst [vmem:[%s6975_s4 + $0x3bb8] sm:$0xff] %v4230_v12  ;;  %6279 = vst [vmem:[%s6975_s4 + $0x3bc0] sm:$0xff] %v4231_v18  ;;  %v18530_v1 = vld [vmem:[%s6889_s15 + $0x3d30] sm:$0xff]  ;;  %v18533_v2 = vld [vmem:[%s6889_s15 + $0x3d38] sm:$0xff]  ;;  %v4276_v47 = vadd.f32 %v7789_v25, %v18527_v0 }
 0x47b   : > { %6280 = vst [vmem:[%s6975_s4 + $0x3bc8] sm:$0xff] %v4232_v20  ;;  %6281 = vst [vmem:[%s6975_s4 + $0x3bd0] sm:$0xff] %v4233_v21  ;;  %v18548_v8 = vld [vmem:[%s6889_s15 + $0x3d40] sm:$0xff]  ;;  %v18551_v10 = vld [vmem:[%s6889_s15 + $0x3d48] sm:$0xff]  ;;  %v4277_v48 = vadd.f32 %v7789_v25, %v18530_v1  ;;  %v4278_v49 = vadd.f32 %v7789_v25, %v18533_v2 }
 0x47c   : > { %6282 = vst [vmem:[%s6975_s4 + $0x3bd8] sm:$0xff] %v4234_v22  ;;  %6283 = vst [vmem:[%s6975_s4 + $0x3be0] sm:$0xff] %v4235_v27  ;;  %v18554_v11 = vld [vmem:[%s6889_s15 + $0x3d50] sm:$0xff]  ;;  %v18557_v12 = vld [vmem:[%s6889_s15 + $0x3d58] sm:$0xff]  ;;  %v4280_v55 = vadd.f32 %v7789_v25, %v18551_v10 }
 0x47d   : > { %6284 = vst [vmem:[%s6975_s4 + $0x3be8] sm:$0xff] %v4236_v28  ;;  %6285 = vst [vmem:[%s6975_s4 + $0x3bf0] sm:$0xff] %v4237_v29  ;;  %v18572_v18 = vld [vmem:[%s6889_s15 + $0x3d60] sm:$0xff]  ;;  %v18575_v20 = vld [vmem:[%s6889_s15 + $0x3d68] sm:$0xff]  ;;  %v4281_v56 = vadd.f32 %v7789_v25, %v18554_v11  ;;  %v4282_v57 = vadd.f32 %v7789_v25, %v18557_v12 }
 0x47e   : > { %6286 = vst [vmem:[%s6975_s4 + $0x3bf8] sm:$0xff] %v4238_v9  ;;  %6287 = vst [vmem:[%s6975_s4 + $0x3c00] sm:$0xff] %v4239_v13  ;;  %v18578_v21 = vld [vmem:[%s6889_s15 + $0x3d70] sm:$0xff]  ;;  %v18581_v22 = vld [vmem:[%s6889_s15 + $0x3d78] sm:$0xff] }
 0x47f   : > { %6288 = vst [vmem:[%s6975_s4 + $0x3c08] sm:$0xff] %v4240_v35  ;;  %6289 = vst [vmem:[%s6975_s4 + $0x3c10] sm:$0xff] %v4241_v36  ;;  %v18596_v27 = vld [vmem:[%s6889_s15 + $0x3d80] sm:$0xff]  ;;  %v18599_v28 = vld [vmem:[%s6889_s15 + $0x3d88] sm:$0xff]  ;;  %v4285_v0 = vadd.f32 %v7789_v25, %v18578_v21  ;;  %v4286_v1 = vadd.f32 %v7789_v25, %v18581_v22 }
 0x480   : > { %6290 = vst [vmem:[%s6975_s4 + $0x3c18] sm:$0xff] %v4242_v37  ;;  %6291 = vst [vmem:[%s6975_s4 + $0x3c20] sm:$0xff] %v4243_v43  ;;  %v18602_v29 = vld [vmem:[%s6889_s15 + $0x3d90] sm:$0xff]  ;;  %v18605_v9 = vld [vmem:[%s6889_s15 + $0x3d98] sm:$0xff] }
 0x481   : > { %6292 = vst [vmem:[%s6975_s4 + $0x3c28] sm:$0xff] %v4244_v44  ;;  %6293 = vst [vmem:[%s6975_s4 + $0x3c30] sm:$0xff] %v4245_v45  ;;  %v18620_v13 = vld [vmem:[%s6889_s15 + $0x3da0] sm:$0xff]  ;;  %v18623_v35 = vld [vmem:[%s6889_s15 + $0x3da8] sm:$0xff]  ;;  %v4289_v10 = vadd.f32 %v7789_v25, %v18602_v29  ;;  %v4290_v11 = vadd.f32 %v7789_v25, %v18605_v9 }
 0x482   : > { %6294 = vst [vmem:[%s6975_s4 + $0x3c38] sm:$0xff] %v4246_v46  ;;  %6295 = vst [vmem:[%s6975_s4 + $0x3c40] sm:$0xff] %v4247_v51  ;;  %v18626_v36 = vld [vmem:[%s6889_s15 + $0x3db0] sm:$0xff]  ;;  %v18629_v37 = vld [vmem:[%s6889_s15 + $0x3db8] sm:$0xff]  ;;  %v4275_v46 = vadd.f32 %v7789_v25, %v18524_v63  ;;  %v4284_v63 = vadd.f32 %v7789_v25, %v18575_v20 }
 0x483   : > { %6296 = vst [vmem:[%s6975_s4 + $0x3c48] sm:$0xff] %v4248_v52  ;;  %6297 = vst [vmem:[%s6975_s4 + $0x3c50] sm:$0xff] %v4249_v53  ;;  %v18644_v42 = vld [vmem:[%s6889_s15 + $0x3dc0] sm:$0xff]  ;;  %v18647_v43 = vld [vmem:[%s6889_s15 + $0x3dc8] sm:$0xff]  ;;  %v4293_v20 = vadd.f32 %v7789_v25, %v18626_v36  ;;  %v4294_v21 = vadd.f32 %v7789_v25, %v18629_v37 }
 0x484   : > { %6298 = vst [vmem:[%s6975_s4 + $0x3c58] sm:$0xff] %v4250_v54  ;;  %6299 = vst [vmem:[%s6975_s4 + $0x3c60] sm:$0xff] %v4251_v59  ;;  %v18650_v44 = vld [vmem:[%s6889_s15 + $0x3dd0] sm:$0xff]  ;;  %v18653_v45 = vld [vmem:[%s6889_s15 + $0x3dd8] sm:$0xff]  ;;  %v4279_v54 = vadd.f32 %v7789_v25, %v18548_v8  ;;  %v4288_v8 = vadd.f32 %v7789_v25, %v18599_v28 }
 0x485   : > { %6300 = vst [vmem:[%s6975_s4 + $0x3c68] sm:$0xff] %v4252_v60  ;;  %6301 = vst [vmem:[%s6975_s4 + $0x3c70] sm:$0xff] %v4253_v61  ;;  %v18668_v50 = vld [vmem:[%s6889_s15 + $0x3de0] sm:$0xff]  ;;  %v18671_v51 = vld [vmem:[%s6889_s15 + $0x3de8] sm:$0xff]  ;;  %v4297_v28 = vadd.f32 %v7789_v25, %v18650_v44  ;;  %v4298_v29 = vadd.f32 %v7789_v25, %v18653_v45 }
 0x486   : > { %6302 = vst [vmem:[%s6975_s4 + $0x3c78] sm:$0xff] %v4254_v62  ;;  %6303 = vst [vmem:[%s6975_s4 + $0x3c80] sm:$0xff] %v4255_v3  ;;  %v18674_v52 = vld [vmem:[%s6889_s15 + $0x3df0] sm:$0xff]  ;;  %v18677_v53 = vld [vmem:[%s6889_s15 + $0x3df8] sm:$0xff]  ;;  %v4283_v62 = vadd.f32 %v7789_v25, %v18572_v18  ;;  %v4292_v18 = vadd.f32 %v7789_v25, %v18623_v35 }
 0x487   : > { %6304 = vst [vmem:[%s6975_s4 + $0x3c88] sm:$0xff] %v4256_v4  ;;  %6305 = vst [vmem:[%s6975_s4 + $0x3c90] sm:$0xff] %v4257_v5  ;;  %v18692_v58 = vld [vmem:[%s6889_s15 + $0x3e00] sm:$0xff]  ;;  %v18695_v59 = vld [vmem:[%s6889_s15 + $0x3e08] sm:$0xff]  ;;  %v4301_v35 = vadd.f32 %v7789_v25, %v18674_v52  ;;  %v4302_v36 = vadd.f32 %v7789_v25, %v18677_v53 }
 0x488   : > { %6306 = vst [vmem:[%s6975_s4 + $0x3c98] sm:$0xff] %v4258_v7  ;;  %6307 = vst [vmem:[%s6975_s4 + $0x3ca0] sm:$0xff] %v4259_v14  ;;  %v18698_v60 = vld [vmem:[%s6889_s15 + $0x3e10] sm:$0xff]  ;;  %v18701_v61 = vld [vmem:[%s6889_s15 + $0x3e18] sm:$0xff]  ;;  %v4287_v7 = vadd.f32 %v7789_v25, %v18596_v27  ;;  %v4296_v27 = vadd.f32 %v7789_v25, %v18647_v43 }
 0x489   : > { %6308 = vst [vmem:[%s6975_s4 + $0x3ca8] sm:$0xff] %v4260_v15  ;;  %6309 = vst [vmem:[%s6975_s4 + $0x3cb0] sm:$0xff] %v4261_v17  ;;  %v18716_v2 = vld [vmem:[%s6889_s15 + $0x3e20] sm:$0xff]  ;;  %v18719_v3 = vld [vmem:[%s6889_s15 + $0x3e28] sm:$0xff]  ;;  %v4306_v43 = vadd.f32 %v7983_v32, %v18701_v61 }
 0x48a   : > { %6310 = vst [vmem:[%s6975_s4 + $0x3cb8] sm:$0xff] %v4262_v16  ;;  %6311 = vst [vmem:[%s6975_s4 + $0x3cc0] sm:$0xff] %v4263_v23  ;;  %v18722_v4 = vld [vmem:[%s6889_s15 + $0x3e30] sm:$0xff]  ;;  %v18725_v5 = vld [vmem:[%s6889_s15 + $0x3e38] sm:$0xff]  ;;  %v4291_v16 = vadd.f32 %v7789_v25, %v18620_v13  ;;  %v4300_v13 = vadd.f32 %v7789_v25, %v18671_v51 }
 0x48b   : > { %6312 = vst [vmem:[%s6975_s4 + $0x3cc8] sm:$0xff] %v4264_v6  ;;  %6313 = vst [vmem:[%s6975_s4 + $0x3cd0] sm:$0xff] %v4265_v24  ;;  %v18740_v12 = vld [vmem:[%s6889_s15 + $0x3e40] sm:$0xff]  ;;  %v18743_v14 = vld [vmem:[%s6889_s15 + $0x3e48] sm:$0xff]  ;;  %v4310_v51 = vadd.f32 %v7983_v32, %v18725_v5 }
 0x48c   : > { %6314 = vst [vmem:[%s6975_s4 + $0x3cd8] sm:$0xff] %v4266_v26  ;;  %6315 = vst [vmem:[%s6975_s4 + $0x3ce0] sm:$0xff] %v4267_v30  ;;  %v18746_v15 = vld [vmem:[%s6889_s15 + $0x3e50] sm:$0xff]  ;;  %v18749_v17 = vld [vmem:[%s6889_s15 + $0x3e58] sm:$0xff]  ;;  %v4295_v26 = vadd.f32 %v7789_v25, %v18644_v42  ;;  %v4305_v42 = vadd.f32 %v7983_v32, %v18698_v60 }
 0x48d   : > { %6316 = vst [vmem:[%s6975_s4 + $0x3ce8] sm:$0xff] %v4268_v31  ;;  %6317 = vst [vmem:[%s6975_s4 + $0x3cf0] sm:$0xff] %v4269_v33  ;;  %v18764_v22 = vld [vmem:[%s6889_s15 + $0x3e60] sm:$0xff]  ;;  %v18767_v23 = vld [vmem:[%s6889_s15 + $0x3e68] sm:$0xff] }
 0x48e   : > { %6318 = vst [vmem:[%s6975_s4 + $0x3cf8] sm:$0xff] %v4270_v34  ;;  %6319 = vst [vmem:[%s6975_s4 + $0x3d00] sm:$0xff] %v4271_v19  ;;  %v18770_v6 = vld [vmem:[%s6889_s15 + $0x3e70] sm:$0xff]  ;;  %v18773_v24 = vld [vmem:[%s6889_s15 + $0x3e78] sm:$0xff]  ;;  %v4299_v34 = vadd.f32 %v7789_v25, %v18668_v50  ;;  %v4303_v25 = vadd.f32 %v7983_v32, %v18692_v58  ;;  %v4309_v50 = vadd.f32 %v7983_v32, %v18722_v4 }
 0x48f   : > { %6320 = vst [vmem:[%s6975_s4 + $0x3d08] sm:$0xff] %v4272_v38  ;;  %6321 = vst [vmem:[%s6975_s4 + $0x3d10] sm:$0xff] %v4273_v39  ;;  %v18788_v9 = vld [vmem:[%s6889_s15 + $0x3e80] sm:$0xff]  ;;  %v18791_v30 = vld [vmem:[%s6889_s15 + $0x3e88] sm:$0xff]  ;;  %v4313_v58 = vadd.f32 %v7983_v32, %v18746_v15 }
 0x490   : > { %6322 = vst [vmem:[%s6975_s4 + $0x3d18] sm:$0xff] %v4274_v41  ;;  %6323 = vst [vmem:[%s6975_s4 + $0x3d20] sm:$0xff] %v4275_v46  ;;  %v18794_v31 = vld [vmem:[%s6889_s15 + $0x3e90] sm:$0xff]  ;;  %v18797_v33 = vld [vmem:[%s6889_s15 + $0x3e98] sm:$0xff]  ;;  %v4304_v41 = vadd.f32 %v7983_v32, %v18695_v59  ;;  %v4314_v59 = vadd.f32 %v7983_v32, %v18749_v17 }
 0x491   : > { %6324 = vst [vmem:[%s6975_s4 + $0x3d28] sm:$0xff] %v4276_v47  ;;  %6325 = vst [vmem:[%s6975_s4 + $0x3d30] sm:$0xff] %v4277_v48  ;;  %v18812_v37 = vld [vmem:[%s6889_s15 + $0x3ea0] sm:$0xff]  ;;  %v18815_v19 = vld [vmem:[%s6889_s15 + $0x3ea8] sm:$0xff]  ;;  %v4307_v48 = vadd.f32 %v7983_v32, %v18716_v2  ;;  %v4317_v2 = vadd.f32 %v7983_v32, %v18770_v6 }
 0x492   : > { %6326 = vst [vmem:[%s6975_s4 + $0x3d38] sm:$0xff] %v4278_v49  ;;  %6327 = vst [vmem:[%s6975_s4 + $0x3d40] sm:$0xff] %v4279_v54  ;;  %v18818_v38 = vld [vmem:[%s6889_s15 + $0x3eb0] sm:$0xff]  ;;  %v18821_v39 = vld [vmem:[%s6889_s15 + $0x3eb8] sm:$0xff]  ;;  %v4308_v49 = vadd.f32 %v7983_v32, %v18719_v3  ;;  %v4318_v3 = vadd.f32 %v7983_v32, %v18773_v24 }
 0x493   : > { %6328 = vst [vmem:[%s6975_s4 + $0x3d48] sm:$0xff] %v4280_v55  ;;  %6329 = vst [vmem:[%s6975_s4 + $0x3d50] sm:$0xff] %v4281_v56  ;;  %v2231_v44 = vld [vmem:[%s6889_s15 + $0x3ec0] sm:$0xff]  ;;  %v2232_v45 = vld [vmem:[%s6889_s15 + $0x3ec8] sm:$0xff]  ;;  %v4311_v56 = vadd.f32 %v7983_v32, %v18740_v12  ;;  %v4321_v12 = vadd.f32 %v7983_v32, %v18794_v31 }
 0x494   : > { %6330 = vst [vmem:[%s6975_s4 + $0x3d58] sm:$0xff] %v4282_v57  ;;  %6331 = vst [vmem:[%s6975_s4 + $0x3d60] sm:$0xff] %v4283_v62  ;;  %v2233_v46 = vld [vmem:[%s6889_s15 + $0x3ed0] sm:$0xff]  ;;  %v2234_v47 = vld [vmem:[%s6889_s15 + $0x3ed8] sm:$0xff]  ;;  %v4312_v57 = vadd.f32 %v7983_v32, %v18743_v14  ;;  %v4322_v14 = vadd.f32 %v7983_v32, %v18797_v33 }
 0x495   : > { %6332 = vst [vmem:[%s6975_s4 + $0x3d68] sm:$0xff] %v4284_v63  ;;  %6333 = vst [vmem:[%s6975_s4 + $0x3d70] sm:$0xff] %v4285_v0  ;;  %v2235_v52 = vld [vmem:[%s6889_s15 + $0x3ee0] sm:$0xff]  ;;  %v2236_v53 = vld [vmem:[%s6889_s15 + $0x3ee8] sm:$0xff]  ;;  %v4315_v0 = vadd.f32 %v7983_v32, %v18764_v22  ;;  %v4326_v22 = vadd.f32 %v7983_v32, %v18821_v39 }
 0x496   : > { %6334 = vst [vmem:[%s6975_s4 + $0x3d78] sm:$0xff] %v4286_v1  ;;  %6335 = vst [vmem:[%s6975_s4 + $0x3d80] sm:$0xff] %v4287_v7  ;;  %v2237_v54 = vld [vmem:[%s6889_s15 + $0x3ef0] sm:$0xff]  ;;  %v2238_v55 = vld [vmem:[%s6889_s15 + $0x3ef8] sm:$0xff]  ;;  %v4316_v1 = vadd.f32 %v7983_v32, %v18767_v23  ;;  %v4331_v33 = vadd.f32 %v7983_v32, %v2235_v52 }
 0x497   : > { %6336 = vst [vmem:[%s6975_s4 + $0x3d88] sm:$0xff] %v4288_v8  ;;  %6337 = vst [vmem:[%s6975_s4 + $0x3d90] sm:$0xff] %v4289_v10  ;;  %v2239_v60 = vld [vmem:[%s6889_s15 + $0x3f00] sm:$0xff]  ;;  %v2240_v61 = vld [vmem:[%s6889_s15 + $0x3f08] sm:$0xff]  ;;  %v4319_v10 = vadd.f32 %v7983_v32, %v18788_v9 }
 0x498   : > { %6338 = vst [vmem:[%s6975_s4 + $0x3d98] sm:$0xff] %v4290_v11  ;;  %6339 = vst [vmem:[%s6975_s4 + $0x3da0] sm:$0xff] %v4291_v16  ;;  %v2241_v62 = vld [vmem:[%s6889_s15 + $0x3f10] sm:$0xff]  ;;  %v2242_v63 = vld [vmem:[%s6889_s15 + $0x3f18] sm:$0xff]  ;;  %v4320_v11 = vadd.f32 %v7983_v32, %v18791_v30  ;;  %v4336_v39 = vadd.f32 %v8177_v40, %v2240_v61 }
 0x499   : > { %6340 = vst [vmem:[%s6975_s4 + $0x3da8] sm:$0xff] %v4292_v18  ;;  %6341 = vst [vmem:[%s6975_s4 + $0x3db0] sm:$0xff] %v4293_v20  ;;  %v2243_v4 = vld [vmem:[%s6889_s15 + $0x3f20] sm:$0xff]  ;;  %v2244_v5 = vld [vmem:[%s6889_s15 + $0x3f28] sm:$0xff]  ;;  %v4323_v18 = vadd.f32 %v7983_v32, %v18812_v37  ;;  %v4324_v20 = vadd.f32 %v7983_v32, %v18815_v19 }
 0x49a   : > { %6342 = vst [vmem:[%s6975_s4 + $0x3db8] sm:$0xff] %v4294_v21  ;;  %6343 = vst [vmem:[%s6975_s4 + $0x3dc0] sm:$0xff] %v4295_v26  ;;  %v2245_v7 = vld [vmem:[%s6889_s15 + $0x3f30] sm:$0xff]  ;;  %v2246_v8 = vld [vmem:[%s6889_s15 + $0x3f38] sm:$0xff]  ;;  %v4325_v21 = vadd.f32 %v7983_v32, %v18818_v38  ;;  %v4327_v26 = vadd.f32 %v7983_v32, %v2231_v44  ;;  %v4335_v38 = vadd.f32 %v8177_v40, %v2239_v60 }
 0x49b   : > { %6344 = vst [vmem:[%s6975_s4 + $0x3dc8] sm:$0xff] %v4296_v27  ;;  %6345 = vst [vmem:[%s6975_s4 + $0x3dd0] sm:$0xff] %v4297_v28  ;;  %v2247_v15 = vld [vmem:[%s6889_s15 + $0x3f40] sm:$0xff]  ;;  %v2248_v17 = vld [vmem:[%s6889_s15 + $0x3f48] sm:$0xff]  ;;  %v4328_v27 = vadd.f32 %v7983_v32, %v2232_v45  ;;  %v4329_v28 = vadd.f32 %v7983_v32, %v2233_v46  ;;  %v4339_v44 = vadd.f32 %v8177_v40, %v2243_v4 }
 0x49c   : > { %6346 = vst [vmem:[%s6975_s4 + $0x3dd8] sm:$0xff] %v4298_v29  ;;  %6347 = vst [vmem:[%s6975_s4 + $0x3de0] sm:$0xff] %v4299_v34  ;;  %v2249_v16 = vld [vmem:[%s6889_s15 + $0x3f50] sm:$0xff]  ;;  %v2250_v23 = vld [vmem:[%s6889_s15 + $0x3f58] sm:$0xff]  ;;  %v4330_v29 = vadd.f32 %v7983_v32, %v2234_v47  ;;  %v4332_v34 = vadd.f32 %v7983_v32, %v2236_v53  ;;  %v4340_v45 = vadd.f32 %v8177_v40, %v2244_v5 }
 0x49d   : > { %6348 = vst [vmem:[%s6975_s4 + $0x3de8] sm:$0xff] %v4300_v13  ;;  %6349 = vst [vmem:[%s6975_s4 + $0x3df0] sm:$0xff] %v4301_v35  ;;  %v2251_v6 = vld [vmem:[%s6889_s15 + $0x3f60] sm:$0xff]  ;;  %v2252_v24 = vld [vmem:[%s6889_s15 + $0x3f68] sm:$0xff]  ;;  %v4333_v13 = vadd.f32 %v7983_v32, %v2237_v54  ;;  %v4334_v35 = vadd.f32 %v7983_v32, %v2238_v55  ;;  %v4338_v32 = vadd.f32 %v8177_v40, %v2242_v63 }
 0x49e   : > { %6350 = vst [vmem:[%s6975_s4 + $0x3df8] sm:$0xff] %v4302_v36  ;;  %6351 = vst [vmem:[%s6975_s4 + $0x3e00] sm:$0xff] %v4303_v25  ;;  %v2253_v9 = vld [vmem:[%s6889_s15 + $0x3f70] sm:$0xff]  ;;  %v2254_v30 = vld [vmem:[%s6889_s15 + $0x3f78] sm:$0xff]  ;;  %v4337_v25 = vadd.f32 %v8177_v40, %v2241_v62  ;;  %v4341_v46 = vadd.f32 %v8177_v40, %v2245_v7  ;;  %v4342_v47 = vadd.f32 %v8177_v40, %v2246_v8 }
 0x49f   : > { %6352 = vst [vmem:[%s6975_s4 + $0x3e08] sm:$0xff] %v4304_v41  ;;  %6353 = vst [vmem:[%s6975_s4 + $0x3e10] sm:$0xff] %v4305_v42  ;;  %v2255_v31 = vld [vmem:[%s6889_s15 + $0x3f80] sm:$0xff]  ;;  %v2256_v36 = vld [vmem:[%s6889_s15 + $0x3f88] sm:$0xff]  ;;  %v4344_v52 = vadd.f32 %v8177_v40, %v2248_v17  ;;  %v4345_v53 = vadd.f32 %v8177_v40, %v2249_v16  ;;  %v4346_v54 = vadd.f32 %v8177_v40, %v2250_v23 }
 0x4a0   : > { %6354 = vst [vmem:[%s6975_s4 + $0x3e18] sm:$0xff] %v4306_v43  ;;  %6355 = vst [vmem:[%s6975_s4 + $0x3e20] sm:$0xff] %v4307_v48  ;;  %v2257_v37 = vld [vmem:[%s6889_s15 + $0x3f90] sm:$0xff]  ;;  %v2258_v19 = vld [vmem:[%s6889_s15 + $0x3f98] sm:$0xff]  ;;  %v4349_v60 = vadd.f32 %v8177_v40, %v2253_v9  ;;  %v4350_v61 = vadd.f32 %v8177_v40, %v2254_v30 }
 0x4a1   : > { %6356 = vst [vmem:[%s6975_s4 + $0x3e28] sm:$0xff] %v4308_v49  ;;  %6357 = vst [vmem:[%s6975_s4 + $0x3e30] sm:$0xff] %v4309_v50  ;;  %v2259_v41 = vld [vmem:[%s6889_s15 + $0x3fa0] sm:$0xff]  ;;  %v2260_v42 = vld [vmem:[%s6889_s15 + $0x3fa8] sm:$0xff]  ;;  %v4354_v4 = vadd.f32 %v8177_v40, %v2258_v19 }
 0x4a2   : > { %6358 = vst [vmem:[%s6975_s4 + $0x3e38] sm:$0xff] %v4310_v51  ;;  %6359 = vst [vmem:[%s6975_s4 + $0x3e40] sm:$0xff] %v4311_v56  ;;  %v2261_v43 = vld [vmem:[%s6889_s15 + $0x3fb0] sm:$0xff]  ;;  %v2262_v48 = vld [vmem:[%s6889_s15 + $0x3fb8] sm:$0xff]  ;;  %v4343_v51 = vadd.f32 %v8177_v40, %v2247_v15  ;;  %v4355_v5 = vadd.f32 %v8177_v40, %v2259_v41  ;;  %v4356_v7 = vadd.f32 %v8177_v40, %v2260_v42 }
 0x4a3   : > { %6360 = vst [vmem:[%s6975_s4 + $0x3e48] sm:$0xff] %v4312_v57  ;;  %6361 = vst [vmem:[%s6975_s4 + $0x3e50] sm:$0xff] %v4313_v58  ;;  %v2263_v49 = vld [vmem:[%s6889_s15 + $0x3fc0] sm:$0xff]  ;;  %v2264_v50 = vld [vmem:[%s6889_s15 + $0x3fc8] sm:$0xff]  ;;  %v4347_v58 = vadd.f32 %v8177_v40, %v2251_v6  ;;  %v4357_v8 = vadd.f32 %v8177_v40, %v2261_v43 }
 0x4a4   : > { %6362 = vst [vmem:[%s6975_s4 + $0x3e58] sm:$0xff] %v4314_v59  ;;  %6363 = vst [vmem:[%s6975_s4 + $0x3e60] sm:$0xff] %v4315_v0  ;;  %v2265_v55 = vld [vmem:[%s6889_s15 + $0x3fd0] sm:$0xff]  ;;  %v2266_v56 = vld [vmem:[%s6889_s15 + $0x3fd8] sm:$0xff]  ;;  %v4348_v59 = vadd.f32 %v8177_v40, %v2252_v24 }
 0x4a5   : > { %6364 = vst [vmem:[%s6975_s4 + $0x3e68] sm:$0xff] %v4316_v1  ;;  %6365 = vst [vmem:[%s6975_s4 + $0x3e70] sm:$0xff] %v4317_v2  ;;  %v2267_v57 = vld [vmem:[%s6889_s15 + $0x3fe0] sm:$0xff]  ;;  %v2268_v62 = vld [vmem:[%s6889_s15 + $0x3fe8] sm:$0xff]  ;;  %v4351_v1 = vadd.f32 %v8177_v40, %v2255_v31  ;;  %v4352_v2 = vadd.f32 %v8177_v40, %v2256_v36  ;;  %v4362_v15 = vadd.f32 %v8177_v40, %v2266_v56 }
 0x4a6   : > { %6366 = vst [vmem:[%s6975_s4 + $0x3e78] sm:$0xff] %v4318_v3  ;;  %6367 = vst [vmem:[%s6975_s4 + $0x3e80] sm:$0xff] %v4319_v10  ;;  %v2269_v63 = vld [vmem:[%s6889_s15 + $0x3ff0] sm:$0xff]  ;;  %v2270_v0 = vld [vmem:[%s6889_s15 + $0x3ff8] sm:$0xff]  ;;  %v4353_v3 = vadd.f32 %v8177_v40, %v2257_v37  ;;  %v4358_v10 = vadd.f32 %v8177_v40, %v2262_v48  ;;  %v4363_v17 = vadd.f32 %v8177_v40, %v2267_v57 }
 0x4a7   : > { %6368 = vst [vmem:[%s6975_s4 + $0x3e88] sm:$0xff] %v4320_v11  ;;  %6369 = vst [vmem:[%s6975_s4 + $0x3e90] sm:$0xff] %v4321_v12  ;;  %v4359_v11 = vadd.f32 %v8177_v40, %v2263_v49  ;;  %v4360_v12 = vadd.f32 %v8177_v40, %v2264_v50  ;;  %v4364_v16 = vadd.f32 %v8177_v40, %v2268_v62 }
 0x4a8   : > { %6370 = vst [vmem:[%s6975_s4 + $0x3e98] sm:$0xff] %v4322_v14  ;;  %6371 = vst [vmem:[%s6975_s4 + $0x3ea0] sm:$0xff] %v4323_v18  ;;  %v4361_v14 = vadd.f32 %v8177_v40, %v2265_v55  ;;  %v4365_v18 = vadd.f32 %v8177_v40, %v2269_v63 }
 0x4a9   : > { %6372 = vst [vmem:[%s6975_s4 + $0x3ea8] sm:$0xff] %v4324_v20  ;;  %6373 = vst [vmem:[%s6975_s4 + $0x3eb0] sm:$0xff] %v4325_v21  ;;  %v4366_v20 = vadd.f32 %v8177_v40, %v2270_v0 }
 0x4aa   : > { %6374 = vst [vmem:[%s6975_s4 + $0x3eb8] sm:$0xff] %v4326_v22  ;;  %6375 = vst [vmem:[%s6975_s4 + $0x3ec0] sm:$0xff] %v4327_v26 }
 0x4ab   : > { %6376 = vst [vmem:[%s6975_s4 + $0x3ec8] sm:$0xff] %v4328_v27  ;;  %6377 = vst [vmem:[%s6975_s4 + $0x3ed0] sm:$0xff] %v4329_v28 }
 0x4ac   : > { %6378 = vst [vmem:[%s6975_s4 + $0x3ed8] sm:$0xff] %v4330_v29  ;;  %6379 = vst [vmem:[%s6975_s4 + $0x3ee0] sm:$0xff] %v4331_v33 }
 0x4ad   : > { %6380 = vst [vmem:[%s6975_s4 + $0x3ee8] sm:$0xff] %v4332_v34  ;;  %6381 = vst [vmem:[%s6975_s4 + $0x3ef0] sm:$0xff] %v4333_v13 }
 0x4ae   : > { %6382 = vst [vmem:[%s6975_s4 + $0x3ef8] sm:$0xff] %v4334_v35  ;;  %6383 = vst [vmem:[%s6975_s4 + $0x3f00] sm:$0xff] %v4335_v38 }
 0x4af   : > { %6384 = vst [vmem:[%s6975_s4 + $0x3f08] sm:$0xff] %v4336_v39  ;;  %6385 = vst [vmem:[%s6975_s4 + $0x3f10] sm:$0xff] %v4337_v25 }
 0x4b0   : > { %6386 = vst [vmem:[%s6975_s4 + $0x3f18] sm:$0xff] %v4338_v32  ;;  %6387 = vst [vmem:[%s6975_s4 + $0x3f20] sm:$0xff] %v4339_v44 }
 0x4b1   : > { %6388 = vst [vmem:[%s6975_s4 + $0x3f28] sm:$0xff] %v4340_v45  ;;  %6389 = vst [vmem:[%s6975_s4 + $0x3f30] sm:$0xff] %v4341_v46 }
 0x4b2   : > { %6390 = vst [vmem:[%s6975_s4 + $0x3f38] sm:$0xff] %v4342_v47  ;;  %6391 = vst [vmem:[%s6975_s4 + $0x3f40] sm:$0xff] %v4343_v51 }
 0x4b3   : > { %6392 = vst [vmem:[%s6975_s4 + $0x3f48] sm:$0xff] %v4344_v52  ;;  %6393 = vst [vmem:[%s6975_s4 + $0x3f50] sm:$0xff] %v4345_v53 }
 0x4b4   : > { %6394 = vst [vmem:[%s6975_s4 + $0x3f58] sm:$0xff] %v4346_v54  ;;  %6395 = vst [vmem:[%s6975_s4 + $0x3f60] sm:$0xff] %v4347_v58 }
 0x4b5   : > { %6396 = vst [vmem:[%s6975_s4 + $0x3f68] sm:$0xff] %v4348_v59  ;;  %6397 = vst [vmem:[%s6975_s4 + $0x3f70] sm:$0xff] %v4349_v60 }
 0x4b6   : > { %6398 = vst [vmem:[%s6975_s4 + $0x3f78] sm:$0xff] %v4350_v61  ;;  %6399 = vst [vmem:[%s6975_s4 + $0x3f80] sm:$0xff] %v4351_v1 }
 0x4b7   : > { %6400 = vst [vmem:[%s6975_s4 + $0x3f88] sm:$0xff] %v4352_v2  ;;  %6401 = vst [vmem:[%s6975_s4 + $0x3f90] sm:$0xff] %v4353_v3 }
 0x4b8   : > { %6402 = vst [vmem:[%s6975_s4 + $0x3f98] sm:$0xff] %v4354_v4  ;;  %6403 = vst [vmem:[%s6975_s4 + $0x3fa0] sm:$0xff] %v4355_v5 }
 0x4b9   : > { %6404 = vst [vmem:[%s6975_s4 + $0x3fa8] sm:$0xff] %v4356_v7  ;;  %6405 = vst [vmem:[%s6975_s4 + $0x3fb0] sm:$0xff] %v4357_v8 }
 0x4ba   : > { %6406 = vst [vmem:[%s6975_s4 + $0x3fb8] sm:$0xff] %v4358_v10  ;;  %6407 = vst [vmem:[%s6975_s4 + $0x3fc0] sm:$0xff] %v4359_v11 }
 0x4bb   : > { %6408 = vst [vmem:[%s6975_s4 + $0x3fc8] sm:$0xff] %v4360_v12  ;;  %6409 = vst [vmem:[%s6975_s4 + $0x3fd0] sm:$0xff] %v4361_v14 }
 0x4bc   : > { %6410 = vst [vmem:[%s6975_s4 + $0x3fd8] sm:$0xff] %v4362_v15  ;;  %6411 = vst [vmem:[%s6975_s4 + $0x3fe0] sm:$0xff] %v4363_v17 }
 0x4bd   : > { %6412 = vst [vmem:[%s6975_s4 + $0x3fe8] sm:$0xff] %v4364_v16  ;;  %6413 = vst [vmem:[%s6975_s4 + $0x3ff0] sm:$0xff] %v4365_v18 }
 0x4be   : > { %6414 = vst [vmem:[%s6975_s4 + $0x3ff8] sm:$0xff] %v4366_v20 }
 0x4bf   : > { %6678 = shalt.err (!%p6675_p5)
}
 0x4c0   : > { %s6679_s25 = scalar_lea.hbm %s19014_s16, 262144  ;;  %s6683_s28 = scalar_lea.hbm %s19085_s2, 524288 }
 0x4c1   : > { %p6680_p4 = scmp.ne.s32.totalorder %s19014_s16, %s6679_s25  ;;  %p6684_p12 = scmp.lt.u32.totalorder %s19014_s16, %s19085_s2 }
 0x4c2   : > { %p6685_p1 = scmp.lt.u32.totalorder %s6683_s28, %s6679_s25  ;;  %p6687_p8 = scmp.lt.u32.totalorder %s6679_s25, %s19014_s16 }
 0x4c3   : > { %p6681_p7 = pnand %p6680_p4, %p19093_p9 }
 0x4c4   : > { %p6686_p3 = por %p6685_p1, %p6684_p12 }
 0x4c5   : > { %p6682_p10 = pneg %p6681_p7 }
 0x4c6   : > { %p6688_p11 = por %p6687_p8, %p6686_p3 }
 0x4c8   : > { %p6689_p0 = pnand %p6688_p11, %p6682_p10 }
 0x4ca   : > { %6692 = shalt.err (!%p6689_p0)
}
 0x4cb   : > { %s6754_s30 = smov 4096   ;;  %s6755_s4 = smov 256  }
 0x4cc   : > { %6568 = dma.vmem_to_hbm [thread:$0]  (%p19093_p9), %s19018_s5, 262144, %s19014_s16, %s6416_s12, %s6754_s30, %s6754_s30, %s6755_s4  }
 0x4cd PF: > { %s6450_s7 = sand.u32 1, %s6727_s9   ;;  %p19094_p6 = scmp.ne.s32.totalorder %s19090_s24, 0 }
 0x4ce   : > { %p19095_p13 = scmp.ge.s32.totalorder %s6747_s14, 2  ;;  %s6451_s15 = scalar_lea.sflag [#allocation4], %s6450_s7 }
 0x4d0   : > { %p6575_p2 = pnand %p19095_p13, %p19094_p6 }
 0x4d2   : > { %6722 = dma.done.wait (!%p6575_p2), %s6451_s15, 262144  }
 0x4d3   : > { %6724 = vsyncadd (!%p6575_p2), %s6451_s15, 4294705152  ;;  %s18_s14 = sadd.s32 1, %s6747_s14   ;;  %s19096_s9 = smov %s6731_s10 }
 0x4d4   : > { %p15_p5 = scmp.ge.s32.totalorder %s18_s14, 4   ;;  %s19097_s10 = smov %s6735_s11 }
 0x4d5   : > { %s19098_s11 = smov %s6827_s23  ;;  %s19099_s12 = smov %s6743_s13 }
 0x4d6   : > { %s19100_s13 = smov %s19102_s17  ;;  %17 = sbr.rel (!%p15_p5) target bundleno = 6 (0x6), region = 76 }
 0x4dd   :  { %6456 = vsyncpa [#allocation3], 1 }
 0x4de   :  { %6458 = vsyncpa [#allocation3 + $0x1], 1 }
 0x4df   :  { %6459 = vsyncpa [#allocation4], 1 }
 0x4e0   :  { %6461 = vsyncpa [#allocation4 + $0x1], 1 }

</bundles_post_ra>
